<compile_context>
chip_gen: v5e
topology: v5e:2x2
jax: 0.10.0
libtpu: 0.0.40
codegen_flags: <defaults>
</compile_context>

<pallas_src>
import jax
import jax.numpy as jnp
from jax.experimental import pallas as pl
from jax.experimental.pallas import tpu as pltpu  # noqa: F401 (kept per template)


# ---------------------------------------------------------------------------
# XLA-side pool-tap-major im2col (the only remaining glue besides 2 tiny ops)
# ---------------------------------------------------------------------------
def _im2col_pool_major(a, *, cols_pool_major=False):
    """a: (Cin, N, D, H, W) -> (8, Cin*27, Mp) bf16 patches.

    Leading axis enumerates the 2x2x2 max-pool taps (pd, ph, pw); rows are
    (ci, kd, kh, kw) matching w.reshape(Cout, Cin*27); columns are pooled
    output positions ordered (n, do, ho, wo), or (do, ho, wo, n) when
    cols_pool_major=True (used by the fused stage3+head kernel).
    """
    Cin, N, D, H, W = a.shape
    Do, Ho, Wo = D // 2, H // 2, W // 2
    ap = jnp.pad(a.astype(jnp.bfloat16),
                 ((0, 0), (0, 0), (1, 1), (1, 1), (1, 1)))
    taps = [ap[:, :, kd:kd + D, kh:kh + H, kw:kw + W]
            for kd in range(3) for kh in range(3) for kw in range(3)]
    b = jnp.stack(taps, axis=1)                        # (Cin, 27, N, D, H, W)
    b = b.reshape(Cin, 27, N, Do, 2, Ho, 2, Wo, 2)
    if cols_pool_major:
        # -> (pd, ph, pw, Cin, 27, Do, Ho, Wo, N): columns ordered (d, h, w, n)
        b = jnp.transpose(b, (4, 6, 8, 0, 1, 3, 5, 7, 2))
    else:
        # -> (pd, ph, pw, Cin, 27, N, Do, Ho, Wo): columns ordered (n, d, h, w)
        b = jnp.transpose(b, (4, 6, 8, 0, 1, 2, 3, 5, 7))
    return b.reshape(8, Cin * 27, N * Do * Ho * Wo)


# ---------------------------------------------------------------------------
# Fused Conv3d(k=3, s=1, p=1) + bias + MaxPool3d(2, 2): one grid-less call,
# 8 unrolled GEMMs chained with max (pool-tap axis folded into the body).
# ---------------------------------------------------------------------------
def _conv_pool_kernel(w_ref, b_ref, p_ref, o_ref):
    # w_ref: (Cout, K) bf16;  p_ref: (8, K, Mp) bf16;  b_ref: (Cout, 1) f32
    w = w_ref[...]
    acc = jnp.dot(w, p_ref[0], preferred_element_type=jnp.float32)
    for t in range(1, 8):
        acc = jnp.maximum(
            acc, jnp.dot(w, p_ref[t], preferred_element_type=jnp.float32))
    o_ref[...] = (acc + b_ref[...]).astype(o_ref.dtype)


def conv3d_pool_stage(a, wmat, bias):
    """a: (Cin, N, D, H, W); wmat: (Cout, Cin*27) bf16; bias: (Cout, 1) f32.

    Returns (Cout, N, D//2, H//2, W//2) bf16 (channel-major, lane-dense store).
    """
    Cin, N, D, H, W = a.shape
    Cout = wmat.shape[0]
    Do, Ho, Wo = D // 2, H // 2, W // 2
    Mp = N * Do * Ho * Wo

    patches = _im2col_pool_major(a)                    # (8, Cin*27, Mp) bf16
    out = pl.pallas_call(
        _conv_pool_kernel,
        out_shape=jax.ShapeDtypeStruct((Cout, Mp), jnp.bfloat16),
    )(wmat, bias, patches)
    return out.reshape(Cout, N, Do, Ho, Wo)


# ---------------------------------------------------------------------------
# Fused stage 3 (conv+pool) + flatten + Linear(512->128)+ReLU
# + Linear(128->1)+Sigmoid — single grid-less pallas_call.
# ---------------------------------------------------------------------------
def _stage3_head_kernel(w3_ref, b3_ref, p3_ref, w1_ref, b1_ref, w2_ref, b2_ref,
                        o_ref):
    # Stage-3 conv + maxpool: 8 tap GEMMs chained with max.
    w3 = w3_ref[...]
    acc = jnp.dot(w3, p3_ref[0], preferred_element_type=jnp.float32)
    for t in range(1, 8):
        acc = jnp.maximum(
            acc, jnp.dot(w3, p3_ref[t], preferred_element_type=jnp.float32))
    s = acc + b3_ref[...]                     # (64, 8*N) f32, columns (d,h,w,n)

    n = o_ref.shape[1]                        # batch size
    nh = w1_ref.shape[1]                      # 128 hidden units

    # Flatten + Linear1: h[j, n] = sum_{c, sp} W1[j, c*8+sp] * s[c, sp*N+n]
    # done as 8 weight-stationary (128, 64) x (64, N) dots, one per pooled
    # spatial position sp — no in-kernel reshapes needed.
    h = jnp.zeros((nh, n), jnp.float32) + b1_ref[...]
    for sp in range(8):
        h = h + jnp.dot(w1_ref[sp], s[:, sp * n:(sp + 1) * n],
                        preferred_element_type=jnp.float32)
    h = jnp.maximum(h, 0.0)                   # ReLU

    # Linear2 + sigmoid
    y = jnp.dot(w2_ref[...], h, preferred_element_type=jnp.float32) + b2_ref[...]
    o_ref[...] = jax.nn.sigmoid(y).astype(o_ref.dtype)


def stage3_and_head(a, w3, b3, w1r, b1, w2, b2):
    """a: (32, N, 4, 4, 4) bf16 -> (N, 1) f32 sigmoid outputs."""
    N = a.shape[1]
    p3 = _im2col_pool_major(a, cols_pool_major=True)   # (8, 864, 8*N) bf16
    out = pl.pallas_call(
        _stage3_head_kernel,
        out_shape=jax.ShapeDtypeStruct((1, N), jnp.float32),
    )(w3, b3, p3, w1r, b1, w2, b2)
    return out.T                                        # (N, 1)


# ---------------------------------------------------------------------------
# Parameters (PyTorch-equivalent init) + one-time layout prep
# ---------------------------------------------------------------------------
def init_raw_params(key):
    ks = jax.random.split(key, 10)

    def uni(k, shape, fan_in):
        bound = 1.0 / jnp.sqrt(jnp.float32(fan_in))
        return jax.random.uniform(k, shape, jnp.float32, -bound, bound)

    return {
        "conv1_w": uni(ks[0], (16, 1, 3, 3, 3), 1 * 27),
        "conv1_b": uni(ks[1], (16,), 1 * 27),
        "conv2_w": uni(ks[2], (32, 16, 3, 3, 3), 16 * 27),
        "conv2_b": uni(ks[3], (32,), 16 * 27),
        "conv3_w": uni(ks[4], (64, 32, 3, 3, 3), 32 * 27),
        "conv3_b": uni(ks[5], (64,), 32 * 27),
        # LazyLinear(128): in_features = 64 * 2 * 2 * 2 = 512 for a 16^3 input
        "lin1_w": uni(ks[6], (128, 512), 512),
        "lin1_b": uni(ks[7], (128,), 512),
        # LazyLinear(1): in_features = 128
        "lin2_w": uni(ks[8], (1, 128), 128),
        "lin2_b": uni(ks[9], (1,), 128),
    }


def prepare_params(raw):
    """One-time reshape/cast so the forward pass does zero weight-layout work."""
    def conv(w):  # (Cout, Cin, 3, 3, 3) -> (Cout, Cin*27) bf16, rows (ci,kd,kh,kw)
        return w.reshape(w.shape[0], -1).astype(jnp.bfloat16)

    # lin1 weight regrouped per pooled spatial position sp = d*4+h*2+w:
    # W1r[sp, j, c] = W1[j, c*8 + sp]   -> shape (8, 128, 64)
    lin1_wr = jnp.transpose(raw["lin1_w"].reshape(128, 64, 8), (2, 0, 1))

    return {
        "conv1_w": conv(raw["conv1_w"]), "conv1_b": raw["conv1_b"].reshape(-1, 1),
        "conv2_w": conv(raw["conv2_w"]), "conv2_b": raw["conv2_b"].reshape(-1, 1),
        "conv3_w": conv(raw["conv3_w"]), "conv3_b": raw["conv3_b"].reshape(-1, 1),
        "lin1_wr": lin1_wr,                          # (8, 128, 64) f32
        "lin1_b": raw["lin1_b"].reshape(-1, 1),      # (128, 1)
        "lin2_w": raw["lin2_w"].reshape(1, -1),      # (1, 128)
        "lin2_b": raw["lin2_b"].reshape(1, 1),       # (1, 1)
    }


# ---------------------------------------------------------------------------
# Forward
# ---------------------------------------------------------------------------
def test_model_forward(params, x):
    """x: (N, 1, D, H, W) NCDHW float32 -> (N, 1) sigmoid outputs."""
    a = jnp.transpose(x, (1, 0, 2, 3, 4))            # (Cin=1, N, D, H, W)
    a = conv3d_pool_stage(a, params["conv1_w"], params["conv1_b"])   # (16,N,8,8,8)
    a = conv3d_pool_stage(a, params["conv2_w"], params["conv2_b"])   # (32,N,4,4,4)
    # Stage 3 + flatten + linear1 + relu + linear2 + sigmoid, all in one call.
    out = stage3_and_head(a, params["conv3_w"], params["conv3_b"],
                          params["lin1_wr"], params["lin1_b"],
                          params["lin2_w"], params["lin2_b"])
    # TODO(synk): reference forward() has no `return` (returns None); we return
    # the final sigmoid activations, the last computed tensor.
    return out


if __name__ == "__main__":
    key = jax.random.PRNGKey(0)
    x = jax.random.normal(key, (2, 1, 16, 16, 16), dtype=jnp.float32)
    params = prepare_params(init_raw_params(jax.random.PRNGKey(42)))

    fwd = jax.jit(test_model_forward)
    out = fwd(params, x)
    jax.block_until_ready(out)
    assert out.shape == (2, 1), out.shape
    print("KERNEL_OK")
</pallas_src>

<mosaic_0001>
module attributes {stable_mosaic.version = 11 : i64} {
  func.func @_conv_pool_kernel(%arg0: memref<16x27xbf16, #tpu.memory_space<vmem>>, %arg1: memref<16x1xf32, #tpu.memory_space<vmem>>, %arg2: memref<8x27x1024xbf16, #tpu.memory_space<vmem>>, %arg3: memref<16x1024xbf16, #tpu.memory_space<vmem>>) attributes {dimension_semantics = [], scalar_prefetch = 0 : i64, scratch_operands = 0 : i64, tpu.core_type = #tpu.core_type<tc>} {
    %c0 = arith.constant 0 : index
    %c0_0 = arith.constant 0 : index
    %0 = vector.load %arg0[%c0, %c0_0] : memref<16x27xbf16, #tpu.memory_space<vmem>>, vector<16x27xbf16>
    %c0_1 = arith.constant 0 : index
    %c0_2 = arith.constant 0 : index
    %c0_3 = arith.constant 0 : index
    %1 = vector.load %arg2[%c0_1, %c0_2, %c0_3] : memref<8x27x1024xbf16, #tpu.memory_space<vmem>>, vector<1x27x1024xbf16>
    %2 = vector.shape_cast %1 : vector<1x27x1024xbf16> to vector<27x1024xbf16>
    %cst = arith.constant dense<0.000000e+00> : vector<16x1024xf32>
    %3 = tpu.matmul %0, %2, %cst {dimension_numbers = #tpu.dot_dimension_numbers<[1], [0], [0], [1], [0, 0, 1, 1], [], []>} : vector<16x27xbf16>, vector<27x1024xbf16>, vector<16x1024xf32> -> vector<16x1024xf32>
    %c1 = arith.constant 1 : index
    %c0_4 = arith.constant 0 : index
    %c0_5 = arith.constant 0 : index
    %4 = vector.load %arg2[%c1, %c0_4, %c0_5] : memref<8x27x1024xbf16, #tpu.memory_space<vmem>>, vector<1x27x1024xbf16>
    %5 = vector.shape_cast %4 : vector<1x27x1024xbf16> to vector<27x1024xbf16>
    %cst_6 = arith.constant dense<0.000000e+00> : vector<16x1024xf32>
    %6 = tpu.matmul %0, %5, %cst_6 {dimension_numbers = #tpu.dot_dimension_numbers<[1], [0], [0], [1], [0, 0, 1, 1], [], []>} : vector<16x27xbf16>, vector<27x1024xbf16>, vector<16x1024xf32> -> vector<16x1024xf32>
    %7 = arith.maximumf %3, %6 : vector<16x1024xf32>
    %c2 = arith.constant 2 : index
    %c0_7 = arith.constant 0 : index
    %c0_8 = arith.constant 0 : index
    %8 = vector.load %arg2[%c2, %c0_7, %c0_8] : memref<8x27x1024xbf16, #tpu.memory_space<vmem>>, vector<1x27x1024xbf16>
    %9 = vector.shape_cast %8 : vector<1x27x1024xbf16> to vector<27x1024xbf16>
    %cst_9 = arith.constant dense<0.000000e+00> : vector<16x1024xf32>
    %10 = tpu.matmul %0, %9, %cst_9 {dimension_numbers = #tpu.dot_dimension_numbers<[1], [0], [0], [1], [0, 0, 1, 1], [], []>} : vector<16x27xbf16>, vector<27x1024xbf16>, vector<16x1024xf32> -> vector<16x1024xf32>
    %11 = arith.maximumf %7, %10 : vector<16x1024xf32>
    %c3 = arith.constant 3 : index
    %c0_10 = arith.constant 0 : index
    %c0_11 = arith.constant 0 : index
    %12 = vector.load %arg2[%c3, %c0_10, %c0_11] : memref<8x27x1024xbf16, #tpu.memory_space<vmem>>, vector<1x27x1024xbf16>
    %13 = vector.shape_cast %12 : vector<1x27x1024xbf16> to vector<27x1024xbf16>
    %cst_12 = arith.constant dense<0.000000e+00> : vector<16x1024xf32>
    %14 = tpu.matmul %0, %13, %cst_12 {dimension_numbers = #tpu.dot_dimension_numbers<[1], [0], [0], [1], [0, 0, 1, 1], [], []>} : vector<16x27xbf16>, vector<27x1024xbf16>, vector<16x1024xf32> -> vector<16x1024xf32>
    %15 = arith.maximumf %11, %14 : vector<16x1024xf32>
    %c4 = arith.constant 4 : index
    %c0_13 = arith.constant 0 : index
    %c0_14 = arith.constant 0 : index
    %16 = vector.load %arg2[%c4, %c0_13, %c0_14] : memref<8x27x1024xbf16, #tpu.memory_space<vmem>>, vector<1x27x1024xbf16>
    %17 = vector.shape_cast %16 : vector<1x27x1024xbf16> to vector<27x1024xbf16>
    %cst_15 = arith.constant dense<0.000000e+00> : vector<16x1024xf32>
    %18 = tpu.matmul %0, %17, %cst_15 {dimension_numbers = #tpu.dot_dimension_numbers<[1], [0], [0], [1], [0, 0, 1, 1], [], []>} : vector<16x27xbf16>, vector<27x1024xbf16>, vector<16x1024xf32> -> vector<16x1024xf32>
    %19 = arith.maximumf %15, %18 : vector<16x1024xf32>
    %c5 = arith.constant 5 : index
    %c0_16 = arith.constant 0 : index
    %c0_17 = arith.constant 0 : index
    %20 = vector.load %arg2[%c5, %c0_16, %c0_17] : memref<8x27x1024xbf16, #tpu.memory_space<vmem>>, vector<1x27x1024xbf16>
    %21 = vector.shape_cast %20 : vector<1x27x1024xbf16> to vector<27x1024xbf16>
    %cst_18 = arith.constant dense<0.000000e+00> : vector<16x1024xf32>
    %22 = tpu.matmul %0, %21, %cst_18 {dimension_numbers = #tpu.dot_dimension_numbers<[1], [0], [0], [1], [0, 0, 1, 1], [], []>} : vector<16x27xbf16>, vector<27x1024xbf16>, vector<16x1024xf32> -> vector<16x1024xf32>
    %23 = arith.maximumf %19, %22 : vector<16x1024xf32>
    %c6 = arith.constant 6 : index
    %c0_19 = arith.constant 0 : index
    %c0_20 = arith.constant 0 : index
    %24 = vector.load %arg2[%c6, %c0_19, %c0_20] : memref<8x27x1024xbf16, #tpu.memory_space<vmem>>, vector<1x27x1024xbf16>
    %25 = vector.shape_cast %24 : vector<1x27x1024xbf16> to vector<27x1024xbf16>
    %cst_21 = arith.constant dense<0.000000e+00> : vector<16x1024xf32>
    %26 = tpu.matmul %0, %25, %cst_21 {dimension_numbers = #tpu.dot_dimension_numbers<[1], [0], [0], [1], [0, 0, 1, 1], [], []>} : vector<16x27xbf16>, vector<27x1024xbf16>, vector<16x1024xf32> -> vector<16x1024xf32>
    %27 = arith.maximumf %23, %26 : vector<16x1024xf32>
    %c7 = arith.constant 7 : index
    %c0_22 = arith.constant 0 : index
    %c0_23 = arith.constant 0 : index
    %28 = vector.load %arg2[%c7, %c0_22, %c0_23] : memref<8x27x1024xbf16, #tpu.memory_space<vmem>>, vector<1x27x1024xbf16>
    %29 = vector.shape_cast %28 : vector<1x27x1024xbf16> to vector<27x1024xbf16>
    %cst_24 = arith.constant dense<0.000000e+00> : vector<16x1024xf32>
    %30 = tpu.matmul %0, %29, %cst_24 {dimension_numbers = #tpu.dot_dimension_numbers<[1], [0], [0], [1], [0, 0, 1, 1], [], []>} : vector<16x27xbf16>, vector<27x1024xbf16>, vector<16x1024xf32> -> vector<16x1024xf32>
    %31 = arith.maximumf %27, %30 : vector<16x1024xf32>
    %c0_25 = arith.constant 0 : index
    %c0_26 = arith.constant 0 : index
    %32 = vector.load %arg1[%c0_25, %c0_26] : memref<16x1xf32, #tpu.memory_space<vmem>>, vector<16x1xf32>
    %33 = vector.broadcast %32 : vector<16x1xf32> to vector<16x1024xf32>
    %34 = arith.addf %31, %33 : vector<16x1024xf32>
    %35 = arith.truncf %34 : vector<16x1024xf32> to vector<16x1024xbf16>
    %c0_27 = arith.constant 0 : index
    %c0_28 = arith.constant 0 : index
    %36 = vector.load %arg3[%c0_27, %c0_28] : memref<16x1024xbf16, #tpu.memory_space<vmem>>, vector<16x1024xbf16>
    tpu.vector_store %arg3[%c0_27, %c0_28], %35 {strides = array<i32>} : memref<16x1024xbf16, #tpu.memory_space<vmem>>, vector<16x1024xbf16>,
    return
  }
}

module attributes {stable_mosaic.version = 11 : i64} {
  func.func @_conv_pool_kernel(%arg0: memref<32x432xbf16, #tpu.memory_space<vmem>>, %arg1: memref<32x1xf32, #tpu.memory_space<vmem>>, %arg2: memref<8x432x128xbf16, #tpu.memory_space<vmem>>, %arg3: memref<32x128xbf16, #tpu.memory_space<vmem>>) attributes {dimension_semantics = [], scalar_prefetch = 0 : i64, scratch_operands = 0 : i64, tpu.core_type = #tpu.core_type<tc>} {
    %c0 = arith.constant 0 : index
    %c0_0 = arith.constant 0 : index
    %0 = vector.load %arg0[%c0, %c0_0] : memref<32x432xbf16, #tpu.memory_space<vmem>>, vector<32x432xbf16>
    %c0_1 = arith.constant 0 : index
    %c0_2 = arith.constant 0 : index
    %c0_3 = arith.constant 0 : index
    %1 = vector.load %arg2[%c0_1, %c0_2, %c0_3] : memref<8x432x128xbf16, #tpu.memory_space<vmem>>, vector<1x432x128xbf16>
    %2 = vector.shape_cast %1 : vector<1x432x128xbf16> to vector<432x128xbf16>
    %cst = arith.constant dense<0.000000e+00> : vector<32x128xf32>
    %3 = tpu.matmul %0, %2, %cst {dimension_numbers = #tpu.dot_dimension_numbers<[1], [0], [0], [1], [0, 0, 1, 1], [], []>} : vector<32x432xbf16>, vector<432x128xbf16>, vector<32x128xf32> -> vector<32x128xf32>
    %c1 = arith.constant 1 : index
    %c0_4 = arith.constant 0 : index
    %c0_5 = arith.constant 0 : index
    %4 = vector.load %arg2[%c1, %c0_4, %c0_5] : memref<8x432x128xbf16, #tpu.memory_space<vmem>>, vector<1x432x128xbf16>
    %5 = vector.shape_cast %4 : vector<1x432x128xbf16> to vector<432x128xbf16>
    %cst_6 = arith.constant dense<0.000000e+00> : vector<32x128xf32>
    %6 = tpu.matmul %0, %5, %cst_6 {dimension_numbers = #tpu.dot_dimension_numbers<[1], [0], [0], [1], [0, 0, 1, 1], [], []>} : vector<32x432xbf16>, vector<432x128xbf16>, vector<32x128xf32> -> vector<32x128xf32>
    %7 = arith.maximumf %3, %6 : vector<32x128xf32>
    %c2 = arith.constant 2 : index
    %c0_7 = arith.constant 0 : index
    %c0_8 = arith.constant 0 : index
    %8 = vector.load %arg2[%c2, %c0_7, %c0_8] : memref<8x432x128xbf16, #tpu.memory_space<vmem>>, vector<1x432x128xbf16>
    %9 = vector.shape_cast %8 : vector<1x432x128xbf16> to vector<432x128xbf16>
    %cst_9 = arith.constant dense<0.000000e+00> : vector<32x128xf32>
    %10 = tpu.matmul %0, %9, %cst_9 {dimension_numbers = #tpu.dot_dimension_numbers<[1], [0], [0], [1], [0, 0, 1, 1], [], []>} : vector<32x432xbf16>, vector<432x128xbf16>, vector<32x128xf32> -> vector<32x128xf32>
    %11 = arith.maximumf %7, %10 : vector<32x128xf32>
    %c3 = arith.constant 3 : index
    %c0_10 = arith.constant 0 : index
    %c0_11 = arith.constant 0 : index
    %12 = vector.load %arg2[%c3, %c0_10, %c0_11] : memref<8x432x128xbf16, #tpu.memory_space<vmem>>, vector<1x432x128xbf16>
    %13 = vector.shape_cast %12 : vector<1x432x128xbf16> to vector<432x128xbf16>
    %cst_12 = arith.constant dense<0.000000e+00> : vector<32x128xf32>
    %14 = tpu.matmul %0, %13, %cst_12 {dimension_numbers = #tpu.dot_dimension_numbers<[1], [0], [0], [1], [0, 0, 1, 1], [], []>} : vector<32x432xbf16>, vector<432x128xbf16>, vector<32x128xf32> -> vector<32x128xf32>
    %15 = arith.maximumf %11, %14 : vector<32x128xf32>
    %c4 = arith.constant 4 : index
    %c0_13 = arith.constant 0 : index
    %c0_14 = arith.constant 0 : index
    %16 = vector.load %arg2[%c4, %c0_13, %c0_14] : memref<8x432x128xbf16, #tpu.memory_space<vmem>>, vector<1x432x128xbf16>
    %17 = vector.shape_cast %16 : vector<1x432x128xbf16> to vector<432x128xbf16>
    %cst_15 = arith.constant dense<0.000000e+00> : vector<32x128xf32>
    %18 = tpu.matmul %0, %17, %cst_15 {dimension_numbers = #tpu.dot_dimension_numbers<[1], [0], [0], [1], [0, 0, 1, 1], [], []>} : vector<32x432xbf16>, vector<432x128xbf16>, vector<32x128xf32> -> vector<32x128xf32>
    %19 = arith.maximumf %15, %18 : vector<32x128xf32>
    %c5 = arith.constant 5 : index
    %c0_16 = arith.constant 0 : index
    %c0_17 = arith.constant 0 : index
    %20 = vector.load %arg2[%c5, %c0_16, %c0_17] : memref<8x432x128xbf16, #tpu.memory_space<vmem>>, vector<1x432x128xbf16>
    %21 = vector.shape_cast %20 : vector<1x432x128xbf16> to vector<432x128xbf16>
    %cst_18 = arith.constant dense<0.000000e+00> : vector<32x128xf32>
    %22 = tpu.matmul %0, %21, %cst_18 {dimension_numbers = #tpu.dot_dimension_numbers<[1], [0], [0], [1], [0, 0, 1, 1], [], []>} : vector<32x432xbf16>, vector<432x128xbf16>, vector<32x128xf32> -> vector<32x128xf32>
    %23 = arith.maximumf %19, %22 : vector<32x128xf32>
    %c6 = arith.constant 6 : index
    %c0_19 = arith.constant 0 : index
    %c0_20 = arith.constant 0 : index
    %24 = vector.load %arg2[%c6, %c0_19, %c0_20] : memref<8x432x128xbf16, #tpu.memory_space<vmem>>, vector<1x432x128xbf16>
    %25 = vector.shape_cast %24 : vector<1x432x128xbf16> to vector<432x128xbf16>
    %cst_21 = arith.constant dense<0.000000e+00> : vector<32x128xf32>
    %26 = tpu.matmul %0, %25, %cst_21 {dimension_numbers = #tpu.dot_dimension_numbers<[1], [0], [0], [1], [0, 0, 1, 1], [], []>} : vector<32x432xbf16>, vector<432x128xbf16>, vector<32x128xf32> -> vector<32x128xf32>
    %27 = arith.maximumf %23, %26 : vector<32x128xf32>
    %c7 = arith.constant 7 : index
    %c0_22 = arith.constant 0 : index
    %c0_23 = arith.constant 0 : index
    %28 = vector.load %arg2[%c7, %c0_22, %c0_23] : memref<8x432x128xbf16, #tpu.memory_space<vmem>>, vector<1x432x128xbf16>
    %29 = vector.shape_cast %28 : vector<1x432x128xbf16> to vector<432x128xbf16>
    %cst_24 = arith.constant dense<0.000000e+00> : vector<32x128xf32>
    %30 = tpu.matmul %0, %29, %cst_24 {dimension_numbers = #tpu.dot_dimension_numbers<[1], [0], [0], [1], [0, 0, 1, 1], [], []>} : vector<32x432xbf16>, vector<432x128xbf16>, vector<32x128xf32> -> vector<32x128xf32>
    %31 = arith.maximumf %27, %30 : vector<32x128xf32>
    %c0_25 = arith.constant 0 : index
    %c0_26 = arith.constant 0 : index
    %32 = vector.load %arg1[%c0_25, %c0_26] : memref<32x1xf32, #tpu.memory_space<vmem>>, vector<32x1xf32>
    %33 = vector.broadcast %32 : vector<32x1xf32> to vector<32x128xf32>
    %34 = arith.addf %31, %33 : vector<32x128xf32>
    %35 = arith.truncf %34 : vector<32x128xf32> to vector<32x128xbf16>
    %c0_27 = arith.constant 0 : index
    %c0_28 = arith.constant 0 : index
    %36 = vector.load %arg3[%c0_27, %c0_28] : memref<32x128xbf16, #tpu.memory_space<vmem>>, vector<32x128xbf16>
    tpu.vector_store %arg3[%c0_27, %c0_28], %35 {strides = array<i32>} : memref<32x128xbf16, #tpu.memory_space<vmem>>, vector<32x128xbf16>,
    return
  }
}

module attributes {stable_mosaic.version = 11 : i64} {
  func.func @_stage3_head_kernel(%arg0: memref<64x864xbf16, #tpu.memory_space<vmem>>, %arg1: memref<64x1xf32, #tpu.memory_space<vmem>>, %arg2: memref<8x864x16xbf16, #tpu.memory_space<vmem>>, %arg3: memref<8x128x64xf32, #tpu.memory_space<vmem>>, %arg4: memref<128x1xf32, #tpu.memory_space<vmem>>, %arg5: memref<1x128xf32, #tpu.memory_space<vmem>>, %arg6: memref<1x1xf32, #tpu.memory_space<vmem>>, %arg7: memref<1x2xf32, #tpu.memory_space<vmem>>) attributes {dimension_semantics = [], scalar_prefetch = 0 : i64, scratch_operands = 0 : i64, tpu.core_type = #tpu.core_type<tc>} {
    %c0 = arith.constant 0 : index
    %c0_0 = arith.constant 0 : index
    %0 = vector.load %arg0[%c0, %c0_0] : memref<64x864xbf16, #tpu.memory_space<vmem>>, vector<64x864xbf16>
    %c0_1 = arith.constant 0 : index
    %c0_2 = arith.constant 0 : index
    %c0_3 = arith.constant 0 : index
    %1 = vector.load %arg2[%c0_1, %c0_2, %c0_3] : memref<8x864x16xbf16, #tpu.memory_space<vmem>>, vector<1x864x16xbf16>
    %2 = vector.shape_cast %1 : vector<1x864x16xbf16> to vector<864x16xbf16>
    %cst = arith.constant dense<0.000000e+00> : vector<64x16xf32>
    %3 = tpu.matmul %0, %2, %cst {dimension_numbers = #tpu.dot_dimension_numbers<[1], [0], [0], [1], [0, 0, 1, 1], [], []>} : vector<64x864xbf16>, vector<864x16xbf16>, vector<64x16xf32> -> vector<64x16xf32>
    %c1 = arith.constant 1 : index
    %c0_4 = arith.constant 0 : index
    %c0_5 = arith.constant 0 : index
    %4 = vector.load %arg2[%c1, %c0_4, %c0_5] : memref<8x864x16xbf16, #tpu.memory_space<vmem>>, vector<1x864x16xbf16>
    %5 = vector.shape_cast %4 : vector<1x864x16xbf16> to vector<864x16xbf16>
    %cst_6 = arith.constant dense<0.000000e+00> : vector<64x16xf32>
    %6 = tpu.matmul %0, %5, %cst_6 {dimension_numbers = #tpu.dot_dimension_numbers<[1], [0], [0], [1], [0, 0, 1, 1], [], []>} : vector<64x864xbf16>, vector<864x16xbf16>, vector<64x16xf32> -> vector<64x16xf32>
    %7 = arith.maximumf %3, %6 : vector<64x16xf32>
    %c2 = arith.constant 2 : index
    %c0_7 = arith.constant 0 : index
    %c0_8 = arith.constant 0 : index
    %8 = vector.load %arg2[%c2, %c0_7, %c0_8] : memref<8x864x16xbf16, #tpu.memory_space<vmem>>, vector<1x864x16xbf16>
    %9 = vector.shape_cast %8 : vector<1x864x16xbf16> to vector<864x16xbf16>
    %cst_9 = arith.constant dense<0.000000e+00> : vector<64x16xf32>
    %10 = tpu.matmul %0, %9, %cst_9 {dimension_numbers = #tpu.dot_dimension_numbers<[1], [0], [0], [1], [0, 0, 1, 1], [], []>} : vector<64x864xbf16>, vector<864x16xbf16>, vector<64x16xf32> -> vector<64x16xf32>
    %11 = arith.maximumf %7, %10 : vector<64x16xf32>
    %c3 = arith.constant 3 : index
    %c0_10 = arith.constant 0 : index
    %c0_11 = arith.constant 0 : index
    %12 = vector.load %arg2[%c3, %c0_10, %c0_11] : memref<8x864x16xbf16, #tpu.memory_space<vmem>>, vector<1x864x16xbf16>
    %13 = vector.shape_cast %12 : vector<1x864x16xbf16> to vector<864x16xbf16>
    %cst_12 = arith.constant dense<0.000000e+00> : vector<64x16xf32>
    %14 = tpu.matmul %0, %13, %cst_12 {dimension_numbers = #tpu.dot_dimension_numbers<[1], [0], [0], [1], [0, 0, 1, 1], [], []>} : vector<64x864xbf16>, vector<864x16xbf16>, vector<64x16xf32> -> vector<64x16xf32>
    %15 = arith.maximumf %11, %14 : vector<64x16xf32>
    %c4 = arith.constant 4 : index
    %c0_13 = arith.constant 0 : index
    %c0_14 = arith.constant 0 : index
    %16 = vector.load %arg2[%c4, %c0_13, %c0_14] : memref<8x864x16xbf16, #tpu.memory_space<vmem>>, vector<1x864x16xbf16>
    %17 = vector.shape_cast %16 : vector<1x864x16xbf16> to vector<864x16xbf16>
    %cst_15 = arith.constant dense<0.000000e+00> : vector<64x16xf32>
    %18 = tpu.matmul %0, %17, %cst_15 {dimension_numbers = #tpu.dot_dimension_numbers<[1], [0], [0], [1], [0, 0, 1, 1], [], []>} : vector<64x864xbf16>, vector<864x16xbf16>, vector<64x16xf32> -> vector<64x16xf32>
    %19 = arith.maximumf %15, %18 : vector<64x16xf32>
    %c5 = arith.constant 5 : index
    %c0_16 = arith.constant 0 : index
    %c0_17 = arith.constant 0 : index
    %20 = vector.load %arg2[%c5, %c0_16, %c0_17] : memref<8x864x16xbf16, #tpu.memory_space<vmem>>, vector<1x864x16xbf16>
    %21 = vector.shape_cast %20 : vector<1x864x16xbf16> to vector<864x16xbf16>
    %cst_18 = arith.constant dense<0.000000e+00> : vector<64x16xf32>
    %22 = tpu.matmul %0, %21, %cst_18 {dimension_numbers = #tpu.dot_dimension_numbers<[1], [0], [0], [1], [0, 0, 1, 1], [], []>} : vector<64x864xbf16>, vector<864x16xbf16>, vector<64x16xf32> -> vector<64x16xf32>
    %23 = arith.maximumf %19, %22 : vector<64x16xf32>
    %c6 = arith.constant 6 : index
    %c0_19 = arith.constant 0 : index
    %c0_20 = arith.constant 0 : index
    %24 = vector.load %arg2[%c6, %c0_19, %c0_20] : memref<8x864x16xbf16, #tpu.memory_space<vmem>>, vector<1x864x16xbf16>
    %25 = vector.shape_cast %24 : vector<1x864x16xbf16> to vector<864x16xbf16>
    %cst_21 = arith.constant dense<0.000000e+00> : vector<64x16xf32>
    %26 = tpu.matmul %0, %25, %cst_21 {dimension_numbers = #tpu.dot_dimension_numbers<[1], [0], [0], [1], [0, 0, 1, 1], [], []>} : vector<64x864xbf16>, vector<864x16xbf16>, vector<64x16xf32> -> vector<64x16xf32>
    %27 = arith.maximumf %23, %26 : vector<64x16xf32>
    %c7 = arith.constant 7 : index
    %c0_22 = arith.constant 0 : index
    %c0_23 = arith.constant 0 : index
    %28 = vector.load %arg2[%c7, %c0_22, %c0_23] : memref<8x864x16xbf16, #tpu.memory_space<vmem>>, vector<1x864x16xbf16>
    %29 = vector.shape_cast %28 : vector<1x864x16xbf16> to vector<864x16xbf16>
    %cst_24 = arith.constant dense<0.000000e+00> : vector<64x16xf32>
    %30 = tpu.matmul %0, %29, %cst_24 {dimension_numbers = #tpu.dot_dimension_numbers<[1], [0], [0], [1], [0, 0, 1, 1], [], []>} : vector<64x864xbf16>, vector<864x16xbf16>, vector<64x16xf32> -> vector<64x16xf32>
    %31 = arith.maximumf %27, %30 : vector<64x16xf32>
    %c0_25 = arith.constant 0 : index
    %c0_26 = arith.constant 0 : index
    %32 = vector.load %arg1[%c0_25, %c0_26] : memref<64x1xf32, #tpu.memory_space<vmem>>, vector<64x1xf32>
    %33 = vector.broadcast %32 : vector<64x1xf32> to vector<64x16xf32>
    %34 = arith.addf %31, %33 : vector<64x16xf32>
    %cst_27 = arith.constant 0.000000e+00 : f32
    %35 = vector.broadcast %cst_27 : f32 to vector<128x2xf32>
    %c0_28 = arith.constant 0 : index
    %c0_29 = arith.constant 0 : index
    %36 = vector.load %arg4[%c0_28, %c0_29] : memref<128x1xf32, #tpu.memory_space<vmem>>, vector<128x1xf32>
    %37 = vector.broadcast %36 : vector<128x1xf32> to vector<128x2xf32>
    %38 = arith.addf %35, %37 : vector<128x2xf32>
    %c0_30 = arith.constant 0 : index
    %c0_31 = arith.constant 0 : index
    %c0_32 = arith.constant 0 : index
    %39 = vector.load %arg3[%c0_30, %c0_31, %c0_32] : memref<8x128x64xf32, #tpu.memory_space<vmem>>, vector<1x128x64xf32>
    %40 = vector.shape_cast %39 : vector<1x128x64xf32> to vector<128x64xf32>
    %41 = vector.extract_strided_slice %34 {offsets = [0, 0], sizes = [64, 2], strides = [1, 1]} : vector<64x16xf32> to vector<64x2xf32>
    %cst_33 = arith.constant dense<0.000000e+00> : vector<128x2xf32>
    %42 = tpu.matmul %40, %41, %cst_33 {dimension_numbers = #tpu.dot_dimension_numbers<[1], [0], [0], [1], [0, 0, 1, 1], [], []>} : vector<128x64xf32>, vector<64x2xf32>, vector<128x2xf32> -> vector<128x2xf32>
    %43 = arith.addf %38, %42 : vector<128x2xf32>
    %c1_34 = arith.constant 1 : index
    %c0_35 = arith.constant 0 : index
    %c0_36 = arith.constant 0 : index
    %44 = vector.load %arg3[%c1_34, %c0_35, %c0_36] : memref<8x128x64xf32, #tpu.memory_space<vmem>>, vector<1x128x64xf32>
    %45 = vector.shape_cast %44 : vector<1x128x64xf32> to vector<128x64xf32>
    %46 = vector.extract_strided_slice %34 {offsets = [0, 2], sizes = [64, 2], strides = [1, 1]} : vector<64x16xf32> to vector<64x2xf32>
    %cst_37 = arith.constant dense<0.000000e+00> : vector<128x2xf32>
    %47 = tpu.matmul %45, %46, %cst_37 {dimension_numbers = #tpu.dot_dimension_numbers<[1], [0], [0], [1], [0, 0, 1, 1], [], []>} : vector<128x64xf32>, vector<64x2xf32>, vector<128x2xf32> -> vector<128x2xf32>
    %48 = arith.addf %43, %47 : vector<128x2xf32>
    %c2_38 = arith.constant 2 : index
    %c0_39 = arith.constant 0 : index
    %c0_40 = arith.constant 0 : index
    %49 = vector.load %arg3[%c2_38, %c0_39, %c0_40] : memref<8x128x64xf32, #tpu.memory_space<vmem>>, vector<1x128x64xf32>
    %50 = vector.shape_cast %49 : vector<1x128x64xf32> to vector<128x64xf32>
    %51 = vector.extract_strided_slice %34 {offsets = [0, 4], sizes = [64, 2], strides = [1, 1]} : vector<64x16xf32> to vector<64x2xf32>
    %cst_41 = arith.constant dense<0.000000e+00> : vector<128x2xf32>
    %52 = tpu.matmul %50, %51, %cst_41 {dimension_numbers = #tpu.dot_dimension_numbers<[1], [0], [0], [1], [0, 0, 1, 1], [], []>} : vector<128x64xf32>, vector<64x2xf32>, vector<128x2xf32> -> vector<128x2xf32>
    %53 = arith.addf %48, %52 : vector<128x2xf32>
    %c3_42 = arith.constant 3 : index
    %c0_43 = arith.constant 0 : index
    %c0_44 = arith.constant 0 : index
    %54 = vector.load %arg3[%c3_42, %c0_43, %c0_44] : memref<8x128x64xf32, #tpu.memory_space<vmem>>, vector<1x128x64xf32>
    %55 = vector.shape_cast %54 : vector<1x128x64xf32> to vector<128x64xf32>
    %56 = vector.extract_strided_slice %34 {offsets = [0, 6], sizes = [64, 2], strides = [1, 1]} : vector<64x16xf32> to vector<64x2xf32>
    %cst_45 = arith.constant dense<0.000000e+00> : vector<128x2xf32>
    %57 = tpu.matmul %55, %56, %cst_45 {dimension_numbers = #tpu.dot_dimension_numbers<[1], [0], [0], [1], [0, 0, 1, 1], [], []>} : vector<128x64xf32>, vector<64x2xf32>, vector<128x2xf32> -> vector<128x2xf32>
    %58 = arith.addf %53, %57 : vector<128x2xf32>
    %c4_46 = arith.constant 4 : index
    %c0_47 = arith.constant 0 : index
    %c0_48 = arith.constant 0 : index
    %59 = vector.load %arg3[%c4_46, %c0_47, %c0_48] : memref<8x128x64xf32, #tpu.memory_space<vmem>>, vector<1x128x64xf32>
    %60 = vector.shape_cast %59 : vector<1x128x64xf32> to vector<128x64xf32>
    %61 = vector.extract_strided_slice %34 {offsets = [0, 8], sizes = [64, 2], strides = [1, 1]} : vector<64x16xf32> to vector<64x2xf32>
    %cst_49 = arith.constant dense<0.000000e+00> : vector<128x2xf32>
    %62 = tpu.matmul %60, %61, %cst_49 {dimension_numbers = #tpu.dot_dimension_numbers<[1], [0], [0], [1], [0, 0, 1, 1], [], []>} : vector<128x64xf32>, vector<64x2xf32>, vector<128x2xf32> -> vector<128x2xf32>
    %63 = arith.addf %58, %62 : vector<128x2xf32>
    %c5_50 = arith.constant 5 : index
    %c0_51 = arith.constant 0 : index
    %c0_52 = arith.constant 0 : index
    %64 = vector.load %arg3[%c5_50, %c0_51, %c0_52] : memref<8x128x64xf32, #tpu.memory_space<vmem>>, vector<1x128x64xf32>
    %65 = vector.shape_cast %64 : vector<1x128x64xf32> to vector<128x64xf32>
    %66 = vector.extract_strided_slice %34 {offsets = [0, 10], sizes = [64, 2], strides = [1, 1]} : vector<64x16xf32> to vector<64x2xf32>
    %cst_53 = arith.constant dense<0.000000e+00> : vector<128x2xf32>
    %67 = tpu.matmul %65, %66, %cst_53 {dimension_numbers = #tpu.dot_dimension_numbers<[1], [0], [0], [1], [0, 0, 1, 1], [], []>} : vector<128x64xf32>, vector<64x2xf32>, vector<128x2xf32> -> vector<128x2xf32>
    %68 = arith.addf %63, %67 : vector<128x2xf32>
    %c6_54 = arith.constant 6 : index
    %c0_55 = arith.constant 0 : index
    %c0_56 = arith.constant 0 : index
    %69 = vector.load %arg3[%c6_54, %c0_55, %c0_56] : memref<8x128x64xf32, #tpu.memory_space<vmem>>, vector<1x128x64xf32>
    %70 = vector.shape_cast %69 : vector<1x128x64xf32> to vector<128x64xf32>
    %71 = vector.extract_strided_slice %34 {offsets = [0, 12], sizes = [64, 2], strides = [1, 1]} : vector<64x16xf32> to vector<64x2xf32>
    %cst_57 = arith.constant dense<0.000000e+00> : vector<128x2xf32>
    %72 = tpu.matmul %70, %71, %cst_57 {dimension_numbers = #tpu.dot_dimension_numbers<[1], [0], [0], [1], [0, 0, 1, 1], [], []>} : vector<128x64xf32>, vector<64x2xf32>, vector<128x2xf32> -> vector<128x2xf32>
    %73 = arith.addf %68, %72 : vector<128x2xf32>
    %c7_58 = arith.constant 7 : index
    %c0_59 = arith.constant 0 : index
    %c0_60 = arith.constant 0 : index
    %74 = vector.load %arg3[%c7_58, %c0_59, %c0_60] : memref<8x128x64xf32, #tpu.memory_space<vmem>>, vector<1x128x64xf32>
    %75 = vector.shape_cast %74 : vector<1x128x64xf32> to vector<128x64xf32>
    %76 = vector.extract_strided_slice %34 {offsets = [0, 14], sizes = [64, 2], strides = [1, 1]} : vector<64x16xf32> to vector<64x2xf32>
    %cst_61 = arith.constant dense<0.000000e+00> : vector<128x2xf32>
    %77 = tpu.matmul %75, %76, %cst_61 {dimension_numbers = #tpu.dot_dimension_numbers<[1], [0], [0], [1], [0, 0, 1, 1], [], []>} : vector<128x64xf32>, vector<64x2xf32>, vector<128x2xf32> -> vector<128x2xf32>
    %78 = arith.addf %73, %77 : vector<128x2xf32>
    %cst_62 = arith.constant 0.000000e+00 : f32
    %79 = vector.broadcast %cst_62 : f32 to vector<128x2xf32>
    %80 = arith.maximumf %78, %79 : vector<128x2xf32>
    %c0_63 = arith.constant 0 : index
    %c0_64 = arith.constant 0 : index
    %81 = vector.load %arg5[%c0_63, %c0_64] : memref<1x128xf32, #tpu.memory_space<vmem>>, vector<1x128xf32>
    %cst_65 = arith.constant dense<0.000000e+00> : vector<1x2xf32>
    %82 = tpu.matmul %81, %80, %cst_65 {dimension_numbers = #tpu.dot_dimension_numbers<[1], [0], [0], [1], [0, 0, 1, 1], [], []>} : vector<1x128xf32>, vector<128x2xf32>, vector<1x2xf32> -> vector<1x2xf32>
    %c0_66 = arith.constant 0 : index
    %c0_67 = arith.constant 0 : index
    %83 = vector.load %arg6[%c0_66, %c0_67] : memref<1x1xf32, #tpu.memory_space<vmem>>, vector<1x1xf32>
    %84 = vector.broadcast %83 : vector<1x1xf32> to vector<1x2xf32>
    %85 = arith.addf %82, %84 : vector<1x2xf32>
    %86 = arith.negf %85 : vector<1x2xf32>
    %87 = math.exp %86 : vector<1x2xf32>
    %cst_68 = arith.constant 1.000000e+00 : f32
    %88 = vector.broadcast %cst_68 : f32 to vector<1x2xf32>
    %89 = arith.addf %88, %87 : vector<1x2xf32>
    %90 = arith.divf %88, %89 : vector<1x2xf32>
    %c0_69 = arith.constant 0 : index
    %c0_70 = arith.constant 0 : index
    %91 = vector.load %arg7[%c0_69, %c0_70] : memref<1x2xf32, #tpu.memory_space<vmem>>, vector<1x2xf32>
    tpu.vector_store %arg7[%c0_69, %c0_70], %90 {strides = array<i32>} : memref<1x2xf32, #tpu.memory_space<vmem>>, vector<1x2xf32>,
    return
  }
}

</mosaic_0001>

<bundles_post_ra>
// kernel: test_model_forward.3
= control target key start
LH: loop header
LB: loop body
LE: loop exit
PB: predicated region body
PF: predicated region fallthrough
CT: control target
= control target key end

     0   :  { %vm114_vm0 = vcmask 1044480   ;;  %vm115_vm1 = vcmask 1045504   ;;  %v2814_v2 = vmov 65535   ;;  %vm110_vm2 = vcmask 220160   ;;  %s4146_s2 = inlined_call_operand.vmem [shape: bf16[8,27,1024], index: 2, kind: input, shape index: {}]   ;;  %s4147_s0 = inlined_call_operand.vmem [shape: bf16[16,27], index: 0, kind: input, shape index: {}]   ;;  %s4148_s1 = inlined_call_operand.vmem [shape: f32[16,1], index: 1, kind: input, shape index: {}]   ;;  %s4149_s3 = inlined_call_operand.vmem [shape: bf16[16,1024], index: 3, kind: output, shape index: {}]  }
   0x1   :  { %v2027_v0 = vld [vmem:[%s4146_s2 + $0x40] sm:$0xf]  ;;  %v116_v3 = vsel %vm114_vm0, 4294967295, %v2814_v2  ;;  %v2690_v6 = vld [vmem:[%s4146_s2 + $0x44] sm:$0xf] }
   0x2   :  { %v2694_v1 = vld [vmem:[%s4146_s2 + $0x5c] sm:$0x30]  ;;  %v2842_v5 = vsel %vm115_vm1, %v116_v3, 0  ;;  %v2029_v7 = vld [vmem:[%s4146_s2 + $0x60] sm:$0x30] }
   0x3   :  { %v2028_v4 = vor.u32 %v2694_v1, %v2027_v0  ;;  %v2032_v8 = vor.u32 %v2690_v6, %v2029_v7  ;;  %v2035_v9 = vld [vmem:[%s4146_s2 + $0x48] sm:$0xf]  ;;  %v2691_v11 = vld [vmem:[%s4146_s2 + $0x4c] sm:$0xf]  ;;  %v1995_v15 = vld [vmem:[%s4146_s2] sm:$0xf] }
   0x4   :  { %v2695_v10 = vld [vmem:[%s4146_s2 + $0x64] sm:$0x30]  ;;  %v2037_v14 = vld [vmem:[%s4146_s2 + $0x68] sm:$0x30]  ;;  %v2686_v16 = vld [vmem:[%s4146_s2 + $0x1c] sm:$0xf0] }
   0x5   :  { %v119_v12 = vand.u32 %v2028_v4, %v2842_v5  ;;  %v2036_v13 = vor.u32 %v2695_v10, %v2035_v9  ;;  %v122_v17 = vand.u32 %v2032_v8, %v2842_v5  ;;  %v2040_v18 = vor.u32 %v2691_v11, %v2037_v14  ;;  %v2682_v19 = vld [vmem:[%s4146_s2 + $0x4] sm:$0xf]  ;;  %v2003_v21 = vld [vmem:[%s4146_s2 + $0x8] sm:$0xf]  ;;  %v2683_v25 = vld [vmem:[%s4146_s2 + $0xc] sm:$0xf] }
   0x6   :  { %v1997_v20 = vld [vmem:[%s4146_s2 + $0x20] sm:$0xf0]  ;;  %v1996_v23 = vor.u32 %v2686_v16, %v1995_v15  ;;  %v2687_v24 = vld [vmem:[%s4146_s2 + $0x24] sm:$0xf0]  ;;  %v2005_v26 = vld [vmem:[%s4146_s2 + $0x28] sm:$0xf0] }
   0x7   :  { %148 = vmatpush.bf16.msra.mxu0 %v119_v12  ;;  %v125_v22 = vand.u32 %v2036_v13, %v2842_v5  ;;  %162 = vmatpush.bf16.msra.mxu1 %v122_v17  ;;  %v128_v27 = vand.u32 %v2040_v18, %v2842_v5  ;;  %v2000_v28 = vor.u32 %v2682_v19, %v1997_v20  ;;  %v2051_v29 = vld [vmem:[%s4146_s2 + $0x58] sm:$0xf]  ;;  %v2693_v31 = vld [vmem:[%s4146_s2 + $0x5c] sm:$0xf]  ;;  %v2043_v35 = vld [vmem:[%s4146_s2 + $0x50] sm:$0xf] }
   0x8   :  { %v2697_v30 = vld [vmem:[%s4146_s2 + $0x74] sm:$0x30]  ;;  %v2004_v32 = vor.u32 %v2687_v24, %v2003_v21  ;;  %v2053_v34 = vld [vmem:[%s4146_s2 + $0x78] sm:$0x30]  ;;  %v2696_v36 = vld [vmem:[%s4146_s2 + $0x6c] sm:$0x30]  ;;  %v2008_v37 = vor.u32 %v2683_v25, %v2005_v26 }
   0x9   :  { %176 = vmatpush.bf16.msra.mxu2 %v125_v22  ;;  %v2052_v33 = vor.u32 %v2697_v30, %v2051_v29  ;;  %190 = vmatpush.bf16.msra.mxu3 %v128_v27  ;;  %v2911_v38 = vld [vmem:[%s4147_s0] sm:$0xff]  ;;  %v2056_v39 = vor.u32 %v2693_v31, %v2053_v34  ;;  %v2044_v40 = vor.u32 %v2696_v36, %v2043_v35  ;;  %v2692_v41 = vld [vmem:[%s4146_s2 + $0x54] sm:$0xf]  ;;  %v2019_v45 = vld [vmem:[%s4146_s2 + $0x18] sm:$0xf] }
   0xa   :  { %v2045_v42 = vld [vmem:[%s4146_s2 + $0x70] sm:$0x30]  ;;  %v2689_v46 = vld [vmem:[%s4146_s2 + $0x34] sm:$0xf0]  ;;  %v2685_v47 = vld [vmem:[%s4146_s2 + $0x1c] sm:$0xf] }
   0xb   :  { %149 = vmatpush.bf16.msra.mxu0 %v1996_v23  ;;  %v137_v43 = vand.u32 %v2052_v33, %v2842_v5  ;;  %v2048_v44 = vor.u32 %v2692_v41, %v2045_v42  ;;  %163 = vmatpush.bf16.msra.mxu1 %v2000_v28  ;;  %v140_v48 = vand.u32 %v2056_v39, %v2842_v5  ;;  %v2021_v49 = vld [vmem:[%s4146_s2 + $0x38] sm:$0xf0]  ;;  %v2011_v50 = vld [vmem:[%s4146_s2 + $0x10] sm:$0xf]  ;;  %v2684_v53 = vld [vmem:[%s4146_s2 + $0x14] sm:$0xf] }
   0xc   :  { %v2688_v51 = vld [vmem:[%s4146_s2 + $0x2c] sm:$0xf0]  ;;  %v131_v52 = vand.u32 %v2044_v40, %v2842_v5  ;;  %v2013_v54 = vld [vmem:[%s4146_s2 + $0x30] sm:$0xf0]  ;;  %v2123_v55 = vld [vmem:[%s4146_s2 + $0xc8] sm:$0xf]  ;;  %v2020_v62 = vor.u32 %v2689_v46, %v2019_v45  ;;  %v2024_v63 = vor.u32 %v2685_v47, %v2021_v49 }
   0xd   :  { %177 = vmatpush.bf16.msra.mxu2 %v2004_v32  ;;  %v2711_v56 = vld [vmem:[%s4146_s2 + $0xe4] sm:$0x30]  ;;  %191 = vmatpush.bf16.msra.mxu3 %v2008_v37  ;;  %v134_v57 = vand.u32 %v2048_v44, %v2842_v5  ;;  %v2707_v59 = vld [vmem:[%s4146_s2 + $0xcc] sm:$0xf]  ;;  %v2115_v61 = vld [vmem:[%s4146_s2 + $0xc0] sm:$0xf]  ;;  %v2012_v8 = vor.u32 %v2688_v51, %v2011_v50  ;;  %v2016_v12 = vor.u32 %v2684_v53, %v2013_v54 }
   0xe   :  { %2057 = vmatmul.msk.bf16.vlgmr.msra.gmra.mxu0 %vm110_vm2, %v2911_v38  ;;  %v2124_v58 = vor.u32 %v2711_v56, %v2123_v55  ;;  %v2125_v60 = vld [vmem:[%s4146_s2 + $0xe8] sm:$0x30]  ;;  %2058 = vmatmul.msk.bf16.vlgmr.msra.gmra.mxu1 %vm110_vm2, %v2911_v38  ;;  %v2710_v1 = vld [vmem:[%s4146_s2 + $0xdc] sm:$0x30]  ;;  %v2706_v2 = vld [vmem:[%s4146_s2 + $0xc4] sm:$0xf] }
   0xf   :  { %v2128_v0 = vor.u32 %v2707_v59, %v2125_v60  ;;  %v2117_v3 = vld [vmem:[%s4146_s2 + $0xe0] sm:$0x30]  ;;  %v2116_v6 = vor.u32 %v2710_v1, %v2115_v61  ;;  %204 = vmatpush.bf16.msrb.mxu0 %v131_v52  ;;  %v2091_v10 = vld [vmem:[%s4146_s2 + $0x88] sm:$0xf]  ;;  %218 = vmatpush.bf16.msrb.mxu1 %v134_v57  ;;  %v2699_v14 = vld [vmem:[%s4146_s2 + $0x8c] sm:$0xf] }
  0x10   :  { %2059 = vmatmul.msk.bf16.vlgmr.msra.gmra.mxu2 %vm110_vm2, %v2911_v38  ;;  %v350_v4 = vand.u32 %v2124_v58, %v2842_v5  ;;  %v2120_v7 = vor.u32 %v2706_v2, %v2117_v3  ;;  %2060 = vmatmul.msk.bf16.vlgmr.msra.gmra.mxu3 %vm110_vm2, %v2911_v38  ;;  %v2703_v11 = vld [vmem:[%s4146_s2 + $0xa4] sm:$0xf0]  ;;  %v2093_v15 = vld [vmem:[%s4146_s2 + $0xa8] sm:$0xf0]  ;;  %v2083_v17 = vld [vmem:[%s4146_s2 + $0x80] sm:$0xf] }
  0x11   :  { %232 = vmatpush.bf16.msrb.mxu2 %v137_v43  ;;  %246 = vmatpush.bf16.msrb.mxu3 %v140_v48  ;;  %v353_v9 = vand.u32 %v2128_v0, %v2842_v5  ;;  %v344_v13 = vand.u32 %v2116_v6, %v2842_v5  ;;  %v2702_v18 = vld [vmem:[%s4146_s2 + $0x9c] sm:$0xf0]  ;;  %v2698_v19 = vld [vmem:[%s4146_s2 + $0x84] sm:$0xf]  ;;  %v2092_v20 = vor.u32 %v2703_v11, %v2091_v10  ;;  %v2131_v22 = vld [vmem:[%s4146_s2 + $0xd0] sm:$0xf] }
  0x12   :  { %v347_v16 = vand.u32 %v2120_v7, %v2842_v5  ;;  %v2085_v21 = vld [vmem:[%s4146_s2 + $0xa0] sm:$0xf0]  ;;  %v2712_v23 = vld [vmem:[%s4146_s2 + $0xec] sm:$0x30]  ;;  %v2096_v24 = vor.u32 %v2699_v14, %v2093_v15  ;;  %v2708_v25 = vld [vmem:[%s4146_s2 + $0xd4] sm:$0xf]  ;;  %v2084_v27 = vor.u32 %v2702_v18, %v2083_v17 }
  0x13   :  { %205 = vmatpush.bf16.msrb.mxu0 %v2012_v8  ;;  %v2133_v26 = vld [vmem:[%s4146_s2 + $0xf0] sm:$0x30]  ;;  %219 = vmatpush.bf16.msrb.mxu1 %v2016_v12  ;;  %v2139_v28 = vld [vmem:[%s4146_s2 + $0xd8] sm:$0xf]  ;;  %v2088_v30 = vor.u32 %v2698_v19, %v2085_v21  ;;  %v2709_v31 = vld [vmem:[%s4146_s2 + $0xdc] sm:$0xf]  ;;  %v2132_v33 = vor.u32 %v2712_v23, %v2131_v22 }
  0x14   :  { %v2713_v29 = vld [vmem:[%s4146_s2 + $0xf4] sm:$0x30]  ;;  %v2141_v32 = vld [vmem:[%s4146_s2 + $0xf8] sm:$0x30]  ;;  %v2136_v34 = vor.u32 %v2708_v25, %v2133_v26  ;;  %v2099_v40 = vld [vmem:[%s4146_s2 + $0x90] sm:$0xf] }
  0x15   :  { %233 = vmatpush.bf16.msrb.mxu2 %v2020_v62  ;;  %247 = vmatpush.bf16.msrb.mxu3 %v2024_v63  ;;  %v2140_v35 = vor.u32 %v2713_v29, %v2139_v28  ;;  %v2144_v36 = vor.u32 %v2709_v31, %v2141_v32  ;;  %v356_v37 = vand.u32 %v2132_v33, %v2842_v5  ;;  %v2704_v41 = vld [vmem:[%s4146_s2 + $0xac] sm:$0xf0]  ;;  %v2700_v43 = vld [vmem:[%s4146_s2 + $0x94] sm:$0xf]  ;;  %v2107_v46 = vld [vmem:[%s4146_s2 + $0x98] sm:$0xf] }
  0x16   :  { %v359_v39 = vand.u32 %v2136_v34, %v2842_v5  ;;  %v2101_v44 = vld [vmem:[%s4146_s2 + $0xb0] sm:$0xf0]  ;;  %v2705_v47 = vld [vmem:[%s4146_s2 + $0xb4] sm:$0xf0]  ;;  %v2701_v48 = vld [vmem:[%s4146_s2 + $0x9c] sm:$0xf]  ;;  %v2100_v50 = vor.u32 %v2704_v41, %v2099_v40 }
  0x17   :  { %373 = vmatpush.bf16.msra.mxu0 %v344_v13  ;;  %387 = vmatpush.bf16.msra.mxu1 %v347_v16  ;;  %v362_v42 = vand.u32 %v2140_v35, %v2842_v5  ;;  %v365_v45 = vand.u32 %v2144_v36, %v2842_v5  ;;  %v2109_v49 = vld [vmem:[%s4146_s2 + $0xb8] sm:$0xf0]  ;;  %v2104_v51 = vor.u32 %v2700_v43, %v2101_v44  ;;  %v2203_v54 = vld [vmem:[%s4146_s2 + $0x140] sm:$0xf]  ;;  %v2722_v56 = vld [vmem:[%s4146_s2 + $0x144] sm:$0xf] }
  0x18   :  { %v2108_v52 = vor.u32 %v2705_v47, %v2107_v46  ;;  %v2112_v53 = vor.u32 %v2701_v48, %v2109_v49  ;;  %v2726_v55 = vld [vmem:[%s4146_s2 + $0x15c] sm:$0x30]  ;;  %v2205_v57 = vld [vmem:[%s4146_s2 + $0x160] sm:$0x30]  ;;  %v2211_v58 = vld [vmem:[%s4146_s2 + $0x148] sm:$0xf] }
  0x19   :  { %401 = vmatpush.bf16.msra.mxu2 %v350_v4  ;;  %415 = vmatpush.bf16.msra.mxu3 %v353_v9  ;;  %v2727_v59 = vld [vmem:[%s4146_s2 + $0x164] sm:$0x30]  ;;  %v2723_v60 = vld [vmem:[%s4146_s2 + $0x14c] sm:$0xf]  ;;  %v2204_v62 = vor.u32 %v2726_v55, %v2203_v54  ;;  %v2208_v63 = vor.u32 %v2722_v56, %v2205_v57  ;;  %v2171_v4 = vld [vmem:[%s4146_s2 + $0x100] sm:$0xf] }
  0x1a   :  { %v2213_v61 = vld [vmem:[%s4146_s2 + $0x168] sm:$0x30]  ;;  %v2212_v0 = vor.u32 %v2727_v59, %v2211_v58  ;;  %v2718_v6 = vld [vmem:[%s4146_s2 + $0x11c] sm:$0xf0]  ;;  %v2714_v8 = vld [vmem:[%s4146_s2 + $0x104] sm:$0xf] }
  0x1b   :  { %374 = vmatpush.bf16.msra.mxu0 %v2084_v27  ;;  %388 = vmatpush.bf16.msra.mxu1 %v2088_v30  ;;  %v2216_v1 = vor.u32 %v2723_v60, %v2213_v61  ;;  %v585_v2 = vand.u32 %v2204_v62, %v2842_v5  ;;  %v588_v3 = vand.u32 %v2208_v63, %v2842_v5  ;;  %v2173_v9 = vld [vmem:[%s4146_s2 + $0x120] sm:$0xf0]  ;;  %v2179_v11 = vld [vmem:[%s4146_s2 + $0x108] sm:$0xf]  ;;  %v2715_v13 = vld [vmem:[%s4146_s2 + $0x10c] sm:$0xf] }
  0x1c   :  { %v591_v7 = vand.u32 %v2212_v0, %v2842_v5  ;;  %v2719_v12 = vld [vmem:[%s4146_s2 + $0x124] sm:$0xf0]  ;;  %v2181_v14 = vld [vmem:[%s4146_s2 + $0x128] sm:$0xf0]  ;;  %v2172_v15 = vor.u32 %v2718_v6, %v2171_v4  ;;  %v2176_v16 = vor.u32 %v2714_v8, %v2173_v9  ;;  %v2219_v19 = vld [vmem:[%s4146_s2 + $0x150] sm:$0xf] }
  0x1d   :  { %402 = vmatpush.bf16.msra.mxu2 %v2092_v20  ;;  %416 = vmatpush.bf16.msra.mxu3 %v2096_v24  ;;  %v594_v10 = vand.u32 %v2216_v1, %v2842_v5  ;;  %v2180_v17 = vor.u32 %v2719_v12, %v2179_v11  ;;  %v2184_v18 = vor.u32 %v2715_v13, %v2181_v14  ;;  %v2728_v20 = vld [vmem:[%s4146_s2 + $0x16c] sm:$0x30]  ;;  %v2724_v21 = vld [vmem:[%s4146_s2 + $0x154] sm:$0xf]  ;;  %v2227_v23 = vld [vmem:[%s4146_s2 + $0x158] sm:$0xf] }
  0x1e   :  { %2061 = vmatmul.msk.bf16.vlgmr.msrb.gmra.mxu0 %vm110_vm2, %v2911_v38  ;;  %2062 = vmatmul.msk.bf16.vlgmr.msrb.gmra.mxu1 %vm110_vm2, %v2911_v38  ;;  %v2221_v22 = vld [vmem:[%s4146_s2 + $0x170] sm:$0x30]  ;;  %v2729_v24 = vld [vmem:[%s4146_s2 + $0x174] sm:$0x30]  ;;  %v2725_v25 = vld [vmem:[%s4146_s2 + $0x15c] sm:$0xf]  ;;  %v2220_v27 = vor.u32 %v2728_v20, %v2219_v19 }
  0x1f   :  { %429 = vmatpush.bf16.msrb.mxu0 %v356_v37  ;;  %443 = vmatpush.bf16.msrb.mxu1 %v359_v39  ;;  %v2229_v26 = vld [vmem:[%s4146_s2 + $0x178] sm:$0x30]  ;;  %v2224_v28 = vor.u32 %v2724_v21, %v2221_v22  ;;  %v2228_v29 = vor.u32 %v2729_v24, %v2227_v23  ;;  %v2187_v33 = vld [vmem:[%s4146_s2 + $0x110] sm:$0xf]  ;;  %v2716_v36 = vld [vmem:[%s4146_s2 + $0x114] sm:$0xf] }
  0x20   :  { %2063 = vmatmul.msk.bf16.vlgmr.msrb.gmra.mxu2 %vm110_vm2, %v2911_v38  ;;  %2064 = vmatmul.msk.bf16.vlgmr.msrb.gmra.mxu3 %vm110_vm2, %v2911_v38  ;;  %v2232_v30 = vor.u32 %v2725_v25, %v2229_v26  ;;  %v597_v31 = vand.u32 %v2220_v27, %v2842_v5  ;;  %v2720_v34 = vld [vmem:[%s4146_s2 + $0x12c] sm:$0xf0]  ;;  %v2189_v37 = vld [vmem:[%s4146_s2 + $0x130] sm:$0xf0]  ;;  %v2195_v40 = vld [vmem:[%s4146_s2 + $0x118] sm:$0xf] }
  0x21   :  { %457 = vmatpush.bf16.msrb.mxu2 %v362_v42  ;;  %471 = vmatpush.bf16.msrb.mxu3 %v365_v45  ;;  %v600_v32 = vand.u32 %v2224_v28, %v2842_v5  ;;  %v603_v35 = vand.u32 %v2228_v29, %v2842_v5  ;;  %v2721_v41 = vld [vmem:[%s4146_s2 + $0x134] sm:$0xf0]  ;;  %v2717_v42 = vld [vmem:[%s4146_s2 + $0x11c] sm:$0xf]  ;;  %v2188_v44 = vor.u32 %v2720_v34, %v2187_v33  ;;  %v2291_v48 = vld [vmem:[%s4146_s2 + $0x1c0] sm:$0xf] }
  0x22   :  { %v606_v39 = vand.u32 %v2232_v30, %v2842_v5  ;;  %v2197_v43 = vld [vmem:[%s4146_s2 + $0x138] sm:$0xf0]  ;;  %v2192_v45 = vor.u32 %v2716_v36, %v2189_v37  ;;  %v2196_v46 = vor.u32 %v2721_v41, %v2195_v40  ;;  %v2742_v49 = vld [vmem:[%s4146_s2 + $0x1dc] sm:$0x30]  ;;  %v2739_v54 = vld [vmem:[%s4146_s2 + $0x1cc] sm:$0xf] }
  0x23   :  { %430 = vmatpush.bf16.msrb.mxu0 %v2100_v50  ;;  %444 = vmatpush.bf16.msrb.mxu1 %v2104_v51  ;;  %v2200_v47 = vor.u32 %v2717_v42, %v2197_v43  ;;  %v2738_v50 = vld [vmem:[%s4146_s2 + $0x1c4] sm:$0xf]  ;;  %v2301_v55 = vld [vmem:[%s4146_s2 + $0x1e8] sm:$0x30]  ;;  %v2292_v56 = vor.u32 %v2742_v49, %v2291_v48  ;;  %v2259_v62 = vld [vmem:[%s4146_s2 + $0x180] sm:$0xf] }
  0x24   :  { %v2293_v51 = vld [vmem:[%s4146_s2 + $0x1e0] sm:$0x30]  ;;  %v2304_v59 = vor.u32 %v2739_v54, %v2301_v55  ;;  %v2734_v63 = vld [vmem:[%s4146_s2 + $0x19c] sm:$0xf0]  ;;  %v2267_v4 = vld [vmem:[%s4146_s2 + $0x188] sm:$0xf] }
  0x25   :  { %458 = vmatpush.bf16.msrb.mxu2 %v2108_v52  ;;  %472 = vmatpush.bf16.msrb.mxu3 %v2112_v53  ;;  %v2299_v52 = vld [vmem:[%s4146_s2 + $0x1c8] sm:$0xf]  ;;  %v2296_v57 = vor.u32 %v2738_v50, %v2293_v51  ;;  %v826_v60 = vand.u32 %v2292_v56, %v2842_v5  ;;  %v2730_v1 = vld [vmem:[%s4146_s2 + $0x184] sm:$0xf]  ;;  %v2269_v8 = vld [vmem:[%s4146_s2 + $0x1a8] sm:$0xf0]  ;;  %v2260_v9 = vor.u32 %v2734_v63, %v2259_v62 }
  0x26   :  { %v2743_v53 = vld [vmem:[%s4146_s2 + $0x1e4] sm:$0x30]  ;;  %v2307_v13 = vld [vmem:[%s4146_s2 + $0x1d0] sm:$0xf]  ;;  %v2741_v19 = vld [vmem:[%s4146_s2 + $0x1dc] sm:$0xf] }
  0x27   :  { %v2300_v58 = vor.u32 %v2743_v53, %v2299_v52  ;;  %v829_v61 = vand.u32 %v2296_v57, %v2842_v5  ;;  %v2735_v6 = vld [vmem:[%s4146_s2 + $0x1a4] sm:$0xf0]  ;;  %v2744_v14 = vld [vmem:[%s4146_s2 + $0x1ec] sm:$0x30]  ;;  %v2317_v20 = vld [vmem:[%s4146_s2 + $0x1f8] sm:$0x30] }
  0x28   :  { %v2268_v11 = vor.u32 %v2735_v6, %v2267_v4  ;;  %v2308_v21 = vor.u32 %v2744_v14, %v2307_v13  ;;  %v2320_v24 = vor.u32 %v2741_v19, %v2317_v20  ;;  %v2275_v27 = vld [vmem:[%s4146_s2 + $0x190] sm:$0xf]  ;;  %v2732_v30 = vld [vmem:[%s4146_s2 + $0x194] sm:$0xf]  ;;  %v2283_v33 = vld [vmem:[%s4146_s2 + $0x198] sm:$0xf] }
  0x29   :  { %v832_v0 = vand.u32 %v2300_v58, %v2842_v5  ;;  %v2736_v28 = vld [vmem:[%s4146_s2 + $0x1ac] sm:$0xf0]  ;;  %v2737_v34 = vld [vmem:[%s4146_s2 + $0x1b4] sm:$0xf0]  ;;  %v2285_v36 = vld [vmem:[%s4146_s2 + $0x1b8] sm:$0xf0] }
  0x2a   :  { %v838_v25 = vand.u32 %v2308_v21, %v2842_v5  ;;  %v2276_v37 = vor.u32 %v2736_v28, %v2275_v27  ;;  %v2284_v40 = vor.u32 %v2737_v34, %v2283_v33  ;;  %v2379_v42 = vld [vmem:[%s4146_s2 + $0x240] sm:$0xf]  ;;  %v2755_v48 = vld [vmem:[%s4146_s2 + $0x24c] sm:$0xf]  ;;  %v2355_v62 = vld [vmem:[%s4146_s2 + $0x208] sm:$0xf] }
  0x2b   :  { %v2758_v43 = vld [vmem:[%s4146_s2 + $0x25c] sm:$0x30]  ;;  %v2389_v49 = vld [vmem:[%s4146_s2 + $0x268] sm:$0x30]  ;;  %v2751_v63 = vld [vmem:[%s4146_s2 + $0x224] sm:$0xf0] }
  0x2c   :  { %v2380_v50 = vor.u32 %v2758_v43, %v2379_v42  ;;  %v2392_v53 = vor.u32 %v2755_v48, %v2389_v49  ;;  %v2347_v56 = vld [vmem:[%s4146_s2 + $0x200] sm:$0xf]  ;;  %v2356_v4 = vor.u32 %v2751_v63, %v2355_v62  ;;  %v2757_v13 = vld [vmem:[%s4146_s2 + $0x25c] sm:$0xf]  ;;  %v2363_v21 = vld [vmem:[%s4146_s2 + $0x210] sm:$0xf] }
  0x2d   :  { %v2750_v57 = vld [vmem:[%s4146_s2 + $0x21c] sm:$0xf0]  ;;  %v2405_v14 = vld [vmem:[%s4146_s2 + $0x278] sm:$0x30]  ;;  %v2371_v27 = vld [vmem:[%s4146_s2 + $0x218] sm:$0xf] }
  0x2e   :  { %2145 = vmatmul.msk.bf16.vlgmr.msra.gmra.mxu0 %vm110_vm2, %v2911_v38  ;;  %2146 = vmatmul.msk.bf16.vlgmr.msra.gmra.mxu1 %vm110_vm2, %v2911_v38  ;;  %v1067_v54 = vand.u32 %v2380_v50, %v2842_v5  ;;  %v2753_v28 = vld [vmem:[%s4146_s2 + $0x234] sm:$0xf0]  ;;  %v2771_v42 = vld [vmem:[%s4146_s2 + $0x2cc] sm:$0xf] }
  0x2f   :  { %614 = vmatpush.bf16.msra.mxu0 %v585_v2  ;;  %628 = vmatpush.bf16.msra.mxu1 %v588_v3  ;;  %v2261_v2 = vld [vmem:[%s4146_s2 + $0x1a0] sm:$0xf0]  ;;  %v835_v3 = vand.u32 %v2304_v59, %v2842_v5  ;;  %v2372_v33 = vor.u32 %v2753_v28, %v2371_v27  ;;  %v2477_v43 = vld [vmem:[%s4146_s2 + $0x2e8] sm:$0x30]  ;;  %v2764_v28 = vld [vmem:[%s4146_s2 + $0x294] sm:$0xf] }
  0x30   :  { %2147 = vmatmul.msk.bf16.vlgmr.msra.gmra.mxu2 %vm110_vm2, %v2911_v38  ;;  %2148 = vmatmul.msk.bf16.vlgmr.msra.gmra.mxu3 %vm110_vm2, %v2911_v38  ;;  %v2746_v59 = vld [vmem:[%s4146_s2 + $0x204] sm:$0xf] }
  0x31   :  { %642 = vmatpush.bf16.msra.mxu2 %v591_v7  ;;  %656 = vmatpush.bf16.msra.mxu3 %v594_v10  ;;  %v2731_v7 = vld [vmem:[%s4146_s2 + $0x18c] sm:$0xf]  ;;  %v2264_v10 = vor.u32 %v2730_v1, %v2261_v2  ;;  %v2348_v2 = vor.u32 %v2750_v57, %v2347_v56  ;;  %v2437_v56 = vld [vmem:[%s4146_s2 + $0x2a0] sm:$0xf0] }
  0x32   :  { %v2272_v12 = vor.u32 %v2731_v7, %v2269_v8  ;;  %v2357_v1 = vld [vmem:[%s4146_s2 + $0x228] sm:$0xf0]  ;;  %v2395_v7 = vld [vmem:[%s4146_s2 + $0x250] sm:$0xf] }
  0x33   :  { %615 = vmatpush.bf16.msra.mxu0 %v2172_v15  ;;  %629 = vmatpush.bf16.msra.mxu1 %v2176_v16  ;;  %v2740_v15 = vld [vmem:[%s4146_s2 + $0x1d4] sm:$0xf]  ;;  %v2760_v8 = vld [vmem:[%s4146_s2 + $0x26c] sm:$0x30] }
  0x34   :  { %v2309_v16 = vld [vmem:[%s4146_s2 + $0x1f0] sm:$0x30] }
  0x35   :  { %643 = vmatpush.bf16.msra.mxu2 %v2180_v17  ;;  %657 = vmatpush.bf16.msra.mxu3 %v2184_v18  ;;  %v2315_v17 = vld [vmem:[%s4146_s2 + $0x1d8] sm:$0xf]  ;;  %v2312_v22 = vor.u32 %v2740_v15, %v2309_v16  ;;  %v2396_v15 = vor.u32 %v2760_v8, %v2395_v7  ;;  %v2483_v7 = vld [vmem:[%s4146_s2 + $0x2d0] sm:$0xf] }
  0x36   :  { %v2745_v18 = vld [vmem:[%s4146_s2 + $0x1f4] sm:$0x30]  ;;  %v2776_v8 = vld [vmem:[%s4146_s2 + $0x2ec] sm:$0x30] }
  0x37   :  { %v2316_v23 = vor.u32 %v2745_v18, %v2315_v17  ;;  %v841_v26 = vand.u32 %v2312_v22, %v2842_v5  ;;  %v2408_v18 = vor.u32 %v2757_v13, %v2405_v14  ;;  %v1079_v19 = vand.u32 %v2396_v15, %v2842_v5  ;;  %v2752_v22 = vld [vmem:[%s4146_s2 + $0x22c] sm:$0xf0]  ;;  %v2773_v13 = vld [vmem:[%s4146_s2 + $0x2dc] sm:$0xf] }
  0x38   :  { %v2493_v14 = vld [vmem:[%s4146_s2 + $0x2f8] sm:$0x30]  ;;  %v2484_v15 = vor.u32 %v2776_v8, %v2483_v7  ;;  %v2782_v7 = vld [vmem:[%s4146_s2 + $0x31c] sm:$0xf0] }
  0x39   :  { %v844_v29 = vand.u32 %v2316_v23, %v2842_v5 }
  0x3e   :  { %2149 = vmatmul.msk.bf16.vlgmr.msrb.gmra.mxu0 %vm110_vm2, %v2911_v38  ;;  %2150 = vmatmul.msk.bf16.vlgmr.msrb.gmra.mxu1 %vm110_vm2, %v2911_v38 }
  0x3f   :  { %670 = vmatpush.bf16.msrb.mxu0 %v597_v31  ;;  %684 = vmatpush.bf16.msrb.mxu1 %v600_v32  ;;  %v2277_v31 = vld [vmem:[%s4146_s2 + $0x1b0] sm:$0xf0]  ;;  %v847_v32 = vand.u32 %v2320_v24, %v2842_v5 }
  0x40   :  { %2151 = vmatmul.msk.bf16.vlgmr.msrb.gmra.mxu2 %vm110_vm2, %v2911_v38  ;;  %2152 = vmatmul.msk.bf16.vlgmr.msrb.gmra.mxu3 %vm110_vm2, %v2911_v38  ;;  %v2748_v24 = vld [vmem:[%s4146_s2 + $0x214] sm:$0xf] }
  0x41   :  { %698 = vmatpush.bf16.msrb.mxu2 %v603_v35  ;;  %712 = vmatpush.bf16.msrb.mxu3 %v606_v39  ;;  %v2733_v35 = vld [vmem:[%s4146_s2 + $0x19c] sm:$0xf]  ;;  %v2280_v39 = vor.u32 %v2732_v30, %v2277_v31  ;;  %v2364_v31 = vor.u32 %v2752_v22, %v2363_v21  ;;  %v1320_v21 = vand.u32 %v2484_v15, %v2842_v5  ;;  %v2779_v15 = vld [vmem:[%s4146_s2 + $0x30c] sm:$0xf] }
  0x42   :  { %v2288_v41 = vor.u32 %v2733_v35, %v2285_v36  ;;  %v2373_v30 = vld [vmem:[%s4146_s2 + $0x238] sm:$0xf0]  ;;  %v2467_v35 = vld [vmem:[%s4146_s2 + $0x2c0] sm:$0xf] }
  0x43   :  { %671 = vmatpush.bf16.msrb.mxu0 %v2188_v44  ;;  %685 = vmatpush.bf16.msrb.mxu1 %v2192_v45  ;;  %v2754_v44 = vld [vmem:[%s4146_s2 + $0x244] sm:$0xf]  ;;  %v2774_v36 = vld [vmem:[%s4146_s2 + $0x2dc] sm:$0x30] }
  0x44   :  { %v2381_v45 = vld [vmem:[%s4146_s2 + $0x260] sm:$0x30] }
  0x45   :  { %699 = vmatpush.bf16.msrb.mxu2 %v2196_v46  ;;  %713 = vmatpush.bf16.msrb.mxu3 %v2200_v47  ;;  %v2387_v46 = vld [vmem:[%s4146_s2 + $0x248] sm:$0xf]  ;;  %v2384_v51 = vor.u32 %v2754_v44, %v2381_v45  ;;  %v2468_v44 = vor.u32 %v2774_v36, %v2467_v35 }
  0x46   :  { %v2759_v47 = vld [vmem:[%s4146_s2 + $0x264] sm:$0x30] }
  0x47   :  { %v2388_v52 = vor.u32 %v2759_v47, %v2387_v46  ;;  %v1070_v55 = vand.u32 %v2384_v51, %v2842_v5  ;;  %v2480_v47 = vor.u32 %v2771_v42, %v2477_v43  ;;  %v1308_v49 = vand.u32 %v2468_v44, %v2842_v5  ;;  %v2555_v44 = vld [vmem:[%s4146_s2 + $0x340] sm:$0xf] }
  0x49   :  { %v1073_v58 = vand.u32 %v2388_v52, %v2842_v5  ;;  %v2435_v52 = vld [vmem:[%s4146_s2 + $0x280] sm:$0xf]  ;;  %v1317_v57 = vand.u32 %v2480_v47, %v2842_v5  ;;  %v2563_v47 = vld [vmem:[%s4146_s2 + $0x348] sm:$0xf] }
  0x4e   :  { %2233 = vmatmul.msk.bf16.vlgmr.msra.gmra.mxu0 %vm110_vm2, %v2911_v38  ;;  %2234 = vmatmul.msk.bf16.vlgmr.msra.gmra.mxu1 %vm110_vm2, %v2911_v38 }
  0x4f   :  { %855 = vmatpush.bf16.msra.mxu0 %v826_v60  ;;  %869 = vmatpush.bf16.msra.mxu1 %v829_v61  ;;  %v2349_v60 = vld [vmem:[%s4146_s2 + $0x220] sm:$0xf0]  ;;  %v1076_v61 = vand.u32 %v2392_v53, %v2842_v5  ;;  %v2766_v53 = vld [vmem:[%s4146_s2 + $0x29c] sm:$0xf0] }
  0x50   :  { %2235 = vmatmul.msk.bf16.vlgmr.msra.gmra.mxu2 %vm110_vm2, %v2911_v38  ;;  %2236 = vmatmul.msk.bf16.vlgmr.msra.gmra.mxu3 %vm110_vm2, %v2911_v38  ;;  %v2436_v62 = vor.u32 %v2766_v53, %v2435_v52  ;;  %v2787_v52 = vld [vmem:[%s4146_s2 + $0x34c] sm:$0xf] }
  0x51   :  { %883 = vmatpush.bf16.msra.mxu2 %v832_v0  ;;  %897 = vmatpush.bf16.msra.mxu3 %v835_v3  ;;  %v2747_v0 = vld [vmem:[%s4146_s2 + $0x20c] sm:$0xf]  ;;  %v2352_v3 = vor.u32 %v2746_v59, %v2349_v60  ;;  %v2767_v59 = vld [vmem:[%s4146_s2 + $0x2a4] sm:$0xf0] }
  0x52   :  { %v2360_v6 = vor.u32 %v2747_v0, %v2357_v1  ;;  %v2763_v60 = vld [vmem:[%s4146_s2 + $0x28c] sm:$0xf] }
  0x53   :  { %856 = vmatpush.bf16.msra.mxu0 %v2260_v9  ;;  %870 = vmatpush.bf16.msra.mxu1 %v2264_v10  ;;  %v2756_v9 = vld [vmem:[%s4146_s2 + $0x254] sm:$0xf]  ;;  %v2565_v53 = vld [vmem:[%s4146_s2 + $0x368] sm:$0x30] }
  0x54   :  { %v2397_v10 = vld [vmem:[%s4146_s2 + $0x270] sm:$0x30] }
  0x55   :  { %884 = vmatpush.bf16.msra.mxu2 %v2268_v11  ;;  %898 = vmatpush.bf16.msra.mxu3 %v2272_v12  ;;  %v2403_v11 = vld [vmem:[%s4146_s2 + $0x258] sm:$0xf]  ;;  %v2400_v16 = vor.u32 %v2756_v9, %v2397_v10  ;;  %v2772_v9 = vld [vmem:[%s4146_s2 + $0x2d4] sm:$0xf] }
  0x56   :  { %v2761_v12 = vld [vmem:[%s4146_s2 + $0x274] sm:$0x30] }
  0x57   :  { %v2404_v17 = vor.u32 %v2761_v12, %v2403_v11  ;;  %v1082_v20 = vand.u32 %v2400_v16, %v2842_v5  ;;  %v2491_v10 = vld [vmem:[%s4146_s2 + $0x2d8] sm:$0xf]  ;;  %v2485_v12 = vld [vmem:[%s4146_s2 + $0x2f0] sm:$0x30] }
  0x58   :  { %v2777_v11 = vld [vmem:[%s4146_s2 + $0x2f4] sm:$0x30]  ;;  %v2488_v16 = vor.u32 %v2772_v9, %v2485_v12 }
  0x59   :  { %v1085_v23 = vand.u32 %v2404_v17, %v2842_v5  ;;  %v2492_v17 = vor.u32 %v2777_v11, %v2491_v10  ;;  %v2778_v10 = vld [vmem:[%s4146_s2 + $0x304] sm:$0xf] }
  0x5a   :  { %v2525_v11 = vld [vmem:[%s4146_s2 + $0x320] sm:$0xf0] }
  0x5b   :  { %v1326_v27 = vand.u32 %v2492_v17, %v2842_v5 }
  0x5e   :  { %2237 = vmatmul.msk.bf16.vlgmr.msrb.gmra.mxu0 %vm110_vm2, %v2911_v38  ;;  %2238 = vmatmul.msk.bf16.vlgmr.msrb.gmra.mxu1 %vm110_vm2, %v2911_v38 }
  0x5f   :  { %911 = vmatpush.bf16.msrb.mxu0 %v838_v25  ;;  %925 = vmatpush.bf16.msrb.mxu1 %v841_v26  ;;  %v2365_v25 = vld [vmem:[%s4146_s2 + $0x230] sm:$0xf0]  ;;  %v1088_v26 = vand.u32 %v2408_v18, %v2842_v5  ;;  %v2496_v18 = vor.u32 %v2773_v13, %v2493_v14  ;;  %v2531_v13 = vld [vmem:[%s4146_s2 + $0x308] sm:$0xf] }
  0x60   :  { %2239 = vmatmul.msk.bf16.vlgmr.msrb.gmra.mxu2 %vm110_vm2, %v2911_v38  ;;  %2240 = vmatmul.msk.bf16.vlgmr.msrb.gmra.mxu3 %vm110_vm2, %v2911_v38  ;;  %v2783_v14 = vld [vmem:[%s4146_s2 + $0x324] sm:$0xf0] }
  0x61   :  { %939 = vmatpush.bf16.msrb.mxu2 %v844_v29  ;;  %953 = vmatpush.bf16.msrb.mxu3 %v847_v32  ;;  %v2749_v29 = vld [vmem:[%s4146_s2 + $0x21c] sm:$0xf]  ;;  %v2368_v32 = vor.u32 %v2748_v24, %v2365_v25  ;;  %v1323_v24 = vand.u32 %v2488_v16, %v2842_v5  ;;  %v2451_v25 = vld [vmem:[%s4146_s2 + $0x290] sm:$0xf]  ;;  %v2533_v16 = vld [vmem:[%s4146_s2 + $0x328] sm:$0xf0] }
  0x62   :  { %v2376_v34 = vor.u32 %v2749_v29, %v2373_v30  ;;  %v2453_v29 = vld [vmem:[%s4146_s2 + $0x2b0] sm:$0xf0]  ;;  %v1329_v30 = vand.u32 %v2496_v18, %v2842_v5  ;;  %v2528_v18 = vor.u32 %v2778_v10, %v2525_v11 }
  0x63   :  { %912 = vmatpush.bf16.msrb.mxu0 %v2276_v37  ;;  %926 = vmatpush.bf16.msrb.mxu1 %v2280_v39  ;;  %v2770_v37 = vld [vmem:[%s4146_s2 + $0x2c4] sm:$0xf]  ;;  %v2456_v36 = vor.u32 %v2764_v28, %v2453_v29  ;;  %v2780_v11 = vld [vmem:[%s4146_s2 + $0x314] sm:$0xf] }
  0x64   :  { %v2469_v39 = vld [vmem:[%s4146_s2 + $0x2e0] sm:$0x30] }
  0x65   :  { %940 = vmatpush.bf16.msrb.mxu2 %v2284_v40  ;;  %954 = vmatpush.bf16.msrb.mxu3 %v2288_v41  ;;  %v2475_v40 = vld [vmem:[%s4146_s2 + $0x2c8] sm:$0xf]  ;;  %v2472_v45 = vor.u32 %v2770_v37, %v2469_v39 }
  0x66   :  { %v2775_v41 = vld [vmem:[%s4146_s2 + $0x2e4] sm:$0x30] }
  0x67   :  { %v2476_v46 = vor.u32 %v2775_v41, %v2475_v40  ;;  %v1311_v51 = vand.u32 %v2472_v45, %v2842_v5  ;;  %v2790_v45 = vld [vmem:[%s4146_s2 + $0x35c] sm:$0x30] }
  0x6e   :  { %2321 = vmatmul.msk.bf16.vlgmr.msra.gmra.mxu0 %vm110_vm2, %v2911_v38  ;;  %2322 = vmatmul.msk.bf16.vlgmr.msra.gmra.mxu1 %vm110_vm2, %v2911_v38 }
  0x6f   :  { %1096 = vmatpush.bf16.msra.mxu0 %v1067_v54  ;;  %1110 = vmatpush.bf16.msra.mxu1 %v1070_v55  ;;  %v1314_v54 = vand.u32 %v2476_v46, %v2842_v5  ;;  %v2762_v55 = vld [vmem:[%s4146_s2 + $0x284] sm:$0xf] }
  0x70   :  { %2323 = vmatmul.msk.bf16.vlgmr.msra.gmra.mxu2 %vm110_vm2, %v2911_v38  ;;  %2324 = vmatmul.msk.bf16.vlgmr.msra.gmra.mxu3 %vm110_vm2, %v2911_v38  ;;  %v2440_v63 = vor.u32 %v2762_v55, %v2437_v56  ;;  %v2786_v46 = vld [vmem:[%s4146_s2 + $0x344] sm:$0xf] }
  0x71   :  { %1124 = vmatpush.bf16.msra.mxu2 %v1073_v58  ;;  %1138 = vmatpush.bf16.msra.mxu3 %v1076_v61  ;;  %v2443_v58 = vld [vmem:[%s4146_s2 + $0x288] sm:$0xf]  ;;  %v2445_v61 = vld [vmem:[%s4146_s2 + $0x2a8] sm:$0xf0] }
  0x72   :  { %v2444_v0 = vor.u32 %v2767_v59, %v2443_v58  ;;  %v2448_v1 = vor.u32 %v2763_v60, %v2445_v61 }
  0x73   :  { %1097 = vmatpush.bf16.msra.mxu0 %v2348_v2  ;;  %1111 = vmatpush.bf16.msra.mxu1 %v2352_v3 }
  0x75   :  { %1125 = vmatpush.bf16.msra.mxu2 %v2356_v4  ;;  %1139 = vmatpush.bf16.msra.mxu3 %v2360_v6 }
  0x7e   :  { %2325 = vmatmul.msk.bf16.vlgmr.msrb.gmra.mxu0 %vm110_vm2, %v2911_v38  ;;  %2326 = vmatmul.msk.bf16.vlgmr.msrb.gmra.mxu1 %vm110_vm2, %v2911_v38 }
  0x7f   :  { %1152 = vmatpush.bf16.msrb.mxu0 %v1079_v19  ;;  %1166 = vmatpush.bf16.msrb.mxu1 %v1082_v20 }
  0x80   :  { %2327 = vmatmul.msk.bf16.vlgmr.msrb.gmra.mxu2 %vm110_vm2, %v2911_v38  ;;  %2328 = vmatmul.msk.bf16.vlgmr.msrb.gmra.mxu3 %vm110_vm2, %v2911_v38 }
  0x81   :  { %1180 = vmatpush.bf16.msrb.mxu2 %v1085_v23  ;;  %1194 = vmatpush.bf16.msrb.mxu3 %v1088_v26  ;;  %v2768_v26 = vld [vmem:[%s4146_s2 + $0x2ac] sm:$0xf0] }
  0x82   :  { %v2452_v35 = vor.u32 %v2768_v26, %v2451_v25 }
  0x83   :  { %1153 = vmatpush.bf16.msrb.mxu0 %v2364_v31  ;;  %1167 = vmatpush.bf16.msrb.mxu1 %v2368_v32  ;;  %v2459_v31 = vld [vmem:[%s4146_s2 + $0x298] sm:$0xf] }
  0x84   :  { %v2769_v32 = vld [vmem:[%s4146_s2 + $0x2b4] sm:$0xf0] }
  0x85   :  { %1181 = vmatpush.bf16.msrb.mxu2 %v2372_v33  ;;  %1195 = vmatpush.bf16.msrb.mxu3 %v2376_v34  ;;  %v2765_v33 = vld [vmem:[%s4146_s2 + $0x29c] sm:$0xf]  ;;  %v2460_v37 = vor.u32 %v2769_v32, %v2459_v31  ;;  %v2571_v32 = vld [vmem:[%s4146_s2 + $0x350] sm:$0xf] }
  0x86   :  { %v2461_v34 = vld [vmem:[%s4146_s2 + $0x2b8] sm:$0xf0] }
  0x87   :  { %v2464_v39 = vor.u32 %v2765_v33, %v2461_v34  ;;  %v2792_v33 = vld [vmem:[%s4146_s2 + $0x36c] sm:$0x30]  ;;  %v2788_v34 = vld [vmem:[%s4146_s2 + $0x354] sm:$0xf] }
  0x8b   :  { %v3451_v48 = vpop.f32.mrf.mxu0  ;;  %v3454_v50 = vpop.f32.mrf.mxu1 }
  0x8e   :  { %2409 = vmatmul.msk.bf16.vlgmr.msra.gmra.mxu0 %vm110_vm2, %v2911_v38  ;;  %2410 = vmatmul.msk.bf16.vlgmr.msra.gmra.mxu1 %vm110_vm2, %v2911_v38 }
  0x8f   :  { %1337 = vmatpush.bf16.msra.mxu0 %v1308_v49  ;;  %1351 = vmatpush.bf16.msra.mxu1 %v1311_v51  ;;  %v2791_v49 = vld [vmem:[%s4146_s2 + $0x364] sm:$0x30]  ;;  %v2557_v51 = vld [vmem:[%s4146_s2 + $0x360] sm:$0x30] }
  0x90   :  { %2411 = vmatmul.msk.bf16.vlgmr.msra.gmra.mxu2 %vm110_vm2, %v2911_v38  ;;  %2412 = vmatmul.msk.bf16.vlgmr.msra.gmra.mxu3 %vm110_vm2, %v2911_v38  ;;  %v2560_v55 = vor.u32 %v2786_v46, %v2557_v51  ;;  %v2564_v56 = vor.u32 %v2791_v49, %v2563_v47 }
  0x91   :  { %1365 = vmatpush.bf16.msra.mxu2 %v1314_v54  ;;  %1379 = vmatpush.bf16.msra.mxu3 %v1317_v57  ;;  %v2556_v54 = vor.u32 %v2790_v45, %v2555_v44  ;;  %v2568_v57 = vor.u32 %v2787_v52, %v2565_v53  ;;  %v2581_v44 = vld [vmem:[%s4146_s2 + $0x378] sm:$0x30]  ;;  %v2572_v45 = vor.u32 %v2792_v33, %v2571_v32 }
  0x92   :  { %v1555_v9 = vand.u32 %v2564_v56, %v2842_v5 }
  0x93   :  { %v3491_v2 = vpop.f32.mrf.mxu2  ;;  %v3493_v3 = vpop.f32.mrf.mxu0  ;;  %1338 = vmatpush.bf16.msra.mxu0 %v2436_v62  ;;  %1352 = vmatpush.bf16.msra.mxu1 %v2440_v63  ;;  %v1549_v60 = vand.u32 %v2556_v54, %v2842_v5  ;;  %v1558_v12 = vand.u32 %v2568_v57, %v2842_v5  ;;  %v1561_v53 = vand.u32 %v2572_v45, %v2842_v5 }
  0x94   :  { %v3495_v4 = vpop.f32.mrf.mxu3  ;;  %v3497_v6 = vpop.f32.mrf.mxu1 }
  0x95   :  { %1366 = vmatpush.bf16.msra.mxu2 %v2444_v0  ;;  %1380 = vmatpush.bf16.msra.mxu3 %v2448_v1  ;;  %v1552_v0 = vand.u32 %v2560_v55, %v2842_v5  ;;  %v2523_v1 = vld [vmem:[%s4146_s2 + $0x300] sm:$0xf] }
  0x96   :  { %v2524_v17 = vor.u32 %v2782_v7, %v2523_v1  ;;  %v2784_v1 = vld [vmem:[%s4146_s2 + $0x32c] sm:$0xf0] }
  0x9b   :  { %v3523_v19 = vpop.f32.mrf.mxu2  ;;  %v3525_v20 = vpop.f32.mrf.mxu0 }
  0x9c   :  { %v3528_v22 = vpop.f32.mrf.mxu3  ;;  %v3530_v23 = vpop.f32.mrf.mxu1 }
  0x9e   :  { %2413 = vmatmul.msk.bf16.vlgmr.msrb.gmra.mxu0 %vm110_vm2, %v2911_v38  ;;  %2414 = vmatmul.msk.bf16.vlgmr.msrb.gmra.mxu1 %vm110_vm2, %v2911_v38 }
  0x9f   :  { %1393 = vmatpush.bf16.msrb.mxu0 %v1320_v21  ;;  %1407 = vmatpush.bf16.msrb.mxu1 %v1323_v24  ;;  %v2532_v21 = vor.u32 %v2783_v14, %v2531_v13  ;;  %v2536_v24 = vor.u32 %v2779_v15, %v2533_v16  ;;  %v3721_v13 = vld [vmem:[%s4147_s0] sm:$0xff]  ;;  %v2547_v15 = vld [vmem:[%s4146_s2 + $0x318] sm:$0xf] }
  0xa0   :  { %2415 = vmatmul.msk.bf16.vlgmr.msrb.gmra.mxu2 %vm110_vm2, %v2911_v38  ;;  %2416 = vmatmul.msk.bf16.vlgmr.msrb.gmra.mxu3 %vm110_vm2, %v2911_v38  ;;  %v2785_v16 = vld [vmem:[%s4146_s2 + $0x334] sm:$0xf0] }
  0xa1   :  { %1421 = vmatpush.bf16.msrb.mxu2 %v1326_v27  ;;  %1435 = vmatpush.bf16.msrb.mxu3 %v1329_v30  ;;  %v2548_v32 = vor.u32 %v2785_v16, %v2547_v15 }
  0xa3   :  { %v3567_v40 = vpop.f32.mrf.mxu2  ;;  %v3569_v41 = vpop.f32.mrf.mxu0  ;;  %1394 = vmatpush.bf16.msrb.mxu0 %v2452_v35  ;;  %1408 = vmatpush.bf16.msrb.mxu1 %v2456_v36  ;;  %v2579_v35 = vld [vmem:[%s4146_s2 + $0x358] sm:$0xf] }
  0xa4   :  { %v3571_v42 = vpop.f32.mrf.mxu3  ;;  %v3573_v43 = vpop.f32.mrf.mxu1  ;;  %v2793_v36 = vld [vmem:[%s4146_s2 + $0x374] sm:$0x30] }
  0xa5   :  { %1422 = vmatpush.bf16.msrb.mxu2 %v2460_v37  ;;  %1436 = vmatpush.bf16.msrb.mxu3 %v2464_v39  ;;  %v2573_v37 = vld [vmem:[%s4146_s2 + $0x370] sm:$0x30]  ;;  %v2789_v39 = vld [vmem:[%s4146_s2 + $0x35c] sm:$0xf]  ;;  %v2580_v47 = vor.u32 %v2793_v36, %v2579_v35 }
  0xa6   :  { %v2576_v46 = vor.u32 %v2788_v34, %v2573_v37  ;;  %v2584_v49 = vor.u32 %v2789_v39, %v2581_v44 }
  0xa7   :  { %v1567_v10 = vand.u32 %v2580_v47, %v2842_v5  ;;  %v2643_v47 = vld [vmem:[%s4146_s2 + $0x3c0] sm:$0xf] }
  0xa8   :  { %v1570_v14 = vand.u32 %v2584_v49, %v2842_v5  ;;  %v2806_v49 = vld [vmem:[%s4146_s2 + $0x3dc] sm:$0x30] }
  0xab   :  { %v3599_v58 = vpop.f32.mrf.mxu2  ;;  %v3601_v59 = vpop.f32.mrf.mxu0 }
  0xac   :  { %v3604_v61 = vpop.f32.mrf.mxu3  ;;  %v479_v62 = vmax.f32 %v3451_v48, %v3601_v59  ;;  %v3608_v63 = vpop.f32.mrf.mxu1 }
  0xad   :  { %v480_v8 = vmax.f32 %v3454_v50, %v3608_v63  ;;  %v2619_v50 = vld [vmem:[%s4146_s2 + $0x388] sm:$0xf] }
  0xae   :  { %2497 = vmatmul.msk.bf16.vlgmr.msra.gmra.mxu0 %vm110_vm2, %v2911_v38  ;;  %2498 = vmatmul.msk.bf16.vlgmr.msra.gmra.mxu1 %vm110_vm2, %v2911_v38  ;;  %v2799_v63 = vld [vmem:[%s4146_s2 + $0x3a4] sm:$0xf0] }
  0xaf   :  { %1578 = vmatpush.bf16.msra.mxu0 %v1549_v60  ;;  %1592 = vmatpush.bf16.msra.mxu1 %v1552_v0  ;;  %v1564_v60 = vand.u32 %v2576_v46, %v2842_v5  ;;  %v2539_v0 = vld [vmem:[%s4146_s2 + $0x310] sm:$0xf] }
  0xb0   :  { %2499 = vmatmul.msk.bf16.vlgmr.msra.gmra.mxu2 %vm110_vm2, %v2911_v38  ;;  %2500 = vmatmul.msk.bf16.vlgmr.msra.gmra.mxu3 %vm110_vm2, %v2911_v38 }
  0xb1   :  { %1606 = vmatpush.bf16.msra.mxu2 %v1555_v9  ;;  %1620 = vmatpush.bf16.msra.mxu3 %v1558_v12  ;;  %v2541_v12 = vld [vmem:[%s4146_s2 + $0x330] sm:$0xf0] }
  0xb3   :  { %v3647_v25 = vpop.f32.mrf.mxu2  ;;  %v3649_v26 = vpop.f32.mrf.mxu0  ;;  %1579 = vmatpush.bf16.msra.mxu0 %v2524_v17  ;;  %1593 = vmatpush.bf16.msra.mxu1 %v2528_v18  ;;  %v2781_v17 = vld [vmem:[%s4146_s2 + $0x31c] sm:$0xf] }
  0xb4   :  { %v481_v27 = vmax.f32 %v3491_v2, %v3647_v25  ;;  %v3653_v28 = vpop.f32.mrf.mxu3  ;;  %v487_v29 = vmax.f32 %v3493_v3, %v3649_v26  ;;  %v3657_v30 = vpop.f32.mrf.mxu1  ;;  %v2549_v18 = vld [vmem:[%s4146_s2 + $0x338] sm:$0xf0]  ;;  %v2659_v2 = vld [vmem:[%s4146_s2 + $0x3d0] sm:$0xf]  ;;  %v2809_v25 = vld [vmem:[%s4146_s2 + $0x3f4] sm:$0x30] }
  0xb5   :  { %v482_v38 = vmax.f32 %v3495_v4, %v3653_v28  ;;  %v488_v31 = vmax.f32 %v3497_v6, %v3657_v30  ;;  %1607 = vmatpush.bf16.msra.mxu2 %v2532_v21  ;;  %1621 = vmatpush.bf16.msra.mxu3 %v2536_v24  ;;  %v2540_v21 = vor.u32 %v2784_v1, %v2539_v0  ;;  %v2807_v0 = vld [vmem:[%s4146_s2 + $0x3e4] sm:$0x30]  ;;  %v2645_v1 = vld [vmem:[%s4146_s2 + $0x3e0] sm:$0x30]  ;;  %v2808_v3 = vld [vmem:[%s4146_s2 + $0x3ec] sm:$0x30] }
  0xb6   :  { %v2544_v24 = vor.u32 %v2780_v11, %v2541_v12  ;;  %v2552_v33 = vor.u32 %v2781_v17, %v2549_v18  ;;  %v2653_v11 = vld [vmem:[%s4146_s2 + $0x3e8] sm:$0x30]  ;;  %v2644_v12 = vor.u32 %v2806_v49, %v2643_v47  ;;  %v2611_v49 = vld [vmem:[%s4146_s2 + $0x380] sm:$0xf]  ;;  %v2804_v4 = vld [vmem:[%s4146_s2 + $0x3d4] sm:$0xf] }
  0xb7   :  { %v2667_v6 = vld [vmem:[%s4146_s2 + $0x3d8] sm:$0xf]  ;;  %v2661_v26 = vld [vmem:[%s4146_s2 + $0x3f0] sm:$0x30]  ;;  %v2669_v28 = vld [vmem:[%s4146_s2 + $0x3f8] sm:$0x30] }
  0xb8   :  { %v2664_v30 = vor.u32 %v2804_v4, %v2661_v26 }
  0xbb   :  { %v3687_v51 = vpop.f32.mrf.mxu2  ;;  %v3689_v52 = vpop.f32.mrf.mxu0 }
  0xbc   :  { %v489_v54 = vmax.f32 %v3523_v19, %v3687_v51  ;;  %v3694_v55 = vpop.f32.mrf.mxu3  ;;  %v483_v56 = vmax.f32 %v3525_v20, %v3689_v52  ;;  %v3698_v57 = vpop.f32.mrf.mxu1  ;;  %v2815_v52 = vmov 0  }
  0xbd   :  { %v490_v7 = vmax.f32 %v3528_v22, %v3694_v55  ;;  %v484_v9 = vmax.f32 %v3530_v23, %v3698_v57  ;;  %2812 = vset.pattern.permute.xlu0 %v2815_v52  ;;  %v2629_v22 = vld [vmem:[%s4146_s2 + $0x3b0] sm:$0xf0]  ;;  %v2635_v55 = vld [vmem:[%s4146_s2 + $0x398] sm:$0xf] }
  0xbe   :  { %2501 = vmatmul.msk.bf16.vlgmr.msrb.gmra.mxu0 %vm110_vm2, %v3721_v13  ;;  %2502 = vmatmul.msk.bf16.vlgmr.msrb.gmra.mxu1 %vm110_vm2, %v3721_v13  ;;  %v2801_v57 = vld [vmem:[%s4146_s2 + $0x3b4] sm:$0xf0] }
  0xbf   :  { %1634 = vmatpush.bf16.msrb.mxu0 %v1561_v53  ;;  %1648 = vmatpush.bf16.msrb.mxu1 %v1564_v60  ;;  %v2802_v53 = vld [vmem:[%s4146_s2 + $0x3c4] sm:$0xf]  ;;  %v2651_v60 = vld [vmem:[%s4146_s2 + $0x3c8] sm:$0xf] }
  0xc0   :  { %2503 = vmatmul.msk.bf16.vlgmr.msrb.gmra.mxu2 %vm110_vm2, %v3721_v13  ;;  %2504 = vmatmul.msk.bf16.vlgmr.msrb.gmra.mxu3 %vm110_vm2, %v3721_v13  ;;  %v2652_v15 = vor.u32 %v2807_v0, %v2651_v60  ;;  %v2613_v0 = vld [vmem:[%s4146_s2 + $0x3a0] sm:$0xf0] }
  0xc1   :  { %1662 = vmatpush.bf16.msrb.mxu2 %v1567_v10  ;;  %1676 = vmatpush.bf16.msrb.mxu3 %v1570_v14  ;;  %v2803_v10 = vld [vmem:[%s4146_s2 + $0x3cc] sm:$0xf]  ;;  %v2648_v14 = vor.u32 %v2802_v53, %v2645_v1  ;;  %v2798_v53 = vld [vmem:[%s4146_s2 + $0x39c] sm:$0xf0] }
  0xc2   :  { %v2656_v16 = vor.u32 %v2803_v10, %v2653_v11  ;;  %v1796_v59 = vand.u32 %v2652_v15, %v2842_v5  ;;  %v2612_v10 = vor.u32 %v2798_v53, %v2611_v49 }
  0xc3   :  { %v3744_v34 = vpop.f32.mrf.mxu2  ;;  %v3746_v35 = vpop.f32.mrf.mxu0  ;;  %1635 = vmatpush.bf16.msrb.mxu0 %v2540_v21  ;;  %1649 = vmatpush.bf16.msrb.mxu1 %v2544_v24  ;;  %v1790_v21 = vand.u32 %v2644_v12, %v2842_v5  ;;  %v1793_v47 = vand.u32 %v2648_v14, %v2842_v5  ;;  %v2620_v12 = vor.u32 %v2799_v63, %v2619_v50 }
  0xc4   :  { %v485_v36 = vmax.f32 %v3567_v40, %v3744_v34  ;;  %v3750_v37 = vpop.f32.mrf.mxu3  ;;  %v491_v39 = vmax.f32 %v3569_v41, %v3746_v35  ;;  %v3754_v44 = vpop.f32.mrf.mxu1  ;;  %v1799_v1 = vand.u32 %v2656_v16, %v2842_v5  ;;  %v1942_v40 = vld [vmem:[%s4148_s1 + $0x8] sm:$0xff] }
  0xc5   :  { %v486_v45 = vmax.f32 %v3571_v42, %v3750_v37  ;;  %1663 = vmatpush.bf16.msrb.mxu2 %v2548_v32  ;;  %1677 = vmatpush.bf16.msrb.mxu3 %v2552_v33  ;;  %v4150_v26 = vmax.f32 %v3573_v43, %v3754_v44 }
  0xcb   :  { %v3784_v17 = vpop.f32.mrf.mxu2  ;;  %v617_v18 = vpop.f32.mrf.mxu0 }
  0xcc   :  { %v493_v24 = vmax.f32 %v3599_v58, %v3784_v17  ;;  %v3789_v32 = vpop.f32.mrf.mxu3  ;;  %v3794_v33 = vmax.f32 %v479_v62, %v617_v18  ;;  %v631_v46 = vpop.f32.mrf.mxu1  ;;  %v2794_v62 = vld [vmem:[%s4146_s2 + $0x384] sm:$0xf] }
  0xcd   :  { %v494_v60 = vmax.f32 %v3604_v61, %v3789_v32  ;;  %v3808_v48 = vmax.f32 %v480_v8, %v631_v46  ;;  %v2795_v8 = vld [vmem:[%s4146_s2 + $0x38c] sm:$0xf]  ;;  %v2616_v11 = vor.u32 %v2794_v62, %v2613_v0 }
  0xce   :  { %2585 = vmatmul.msk.bf16.vlgmr.msra.gmra.mxu0 %vm110_vm2, %v3721_v13  ;;  %2586 = vmatmul.msk.bf16.vlgmr.msra.gmra.mxu1 %vm110_vm2, %v3721_v13  ;;  %v2621_v46 = vld [vmem:[%s4146_s2 + $0x3a8] sm:$0xf0] }
  0xcf   :  { %1819 = vmatpush.bf16.msra.mxu0 %v1790_v21  ;;  %1833 = vmatpush.bf16.msra.mxu1 %v1793_v47  ;;  %v2624_v14 = vor.u32 %v2795_v8, %v2621_v46 }
  0xd0   :  { %2587 = vmatmul.msk.bf16.vlgmr.msra.gmra.mxu2 %vm110_vm2, %v3721_v13  ;;  %2588 = vmatmul.msk.bf16.vlgmr.msra.gmra.mxu3 %vm110_vm2, %v3721_v13 }
  0xd1   :  { %1847 = vmatpush.bf16.msra.mxu2 %v1796_v59  ;;  %1861 = vmatpush.bf16.msra.mxu3 %v1799_v1 }
  0xd3   :  { %v645_v15 = vpop.f32.mrf.mxu2  ;;  %v619_v16 = vpop.f32.mrf.mxu0  ;;  %1820 = vmatpush.bf16.msra.mxu0 %v2612_v10  ;;  %1834 = vmatpush.bf16.msra.mxu1 %v2616_v11  ;;  %v1805_v10 = vand.u32 %v2664_v30, %v2842_v5  ;;  %v2627_v11 = vld [vmem:[%s4146_s2 + $0x390] sm:$0xf] }
  0xd4   :  { %v3841_v18 = vmax.f32 %v481_v27, %v645_v15  ;;  %v659_v21 = vpop.f32.mrf.mxu3  ;;  %v3846_v47 = vmax.f32 %v487_v29, %v619_v16  ;;  %v633_v49 = vpop.f32.mrf.mxu1  ;;  %v2805_v27 = vld [vmem:[%s4146_s2 + $0x3dc] sm:$0xf]  ;;  %v2660_v29 = vor.u32 %v2808_v3, %v2659_v2  ;;  %v2636_v15 = vor.u32 %v2801_v57, %v2635_v55 }
  0xd5   :  { %v3851_v53 = vmax.f32 %v482_v38, %v659_v21  ;;  %v3856_v59 = vmax.f32 %v488_v31, %v633_v49  ;;  %1848 = vmatpush.bf16.msra.mxu2 %v2620_v12  ;;  %1862 = vmatpush.bf16.msra.mxu3 %v2624_v14  ;;  %v2668_v38 = vor.u32 %v2809_v25, %v2667_v6  ;;  %v2800_v12 = vld [vmem:[%s4146_s2 + $0x3ac] sm:$0xf0] }
  0xd6   :  { %v2672_v31 = vor.u32 %v2805_v27, %v2669_v28  ;;  %v1802_v1 = vand.u32 %v2660_v29, %v2842_v5 }
  0xd7   :  { %v1808_v51 = vand.u32 %v2668_v38, %v2842_v5 }
  0xd8   :  { %v1811_v23 = vand.u32 %v2672_v31, %v2842_v5  ;;  %v2637_v5 = vld [vmem:[%s4146_s2 + $0x3b8] sm:$0xf0] }
  0xdb   :  { %v647_v62 = vpop.f32.mrf.mxu2  ;;  %v673_v0 = vpop.f32.mrf.mxu0 }
  0xdc   :  { %v3886_v50 = vmax.f32 %v489_v54, %v647_v62  ;;  %v661_v63 = vpop.f32.mrf.mxu3  ;;  %v3891_v8 = vmax.f32 %v483_v56, %v673_v0  ;;  %v687_v46 = vpop.f32.mrf.mxu1  ;;  %v1941_v54 = vld [vmem:[%s4148_s1] sm:$0xff]  ;;  %v2796_v56 = vld [vmem:[%s4146_s2 + $0x394] sm:$0xf] }
  0xdd   :  { %v3903_v19 = vmax.f32 %v490_v7, %v661_v63  ;;  %v3908_v20 = vmax.f32 %v484_v9, %v687_v46  ;;  %1945 = vperm.xlu0 %2812, %v1941_v54   ;;  %v2797_v7 = vld [vmem:[%s4146_s2 + $0x39c] sm:$0xf]  ;;  %v2628_v9 = vor.u32 %v2800_v12, %v2627_v11  ;;  %v2632_v14 = vor.u32 %v2796_v56, %v2629_v22 }
  0xde   :  { %2589 = vmatmul.msk.bf16.vlgmr.msrb.gmra.mxu0 %vm110_vm2, %v3721_v13  ;;  %2590 = vmatmul.msk.bf16.vlgmr.msrb.gmra.mxu1 %vm110_vm2, %v3721_v13  ;;  %v2640_v16 = vor.u32 %v2797_v7, %v2637_v5 }
  0xdf   :  { %1875 = vmatpush.bf16.msrb.mxu0 %v1802_v1  ;;  %1889 = vmatpush.bf16.msrb.mxu1 %v1805_v10 }
  0xe0   :  { %2591 = vmatmul.msk.bf16.vlgmr.msrb.gmra.mxu2 %vm110_vm2, %v3721_v13  ;;  %2592 = vmatmul.msk.bf16.vlgmr.msrb.gmra.mxu3 %vm110_vm2, %v3721_v13 }
  0xe1   :  { %1903 = vmatpush.bf16.msrb.mxu2 %v1808_v51  ;;  %1917 = vmatpush.bf16.msrb.mxu3 %v1811_v23 }
  0xe3   :  { %v701_v21 = vpop.f32.mrf.mxu2  ;;  %v675_v49 = vpop.f32.mrf.mxu0  ;;  %1876 = vmatpush.bf16.msrb.mxu0 %v2628_v9  ;;  %1890 = vmatpush.bf16.msrb.mxu1 %v2632_v14 }
  0xe4   :  { %v3944_v2 = vmax.f32 %v485_v36, %v701_v21  ;;  %v715_v3 = vpop.f32.mrf.mxu3  ;;  %v3949_v4 = vmax.f32 %v491_v39, %v675_v49  ;;  %v689_v6 = vpop.f32.mrf.mxu1 }
  0xe5   :  { %v3954_v25 = vmax.f32 %v486_v45, %v715_v3  ;;  %v3959_v27 = vmax.f32 %v4150_v26, %v689_v6  ;;  %1904 = vmatpush.bf16.msrb.mxu2 %v2636_v15  ;;  %1918 = vmatpush.bf16.msrb.mxu3 %v2640_v16 }
  0xe6   :  { %1950 = vperm.xlu0 %2812, %v1942_v40  }
  0xeb   :  { %v703_v41 = vpop.f32.mrf.mxu2  ;;  %v858_v34 = vpop.f32.mrf.mxu0 }
  0xec   :  { %v3967_v42 = vmax.f32 %v493_v24, %v703_v41  ;;  %v717_v35 = vpop.f32.mrf.mxu3  ;;  %v961_v36 = vmax.f32 %v3794_v33, %v858_v34  ;;  %v872_v43 = vpop.f32.mrf.mxu1 }
  0xed   :  { %v3973_v37 = vmax.f32 %v494_v60, %v717_v35  ;;  %v962_v39 = vmax.f32 %v3808_v48, %v872_v43 }
  0xee   :  { %2673 = vmatmul.msk.bf16.vlgmr.msra.gmra.mxu0 %vm110_vm2, %v3721_v13  ;;  %2674 = vmatmul.msk.bf16.vlgmr.msra.gmra.mxu1 %vm110_vm2, %v3721_v13 }
  0xf0   :  { %2675 = vmatmul.msk.bf16.vlgmr.msra.gmra.mxu2 %vm110_vm2, %v3721_v13  ;;  %2676 = vmatmul.msk.bf16.vlgmr.msra.gmra.mxu3 %vm110_vm2, %v3721_v13 }
  0xf3   :  { %v886_v58 = vpop.f32.mrf.mxu2  ;;  %v860_v44 = vpop.f32.mrf.mxu0 }
  0xf4   :  { %v963_v61 = vmax.f32 %v3841_v18, %v886_v58  ;;  %v900_v45 = vpop.f32.mrf.mxu3  ;;  %v969_v17 = vmax.f32 %v3846_v47, %v860_v44  ;;  %v874_v24 = vpop.f32.mrf.mxu1 }
  0xf5   :  { %v964_v32 = vmax.f32 %v3851_v53, %v900_v45  ;;  %v970_v33 = vmax.f32 %v3856_v59, %v874_v24 }
  0xfb   :  { %v888_v60 = vpop.f32.mrf.mxu2  ;;  %v914_v48 = vpop.f32.mrf.mxu0 }
  0xfc   :  { %v971_v28 = vmax.f32 %v3886_v50, %v888_v60  ;;  %v902_v29 = vpop.f32.mrf.mxu3  ;;  %v965_v30 = vmax.f32 %v3891_v8, %v914_v48  ;;  %v928_v38 = vpop.f32.mrf.mxu1 }
  0xfd   :  { %v972_v31 = vmax.f32 %v3903_v19, %v902_v29  ;;  %v966_v18 = vmax.f32 %v3908_v20, %v928_v38 }
  0xfe   :  { %2677 = vmatmul.msk.bf16.vlgmr.msrb.gmra.mxu0 %vm110_vm2, %v3721_v13  ;;  %2678 = vmatmul.msk.bf16.vlgmr.msrb.gmra.mxu1 %vm110_vm2, %v3721_v13 }
 0x100   :  { %2679 = vmatmul.msk.bf16.vlgmr.msrb.gmra.mxu2 %vm110_vm2, %v3721_v13  ;;  %2680 = vmatmul.msk.bf16.vlgmr.msrb.gmra.mxu3 %vm110_vm2, %v3721_v13 }
 0x103   :  { %v942_v47 = vpop.f32.mrf.mxu2  ;;  %v916_v53 = vpop.f32.mrf.mxu0 }
 0x104   :  { %v967_v59 = vmax.f32 %v3944_v2, %v942_v47  ;;  %v956_v62 = vpop.f32.mrf.mxu3  ;;  %v973_v0 = vmax.f32 %v3949_v4, %v916_v53  ;;  %v930_v1 = vpop.f32.mrf.mxu1 }
 0x105   :  { %v968_v50 = vmax.f32 %v3954_v25, %v956_v62  ;;  %v974_v63 = vmax.f32 %v3959_v27, %v930_v1 }
 0x10b   :  { %v944_v8 = vpop.f32.mrf.mxu2  ;;  %v1099_v46 = vpop.f32.mrf.mxu0 }
 0x10c   :  { %v975_v10 = vmax.f32 %v3967_v42, %v944_v8  ;;  %v958_v11 = vpop.f32.mrf.mxu3  ;;  %v4005_v12 = vmax.f32 %v961_v36, %v1099_v46  ;;  %v1113_v13 = vpop.f32.mrf.mxu1 }
 0x10d   :  { %v976_v19 = vmax.f32 %v3973_v37, %v958_v11  ;;  %v4008_v20 = vmax.f32 %v962_v39, %v1113_v13 }
 0x113   :  { %v1127_v51 = vpop.f32.mrf.mxu2  ;;  %v1101_v52 = vpop.f32.mrf.mxu0 }
 0x114   :  { %v4010_v54 = vmax.f32 %v963_v61, %v1127_v51  ;;  %v1141_v56 = vpop.f32.mrf.mxu3  ;;  %v4012_v22 = vmax.f32 %v969_v17, %v1101_v52  ;;  %v1115_v23 = vpop.f32.mrf.mxu1 }
 0x115   :  { %v4014_v55 = vmax.f32 %v964_v32, %v1141_v56  ;;  %v4016_v57 = vmax.f32 %v970_v33, %v1115_v23 }
 0x11b   :  { %v1129_v7 = vpop.f32.mrf.mxu2  ;;  %v1155_v5 = vpop.f32.mrf.mxu0 }
 0x11c   :  { %v4018_v9 = vmax.f32 %v971_v28, %v1129_v7  ;;  %v1143_v14 = vpop.f32.mrf.mxu3  ;;  %v4020_v15 = vmax.f32 %v965_v30, %v1155_v5  ;;  %v1169_v16 = vpop.f32.mrf.mxu1 }
 0x11d   :  { %v4022_v21 = vmax.f32 %v972_v31, %v1143_v14  ;;  %v4024_v49 = vmax.f32 %v966_v18, %v1169_v16 }
 0x123   :  { %v1183_v2 = vpop.f32.mrf.mxu2  ;;  %v1157_v3 = vpop.f32.mrf.mxu0 }
 0x124   :  { %v4026_v4 = vmax.f32 %v967_v59, %v1183_v2  ;;  %v1197_v6 = vpop.f32.mrf.mxu3  ;;  %v4028_v25 = vmax.f32 %v973_v0, %v1157_v3  ;;  %v1171_v26 = vpop.f32.mrf.mxu1 }
 0x125   :  { %v4030_v27 = vmax.f32 %v968_v50, %v1197_v6  ;;  %v4032_v40 = vmax.f32 %v974_v63, %v1171_v26 }
 0x12b   :  { %v1185_v41 = vpop.f32.mrf.mxu2  ;;  %v1340_v34 = vpop.f32.mrf.mxu0 }
 0x12c   :  { %v4034_v42 = vmax.f32 %v975_v10, %v1185_v41  ;;  %v1199_v35 = vpop.f32.mrf.mxu3  ;;  %v1354_v36 = vpop.f32.mrf.mxu1  ;;  %v1443_v10 = vmax.f32 %v4005_v12, %v1340_v34 }
 0x12d   :  { %v4036_v43 = vmax.f32 %v976_v19, %v1199_v35  ;;  %v1444_v13 = vmax.f32 %v4008_v20, %v1354_v36 }
 0x133   :  { %v1368_v37 = vpop.f32.mrf.mxu2  ;;  %v1342_v39 = vpop.f32.mrf.mxu0 }
 0x134   :  { %v1382_v58 = vpop.f32.mrf.mxu3  ;;  %v1356_v44 = vpop.f32.mrf.mxu1  ;;  %v1445_v12 = vmax.f32 %v4010_v54, %v1368_v37  ;;  %v1451_v3 = vmax.f32 %v4012_v22, %v1342_v39 }
 0x135   :  { %v1446_v20 = vmax.f32 %v4014_v55, %v1382_v58  ;;  %v1452_v6 = vmax.f32 %v4016_v57, %v1356_v44 }
 0x13b   :  { %v4038_v61 = vpop.f32.mrf.mxu2  ;;  %v4040_v45 = vpop.f32.mrf.mxu0 }
 0x13c   :  { %v4042_v17 = vpop.f32.mrf.mxu3  ;;  %v4044_v24 = vpop.f32.mrf.mxu1 }
 0x143   :  { %v4046_v32 = vpop.f32.mrf.mxu2  ;;  %v4048_v33 = vpop.f32.mrf.mxu0 }
 0x144   :  { %v4050_v60 = vpop.f32.mrf.mxu3  ;;  %v4052_v48 = vpop.f32.mrf.mxu1 }
 0x14b   :  { %v4054_v28 = vpop.f32.mrf.mxu2  ;;  %v1581_v29 = vpop.f32.mrf.mxu0 }
 0x14c   :  { %v4056_v30 = vpop.f32.mrf.mxu3  ;;  %v1595_v38 = vpop.f32.mrf.mxu1  ;;  %v1684_v19 = vmax.f32 %v1443_v10, %v1581_v29 }
 0x14d   :  { %v1685_v51 = vmax.f32 %v1444_v13, %v1595_v38  ;;  %v1454_v13 = vmax.f32 %v4022_v21, %v4042_v17 }
 0x14f   :  { %v4067_v11 = vpop.permute.xlu0 %1945 }
 0x153   :  { %v1609_v31 = vpop.f32.mrf.mxu2  ;;  %v1583_v18 = vpop.f32.mrf.mxu0 }
 0x154   :  { %v1623_v47 = vpop.f32.mrf.mxu3  ;;  %v1597_v53 = vpop.f32.mrf.mxu1  ;;  %v1686_v41 = vmax.f32 %v1445_v12, %v1609_v31  ;;  %v1692_v34 = vmax.f32 %v1451_v3, %v1583_v18  ;;  %v1455_v12 = vmax.f32 %v4028_v25, %v4048_v33  ;;  %v1450_v3 = vmax.f32 %v4030_v27, %v4050_v60 }
 0x155   :  { %v1687_v36 = vmax.f32 %v1446_v20, %v1623_v47  ;;  %v1693_v29 = vmax.f32 %v1452_v6, %v1597_v53  ;;  %v1453_v47 = vmax.f32 %v4018_v9, %v4038_v61  ;;  %v1447_v53 = vmax.f32 %v4020_v15, %v4040_v45 }
 0x156   :  { %v1456_v20 = vmax.f32 %v4032_v40, %v4052_v48 }
 0x158   :  { %v4080_v35 = vpop.permute.xlu0 %1950 }
 0x15b   :  { %v1611_v59 = vpop.f32.mrf.mxu2  ;;  %v1637_v62 = vpop.f32.mrf.mxu0 }
 0x15c   :  { %v1625_v0 = vpop.f32.mrf.mxu3  ;;  %v1651_v1 = vpop.f32.mrf.mxu1 }
 0x163   :  { %v4058_v50 = vpop.f32.mrf.mxu2  ;;  %v4060_v63 = vpop.f32.mrf.mxu0 }
 0x164   :  { %v4062_v8 = vpop.f32.mrf.mxu3  ;;  %v4064_v46 = vpop.f32.mrf.mxu1 }
 0x16b   :  { %v4070_v52 = vpop.f32.mrf.mxu2  ;;  %v1822_v56 = vpop.f32.mrf.mxu0 }
 0x16c   :  { %v4072_v23 = vpop.f32.mrf.mxu3  ;;  %v1925_v7 = vmax.f32 %v1684_v19, %v1822_v56  ;;  %v1836_v5 = vpop.f32.mrf.mxu1  ;;  %v1448_v19 = vmax.f32 %v4024_v49, %v4044_v24 }
 0x16d   :  { %v1926_v14 = vmax.f32 %v1685_v51, %v1836_v5  ;;  %v1688_v5 = vmax.f32 %v1447_v53, %v1637_v62 }
 0x16e   :  { %v1953_v16 = vadd.f32 %v4067_v11, %v1925_v7  ;;  %v1694_v7 = vmax.f32 %v1453_v47, %v1611_v59 }
 0x16f   :  { %v1954_v2 = vadd.f32 %v4067_v11, %v1926_v14  ;;  %v1695_v14 = vmax.f32 %v1454_v13, %v1625_v0 }
 0x171   :  { %v1969_v26 = vpack.c.bf16 %v1954_v2, %v1953_v16  ;;  %v1689_v16 = vmax.f32 %v1448_v19, %v1651_v1  ;;  %v1449_v2 = vmax.f32 %v4026_v4, %v4046_v32 }
 0x173   :  { %v1850_v38 = vpop.f32.mrf.mxu2  ;;  %1977 = vst [vmem:[%s4149_s3] sm:$0xff] %v1969_v26  ;;  %v1824_v10 = vpop.f32.mrf.mxu0 }
 0x174   :  { %v1927_v54 = vmax.f32 %v1686_v41, %v1850_v38  ;;  %v1864_v37 = vpop.f32.mrf.mxu3  ;;  %v1933_v22 = vmax.f32 %v1692_v34, %v1824_v10  ;;  %v1838_v39 = vpop.f32.mrf.mxu1  ;;  %v1690_v41 = vmax.f32 %v1449_v2, %v4058_v50  ;;  %v1696_v34 = vmax.f32 %v1455_v12, %v4060_v63 }
 0x175   :  { %v1928_v55 = vmax.f32 %v1687_v36, %v1864_v37  ;;  %v1934_v58 = vmax.f32 %v1693_v29, %v1838_v39  ;;  %v1691_v36 = vmax.f32 %v1450_v3, %v4062_v8  ;;  %v1697_v29 = vmax.f32 %v1456_v20, %v4064_v46 }
 0x176   :  { %v1955_v57 = vadd.f32 %v4067_v11, %v1927_v54  ;;  %v1961_v44 = vadd.f32 %v4080_v35, %v1933_v22  ;;  %v1457_v38 = vmax.f32 %v4034_v42, %v4054_v28  ;;  %v1458_v10 = vmax.f32 %v4036_v43, %v4056_v30 }
 0x177   :  { %v1956_v31 = vadd.f32 %v4067_v11, %v1928_v55  ;;  %v1962_v18 = vadd.f32 %v4080_v35, %v1934_v58 }
 0x178   :  { %v1698_v22 = vmax.f32 %v1457_v38, %v4070_v52  ;;  %v1699_v39 = vmax.f32 %v1458_v10, %v4072_v23 }
 0x179   :  { %v1970_v51 = vpack.c.bf16 %v1956_v31, %v1955_v57  ;;  %v1973_v56 = vpack.c.bf16 %v1962_v18, %v1961_v44 }
 0x17b   :  { %1978 = vst [vmem:[%s4149_s3 + $0x8] sm:$0xff] %v1970_v51  ;;  %v1852_v9 = vpop.f32.mrf.mxu2  ;;  %v1878_v61 = vpop.f32.mrf.mxu0 }
 0x17c   :  { %1981 = vst [vmem:[%s4149_s3 + $0x20] sm:$0xff] %v1973_v56  ;;  %v1935_v15 = vmax.f32 %v1694_v7, %v1852_v9  ;;  %v1866_v21 = vpop.f32.mrf.mxu3  ;;  %v1929_v45 = vmax.f32 %v1688_v5, %v1878_v61  ;;  %v1892_v49 = vpop.f32.mrf.mxu1 }
 0x17d   :  { %v1936_v17 = vmax.f32 %v1695_v14, %v1866_v21  ;;  %v1930_v24 = vmax.f32 %v1689_v16, %v1892_v49 }
 0x17e   :  { %v1963_v59 = vadd.f32 %v4080_v35, %v1935_v15  ;;  %v1957_v62 = vadd.f32 %v4067_v11, %v1929_v45 }
 0x17f   :  { %v1964_v0 = vadd.f32 %v4080_v35, %v1936_v17  ;;  %v1958_v1 = vadd.f32 %v4067_v11, %v1930_v24 }
 0x181   :  { %v1974_v6 = vpack.c.bf16 %v1964_v0, %v1963_v59  ;;  %v1971_v26 = vpack.c.bf16 %v1958_v1, %v1957_v62 }
 0x183   :  { %1982 = vst [vmem:[%s4149_s3 + $0x28] sm:$0xff] %v1974_v6  ;;  %v1906_v4 = vpop.f32.mrf.mxu2  ;;  %v1880_v25 = vpop.f32.mrf.mxu0 }
 0x184   :  { %1979 = vst [vmem:[%s4149_s3 + $0x10] sm:$0xff] %v1971_v26  ;;  %v1931_v27 = vmax.f32 %v1690_v41, %v1906_v4  ;;  %v1920_v40 = vpop.f32.mrf.mxu3  ;;  %v1937_v32 = vmax.f32 %v1696_v34, %v1880_v25  ;;  %v1894_v33 = vpop.f32.mrf.mxu1 }
 0x185   :  { %v1932_v60 = vmax.f32 %v1691_v36, %v1920_v40  ;;  %v1938_v48 = vmax.f32 %v1697_v29, %v1894_v33 }
 0x186   :  { %v1959_v50 = vadd.f32 %v4067_v11, %v1931_v27  ;;  %v1965_v63 = vadd.f32 %v4080_v35, %v1937_v32 }
 0x187   :  { %v1960_v8 = vadd.f32 %v4067_v11, %v1932_v60  ;;  %v1966_v46 = vadd.f32 %v4080_v35, %v1938_v48 }
 0x189   :  { %v1972_v54 = vpack.c.bf16 %v1960_v8, %v1959_v50  ;;  %v1975_v37 = vpack.c.bf16 %v1966_v46, %v1965_v63 }
 0x18b   :  { %1980 = vst [vmem:[%s4149_s3 + $0x18] sm:$0xff] %v1972_v54  ;;  %v1908_v55 = vpop.f32.mrf.mxu2 }
 0x18c   :  { %1983 = vst [vmem:[%s4149_s3 + $0x30] sm:$0xff] %v1975_v37  ;;  %v1939_v11 = vmax.f32 %v1698_v22, %v1908_v55  ;;  %v1922_v42 = vpop.f32.mrf.mxu3 }
 0x18d   :  { %v1940_v28 = vmax.f32 %v1699_v39, %v1922_v42 }
 0x18e   :  { %v1967_v43 = vadd.f32 %v4080_v35, %v1939_v11 }
 0x18f   :  { %v1968_v30 = vadd.f32 %v4080_v35, %v1940_v28 }
 0x191   :  { %v1976_v58 = vpack.c.bf16 %v1968_v30, %v1967_v43 }
 0x193   :  { %1984 = vst [vmem:[%s4149_s3 + $0x38] sm:$0xff] %v1976_v58 }

// kernel: test_model_forward.4
= control target key start
LH: loop header
LB: loop body
LE: loop exit
PB: predicated region body
PF: predicated region fallthrough
CT: control target
= control target key end

     0   :  { %vm277_vm0 = vcmask 392192   ;;  %s4924_s2 = inlined_call_operand.vmem [shape: bf16[8,432,128], index: 2, kind: input, shape index: {}]   ;;  %s4925_s0 = inlined_call_operand.vmem [shape: bf16[32,432], index: 0, kind: input, shape index: {}]   ;;  %s4926_s1 = inlined_call_operand.vmem [shape: f32[32,1], index: 1, kind: input, shape index: {}]   ;;  %s4927_s3 = inlined_call_operand.vmem [shape: bf16[32,128], index: 3, kind: output, shape index: {}]  }
   0x1   :  { %v3784_v0 = vld [vmem:[%s4924_s2 + $0x38] sm:$0xff]  ;;  %v3803_v3 = vld [vmem:[%s4924_s2 + $0xd0] sm:$0xff]  ;;  %v3802_v7 = vld [vmem:[%s4924_s2 + $0xc8] sm:$0xff] }
   0x2   :  { %v3792_v1 = vld [vmem:[%s4924_s2 + $0x78] sm:$0xff]  ;;  %284 = vmatpush.bf16.msra.mxu0 %v3784_v0  ;;  %v3783_v4 = vld [vmem:[%s4924_s2 + $0x30] sm:$0xff]  ;;  %346 = vmatpush.bf16.msra.mxu3 %v3803_v3  ;;  %v3782_v8 = vld [vmem:[%s4924_s2 + $0x28] sm:$0xff] }
   0x3   :  { %v3800_v2 = vld [vmem:[%s4924_s2 + $0xb8] sm:$0xff]  ;;  %303 = vmatpush.bf16.msra.mxu1 %v3792_v1  ;;  %v3791_v5 = vld [vmem:[%s4924_s2 + $0x70] sm:$0xff]  ;;  %v3790_v9 = vld [vmem:[%s4924_s2 + $0x68] sm:$0xff] }
   0x4   :  { %322 = vmatpush.bf16.msra.mxu2 %v3800_v2  ;;  %v3799_v6 = vld [vmem:[%s4924_s2 + $0xb0] sm:$0xff]  ;;  %v3798_v10 = vld [vmem:[%s4924_s2 + $0xa8] sm:$0xff]  ;;  %v3801_v11 = vld [vmem:[%s4924_s2 + $0xc0] sm:$0xff] }
   0x5   :  { %v3770_v12 = vld [vmem:[%s4925_s0 + $0xc] sm:$0xf]  ;;  %v2491_v13 = vld [vmem:[%s4925_s0 + $0x18] sm:$0xf0]  ;;  %v3811_v14 = vld [vmem:[%s4924_s2 + $0x110] sm:$0xff] }
   0x6   :  { %285 = vmatpush.bf16.msra.mxu0 %v3783_v4  ;;  %347 = vmatpush.bf16.msra.mxu3 %v3802_v7  ;;  %v4081_v15 = vor.u32 %v3770_v12, %v2491_v13  ;;  %v3781_v16 = vld [vmem:[%s4924_s2 + $0x20] sm:$0xff]  ;;  %v3810_v19 = vld [vmem:[%s4924_s2 + $0x108] sm:$0xff]  ;;  %v3780_v20 = vld [vmem:[%s4924_s2 + $0x18] sm:$0xff] }
   0x7   :  { %304 = vmatpush.bf16.msra.mxu1 %v3791_v5  ;;  %v3789_v17 = vld [vmem:[%s4924_s2 + $0x60] sm:$0xff]  ;;  %v3788_v21 = vld [vmem:[%s4924_s2 + $0x58] sm:$0xff]  ;;  %v3779_v24 = vld [vmem:[%s4924_s2 + $0x10] sm:$0xff] }
   0x8   :  { %323 = vmatpush.bf16.msra.mxu2 %v3799_v6  ;;  %v3797_v18 = vld [vmem:[%s4924_s2 + $0xa0] sm:$0xff]  ;;  %v3796_v22 = vld [vmem:[%s4924_s2 + $0x98] sm:$0xff]  ;;  %v3787_v25 = vld [vmem:[%s4924_s2 + $0x50] sm:$0xff] }
   0x9   :  { %v3809_v23 = vld [vmem:[%s4924_s2 + $0x100] sm:$0xff]  ;;  %v3795_v26 = vld [vmem:[%s4924_s2 + $0x90] sm:$0xff]  ;;  %v3808_v27 = vld [vmem:[%s4924_s2 + $0xf8] sm:$0xff] }
   0xa   :  { %286 = vmatpush.bf16.msra.mxu0 %v3782_v8  ;;  %348 = vmatpush.bf16.msra.mxu3 %v3801_v11  ;;  %v3778_v28 = vld [vmem:[%s4924_s2 + $0x8] sm:$0xff]  ;;  %v2507_v32 = vld [vmem:[%s4925_s0 + $0x38] sm:$0xf0]  ;;  %v3807_v33 = vld [vmem:[%s4924_s2 + $0xf0] sm:$0xff] }
   0xb   :  { %305 = vmatpush.bf16.msra.mxu1 %v3790_v9  ;;  %v3786_v29 = vld [vmem:[%s4924_s2 + $0x48] sm:$0xff]  ;;  %v3777_v34 = vld [vmem:[%s4924_s2] sm:$0xff]  ;;  %v3771_v39 = vld [vmem:[%s4925_s0 + $0xc] sm:$0xf0] }
   0xc   :  { %324 = vmatpush.bf16.msra.mxu2 %v3798_v10  ;;  %v3794_v30 = vld [vmem:[%s4924_s2 + $0x88] sm:$0xff]  ;;  %v3785_v35 = vld [vmem:[%s4924_s2 + $0x40] sm:$0xff]  ;;  %v2483_v41 = vld [vmem:[%s4925_s0 + $0x10] sm:$0xf0] }
   0xd   :  { %2619 = vmatmul.msk.bf16.vlgmr.msra.gmra.mxu3 %vm277_vm0, %v4081_v15  ;;  %v3774_v31 = vld [vmem:[%s4925_s0 + $0x2c] sm:$0xf]  ;;  %v3793_v36 = vld [vmem:[%s4924_s2 + $0x80] sm:$0xff]  ;;  %v2489_v42 = vld [vmem:[%s4925_s0 + $0x8] sm:$0xf] }
   0xe   :  { %577 = vmatpush.bf16.msrb.mxu3 %v3811_v14  ;;  %287 = vmatpush.bf16.msra.mxu0 %v3781_v16  ;;  %v4148_v37 = vor.u32 %v3774_v31, %v2507_v32  ;;  %v2481_v38 = vld [vmem:[%s4925_s0] sm:$0xf]  ;;  %v3769_v40 = vld [vmem:[%s4925_s0 + $0x4] sm:$0xf]  ;;  %v3772_v43 = vld [vmem:[%s4925_s0 + $0x14] sm:$0xf0] }
   0xf   :  { %306 = vmatpush.bf16.msra.mxu1 %v3789_v17  ;;  %v3806_v44 = vld [vmem:[%s4924_s2 + $0xe8] sm:$0xff]  ;;  %v4174_v46 = vor.u32 %v3771_v39, %v2481_v38  ;;  %v3827_v47 = vld [vmem:[%s4924_s2 + $0x190] sm:$0xff]  ;;  %v4181_v48 = vor.u32 %v3769_v40, %v2483_v41  ;;  %v4183_v49 = vor.u32 %v3772_v43, %v2489_v42  ;;  %v3805_v51 = vld [vmem:[%s4924_s2 + $0xe0] sm:$0xff] }
  0x10   :  { %325 = vmatpush.bf16.msra.mxu2 %v3797_v18  ;;  %v3830_v45 = vld [vmem:[%s4924_s2 + $0x1a8] sm:$0xff]  ;;  %v3819_v50 = vld [vmem:[%s4924_s2 + $0x150] sm:$0xff]  ;;  %v3829_v52 = vld [vmem:[%s4924_s2 + $0x1a0] sm:$0xff] }
  0x11   :  { %v3826_v53 = vld [vmem:[%s4924_s2 + $0x188] sm:$0xff]  ;;  %v3804_v55 = vld [vmem:[%s4924_s2 + $0xd8] sm:$0xff]  ;;  %v3825_v57 = vld [vmem:[%s4924_s2 + $0x180] sm:$0xff] }
  0x12   :  { %578 = vmatpush.bf16.msrb.mxu3 %v3810_v19  ;;  %288 = vmatpush.bf16.msra.mxu0 %v3780_v20  ;;  %v3818_v54 = vld [vmem:[%s4924_s2 + $0x148] sm:$0xff]  ;;  %v3828_v56 = vld [vmem:[%s4924_s2 + $0x198] sm:$0xff]  ;;  %v3857_v59 = vld [vmem:[%s4924_s2 + $0x280] sm:$0xff] }
  0x13   :  { %307 = vmatpush.bf16.msra.mxu1 %v3788_v21  ;;  %v3838_v58 = vld [vmem:[%s4924_s2 + $0x1e8] sm:$0xff]  ;;  %v3817_v60 = vld [vmem:[%s4924_s2 + $0x140] sm:$0xff]  ;;  %v3816_v61 = vld [vmem:[%s4924_s2 + $0x138] sm:$0xff] }
  0x14   :  { %326 = vmatpush.bf16.msra.mxu2 %v3796_v22  ;;  %v3824_v62 = vld [vmem:[%s4924_s2 + $0x178] sm:$0xff]  ;;  %v2497_v63 = vld [vmem:[%s4925_s0 + $0x20] sm:$0xf]  ;;  %v3775_v1 = vld [vmem:[%s4925_s0 + $0x2c] sm:$0xf0] }
  0x15   :  { %v3837_v0 = vld [vmem:[%s4924_s2 + $0x1e0] sm:$0xff]  ;;  %v3856_v3 = vld [vmem:[%s4924_s2 + $0x278] sm:$0xff]  ;;  %v2499_v4 = vld [vmem:[%s4925_s0 + $0x30] sm:$0xf0]  ;;  %v4251_v7 = vor.u32 %v3775_v1, %v2497_v63 }
  0x16   :  { %579 = vmatpush.bf16.msrb.mxu3 %v3809_v23  ;;  %289 = vmatpush.bf16.msra.mxu0 %v3779_v24  ;;  %v3773_v2 = vld [vmem:[%s4925_s0 + $0x24] sm:$0xf]  ;;  %v2505_v5 = vld [vmem:[%s4925_s0 + $0x28] sm:$0xf]  ;;  %v3776_v6 = vld [vmem:[%s4925_s0 + $0x34] sm:$0xf0] }
  0x17   :  { %308 = vmatpush.bf16.msra.mxu1 %v3787_v25  ;;  %v3823_v8 = vld [vmem:[%s4924_s2 + $0x170] sm:$0xff]  ;;  %v4257_v9 = vor.u32 %v3773_v2, %v2499_v4  ;;  %v4259_v10 = vor.u32 %v3776_v6, %v2505_v5  ;;  %v3836_v12 = vld [vmem:[%s4924_s2 + $0x1d8] sm:$0xff]  ;;  %v3822_v13 = vld [vmem:[%s4924_s2 + $0x168] sm:$0xff] }
  0x18   :  { %327 = vmatpush.bf16.msra.mxu2 %v3795_v26  ;;  %v3815_v11 = vld [vmem:[%s4924_s2 + $0x130] sm:$0xff]  ;;  %v3814_v14 = vld [vmem:[%s4924_s2 + $0x128] sm:$0xff]  ;;  %v3821_v18 = vld [vmem:[%s4924_s2 + $0x160] sm:$0xff] }
  0x19   :  { %v3835_v16 = vld [vmem:[%s4924_s2 + $0x1d0] sm:$0xff]  ;;  %v3813_v19 = vld [vmem:[%s4924_s2 + $0x120] sm:$0xff]  ;;  %v3834_v20 = vld [vmem:[%s4924_s2 + $0x1c8] sm:$0xff] }
  0x1a   :  { %580 = vmatpush.bf16.msrb.mxu3 %v3808_v27  ;;  %290 = vmatpush.bf16.msra.mxu0 %v3778_v28  ;;  %v3855_v17 = vld [vmem:[%s4924_s2 + $0x270] sm:$0xff]  ;;  %v3820_v21 = vld [vmem:[%s4924_s2 + $0x158] sm:$0xff]  ;;  %v3854_v22 = vld [vmem:[%s4924_s2 + $0x268] sm:$0xff] }
  0x1b   :  { %309 = vmatpush.bf16.msra.mxu1 %v3786_v29  ;;  %v3812_v23 = vld [vmem:[%s4924_s2 + $0x118] sm:$0xff]  ;;  %v3833_v24 = vld [vmem:[%s4924_s2 + $0x1c0] sm:$0xff]  ;;  %v3846_v25 = vld [vmem:[%s4924_s2 + $0x228] sm:$0xff] }
  0x1c   :  { %328 = vmatpush.bf16.msra.mxu2 %v3794_v30  ;;  %v3832_v26 = vld [vmem:[%s4924_s2 + $0x1b8] sm:$0xff]  ;;  %v3845_v27 = vld [vmem:[%s4924_s2 + $0x220] sm:$0xff]  ;;  %v3831_v29 = vld [vmem:[%s4924_s2 + $0x1b0] sm:$0xff] }
  0x1d   :  { %2620 = vmatmul.msk.bf16.gmra.mxu3 %vm277_vm0, %v4148_v37  ;;  %v3853_v28 = vld [vmem:[%s4924_s2 + $0x260] sm:$0xff]  ;;  %v3884_v30 = vld [vmem:[%s4924_s2 + $0x358] sm:$0xff]  ;;  %v3842_v39 = vld [vmem:[%s4924_s2 + $0x208] sm:$0xff] }
  0x1e   :  { %581 = vmatpush.bf16.msrb.mxu3 %v3807_v33  ;;  %291 = vmatpush.bf16.msra.mxu0 %v3777_v34  ;;  %v3844_v31 = vld [vmem:[%s4924_s2 + $0x218] sm:$0xff]  ;;  %v3865_v33 = vld [vmem:[%s4924_s2 + $0x2c0] sm:$0xff]  ;;  %v3883_v34 = vld [vmem:[%s4924_s2 + $0x350] sm:$0xff] }
  0x1f   :  { %310 = vmatpush.bf16.msra.mxu1 %v3785_v35  ;;  %v3852_v32 = vld [vmem:[%s4924_s2 + $0x258] sm:$0xff]  ;;  %v3843_v35 = vld [vmem:[%s4924_s2 + $0x210] sm:$0xff]  ;;  %v3850_v40 = vld [vmem:[%s4924_s2 + $0x248] sm:$0xff] }
  0x20   :  { %329 = vmatpush.bf16.msra.mxu2 %v3793_v36  ;;  %v3851_v36 = vld [vmem:[%s4924_s2 + $0x250] sm:$0xff]  ;;  %v3864_v38 = vld [vmem:[%s4924_s2 + $0x2b8] sm:$0xff]  ;;  %v3841_v42 = vld [vmem:[%s4924_s2 + $0x200] sm:$0xff] }
  0x21   :  { %292 = vmatmul.bf16.vlgmr.msra.gmra.mxu0 %v4174_v46  ;;  %v3863_v41 = vld [vmem:[%s4924_s2 + $0x2b0] sm:$0xff]  ;;  %v3849_v43 = vld [vmem:[%s4924_s2 + $0x240] sm:$0xff]  ;;  %v3870_v1 = vld [vmem:[%s4924_s2 + $0x2e8] sm:$0xff] }
  0x22   :  { %582 = vmatpush.bf16.msrb.mxu3 %v3806_v44  ;;  %311 = vmatmul.bf16.vlgmr.msra.gmra.mxu1 %v4181_v48  ;;  %v3862_v44 = vld [vmem:[%s4924_s2 + $0x2a8] sm:$0xff]  ;;  %v3879_v63 = vld [vmem:[%s4924_s2 + $0x330] sm:$0xff]  ;;  %v3869_v5 = vld [vmem:[%s4924_s2 + $0x2e0] sm:$0xff] }
  0x23   :  { %615 = vmatpush.bf16.msrb.mxu1 %v3827_v47  ;;  %330 = vmatmul.bf16.vlgmr.msra.gmra.mxu2 %v4183_v49  ;;  %v3848_v47 = vld [vmem:[%s4924_s2 + $0x238] sm:$0xff]  ;;  %v3891_v2 = vld [vmem:[%s4924_s2 + $0x390] sm:$0xff]  ;;  %v3878_v4 = vld [vmem:[%s4924_s2 + $0x328] sm:$0xff] }
  0x24   :  { %639 = vmatpush.bf16.msrb.mxu2 %v3830_v45  ;;  %596 = vmatpush.bf16.msrb.mxu0 %v3819_v50  ;;  %v3840_v45 = vld [vmem:[%s4924_s2 + $0x1f8] sm:$0xff]  ;;  %v3882_v50 = vld [vmem:[%s4924_s2 + $0x348] sm:$0xff]  ;;  %v3877_v6 = vld [vmem:[%s4924_s2 + $0x320] sm:$0xff] }
  0x26   :  { %583 = vmatpush.bf16.msrb.mxu3 %v3805_v51  ;;  %v3861_v51 = vld [vmem:[%s4924_s2 + $0x2a0] sm:$0xff] }
  0x27   :  { %616 = vmatpush.bf16.msrb.mxu1 %v3826_v53  ;;  %v3847_v53 = vld [vmem:[%s4924_s2 + $0x230] sm:$0xff] }
  0x28   :  { %640 = vmatpush.bf16.msrb.mxu2 %v3829_v52  ;;  %597 = vmatpush.bf16.msrb.mxu0 %v3818_v54  ;;  %v3839_v52 = vld [vmem:[%s4924_s2 + $0x1f0] sm:$0xff]  ;;  %v3860_v54 = vld [vmem:[%s4924_s2 + $0x298] sm:$0xff] }
  0x2a   :  { %584 = vmatpush.bf16.msrb.mxu3 %v3804_v55  ;;  %v3873_v55 = vld [vmem:[%s4924_s2 + $0x300] sm:$0xff] }
  0x2b   :  { %617 = vmatpush.bf16.msrb.mxu1 %v3825_v57  ;;  %v3859_v57 = vld [vmem:[%s4924_s2 + $0x290] sm:$0xff] }
  0x2c   :  { %641 = vmatpush.bf16.msrb.mxu2 %v3828_v56  ;;  %598 = vmatpush.bf16.msrb.mxu0 %v3817_v60  ;;  %v3881_v56 = vld [vmem:[%s4924_s2 + $0x340] sm:$0xff]  ;;  %v3858_v60 = vld [vmem:[%s4924_s2 + $0x288] sm:$0xff] }
  0x2d   :  { %585 = vmatmul.bf16.vlgmr.msrb.gmra.mxu3 %v4174_v46 }
  0x2e   :  { %874 = vmatpush.bf16.msra.mxu3 %v3838_v58  ;;  %v3872_v58 = vld [vmem:[%s4924_s2 + $0x2f8] sm:$0xff] }
  0x2f   :  { %618 = vmatpush.bf16.msrb.mxu1 %v3824_v62  ;;  %v3892_v62 = vld [vmem:[%s4924_s2 + $0x398] sm:$0xff] }
  0x30   :  { %936 = vmatpush.bf16.msra.mxu2 %v3857_v59  ;;  %599 = vmatpush.bf16.msrb.mxu0 %v3816_v61  ;;  %v3880_v59 = vld [vmem:[%s4924_s2 + $0x338] sm:$0xff]  ;;  %v3871_v61 = vld [vmem:[%s4924_s2 + $0x2f0] sm:$0xff] }
  0x31   :  { %297 = vmatmul.bf16.gmra.mxu0 %v4251_v7 }
  0x32   :  { %875 = vmatpush.bf16.msra.mxu3 %v3837_v0  ;;  %316 = vmatmul.bf16.gmra.mxu1 %v4257_v9  ;;  %v3911_v0 = vld [vmem:[%s4924_s2 + $0x430] sm:$0xff] }
  0x33   :  { %619 = vmatpush.bf16.msrb.mxu1 %v3823_v8  ;;  %335 = vmatmul.bf16.gmra.mxu2 %v4259_v10  ;;  %v3890_v8 = vld [vmem:[%s4924_s2 + $0x388] sm:$0xff] }
  0x34   :  { %937 = vmatpush.bf16.msra.mxu2 %v3856_v3  ;;  %600 = vmatpush.bf16.msrb.mxu0 %v3815_v11  ;;  %v3910_v3 = vld [vmem:[%s4924_s2 + $0x428] sm:$0xff]  ;;  %v3868_v11 = vld [vmem:[%s4924_s2 + $0x2d8] sm:$0xff] }
  0x36   :  { %876 = vmatpush.bf16.msra.mxu3 %v3836_v12  ;;  %v3876_v12 = vld [vmem:[%s4924_s2 + $0x318] sm:$0xff] }
  0x37   :  { %620 = vmatpush.bf16.msrb.mxu1 %v3822_v13  ;;  %v3889_v13 = vld [vmem:[%s4924_s2 + $0x380] sm:$0xff] }
  0x38   :  { %938 = vmatpush.bf16.msra.mxu2 %v3855_v17  ;;  %601 = vmatpush.bf16.msrb.mxu0 %v3814_v14  ;;  %v3867_v14 = vld [vmem:[%s4924_s2 + $0x2d0] sm:$0xff]  ;;  %v3888_v17 = vld [vmem:[%s4924_s2 + $0x378] sm:$0xff] }
  0x3a   :  { %877 = vmatpush.bf16.msra.mxu3 %v3835_v16  ;;  %v3875_v16 = vld [vmem:[%s4924_s2 + $0x310] sm:$0xff] }
  0x3b   :  { %621 = vmatpush.bf16.msrb.mxu1 %v3821_v18  ;;  %v3909_v18 = vld [vmem:[%s4924_s2 + $0x420] sm:$0xff] }
  0x3c   :  { %602 = vmatpush.bf16.msrb.mxu0 %v3813_v19  ;;  %v3866_v19 = vld [vmem:[%s4924_s2 + $0x2c8] sm:$0xff] }
  0x3d   :  { %590 = vmatmul.bf16.gmra.mxu3 %v4251_v7 }
  0x3e   :  { %878 = vmatpush.bf16.msra.mxu3 %v3834_v20  ;;  %v3900_v20 = vld [vmem:[%s4924_s2 + $0x3d8] sm:$0xff] }
  0x3f   :  { %622 = vmatpush.bf16.msrb.mxu1 %v3820_v21  ;;  %v3874_v21 = vld [vmem:[%s4924_s2 + $0x308] sm:$0xff] }
  0x40   :  { %603 = vmatpush.bf16.msrb.mxu0 %v3812_v23  ;;  %v3908_v23 = vld [vmem:[%s4924_s2 + $0x418] sm:$0xff] }
  0x42   :  { %879 = vmatpush.bf16.msra.mxu3 %v3833_v24  ;;  %623 = vmatmul.bf16.vlgmr.msrb.gmra.mxu1 %v4183_v49  ;;  %v3899_v24 = vld [vmem:[%s4924_s2 + $0x3d0] sm:$0xff] }
  0x43   :  { %912 = vmatpush.bf16.msra.mxu1 %v3854_v22  ;;  %604 = vmatmul.bf16.vlgmr.msrb.gmra.mxu0 %v4181_v48  ;;  %v3887_v22 = vld [vmem:[%s4924_s2 + $0x370] sm:$0xff] }
  0x44   :  { %893 = vmatpush.bf16.msra.mxu0 %v3846_v25  ;;  %2783 = vmatmul.msk.bf16.vlgmr.msrb.gmra.mxu2 %vm277_vm0, %v4081_v15  ;;  %v3886_v25 = vld [vmem:[%s4924_s2 + $0x368] sm:$0xff] }
  0x45   :  { %1233 = vmatpush.bf16.msrb.mxu2 %v3884_v30  ;;  %v3919_v30 = vld [vmem:[%s4924_s2 + $0x470] sm:$0xff] }
  0x46   :  { %880 = vmatpush.bf16.msra.mxu3 %v3832_v26  ;;  %v3907_v26 = vld [vmem:[%s4924_s2 + $0x410] sm:$0xff] }
  0x47   :  { %913 = vmatpush.bf16.msra.mxu1 %v3853_v28  ;;  %v3885_v28 = vld [vmem:[%s4924_s2 + $0x360] sm:$0xff] }
  0x48   :  { %894 = vmatpush.bf16.msra.mxu0 %v3845_v27  ;;  %v3898_v27 = vld [vmem:[%s4924_s2 + $0x3c8] sm:$0xff] }
  0x49   :  { %1234 = vmatpush.bf16.msrb.mxu2 %v3883_v34  ;;  %v3918_v34 = vld [vmem:[%s4924_s2 + $0x468] sm:$0xff] }
  0x4a   :  { %881 = vmatpush.bf16.msra.mxu3 %v3831_v29  ;;  %v3906_v29 = vld [vmem:[%s4924_s2 + $0x408] sm:$0xff] }
  0x4b   :  { %914 = vmatpush.bf16.msra.mxu1 %v3852_v32  ;;  %v3938_v32 = vld [vmem:[%s4924_s2 + $0x508] sm:$0xff] }
  0x4c   :  { %895 = vmatpush.bf16.msra.mxu0 %v3844_v31  ;;  %v3897_v31 = vld [vmem:[%s4924_s2 + $0x3c0] sm:$0xff] }
  0x4d   :  { %882 = vmatmul.bf16.vlgmr.msra.gmra.mxu3 %v4174_v46  ;;  %1235 = vmatpush.bf16.msrb.mxu2 %v3882_v50  ;;  %v3893_v50 = vld [vmem:[%s4924_s2 + $0x3a0] sm:$0xff] }
  0x4e   :  { %1171 = vmatpush.bf16.msrb.mxu3 %v3865_v33  ;;  %v3905_v33 = vld [vmem:[%s4924_s2 + $0x400] sm:$0xff] }
  0x4f   :  { %915 = vmatpush.bf16.msra.mxu1 %v3851_v36  ;;  %v3904_v36 = vld [vmem:[%s4924_s2 + $0x3f8] sm:$0xff] }
  0x50   :  { %896 = vmatpush.bf16.msra.mxu0 %v3843_v35  ;;  %v3896_v35 = vld [vmem:[%s4924_s2 + $0x3b8] sm:$0xff] }
  0x52   :  { %1172 = vmatpush.bf16.msrb.mxu3 %v3864_v38  ;;  %628 = vmatmul.bf16.gmra.mxu1 %v4259_v10  ;;  %v3917_v38 = vld [vmem:[%s4924_s2 + $0x460] sm:$0xff] }
  0x53   :  { %916 = vmatpush.bf16.msra.mxu1 %v3850_v40  ;;  %609 = vmatmul.bf16.gmra.mxu0 %v4257_v9  ;;  %v3903_v40 = vld [vmem:[%s4924_s2 + $0x3f0] sm:$0xff] }
  0x54   :  { %897 = vmatpush.bf16.msra.mxu0 %v3842_v39  ;;  %2784 = vmatmul.msk.bf16.gmra.mxu2 %vm277_vm0, %v4148_v37  ;;  %v3895_v39 = vld [vmem:[%s4924_s2 + $0x3b0] sm:$0xff] }
  0x56   :  { %1173 = vmatpush.bf16.msrb.mxu3 %v3863_v41  ;;  %v3916_v41 = vld [vmem:[%s4924_s2 + $0x458] sm:$0xff] }
  0x57   :  { %917 = vmatpush.bf16.msra.mxu1 %v3849_v43  ;;  %v3902_v43 = vld [vmem:[%s4924_s2 + $0x3e8] sm:$0xff] }
  0x58   :  { %898 = vmatpush.bf16.msra.mxu0 %v3841_v42  ;;  %v3894_v42 = vld [vmem:[%s4924_s2 + $0x3a8] sm:$0xff] }
  0x5a   :  { %1174 = vmatpush.bf16.msrb.mxu3 %v3862_v44  ;;  %v3937_v44 = vld [vmem:[%s4924_s2 + $0x500] sm:$0xff] }
  0x5b   :  { %918 = vmatpush.bf16.msra.mxu1 %v3848_v47  ;;  %v3915_v47 = vld [vmem:[%s4924_s2 + $0x450] sm:$0xff] }
  0x5c   :  { %899 = vmatpush.bf16.msra.mxu0 %v3840_v45 }
  0x5d   :  { %887 = vmatmul.bf16.gmra.mxu3 %v4251_v7 }
  0x5e   :  { %1175 = vmatpush.bf16.msrb.mxu3 %v3861_v51  ;;  %v3901_v51 = vld [vmem:[%s4924_s2 + $0x3e0] sm:$0xff] }
  0x5f   :  { %919 = vmatpush.bf16.msra.mxu1 %v3847_v53  ;;  %v3914_v53 = vld [vmem:[%s4924_s2 + $0x448] sm:$0xff] }
  0x60   :  { %900 = vmatpush.bf16.msra.mxu0 %v3839_v52  ;;  %v3927_v52 = vld [vmem:[%s4924_s2 + $0x4b0] sm:$0xff] }
  0x62   :  { %1176 = vmatpush.bf16.msrb.mxu3 %v3860_v54  ;;  %920 = vmatmul.bf16.vlgmr.msra.gmra.mxu1 %v4183_v49  ;;  %v3935_v54 = vld [vmem:[%s4924_s2 + $0x4f0] sm:$0xff] }
  0x63   :  { %1209 = vmatpush.bf16.msrb.mxu1 %v3881_v56  ;;  %901 = vmatmul.bf16.vlgmr.msra.gmra.mxu0 %v4181_v48  ;;  %v3936_v56 = vld [vmem:[%s4924_s2 + $0x4f8] sm:$0xff] }
  0x64   :  { %1190 = vmatpush.bf16.msrb.mxu0 %v3873_v55  ;;  %2947 = vmatmul.msk.bf16.vlgmr.msra.gmra.mxu2 %vm277_vm0, %v4081_v15  ;;  %v3926_v55 = vld [vmem:[%s4924_s2 + $0x4a8] sm:$0xff] }
  0x65   :  { %1530 = vmatpush.bf16.msra.mxu2 %v3911_v0 }
  0x66   :  { %1177 = vmatpush.bf16.msrb.mxu3 %v3859_v57 }
  0x67   :  { %1210 = vmatpush.bf16.msrb.mxu1 %v3880_v59  ;;  %v3934_v59 = vld [vmem:[%s4924_s2 + $0x4e8] sm:$0xff] }
  0x68   :  { %1191 = vmatpush.bf16.msrb.mxu0 %v3872_v58  ;;  %v3913_v58 = vld [vmem:[%s4924_s2 + $0x440] sm:$0xff] }
  0x69   :  { %1531 = vmatpush.bf16.msra.mxu2 %v3910_v3  ;;  %v3924_v3 = vld [vmem:[%s4924_s2 + $0x498] sm:$0xff] }
  0x6a   :  { %1178 = vmatpush.bf16.msrb.mxu3 %v3858_v60  ;;  %v3925_v60 = vld [vmem:[%s4924_s2 + $0x4a0] sm:$0xff] }
  0x6b   :  { %1211 = vmatpush.bf16.msrb.mxu1 %v3879_v63 }
  0x6c   :  { %1192 = vmatpush.bf16.msrb.mxu0 %v3871_v61  ;;  %v3912_v61 = vld [vmem:[%s4924_s2 + $0x438] sm:$0xff] }
  0x6d   :  { %1179 = vmatmul.bf16.vlgmr.msrb.gmra.mxu3 %v4174_v46  ;;  %1532 = vmatpush.bf16.msra.mxu2 %v3909_v18  ;;  %v3944_v18 = vld [vmem:[%s4924_s2 + $0x538] sm:$0xff] }
  0x6e   :  { %1468 = vmatpush.bf16.msra.mxu3 %v3892_v62  ;;  %v3933_v62 = vld [vmem:[%s4924_s2 + $0x4e0] sm:$0xff] }
  0x6f   :  { %1212 = vmatpush.bf16.msrb.mxu1 %v3878_v4 }
  0x70   :  { %1193 = vmatpush.bf16.msrb.mxu0 %v3870_v1  ;;  %v3946_v1 = vld [vmem:[%s4924_s2 + $0x548] sm:$0xff] }
  0x72   :  { %1469 = vmatpush.bf16.msra.mxu3 %v3891_v2  ;;  %925 = vmatmul.bf16.gmra.mxu1 %v4259_v10 }
  0x73   :  { %1213 = vmatpush.bf16.msrb.mxu1 %v3877_v6  ;;  %906 = vmatmul.bf16.gmra.mxu0 %v4257_v9  ;;  %v3945_v6 = vld [vmem:[%s4924_s2 + $0x540] sm:$0xff] }
  0x74   :  { %1194 = vmatpush.bf16.msrb.mxu0 %v3869_v5  ;;  %2948 = vmatmul.msk.bf16.gmra.mxu2 %vm277_vm0, %v4148_v37  ;;  %v3932_v5 = vld [vmem:[%s4924_s2 + $0x4d8] sm:$0xff] }
  0x76   :  { %1470 = vmatpush.bf16.msra.mxu3 %v3890_v8  ;;  %v3965_v8 = vld [vmem:[%s4924_s2 + $0x5e0] sm:$0xff] }
  0x77   :  { %1214 = vmatpush.bf16.msrb.mxu1 %v3876_v12 }
  0x78   :  { %1195 = vmatpush.bf16.msrb.mxu0 %v3868_v11  ;;  %v3923_v11 = vld [vmem:[%s4924_s2 + $0x490] sm:$0xff] }
  0x7a   :  { %1471 = vmatpush.bf16.msra.mxu3 %v3889_v13  ;;  %v3931_v13 = vld [vmem:[%s4924_s2 + $0x4d0] sm:$0xff] }
  0x7b   :  { %1215 = vmatpush.bf16.msrb.mxu1 %v3875_v16 }
  0x7c   :  { %1196 = vmatpush.bf16.msrb.mxu0 %v3867_v14 }
  0x7d   :  { %1184 = vmatmul.bf16.gmra.mxu3 %v4251_v7 }
  0x7e   :  { %1472 = vmatpush.bf16.msra.mxu3 %v3888_v17 }
  0x7f   :  { %1216 = vmatpush.bf16.msrb.mxu1 %v3874_v21  ;;  %v3922_v21 = vld [vmem:[%s4924_s2 + $0x488] sm:$0xff] }
  0x80   :  { %1197 = vmatpush.bf16.msrb.mxu0 %v3866_v19 }
  0x82   :  { %1473 = vmatpush.bf16.msra.mxu3 %v3887_v22  ;;  %1217 = vmatmul.bf16.vlgmr.msrb.gmra.mxu1 %v4183_v49 }
  0x83   :  { %1506 = vmatpush.bf16.msra.mxu1 %v3908_v23  ;;  %1198 = vmatmul.bf16.vlgmr.msrb.gmra.mxu0 %v4181_v48  ;;  %v3930_v23 = vld [vmem:[%s4924_s2 + $0x4c8] sm:$0xff] }
  0x84   :  { %1487 = vmatpush.bf16.msra.mxu0 %v3900_v20  ;;  %3111 = vmatmul.msk.bf16.vlgmr.msrb.gmra.mxu2 %vm277_vm0, %v4081_v15 }
  0x85   :  { %1827 = vmatpush.bf16.msrb.mxu2 %v3938_v32 }
  0x86   :  { %1474 = vmatpush.bf16.msra.mxu3 %v3886_v25  ;;  %v3921_v25 = vld [vmem:[%s4924_s2 + $0x480] sm:$0xff] }
  0x87   :  { %1507 = vmatpush.bf16.msra.mxu1 %v3907_v26 }
  0x88   :  { %1488 = vmatpush.bf16.msra.mxu0 %v3899_v24  ;;  %v3943_v24 = vld [vmem:[%s4924_s2 + $0x530] sm:$0xff] }
  0x89   :  { %1828 = vmatpush.bf16.msrb.mxu2 %v3937_v44 }
  0x8a   :  { %1475 = vmatpush.bf16.msra.mxu3 %v3885_v28 }
  0x8b   :  { %1508 = vmatpush.bf16.msra.mxu1 %v3906_v29 }
  0x8c   :  { %1489 = vmatpush.bf16.msra.mxu0 %v3898_v27  ;;  %v3929_v27 = vld [vmem:[%s4924_s2 + $0x4c0] sm:$0xff] }
  0x8d   :  { %1476 = vmatmul.bf16.vlgmr.msra.gmra.mxu3 %v4174_v46  ;;  %1829 = vmatpush.bf16.msrb.mxu2 %v3936_v56  ;;  %v3960_v56 = vld [vmem:[%s4924_s2 + $0x5b8] sm:$0xff] }
  0x8e   :  { %1765 = vmatpush.bf16.msrb.mxu3 %v3919_v30 }
  0x8f   :  { %1509 = vmatpush.bf16.msra.mxu1 %v3905_v33 }
  0x90   :  { %1490 = vmatpush.bf16.msra.mxu0 %v3897_v31  ;;  %v350_v45 = vpop.f32.mrf.mxu3  ;;  %v3942_v31 = vld [vmem:[%s4924_s2 + $0x528] sm:$0xff] }
  0x92   :  { %1766 = vmatpush.bf16.msrb.mxu3 %v3918_v34  ;;  %1222 = vmatmul.bf16.gmra.mxu1 %v4259_v10  ;;  %v3920_v34 = vld [vmem:[%s4924_s2 + $0x478] sm:$0xff] }
  0x93   :  { %1510 = vmatpush.bf16.msra.mxu1 %v3904_v36  ;;  %1203 = vmatmul.bf16.gmra.mxu0 %v4257_v9  ;;  %v3928_v36 = vld [vmem:[%s4924_s2 + $0x4b8] sm:$0xff] }
  0x94   :  { %1491 = vmatpush.bf16.msra.mxu0 %v3896_v35  ;;  %3112 = vmatmul.msk.bf16.gmra.mxu2 %vm277_vm0, %v4148_v37 }
  0x96   :  { %1767 = vmatpush.bf16.msrb.mxu3 %v3917_v38  ;;  %v3954_v38 = vld [vmem:[%s4924_s2 + $0x588] sm:$0xff] }
  0x97   :  { %1511 = vmatpush.bf16.msra.mxu1 %v3903_v40  ;;  %v3962_v40 = vld [vmem:[%s4924_s2 + $0x5c8] sm:$0xff] }
  0x98   :  { %1492 = vmatpush.bf16.msra.mxu0 %v3895_v39  ;;  %v352_v57 = vpop.f32.mrf.mxu3  ;;  %v3964_v39 = vld [vmem:[%s4924_s2 + $0x5d8] sm:$0xff] }
  0x9a   :  { %1768 = vmatpush.bf16.msrb.mxu3 %v3916_v41  ;;  %v3941_v41 = vld [vmem:[%s4924_s2 + $0x520] sm:$0xff] }
  0x9b   :  { %1512 = vmatpush.bf16.msra.mxu1 %v3902_v43  ;;  %v3953_v43 = vld [vmem:[%s4924_s2 + $0x580] sm:$0xff] }
  0x9c   :  { %1493 = vmatpush.bf16.msra.mxu0 %v3894_v42 }
  0x9d   :  { %1481 = vmatmul.bf16.gmra.mxu3 %v4251_v7 }
  0x9e   :  { %1769 = vmatpush.bf16.msrb.mxu3 %v3915_v47  ;;  %v293_v63 = vpop.f32.mrf.mxu0  ;;  %v3961_v47 = vld [vmem:[%s4924_s2 + $0x5c0] sm:$0xff] }
  0x9f   :  { %1513 = vmatpush.bf16.msra.mxu1 %v3901_v51  ;;  %v312_v0 = vpop.f32.mrf.mxu1  ;;  %v3940_v51 = vld [vmem:[%s4924_s2 + $0x518] sm:$0xff] }
  0xa0   :  { %1494 = vmatpush.bf16.msra.mxu0 %v3893_v50  ;;  %v313_v2 = vadd.f32 %v312_v0, %v293_v63  ;;  %v4604_v4 = vpop.f32.mrf.mxu3 }
  0xa2   :  { %1770 = vmatpush.bf16.msrb.mxu3 %v3914_v53  ;;  %1514 = vmatmul.bf16.vlgmr.msra.gmra.mxu1 %v4183_v49 }
  0xa3   :  { %1803 = vmatpush.bf16.msrb.mxu1 %v3935_v54  ;;  %1495 = vmatmul.bf16.vlgmr.msra.gmra.mxu0 %v4181_v48 }
  0xa4   :  { %1784 = vmatpush.bf16.msrb.mxu0 %v3927_v52  ;;  %3275 = vmatmul.msk.bf16.vlgmr.msra.gmra.mxu2 %vm277_vm0, %v4081_v15 }
  0xa5   :  { %2124 = vmatpush.bf16.msra.mxu2 %v3965_v8 }
  0xa6   :  { %1771 = vmatpush.bf16.msrb.mxu3 %v3913_v58  ;;  %v331_v12 = vpop.f32.mrf.mxu2  ;;  %v295_v16 = vpop.f32.mrf.mxu0  ;;  %v3939_v58 = vld [vmem:[%s4924_s2 + $0x510] sm:$0xff] }
  0xa7   :  { %1804 = vmatpush.bf16.msrb.mxu1 %v3934_v59  ;;  %v332_v14 = vadd.f32 %v331_v12, %v313_v2  ;;  %v314_v17 = vpop.f32.mrf.mxu1  ;;  %v3973_v59 = vld [vmem:[%s4924_s2 + $0x620] sm:$0xff]  ;;  %v3992_v12 = vld [vmem:[%s4924_s2 + $0x6b8] sm:$0xff] }
  0xa8   :  { %1785 = vmatpush.bf16.msrb.mxu0 %v3926_v55  ;;  %v315_v20 = vadd.f32 %v314_v17, %v295_v16  ;;  %v4633_v22 = vpop.f32.mrf.mxu3  ;;  %v3952_v55 = vld [vmem:[%s4924_s2 + $0x578] sm:$0xff] }
  0xa9   :  { %v4628_v19 = vadd.f32 %v350_v45, %v332_v14  ;;  %2125 = vmatpush.bf16.msra.mxu2 %v3964_v39  ;;  %v3949_v14 = vld [vmem:[%s4924_s2 + $0x560] sm:$0xff]  ;;  %v3968_v39 = vld [vmem:[%s4924_s2 + $0x5f8] sm:$0xff] }
  0xaa   :  { %1772 = vmatpush.bf16.msrb.mxu3 %v3912_v61  ;;  %v3951_v61 = vld [vmem:[%s4924_s2 + $0x570] sm:$0xff] }
  0xab   :  { %1805 = vmatpush.bf16.msrb.mxu1 %v3933_v62 }
  0xac   :  { %1786 = vmatpush.bf16.msrb.mxu0 %v3925_v60 }
  0xad   :  { %1773 = vmatmul.bf16.vlgmr.msrb.gmra.mxu3 %v4174_v46 }
  0xae   :  { %2062 = vmatpush.bf16.msra.mxu3 %v3946_v1  ;;  %v333_v26 = vpop.f32.mrf.mxu2  ;;  %v298_v29 = vpop.f32.mrf.mxu0  ;;  %v3959_v1 = vld [vmem:[%s4924_s2 + $0x5b0] sm:$0xff] }
  0xaf   :  { %1806 = vmatpush.bf16.msrb.mxu1 %v3932_v5  ;;  %v334_v28 = vadd.f32 %v333_v26, %v315_v20  ;;  %v317_v30 = vpop.f32.mrf.mxu1  ;;  %v3948_v26 = vld [vmem:[%s4924_s2 + $0x558] sm:$0xff] }
  0xb0   :  { %1787 = vmatpush.bf16.msrb.mxu0 %v3924_v3  ;;  %v318_v33 = vadd.f32 %v317_v30, %v298_v29  ;;  %v586_v35 = vpop.f32.mrf.mxu3  ;;  %v3969_v29 = vld [vmem:[%s4924_s2 + $0x600] sm:$0xff]  ;;  %v3947_v30 = vld [vmem:[%s4924_s2 + $0x550] sm:$0xff] }
  0xb1   :  { %v4651_v32 = vadd.f32 %v352_v57, %v334_v28  ;;  %v3963_v57 = vld [vmem:[%s4924_s2 + $0x5d0] sm:$0xff]  ;;  %v3956_v28 = vld [vmem:[%s4924_s2 + $0x598] sm:$0xff] }
  0xb2   :  { %2063 = vmatpush.bf16.msra.mxu3 %v3945_v6  ;;  %1519 = vmatmul.bf16.gmra.mxu1 %v4259_v10  ;;  %v3950_v6 = vld [vmem:[%s4924_s2 + $0x568] sm:$0xff] }
  0xb3   :  { %1807 = vmatpush.bf16.msrb.mxu1 %v3931_v13  ;;  %1500 = vmatmul.bf16.gmra.mxu0 %v4257_v9  ;;  %v3971_v13 = vld [vmem:[%s4924_s2 + $0x610] sm:$0xff] }
  0xb4   :  { %1788 = vmatpush.bf16.msrb.mxu0 %v3923_v11  ;;  %3276 = vmatmul.msk.bf16.gmra.mxu2 %vm277_vm0, %v4148_v37  ;;  %v3958_v11 = vld [vmem:[%s4924_s2 + $0x5a8] sm:$0xff] }
  0xb5   :  { %2126 = vmatpush.bf16.msra.mxu2 %v3963_v57 }
  0xb6   :  { %2064 = vmatpush.bf16.msra.mxu3 %v3944_v18  ;;  %v336_v42 = vpop.f32.mrf.mxu2  ;;  %v300_v45 = vpop.f32.mrf.mxu0 }
  0xb7   :  { %1808 = vmatpush.bf16.msrb.mxu1 %v3930_v23  ;;  %v337_v44 = vadd.f32 %v336_v42, %v318_v33  ;;  %v319_v50 = vpop.f32.mrf.mxu1  ;;  %v3970_v23 = vld [vmem:[%s4924_s2 + $0x608] sm:$0xff] }
  0xb8   :  { %1789 = vmatpush.bf16.msrb.mxu0 %v3922_v21  ;;  %v320_v53 = vadd.f32 %v319_v50, %v300_v45  ;;  %v588_v54 = vpop.f32.mrf.mxu3  ;;  %v3957_v21 = vld [vmem:[%s4924_s2 + $0x5a0] sm:$0xff]  ;;  %v3980_v50 = vld [vmem:[%s4924_s2 + $0x658] sm:$0xff] }
  0xb9   :  { %v4685_v52 = vadd.f32 %v4604_v4, %v337_v44  ;;  %v3972_v4 = vld [vmem:[%s4924_s2 + $0x618] sm:$0xff]  ;;  %v3991_v44 = vld [vmem:[%s4924_s2 + $0x6b0] sm:$0xff] }
  0xba   :  { %2065 = vmatpush.bf16.msra.mxu3 %v3943_v24 }
  0xbb   :  { %1809 = vmatpush.bf16.msrb.mxu1 %v3929_v27 }
  0xbc   :  { %1790 = vmatpush.bf16.msrb.mxu0 %v3921_v25 }
  0xbd   :  { %1778 = vmatmul.bf16.gmra.mxu3 %v4251_v7 }
  0xbe   :  { %2066 = vmatpush.bf16.msra.mxu3 %v3942_v31  ;;  %v338_v60 = vpop.f32.mrf.mxu2 }
  0xbf   :  { %1810 = vmatpush.bf16.msrb.mxu1 %v3928_v36  ;;  %v339_v62 = vadd.f32 %v338_v60, %v320_v53  ;;  %v624_v0 = vpop.f32.mrf.mxu1  ;;  %v3955_v36 = vld [vmem:[%s4924_s2 + $0x590] sm:$0xff] }
  0xc0   :  { %1791 = vmatpush.bf16.msrb.mxu0 %v3920_v34  ;;  %v605_v63 = vpop.f32.mrf.mxu0  ;;  %v591_v5 = vpop.f32.mrf.mxu3 }
  0xc1   :  { %v4710_v2 = vadd.f32 %v4633_v22, %v339_v62  ;;  %v606_v3 = vadd.f32 %v605_v63, %v586_v35  ;;  %v3987_v62 = vld [vmem:[%s4924_s2 + $0x690] sm:$0xff] }
  0xc2   :  { %2067 = vmatpush.bf16.msra.mxu3 %v3941_v41  ;;  %1811 = vmatmul.bf16.vlgmr.msrb.gmra.mxu1 %v4183_v49 }
  0xc3   :  { %2100 = vmatpush.bf16.msra.mxu1 %v3962_v40  ;;  %v625_v8 = vadd.f32 %v624_v0, %v606_v3  ;;  %1792 = vmatmul.bf16.vlgmr.msrb.gmra.mxu0 %v4181_v48  ;;  %v3981_v40 = vld [vmem:[%s4924_s2 + $0x660] sm:$0xff]  ;;  %v3990_v0 = vld [vmem:[%s4924_s2 + $0x6a8] sm:$0xff] }
  0xc4   :  { %2081 = vmatpush.bf16.msra.mxu0 %v3954_v38  ;;  %3439 = vmatmul.msk.bf16.vlgmr.msrb.gmra.mxu2 %vm277_vm0, %v4081_v15  ;;  %v3986_v3 = vld [vmem:[%s4924_s2 + $0x688] sm:$0xff] }
  0xc5   :  { %2421 = vmatpush.bf16.msrb.mxu2 %v3992_v12  ;;  %v3977_v12 = vld [vmem:[%s4924_s2 + $0x640] sm:$0xff] }
  0xc6   :  { %2068 = vmatpush.bf16.msra.mxu3 %v3940_v51  ;;  %v3988_v51 = vld [vmem:[%s4924_s2 + $0x698] sm:$0xff] }
  0xc7   :  { %2101 = vmatpush.bf16.msra.mxu1 %v3961_v47  ;;  %v643_v16 = vpop.f32.mrf.mxu2  ;;  %v626_v20 = vpop.f32.mrf.mxu1  ;;  %v3967_v47 = vld [vmem:[%s4924_s2 + $0x5f0] sm:$0xff] }
  0xc8   :  { %2082 = vmatpush.bf16.msra.mxu0 %v3953_v43  ;;  %v4734_v17 = vadd.f32 %v643_v16, %v625_v8  ;;  %v607_v18 = vpop.f32.mrf.mxu0  ;;  %v593_v25 = vpop.f32.mrf.mxu3  ;;  %v3989_v43 = vld [vmem:[%s4924_s2 + $0x6a0] sm:$0xff] }
  0xc9   :  { %v608_v22 = vadd.f32 %v607_v18, %v588_v54  ;;  %2422 = vmatpush.bf16.msrb.mxu2 %v3991_v44  ;;  %v3985_v16 = vld [vmem:[%s4924_s2 + $0x680] sm:$0xff] }
  0xca   :  { %2069 = vmatpush.bf16.msra.mxu3 %v3939_v58  ;;  %v653_v24 = vmax.f32 %v4628_v19, %v4734_v17  ;;  %v3966_v58 = vld [vmem:[%s4924_s2 + $0x5e8] sm:$0xff] }
  0xcb   :  { %2102 = vmatpush.bf16.msra.mxu1 %v3960_v56  ;;  %v627_v27 = vadd.f32 %v626_v20, %v608_v22  ;;  %v3976_v20 = vld [vmem:[%s4924_s2 + $0x638] sm:$0xff]  ;;  %v3982_v19 = vld [vmem:[%s4924_s2 + $0x668] sm:$0xff] }
  0xcc   :  { %2083 = vmatpush.bf16.msra.mxu0 %v3952_v55 }
  0xcd   :  { %2070 = vmatmul.bf16.vlgmr.msra.gmra.mxu3 %v4174_v46  ;;  %2423 = vmatpush.bf16.msrb.mxu2 %v3990_v0 }
  0xce   :  { %2359 = vmatpush.bf16.msrb.mxu3 %v3973_v59  ;;  %v3979_v59 = vld [vmem:[%s4924_s2 + $0x650] sm:$0xff] }
  0xcf   :  { %2103 = vmatpush.bf16.msra.mxu1 %v3959_v1  ;;  %v645_v31 = vpop.f32.mrf.mxu2  ;;  %v629_v35 = vpop.f32.mrf.mxu1  ;;  %v3978_v1 = vld [vmem:[%s4924_s2 + $0x648] sm:$0xff] }
  0xd0   :  { %2084 = vmatpush.bf16.msra.mxu0 %v3951_v61  ;;  %v4757_v33 = vadd.f32 %v645_v31, %v627_v27  ;;  %v610_v34 = vpop.f32.mrf.mxu0  ;;  %v883_v42 = vpop.f32.mrf.mxu3  ;;  %v3983_v31 = vld [vmem:[%s4924_s2 + $0x670] sm:$0xff] }
  0xd1   :  { %v611_v38 = vadd.f32 %v610_v34, %v591_v5 }
  0xd2   :  { %2360 = vmatpush.bf16.msrb.mxu3 %v3972_v4  ;;  %v654_v41 = vmax.f32 %v4651_v32, %v4757_v33  ;;  %1816 = vmatmul.bf16.gmra.mxu1 %v4259_v10  ;;  %v2439_v32 = vld [vmem:[%s4926_s1] sm:$0xff] }
  0xd3   :  { %2104 = vmatpush.bf16.msra.mxu1 %v3958_v11  ;;  %v630_v45 = vadd.f32 %v629_v35, %v611_v38  ;;  %1797 = vmatmul.bf16.gmra.mxu0 %v4257_v9  ;;  %v3974_v35 = vld [vmem:[%s4924_s2 + $0x628] sm:$0xff] }
  0xd4   :  { %2085 = vmatpush.bf16.msra.mxu0 %v3950_v6  ;;  %3440 = vmatmul.msk.bf16.gmra.mxu2 %vm277_vm0, %v4148_v37 }
  0xd6   :  { %2361 = vmatpush.bf16.msrb.mxu3 %v3971_v13 }
  0xd7   :  { %2105 = vmatpush.bf16.msra.mxu1 %v3957_v21  ;;  %v648_v53 = vpop.f32.mrf.mxu2  ;;  %v631_v56 = vpop.f32.mrf.mxu1  ;;  %v3984_v21 = vld [vmem:[%s4924_s2 + $0x678] sm:$0xff] }
  0xd8   :  { %2086 = vmatpush.bf16.msra.mxu0 %v3949_v14  ;;  %v4789_v54 = vadd.f32 %v648_v53, %v630_v45  ;;  %v612_v55 = vpop.f32.mrf.mxu0  ;;  %v885_v61 = vpop.f32.mrf.mxu3 }
  0xd9   :  { %v613_v57 = vadd.f32 %v612_v55, %v593_v25 }
  0xda   :  { %2362 = vmatpush.bf16.msrb.mxu3 %v3970_v23  ;;  %v655_v60 = vmax.f32 %v4685_v52, %v4789_v54 }
  0xdb   :  { %2106 = vmatpush.bf16.msra.mxu1 %v3956_v28  ;;  %v632_v63 = vadd.f32 %v631_v56, %v613_v57  ;;  %v3975_v28 = vld [vmem:[%s4924_s2 + $0x630] sm:$0xff] }
  0xdc   :  { %2087 = vmatpush.bf16.msra.mxu0 %v3948_v26 }
  0xdd   :  { %2075 = vmatmul.bf16.gmra.mxu3 %v4251_v7 }
  0xde   :  { %2363 = vmatpush.bf16.msrb.mxu3 %v3969_v29 }
  0xdf   :  { %2107 = vmatpush.bf16.msra.mxu1 %v3955_v36  ;;  %v650_v4 = vpop.f32.mrf.mxu2  ;;  %v921_v8 = vpop.f32.mrf.mxu1 }
  0xe0   :  { %2088 = vmatpush.bf16.msra.mxu0 %v3947_v30  ;;  %v4812_v5 = vadd.f32 %v650_v4, %v632_v63  ;;  %v902_v6 = vpop.f32.mrf.mxu0  ;;  %v888_v14 = vpop.f32.mrf.mxu3 }
  0xe1   :  { %v903_v11 = vadd.f32 %v902_v6, %v883_v42 }
  0xe2   :  { %2364 = vmatpush.bf16.msrb.mxu3 %v3968_v39  ;;  %v656_v13 = vmax.f32 %v4710_v2, %v4812_v5  ;;  %2108 = vmatmul.bf16.vlgmr.msra.gmra.mxu1 %v4183_v49 }
  0xe3   :  { %2397 = vmatpush.bf16.msrb.mxu1 %v3989_v43  ;;  %v922_v18 = vadd.f32 %v921_v8, %v903_v11  ;;  %2089 = vmatmul.bf16.vlgmr.msra.gmra.mxu0 %v4181_v48 }
  0xe4   :  { %2378 = vmatpush.bf16.msrb.mxu0 %v3981_v40  ;;  %3603 = vmatmul.msk.bf16.vlgmr.msra.gmra.mxu2 %vm277_vm0, %v4081_v15 }
  0xe6   :  { %2365 = vmatpush.bf16.msrb.mxu3 %v3967_v47 }
  0xe7   :  { %2398 = vmatpush.bf16.msrb.mxu1 %v3988_v51  ;;  %v940_v22 = vpop.f32.mrf.mxu2  ;;  %v923_v26 = vpop.f32.mrf.mxu1 }
  0xe8   :  { %2379 = vmatpush.bf16.msrb.mxu0 %v3980_v50  ;;  %v941_v23 = vadd.f32 %v940_v22, %v922_v18  ;;  %v904_v25 = vpop.f32.mrf.mxu0  ;;  %v890_v30 = vpop.f32.mrf.mxu3 }
  0xe9   :  { %v905_v27 = vadd.f32 %v904_v25, %v885_v61  ;;  %v2440_v61 = vld [vmem:[%s4926_s1 + $0x8] sm:$0xff] }
  0xea   :  { %2366 = vmatpush.bf16.msrb.mxu3 %v3966_v58  ;;  %v4838_v29 = vmax.f32 %v653_v24, %v941_v23 }
  0xeb   :  { %2399 = vmatpush.bf16.msrb.mxu1 %v3987_v62  ;;  %v924_v34 = vadd.f32 %v923_v26, %v905_v27 }
  0xec   :  { %2380 = vmatpush.bf16.msrb.mxu0 %v3979_v59 }
  0xed   :  { %2367 = vmatmul.bf16.vlgmr.msrb.gmra.mxu3 %v4174_v46 }
  0xee   :  { %4004 = vmatpush.bf16.msra.mxu3 %v3981_v40 }
  0xef   :  { %2400 = vmatpush.bf16.msrb.mxu1 %v3986_v3  ;;  %v942_v17 = vpop.f32.mrf.mxu2  ;;  %v926_v38 = vpop.f32.mrf.mxu1  ;;  %v2442_v3 = vld [vmem:[%s4926_s1 + $0x18] sm:$0xff] }
  0xf0   :  { %2381 = vmatpush.bf16.msrb.mxu0 %v3978_v1  ;;  %v943_v24 = vadd.f32 %v942_v17, %v924_v34  ;;  %v907_v36 = vpop.f32.mrf.mxu0  ;;  %v1180_v42 = vpop.f32.mrf.mxu3 }
  0xf1   :  { %v908_v39 = vadd.f32 %v907_v36, %v888_v14 }
  0xf2   :  { %4005 = vmatpush.bf16.msra.mxu3 %v3980_v50  ;;  %v4853_v40 = vmax.f32 %v654_v41, %v943_v24  ;;  %2113 = vmatmul.bf16.gmra.mxu1 %v4259_v10  ;;  %v4015_v50 = vmov 0  }
  0xf3   :  { %2401 = vmatpush.bf16.msrb.mxu1 %v3985_v16  ;;  %v927_v43 = vadd.f32 %v926_v38, %v908_v39  ;;  %2094 = vmatmul.bf16.gmra.mxu0 %v4257_v9 }
  0xf4   :  { %2382 = vmatpush.bf16.msrb.mxu0 %v3977_v12  ;;  %3604 = vmatmul.msk.bf16.gmra.mxu2 %vm277_vm0, %v4148_v37 }
  0xf5   :  { %4013 = vset.pattern.permute.xlu0 %v4015_v50  ;;  %4014 = vset.pattern.permute.xlu1 %v4015_v50 }
  0xf6   :  { %4006 = vmatpush.bf16.msra.mxu3 %v3979_v59  ;;  %2445 = vperm.xlu0 %4013, %v2439_v32   ;;  %v2441_v59 = vld [vmem:[%s4926_s1 + $0x10] sm:$0xff] }
  0xf7   :  { %2402 = vmatpush.bf16.msrb.mxu1 %v3984_v21  ;;  %v945_v46 = vpop.f32.mrf.mxu2  ;;  %v928_v47 = vpop.f32.mrf.mxu1  ;;  %2455 = vperm.xlu1 %4014, %v2441_v59  }
  0xf8   :  { %2383 = vmatpush.bf16.msrb.mxu0 %v3976_v20  ;;  %v946_v44 = vadd.f32 %v945_v46, %v927_v43  ;;  %v909_v45 = vpop.f32.mrf.mxu0  ;;  %v1182_v51 = vpop.f32.mrf.mxu3 }
  0xf9   :  { %v910_v33 = vadd.f32 %v909_v45, %v890_v30 }
  0xfa   :  { %4007 = vmatpush.bf16.msra.mxu3 %v3978_v1  ;;  %v4865_v41 = vmax.f32 %v655_v60, %v946_v44 }
  0xfb   :  { %2403 = vmatpush.bf16.msrb.mxu1 %v3983_v31  ;;  %v929_v53 = vadd.f32 %v928_v47, %v910_v33 }
  0xfc   :  { %2384 = vmatpush.bf16.msrb.mxu0 %v3975_v28 }
  0xfd   :  { %2372 = vmatmul.bf16.gmra.mxu3 %v4251_v7 }
  0xfe   :  { %4008 = vmatpush.bf16.msra.mxu3 %v3977_v12  ;;  %2450 = vperm.xlu0 %4013, %v2440_v61  }
  0xff   :  { %2404 = vmatpush.bf16.msrb.mxu1 %v3982_v19  ;;  %v947_v55 = vpop.f32.mrf.mxu2  ;;  %v1218_v58 = vpop.f32.mrf.mxu1  ;;  %2460 = vperm.xlu1 %4014, %v2442_v3  }
 0x100   :  { %2385 = vmatpush.bf16.msrb.mxu0 %v3974_v35  ;;  %v948_v56 = vadd.f32 %v947_v55, %v929_v53  ;;  %v1199_v57 = vpop.f32.mrf.mxu0  ;;  %v1185_v7 = vpop.f32.mrf.mxu3 }
 0x101   :  { %v1200_v52 = vadd.f32 %v1199_v57, %v1180_v42 }
 0x102   :  { %4009 = vmatpush.bf16.msra.mxu3 %v3976_v20  ;;  %v4877_v54 = vmax.f32 %v656_v13, %v948_v56  ;;  %2405 = vmatmul.bf16.vlgmr.msrb.gmra.mxu1 %v4183_v49 }
 0x103   :  { %v1219_v60 = vadd.f32 %v1218_v58, %v1200_v52  ;;  %2386 = vmatmul.bf16.vlgmr.msrb.gmra.mxu0 %v4181_v48 }
 0x104   :  { %3767 = vmatmul.msk.bf16.vlgmr.msrb.gmra.mxu2 %vm277_vm0, %v4081_v15 }
 0x106   :  { %4010 = vmatpush.bf16.msra.mxu3 %v3975_v28 }
 0x107   :  { %v1237_v62 = vpop.f32.mrf.mxu2  ;;  %v1220_v1 = vpop.f32.mrf.mxu1 }
 0x108   :  { %v1238_v63 = vadd.f32 %v1237_v62, %v1219_v60  ;;  %v1201_v0 = vpop.f32.mrf.mxu0  ;;  %v1187_v5 = vpop.f32.mrf.mxu3 }
 0x109   :  { %v1202_v2 = vadd.f32 %v1201_v0, %v1182_v51 }
 0x10a   :  { %4011 = vmatpush.bf16.msra.mxu3 %v3974_v35  ;;  %v1247_v4 = vmax.f32 %v4838_v29, %v1238_v63 }
 0x10b   :  { %v1221_v6 = vadd.f32 %v1220_v1, %v1202_v2 }
 0x10d   :  { %2391 = vmatmul.bf16.vlgmr.msra.gmra.mxu3 %v4257_v9 }
 0x10f   :  { %v1239_v48 = vpop.f32.mrf.mxu2  ;;  %v1223_v15 = vpop.f32.mrf.mxu1 }
 0x110   :  { %v1240_v49 = vadd.f32 %v1239_v48, %v1221_v6  ;;  %v1204_v8 = vpop.f32.mrf.mxu0  ;;  %v1477_v13 = vpop.f32.mrf.mxu3 }
 0x111   :  { %v1205_v11 = vadd.f32 %v1204_v8, %v1185_v7 }
 0x112   :  { %v1248_v12 = vmax.f32 %v4853_v40, %v1240_v49  ;;  %2410 = vmatmul.bf16.gmra.mxu1 %v4259_v10 }
 0x113   :  { %v1224_v14 = vadd.f32 %v1223_v15, %v1205_v11 }
 0x114   :  { %3768 = vmatmul.msk.bf16.gmra.mxu2 %vm277_vm0, %v4148_v37 }
 0x117   :  { %v1242_v16 = vpop.f32.mrf.mxu2  ;;  %v1225_v21 = vpop.f32.mrf.mxu1 }
 0x118   :  { %v1243_v18 = vadd.f32 %v1242_v16, %v1224_v14  ;;  %v1206_v20 = vpop.f32.mrf.mxu0  ;;  %v1479_v23 = vpop.f32.mrf.mxu3 }
 0x119   :  { %v1207_v22 = vadd.f32 %v1206_v20, %v1187_v5 }
 0x11a   :  { %v1249_v9 = vmax.f32 %v4865_v41, %v1243_v18 }
 0x11b   :  { %v1226_v25 = vadd.f32 %v1225_v21, %v1207_v22 }
 0x11f   :  { %v1244_v26 = vpop.f32.mrf.mxu2  ;;  %v1515_v29 = vpop.f32.mrf.mxu1 }
 0x120   :  { %v1245_v27 = vadd.f32 %v1244_v26, %v1226_v25  ;;  %v1496_v28 = vpop.f32.mrf.mxu0  ;;  %v1482_v10 = vpop.f32.mrf.mxu3 }
 0x121   :  { %v1497_v30 = vadd.f32 %v1496_v28, %v1477_v13 }
 0x122   :  { %v1250_v31 = vmax.f32 %v4877_v54, %v1245_v27 }
 0x123   :  { %v1516_v34 = vadd.f32 %v1515_v29, %v1497_v30 }
 0x127   :  { %v1534_v35 = vpop.f32.mrf.mxu2  ;;  %v1517_v17 = vpop.f32.mrf.mxu1 }
 0x128   :  { %v1535_v37 = vadd.f32 %v1534_v35, %v1516_v34  ;;  %v1498_v19 = vpop.f32.mrf.mxu0  ;;  %v1484_v38 = vpop.f32.mrf.mxu3 }
 0x129   :  { %v1499_v24 = vadd.f32 %v1498_v19, %v1479_v23 }
 0x12a   :  { %v4894_v36 = vmax.f32 %v1247_v4, %v1535_v37 }
 0x12b   :  { %v1518_v39 = vadd.f32 %v1517_v17, %v1499_v24 }
 0x12f   :  { %v1536_v40 = vpop.f32.mrf.mxu2  ;;  %v1520_v46 = vpop.f32.mrf.mxu1 }
 0x130   :  { %v1537_v42 = vadd.f32 %v1536_v40, %v1518_v39  ;;  %v1501_v43 = vpop.f32.mrf.mxu0  ;;  %v1774_v47 = vpop.f32.mrf.mxu3 }
 0x131   :  { %v1502_v44 = vadd.f32 %v1501_v43, %v1482_v10 }
 0x132   :  { %v4896_v45 = vmax.f32 %v1248_v12, %v1537_v42 }
 0x133   :  { %v1521_v50 = vadd.f32 %v1520_v46, %v1502_v44 }
 0x137   :  { %v1539_v32 = vpop.f32.mrf.mxu2  ;;  %v1522_v51 = vpop.f32.mrf.mxu1 }
 0x138   :  { %v1540_v33 = vadd.f32 %v1539_v32, %v1521_v50  ;;  %v1503_v41 = vpop.f32.mrf.mxu0  ;;  %v1776_v56 = vpop.f32.mrf.mxu3 }
 0x139   :  { %v1504_v53 = vadd.f32 %v1503_v41, %v1484_v38 }
 0x13a   :  { %v4898_v55 = vmax.f32 %v1249_v9, %v1540_v33 }
 0x13b   :  { %v1523_v57 = vadd.f32 %v1522_v51, %v1504_v53 }
 0x13f   :  { %v1541_v58 = vpop.f32.mrf.mxu2  ;;  %v1812_v52 = vpop.f32.mrf.mxu1 }
 0x140   :  { %v1542_v59 = vadd.f32 %v1541_v58, %v1523_v57  ;;  %v1793_v61 = vpop.f32.mrf.mxu0  ;;  %v1779_v60 = vpop.f32.mrf.mxu3 }
 0x141   :  { %v1794_v54 = vadd.f32 %v1793_v61, %v1774_v47 }
 0x142   :  { %v4900_v7 = vmax.f32 %v1250_v31, %v1542_v59 }
 0x143   :  { %v1813_v62 = vadd.f32 %v1812_v52, %v1794_v54 }
 0x147   :  { %v1831_v63 = vpop.f32.mrf.mxu2  ;;  %v1814_v3 = vpop.f32.mrf.mxu1 }
 0x148   :  { %v1832_v0 = vadd.f32 %v1831_v63, %v1813_v62  ;;  %v1795_v1 = vpop.f32.mrf.mxu0  ;;  %v1781_v5 = vpop.f32.mrf.mxu3 }
 0x149   :  { %v1796_v4 = vadd.f32 %v1795_v1, %v1776_v56 }
 0x14a   :  { %v1841_v2 = vmax.f32 %v4894_v36, %v1832_v0 }
 0x14b   :  { %v1815_v6 = vadd.f32 %v1814_v3, %v1796_v4 }
 0x14f   :  { %v1833_v48 = vpop.f32.mrf.mxu2  ;;  %v1817_v15 = vpop.f32.mrf.mxu1 }
 0x150   :  { %v1834_v49 = vadd.f32 %v1833_v48, %v1815_v6  ;;  %v1798_v8 = vpop.f32.mrf.mxu0  ;;  %v2071_v13 = vpop.f32.mrf.mxu3 }
 0x151   :  { %v1799_v11 = vadd.f32 %v1798_v8, %v1779_v60 }
 0x152   :  { %v1842_v12 = vmax.f32 %v4896_v45, %v1834_v49 }
 0x153   :  { %v1818_v14 = vadd.f32 %v1817_v15, %v1799_v11 }
 0x157   :  { %v1836_v16 = vpop.f32.mrf.mxu2  ;;  %v1819_v21 = vpop.f32.mrf.mxu1 }
 0x158   :  { %v4904_v18 = vadd.f32 %v1836_v16, %v1818_v14  ;;  %v1800_v20 = vpop.f32.mrf.mxu0  ;;  %v2073_v23 = vpop.f32.mrf.mxu3 }
 0x159   :  { %v1801_v9 = vadd.f32 %v1800_v20, %v1781_v5 }
 0x15a   :  { %v1843_v22 = vmax.f32 %v4898_v55, %v4904_v18 }
 0x15b   :  { %v1820_v25 = vadd.f32 %v1819_v21, %v1801_v9 }
 0x15f   :  { %v1838_v26 = vpop.f32.mrf.mxu2  ;;  %v2109_v29 = vpop.f32.mrf.mxu1 }
 0x160   :  { %v4908_v27 = vadd.f32 %v1838_v26, %v1820_v25  ;;  %v2090_v28 = vpop.f32.mrf.mxu0  ;;  %v2076_v31 = vpop.f32.mrf.mxu3 }
 0x161   :  { %v2091_v47 = vadd.f32 %v2090_v28, %v2071_v13 }
 0x162   :  { %v1844_v30 = vmax.f32 %v4900_v7, %v4908_v27 }
 0x163   :  { %v2110_v51 = vadd.f32 %v2109_v29, %v2091_v47 }
 0x167   :  { %v2128_v10 = vpop.f32.mrf.mxu2  ;;  %v2111_v35 = vpop.f32.mrf.mxu1 }
 0x168   :  { %v2092_v34 = vpop.f32.mrf.mxu0  ;;  %v2078_v37 = vpop.f32.mrf.mxu3  ;;  %v2129_v57 = vadd.f32 %v2128_v10, %v2110_v51 }
 0x169   :  { %v2093_v50 = vadd.f32 %v2092_v34, %v2073_v23  ;;  %v2446_v41 = vpop.permute.xlu0 %2445 }
 0x16a   :  { %v2138_v62 = vmax.f32 %v1841_v2, %v2129_v57 }
 0x16b   :  { %v2112_v58 = vadd.f32 %v2111_v35, %v2093_v50 }
 0x16f   :  { %v2130_v19 = vpop.f32.mrf.mxu2  ;;  %v2114_v24 = vpop.f32.mrf.mxu1 }
 0x170   :  { %v2095_v17 = vpop.f32.mrf.mxu0  ;;  %v2368_v36 = vpop.f32.mrf.mxu3  ;;  %v2131_v54 = vadd.f32 %v2130_v19, %v2112_v58 }
 0x171   :  { %v2451_v5 = vpop.permute.xlu0 %2450  ;;  %v2096_v8 = vadd.f32 %v2095_v17, %v2076_v31 }
 0x172   :  { %v2139_v1 = vmax.f32 %v1842_v12, %v2131_v54  ;;  %v2456_v12 = vpop.permute.xlu1 %2455 }
 0x173   :  { %v2115_v21 = vadd.f32 %v2114_v24, %v2096_v8 }
 0x177   :  { %v2133_v38 = vpop.f32.mrf.mxu2  ;;  %v2116_v40 = vpop.f32.mrf.mxu1 }
 0x178   :  { %v2097_v39 = vpop.f32.mrf.mxu0  ;;  %v2370_v42 = vpop.f32.mrf.mxu3  ;;  %v2134_v9 = vadd.f32 %v2133_v38, %v2115_v21 }
 0x179   :  { %v2098_v14 = vadd.f32 %v2097_v39, %v2078_v37 }
 0x17a   :  { %v2140_v34 = vmax.f32 %v1843_v22, %v2134_v9 }
 0x17b   :  { %v2117_v23 = vadd.f32 %v2116_v40, %v2098_v14 }
 0x17f   :  { %v2135_v43 = vpop.f32.mrf.mxu2  ;;  %v2406_v44 = vpop.f32.mrf.mxu1 }
 0x180   :  { %v2387_v46 = vpop.f32.mrf.mxu0  ;;  %v2373_v45 = vpop.f32.mrf.mxu3  ;;  %v2136_v28 = vadd.f32 %v2135_v43, %v2117_v23 }
 0x181   :  { %v2388_v32 = vadd.f32 %v2387_v46, %v2368_v36  ;;  %v2461_v36 = vpop.permute.xlu1 %2460 }
 0x182   :  { %v2141_v37 = vmax.f32 %v1844_v30, %v2136_v28 }
 0x183   :  { %v2407_v59 = vadd.f32 %v2406_v44, %v2388_v32 }
 0x187   :  { %v2425_v33 = vpop.f32.mrf.mxu2  ;;  %v2408_v56 = vpop.f32.mrf.mxu1 }
 0x188   :  { %v2389_v53 = vpop.f32.mrf.mxu0  ;;  %v2375_v52 = vpop.f32.mrf.mxu3  ;;  %v2426_v60 = vadd.f32 %v2425_v33, %v2407_v59 }
 0x189   :  { %v2390_v61 = vadd.f32 %v2389_v53, %v2370_v42 }
 0x18a   :  { %v2435_v3 = vmax.f32 %v2138_v62, %v2426_v60 }
 0x18b   :  { %v2409_v63 = vadd.f32 %v2408_v56, %v2390_v61 }
 0x18c   :  { %v2463_v15 = vadd.f32 %v2446_v41, %v2435_v3 }
 0x18f   :  { %v2427_v0 = vpop.f32.mrf.mxu2  ;;  %v2411_v6 = vpop.f32.mrf.mxu1 }
 0x190   :  { %v2428_v4 = vadd.f32 %v2427_v0, %v2409_v63  ;;  %v2392_v49 = vpop.f32.mrf.mxu3 }
 0x191   :  { %v2393_v13 = vadd.f32 %v2392_v49, %v2373_v45 }
 0x192   :  { %v2436_v48 = vmax.f32 %v2139_v1, %v2428_v4 }
 0x193   :  { %v2412_v2 = vadd.f32 %v2411_v6, %v2393_v13 }
 0x194   :  { %v2464_v11 = vadd.f32 %v2451_v5, %v2436_v48 }
 0x196   :  { %v3996_v16 = vpack.c.bf16 %v2464_v11, %v2463_v15 }
 0x197   :  { %v2430_v20 = vpop.f32.mrf.mxu2  ;;  %v2413_v31 = vpop.f32.mrf.mxu1 }
 0x198   :  { %3997 = vst [vmem:[%s4927_s3] sm:$0xff] %v3996_v16   ;;  %v2394_v25 = vpop.f32.mrf.mxu3  ;;  %v2431_v29 = vadd.f32 %v2430_v20, %v2412_v2 }
 0x199   :  { %v2395_v26 = vadd.f32 %v2394_v25, %v2375_v52 }
 0x19a   :  { %v2437_v19 = vmax.f32 %v2140_v34, %v2431_v29 }
 0x19b   :  { %v2414_v10 = vadd.f32 %v2413_v31, %v2395_v26 }
 0x19c   :  { %v2465_v38 = vadd.f32 %v2456_v12, %v2437_v19 }
 0x19f   :  { %v2432_v35 = vpop.f32.mrf.mxu2 }
 0x1a0   :  { %v2433_v17 = vadd.f32 %v2432_v35, %v2414_v10 }
 0x1a2   :  { %v2438_v24 = vmax.f32 %v2141_v37, %v2433_v17 }
 0x1a4   :  { %v2466_v39 = vadd.f32 %v2461_v36, %v2438_v24 }
 0x1a6   :  { %v4001_v40 = vpack.c.bf16 %v2466_v39, %v2465_v38 }
 0x1a8   :  { %4003 = vst [vmem:[%s4927_s3 + $0x8] sm:$0xff] %v4001_v40  }

// kernel: test_model_forward.5
= control target key start
LH: loop header
LB: loop body
LE: loop exit
PB: predicated region body
PF: predicated region fallthrough
CT: control target
= control target key end

     0   :  { %s13716_s0 = inlined_call_operand.vmem [shape: bf16[64,864], index: 0, kind: input, shape index: {}]   ;;  %s13717_s1 = inlined_call_operand.vmem [shape: f32[64,1], index: 1, kind: input, shape index: {}]   ;;  %s13718_s2 = inlined_call_operand.vmem [shape: bf16[8,864,16], index: 2, kind: input, shape index: {}]   ;;  %s13719_s3 = inlined_call_operand.vmem [shape: f32[8,128,64], index: 3, kind: input, shape index: {}]   ;;  %s13720_s4 = inlined_call_operand.vmem [shape: f32[128,1], index: 4, kind: input, shape index: {}]   ;;  %s13721_s5 = inlined_call_operand.vmem [shape: f32[1,128], index: 5, kind: input, shape index: {}]   ;;  %s13722_s6 = inlined_call_operand.<no memory space> [shape: f32[1,1], index: 6, kind: input, shape index: {}]   ;;  %s13723_s7 = inlined_call_operand.hbm [shape: f32[1,2], index: 7, kind: output, shape index: {}]  }
   0x1   :  { %v12_v0 = vstv %s13722_s6 }
   0x2   :  { %13 = vst [vmem:[#allocation2] sm:$0x1] %v12_v0 }
   0x3   :  { %v9855_v1 = vld [vmem:[%s13718_s2 + $0x38] sm:$0xff]  ;;  %v9854_v5 = vld [vmem:[%s13718_s2 + $0x30] sm:$0xff]  ;;  %v9853_v9 = vld [vmem:[%s13718_s2 + $0x28] sm:$0xff] }
   0x4   :  { %v9863_v2 = vld [vmem:[%s13718_s2 + $0x78] sm:$0xff]  ;;  %647 = vmatpush.bf16.msra.mxu0 %v9855_v1  ;;  %v9862_v6 = vld [vmem:[%s13718_s2 + $0x70] sm:$0xff]  ;;  %v9861_v10 = vld [vmem:[%s13718_s2 + $0x68] sm:$0xff] }
   0x5   :  { %v9871_v3 = vld [vmem:[%s13718_s2 + $0xb8] sm:$0xff]  ;;  %676 = vmatpush.bf16.msra.mxu1 %v9863_v2  ;;  %v9870_v7 = vld [vmem:[%s13718_s2 + $0xb0] sm:$0xff]  ;;  %v9869_v11 = vld [vmem:[%s13718_s2 + $0xa8] sm:$0xff] }
   0x6   :  { %v9879_v4 = vld [vmem:[%s13718_s2 + $0xf8] sm:$0xff]  ;;  %705 = vmatpush.bf16.msra.mxu2 %v9871_v3  ;;  %v9878_v8 = vld [vmem:[%s13718_s2 + $0xf0] sm:$0xff]  ;;  %v9877_v12 = vld [vmem:[%s13718_s2 + $0xe8] sm:$0xff] }
   0x7   :  { %734 = vmatpush.bf16.msra.mxu3 %v9879_v4  ;;  %v9852_v13 = vld [vmem:[%s13718_s2 + $0x20] sm:$0xff]  ;;  %v9851_v17 = vld [vmem:[%s13718_s2 + $0x18] sm:$0xff] }
   0x8   :  { %648 = vmatpush.bf16.msra.mxu0 %v9854_v5  ;;  %v9860_v14 = vld [vmem:[%s13718_s2 + $0x60] sm:$0xff]  ;;  %v9859_v18 = vld [vmem:[%s13718_s2 + $0x58] sm:$0xff] }
   0x9   :  { %677 = vmatpush.bf16.msra.mxu1 %v9862_v6  ;;  %v9868_v15 = vld [vmem:[%s13718_s2 + $0xa0] sm:$0xff] }
   0xa   :  { %706 = vmatpush.bf16.msra.mxu2 %v9870_v7  ;;  %v9876_v16 = vld [vmem:[%s13718_s2 + $0xe0] sm:$0xff] }
   0xb   :  { %735 = vmatpush.bf16.msra.mxu3 %v9878_v8 }
   0xc   :  { %649 = vmatpush.bf16.msra.mxu0 %v9853_v9 }
   0xd   :  { %678 = vmatpush.bf16.msra.mxu1 %v9861_v10 }
   0xe   :  { %707 = vmatpush.bf16.msra.mxu2 %v9869_v11 }
   0xf   :  { %736 = vmatpush.bf16.msra.mxu3 %v9877_v12 }
  0x10   :  { %650 = vmatpush.bf16.msra.mxu0 %v9852_v13 }
  0x11   :  { %679 = vmatpush.bf16.msra.mxu1 %v9860_v14 }
  0x12   :  { %14 = vsyncpa [#allocation4], 0  ;;  %708 = vmatpush.bf16.msra.mxu2 %v9868_v15  ;;  %v9867_v19 = vld [vmem:[%s13718_s2 + $0x98] sm:$0xff]  ;;  %v9850_v21 = vld [vmem:[%s13718_s2 + $0x10] sm:$0xff]  ;;  %vm634_vm0 = vcmask 785408   ;;  %s10464_s29 = smov 122  }
  0x13   :  { %737 = vmatpush.bf16.msra.mxu3 %v9876_v16  ;;  %v9875_v20 = vld [vmem:[%s13718_s2 + $0xd8] sm:$0xff]  ;;  %v9858_v22 = vld [vmem:[%s13718_s2 + $0x50] sm:$0xff]  ;;  %v9849_v25 = vld [vmem:[%s13718_s2 + $0x8] sm:$0xff]  ;;  %s10465_s30 = smov 124   ;;  %vm5542_vm1 = vcmask 523264   ;;  %s10466_s11 = smov 120  }
  0x14   :  { %651 = vmatpush.bf16.msra.mxu0 %v9851_v17  ;;  %v9866_v23 = vld [vmem:[%s13718_s2 + $0x90] sm:$0xff]  ;;  %v9857_v26 = vld [vmem:[%s13718_s2 + $0x48] sm:$0xff]  ;;  %v9848_v29 = vld [vmem:[%s13718_s2] sm:$0xff]  ;;  %s10467_s12 = smov 116   ;;  %s10468_s13 = smov 114   ;;  %vm6933_vm5 = vcmask 8192  }
  0x15   :  { %680 = vmatpush.bf16.msra.mxu1 %v9859_v18  ;;  %v9874_v24 = vld [vmem:[%s13718_s2 + $0xd0] sm:$0xff]  ;;  %v9865_v27 = vld [vmem:[%s13718_s2 + $0x88] sm:$0xff]  ;;  %v9856_v30 = vld [vmem:[%s13718_s2 + $0x40] sm:$0xff]  ;;  %s10469_s14 = smov 118   ;;  %s10470_s19 = smov [#allocation3]  }
  0x16   :  { %709 = vmatpush.bf16.msra.mxu2 %v9867_v19  ;;  %v9873_v28 = vld [vmem:[%s13718_s2 + $0xc8] sm:$0xff]  ;;  %v9864_v31 = vld [vmem:[%s13718_s2 + $0x80] sm:$0xff]  ;;  %v9823_v34 = vld [vmem:[%s13716_s0 + $0x18] sm:$0xf0]  ;;  %s6942_s22 = sshll.u32 %s13723_s7, 4  ;;  %s6943_s22 = int_to_ptr.hbm [resolvable:$true] %s6942_s22 }
  0x17   :  { %738 = vmatpush.bf16.msra.mxu3 %v9875_v20  ;;  %v9872_v32 = vld [vmem:[%s13718_s2 + $0xc0] sm:$0xff]  ;;  %v6961_v37 = vld [vmem:[%s13716_s0 + $0x8] sm:$0xf]  ;;  %v9821_v39 = vld [vmem:[%s13716_s0 + $0xc] sm:$0xf] }
  0x18   :  { %652 = vmatpush.bf16.msra.mxu0 %v9850_v21  ;;  %v6953_v33 = vld [vmem:[%s13716_s0] sm:$0xf]  ;;  %v9820_v35 = vld [vmem:[%s13716_s0 + $0x4] sm:$0xf]  ;;  %v6963_v40 = vld [vmem:[%s13716_s0 + $0x24] sm:$0xf0] }
  0x19   :  { %681 = vmatpush.bf16.msra.mxu1 %v9858_v22  ;;  %v6955_v36 = vld [vmem:[%s13716_s0 + $0x1c] sm:$0xf0]  ;;  %v9824_v38 = vld [vmem:[%s13716_s0 + $0x20] sm:$0xf0]  ;;  %v10634_v41 = vor.u32 %v9823_v34, %v6953_v33  ;;  %v10640_v44 = vor.u32 %v9821_v39, %v6963_v40  ;;  %v9887_v45 = vld [vmem:[%s13718_s2 + $0x138] sm:$0xff] }
  0x1a   :  { %710 = vmatpush.bf16.msra.mxu2 %v9866_v23  ;;  %v10636_v42 = vor.u32 %v9820_v35, %v6955_v36  ;;  %v10638_v43 = vor.u32 %v9824_v38, %v6961_v37  ;;  %v9895_v46 = vld [vmem:[%s13718_s2 + $0x178] sm:$0xff]  ;;  %v9909_v47 = vld [vmem:[%s13718_s2 + $0x1e8] sm:$0xff]  ;;  %v9886_v48 = vld [vmem:[%s13718_s2 + $0x130] sm:$0xff] }
  0x1b   :  { %739 = vmatpush.bf16.msra.mxu3 %v9874_v24  ;;  %v9894_v49 = vld [vmem:[%s13718_s2 + $0x170] sm:$0xff]  ;;  %v9901_v50 = vld [vmem:[%s13718_s2 + $0x1a8] sm:$0xff]  ;;  %v9908_v51 = vld [vmem:[%s13718_s2 + $0x1e0] sm:$0xff] }
  0x1c   :  { %653 = vmatpush.bf16.msra.mxu0 %v9849_v25  ;;  %v9900_v52 = vld [vmem:[%s13718_s2 + $0x1a0] sm:$0xff]  ;;  %v9885_v53 = vld [vmem:[%s13718_s2 + $0x128] sm:$0xff]  ;;  %v6981_v55 = vld [vmem:[%s13716_s0 + $0x38] sm:$0xf] }
  0x1d   :  { %682 = vmatpush.bf16.msra.mxu1 %v9857_v26  ;;  %v9893_v54 = vld [vmem:[%s13718_s2 + $0x168] sm:$0xff]  ;;  %v9907_v56 = vld [vmem:[%s13718_s2 + $0x1d8] sm:$0xff]  ;;  %v9830_v57 = vld [vmem:[%s13716_s0 + $0x50] sm:$0xf0] }
  0x1e   :  { %711 = vmatpush.bf16.msra.mxu2 %v9865_v27  ;;  %v9827_v58 = vld [vmem:[%s13716_s0 + $0x3c] sm:$0xf]  ;;  %v6983_v59 = vld [vmem:[%s13716_s0 + $0x54] sm:$0xf0]  ;;  %v6989_v60 = vld [vmem:[%s13716_s0 + $0x40] sm:$0xf]  ;;  %v10712_v3 = vor.u32 %v9830_v57, %v6981_v55 }
  0x1f   :  { %740 = vmatpush.bf16.msra.mxu3 %v9873_v28  ;;  %v9831_v61 = vld [vmem:[%s13716_s0 + $0x58] sm:$0xf0]  ;;  %v9828_v62 = vld [vmem:[%s13716_s0 + $0x44] sm:$0xf]  ;;  %v6991_v63 = vld [vmem:[%s13716_s0 + $0x5c] sm:$0xf0]  ;;  %v10714_v4 = vor.u32 %v9827_v58, %v6983_v59 }
  0x20   :  { %654 = vmatpush.bf16.msra.mxu0 %v9848_v29  ;;  %v9884_v0 = vld [vmem:[%s13718_s2 + $0x120] sm:$0xff]  ;;  %v9906_v2 = vld [vmem:[%s13718_s2 + $0x1d0] sm:$0xff]  ;;  %v10716_v5 = vor.u32 %v9831_v61, %v6989_v60  ;;  %v10718_v6 = vor.u32 %v9828_v62, %v6991_v63  ;;  %v9883_v7 = vld [vmem:[%s13718_s2 + $0x118] sm:$0xff] }
  0x21   :  { %683 = vmatpush.bf16.msra.mxu1 %v9856_v30  ;;  %v9892_v1 = vld [vmem:[%s13718_s2 + $0x160] sm:$0xff]  ;;  %v9891_v8 = vld [vmem:[%s13718_s2 + $0x158] sm:$0xff]  ;;  %v9905_v10 = vld [vmem:[%s13718_s2 + $0x1c8] sm:$0xff] }
  0x22   :  { %712 = vmatpush.bf16.msra.mxu2 %v9864_v31  ;;  %v9899_v9 = vld [vmem:[%s13718_s2 + $0x198] sm:$0xff]  ;;  %v9882_v11 = vld [vmem:[%s13718_s2 + $0x110] sm:$0xff]  ;;  %v9904_v14 = vld [vmem:[%s13718_s2 + $0x1c0] sm:$0xff] }
  0x23   :  { %741 = vmatpush.bf16.msra.mxu3 %v9872_v32  ;;  %655 = vmatmul.bf16.vlgmr.msra.gmra.mxu0 %v10634_v41  ;;  %v9890_v12 = vld [vmem:[%s13718_s2 + $0x150] sm:$0xff]  ;;  %v9881_v15 = vld [vmem:[%s13718_s2 + $0x108] sm:$0xff]  ;;  %v9903_v19 = vld [vmem:[%s13718_s2 + $0x1b8] sm:$0xff] }
  0x24   :  { %684 = vmatmul.bf16.vlgmr.msra.gmra.mxu1 %v10636_v42  ;;  %763 = vmatpush.bf16.msrb.mxu0 %v9887_v45  ;;  %v9898_v13 = vld [vmem:[%s13718_s2 + $0x190] sm:$0xff]  ;;  %v9889_v16 = vld [vmem:[%s13718_s2 + $0x148] sm:$0xff]  ;;  %v7017_v23 = vld [vmem:[%s13716_s0 + $0x78] sm:$0xf] }
  0x25   :  { %713 = vmatmul.bf16.vlgmr.msra.gmra.mxu2 %v10638_v43  ;;  %792 = vmatpush.bf16.msrb.mxu1 %v9895_v46  ;;  %v7009_v17 = vld [vmem:[%s13716_s0 + $0x70] sm:$0xf]  ;;  %v9897_v18 = vld [vmem:[%s13718_s2 + $0x188] sm:$0xff]  ;;  %v9834_v21 = vld [vmem:[%s13716_s0 + $0x74] sm:$0xf] }
  0x26   :  { %742 = vmatmul.bf16.vlgmr.msra.gmra.mxu3 %v10640_v44  ;;  %823 = vmatpush.bf16.msrb.mxu2 %v9901_v50  ;;  %v9837_v20 = vld [vmem:[%s13716_s0 + $0x88] sm:$0xf0]  ;;  %v7011_v22 = vld [vmem:[%s13716_s0 + $0x8c] sm:$0xf0]  ;;  %v9838_v24 = vld [vmem:[%s13716_s0 + $0x90] sm:$0xf0] }
  0x27   :  { %1283 = vmatpush.bf16.msrb.mxu3 %v9909_v47  ;;  %v9835_v25 = vld [vmem:[%s13716_s0 + $0x7c] sm:$0xf]  ;;  %v7019_v26 = vld [vmem:[%s13716_s0 + $0x94] sm:$0xf0]  ;;  %v9880_v27 = vld [vmem:[%s13718_s2 + $0x100] sm:$0xff]  ;;  %v10796_v31 = vor.u32 %v9837_v20, %v7009_v17  ;;  %v10798_v32 = vor.u32 %v9834_v21, %v7011_v22  ;;  %v10800_v33 = vor.u32 %v9838_v24, %v7017_v23 }
  0x28   :  { %764 = vmatpush.bf16.msrb.mxu0 %v9886_v48  ;;  %v9888_v28 = vld [vmem:[%s13718_s2 + $0x140] sm:$0xff]  ;;  %v9902_v30 = vld [vmem:[%s13718_s2 + $0x1b0] sm:$0xff]  ;;  %v10802_v34 = vor.u32 %v9835_v25, %v7019_v26  ;;  %v7037_v35 = vld [vmem:[%s13716_s0 + $0xa8] sm:$0xf] }
  0x29   :  { %793 = vmatpush.bf16.msrb.mxu1 %v9894_v49  ;;  %v9896_v29 = vld [vmem:[%s13718_s2 + $0x180] sm:$0xff]  ;;  %v9841_v37 = vld [vmem:[%s13716_s0 + $0xac] sm:$0xf]  ;;  %v7039_v38 = vld [vmem:[%s13716_s0 + $0xc4] sm:$0xf0] }
  0x2a   :  { %824 = vmatpush.bf16.msrb.mxu2 %v9900_v52  ;;  %v9844_v36 = vld [vmem:[%s13716_s0 + $0xc0] sm:$0xf0]  ;;  %v7045_v39 = vld [vmem:[%s13716_s0 + $0xb0] sm:$0xf]  ;;  %v9845_v40 = vld [vmem:[%s13716_s0 + $0xc8] sm:$0xf0]  ;;  %v10834_v48 = vor.u32 %v9841_v37, %v7039_v38 }
  0x2b   :  { %1284 = vmatpush.bf16.msrb.mxu3 %v9908_v51  ;;  %v9842_v45 = vld [vmem:[%s13716_s0 + $0xb4] sm:$0xf]  ;;  %v7047_v46 = vld [vmem:[%s13716_s0 + $0xcc] sm:$0xf0]  ;;  %v10832_v47 = vor.u32 %v9844_v36, %v7037_v35  ;;  %v10836_v49 = vor.u32 %v9845_v40, %v7045_v39  ;;  %v9825_v52 = vld [vmem:[%s13716_s0 + $0x28] sm:$0xf0] }
  0x2c   :  { %765 = vmatpush.bf16.msrb.mxu0 %v9885_v53  ;;  %v10838_v50 = vor.u32 %v9842_v45, %v7047_v46  ;;  %v6969_v51 = vld [vmem:[%s13716_s0 + $0x10] sm:$0xf]  ;;  %v9822_v53 = vld [vmem:[%s13716_s0 + $0x14] sm:$0xf]  ;;  %v6977_v55 = vld [vmem:[%s13716_s0 + $0x18] sm:$0xf] }
  0x2d   :  { %794 = vmatpush.bf16.msrb.mxu1 %v9893_v54  ;;  %13737 = vst [vmem:[#allocation6_spill] sm:$0xff] %v10836_v49  ;;  %v6971_v54 = vld [vmem:[%s13716_s0 + $0x2c] sm:$0xf0]  ;;  %v10862_v57 = vor.u32 %v9825_v52, %v6969_v51  ;;  %v9917_v60 = vld [vmem:[%s13718_s2 + $0x228] sm:$0xff]  ;;  %v9928_v35 = vld [vmem:[%s13718_s2 + $0x280] sm:$0xff] }
  0x2e   :  { %825 = vmatpush.bf16.msrb.mxu2 %v9899_v9  ;;  %13738 = vst [vmem:[#allocation7_spill] sm:$0xff] %v10838_v50  ;;  %v10864_v58 = vor.u32 %v9822_v53, %v6971_v54  ;;  %v9925_v61 = vld [vmem:[%s13718_s2 + $0x268] sm:$0xff]  ;;  %v9923_v9 = vld [vmem:[%s13718_s2 + $0x258] sm:$0xff]  ;;  %v9930_v20 = vld [vmem:[%s13718_s2 + $0x290] sm:$0xff] }
  0x2f   :  { %1285 = vmatpush.bf16.msrb.mxu3 %v9907_v56  ;;  %v9826_v56 = vld [vmem:[%s13716_s0 + $0x30] sm:$0xf0]  ;;  %v9933_v62 = vld [vmem:[%s13718_s2 + $0x2a8] sm:$0xff]  ;;  %v9936_v36 = vld [vmem:[%s13718_s2 + $0x2c0] sm:$0xff] }
  0x30   :  { %766 = vmatpush.bf16.msrb.mxu0 %v9884_v0  ;;  %v10866_v59 = vor.u32 %v9826_v56, %v6977_v55  ;;  %v9941_v63 = vld [vmem:[%s13718_s2 + $0x2e8] sm:$0xff]  ;;  %v9916_v0 = vld [vmem:[%s13718_s2 + $0x220] sm:$0xff]  ;;  %v9938_v21 = vld [vmem:[%s13718_s2 + $0x2d0] sm:$0xff] }
  0x31   :  { %795 = vmatpush.bf16.msrb.mxu1 %v9892_v1  ;;  %v9924_v1 = vld [vmem:[%s13718_s2 + $0x260] sm:$0xff]  ;;  %v9833_v17 = vld [vmem:[%s13716_s0 + $0x68] sm:$0xf0]  ;;  %v9911_v37 = vld [vmem:[%s13718_s2 + $0x1f8] sm:$0xff] }
  0x32   :  { %826 = vmatpush.bf16.msrb.mxu2 %v9898_v13  ;;  %v9832_v13 = vld [vmem:[%s13716_s0 + $0x60] sm:$0xf0]  ;;  %v9913_v25 = vld [vmem:[%s13718_s2 + $0x208] sm:$0xff]  ;;  %v9919_v38 = vld [vmem:[%s13718_s2 + $0x238] sm:$0xff] }
  0x33   :  { %1286 = vmatpush.bf16.msrb.mxu3 %v9906_v2  ;;  %660 = vmatmul.bf16.gmra.mxu0 %v10712_v3  ;;  %v9932_v2 = vld [vmem:[%s13718_s2 + $0x2a0] sm:$0xff]  ;;  %v9921_v26 = vld [vmem:[%s13718_s2 + $0x248] sm:$0xff]  ;;  %v9927_v39 = vld [vmem:[%s13718_s2 + $0x278] sm:$0xff] }
  0x34   :  { %689 = vmatmul.bf16.gmra.mxu1 %v10714_v4  ;;  %767 = vmatpush.bf16.msrb.mxu0 %v9883_v7  ;;  %v9940_v7 = vld [vmem:[%s13718_s2 + $0x2e0] sm:$0xff]  ;;  %v9935_v40 = vld [vmem:[%s13718_s2 + $0x2b8] sm:$0xff]  ;;  %v7033_v53 = vld [vmem:[%s13716_s0 + $0x88] sm:$0xf] }
  0x35   :  { %718 = vmatmul.bf16.gmra.mxu2 %v10716_v5  ;;  %796 = vmatpush.bf16.msrb.mxu1 %v9891_v8  ;;  %v9915_v8 = vld [vmem:[%s13718_s2 + $0x218] sm:$0xff]  ;;  %v7025_v45 = vld [vmem:[%s13716_s0 + $0x80] sm:$0xf]  ;;  %v9836_v51 = vld [vmem:[%s13716_s0 + $0x84] sm:$0xf] }
  0x36   :  { %747 = vmatmul.bf16.gmra.mxu3 %v10718_v6  ;;  %827 = vmatpush.bf16.msrb.mxu2 %v9897_v18  ;;  %v9914_v18 = vld [vmem:[%s13718_s2 + $0x210] sm:$0xff]  ;;  %v9839_v46 = vld [vmem:[%s13716_s0 + $0x98] sm:$0xf0]  ;;  %v7027_v52 = vld [vmem:[%s13716_s0 + $0x9c] sm:$0xf0] }
  0x37   :  { %1287 = vmatpush.bf16.msrb.mxu3 %v9905_v10  ;;  %v9931_v10 = vld [vmem:[%s13718_s2 + $0x298] sm:$0xff]  ;;  %v9840_v54 = vld [vmem:[%s13716_s0 + $0xa0] sm:$0xf0]  ;;  %v11004_v55 = vor.u32 %v9839_v46, %v7025_v45  ;;  %v11006_v56 = vor.u32 %v9836_v51, %v7027_v52  ;;  %v9946_v51 = vld [vmem:[%s13718_s2 + $0x310] sm:$0xff] }
  0x38   :  { %768 = vmatpush.bf16.msrb.mxu0 %v9882_v11  ;;  %v9939_v11 = vld [vmem:[%s13718_s2 + $0x2d8] sm:$0xff]  ;;  %v9954_v52 = vld [vmem:[%s13718_s2 + $0x350] sm:$0xff] }
  0x39   :  { %797 = vmatpush.bf16.msrb.mxu1 %v9890_v12  ;;  %v6997_v12 = vld [vmem:[%s13716_s0 + $0x48] sm:$0xf]  ;;  %13739 = vst [vmem:[#allocation8_spill] sm:$0xff] %v11004_v55 }
  0x3a   :  { %828 = vmatpush.bf16.msrb.mxu2 %v9896_v29  ;;  %v10939_v22 = vor.u32 %v9832_v13, %v6997_v12  ;;  %v9912_v29 = vld [vmem:[%s13718_s2 + $0x200] sm:$0xff]  ;;  %13740 = vst [vmem:[#allocation9_spill] sm:$0xff] %v11006_v56 }
  0x3b   :  { %1288 = vmatpush.bf16.msrb.mxu3 %v9904_v14  ;;  %v9829_v14 = vld [vmem:[%s13716_s0 + $0x4c] sm:$0xf] }
  0x3c   :  { %769 = vmatpush.bf16.msrb.mxu0 %v9881_v15  ;;  %v6999_v15 = vld [vmem:[%s13716_s0 + $0x64] sm:$0xf0] }
  0x3d   :  { %798 = vmatpush.bf16.msrb.mxu1 %v9889_v16  ;;  %v7005_v16 = vld [vmem:[%s13716_s0 + $0x50] sm:$0xf]  ;;  %v10941_v23 = vor.u32 %v9829_v14, %v6999_v15 }
  0x3e   :  { %1370 = vmatpush.bf16.msra.mxu2 %v9933_v62  ;;  %v10943_v24 = vor.u32 %v9833_v17, %v7005_v16  ;;  %v9926_v62 = vld [vmem:[%s13718_s2 + $0x270] sm:$0xff]  ;;  %v9949_v17 = vld [vmem:[%s13718_s2 + $0x328] sm:$0xff] }
  0x3f   :  { %1289 = vmatpush.bf16.msrb.mxu3 %v9903_v19  ;;  %v9922_v19 = vld [vmem:[%s13718_s2 + $0x250] sm:$0xff] }
  0x40   :  { %770 = vmatpush.bf16.msrb.mxu0 %v9880_v27  ;;  %v9929_v27 = vld [vmem:[%s13718_s2 + $0x288] sm:$0xff] }
  0x41   :  { %799 = vmatpush.bf16.msrb.mxu1 %v9888_v28  ;;  %v9937_v28 = vld [vmem:[%s13718_s2 + $0x2c8] sm:$0xff] }
  0x42   :  { %1371 = vmatpush.bf16.msra.mxu2 %v9932_v2  ;;  %v9846_v2 = vld [vmem:[%s13716_s0 + $0xd0] sm:$0xf0] }
  0x43   :  { %1290 = vmatpush.bf16.msrb.mxu3 %v9902_v30  ;;  %665 = vmatmul.bf16.gmra.mxu0 %v10796_v31  ;;  %v9920_v30 = vld [vmem:[%s13718_s2 + $0x240] sm:$0xff] }
  0x44   :  { %694 = vmatmul.bf16.gmra.mxu1 %v10798_v32  ;;  %1312 = vmatpush.bf16.msra.mxu0 %v9917_v60  ;;  %v9910_v60 = vld [vmem:[%s13718_s2 + $0x1f0] sm:$0xff] }
  0x45   :  { %723 = vmatmul.bf16.gmra.mxu2 %v10800_v33  ;;  %1341 = vmatpush.bf16.msra.mxu1 %v9925_v61  ;;  %v9918_v61 = vld [vmem:[%s13718_s2 + $0x230] sm:$0xff] }
  0x46   :  { %752 = vmatmul.bf16.gmra.mxu3 %v10802_v34  ;;  %1372 = vmatpush.bf16.msra.mxu2 %v9931_v10  ;;  %v9847_v10 = vld [vmem:[%s13716_s0 + $0xd8] sm:$0xf0] }
  0x47   :  { %1399 = vmatpush.bf16.msra.mxu3 %v9941_v63  ;;  %v11017_v63 = vor.u32 %v9840_v54, %v7033_v53  ;;  %v9960_v53 = vld [vmem:[%s13718_s2 + $0x380] sm:$0xff] }
  0x48   :  { %1313 = vmatpush.bf16.msra.mxu0 %v9916_v0  ;;  %v9934_v0 = vld [vmem:[%s13718_s2 + $0x2b0] sm:$0xff] }
  0x49   :  { %1342 = vmatpush.bf16.msra.mxu1 %v9924_v1  ;;  %13741 = vst [vmem:[#allocation10_spill] sm:$0xff] %v11017_v63  ;;  %v7053_v1 = vld [vmem:[%s13716_s0 + $0xb8] sm:$0xf] }
  0x4a   :  { %1373 = vmatpush.bf16.msra.mxu2 %v9930_v20 }
  0x4b   :  { %1400 = vmatpush.bf16.msra.mxu3 %v9940_v7  ;;  %v9843_v7 = vld [vmem:[%s13716_s0 + $0xbc] sm:$0xf] }
  0x4c   :  { %1314 = vmatpush.bf16.msra.mxu0 %v9915_v8  ;;  %v7055_v8 = vld [vmem:[%s13716_s0 + $0xd4] sm:$0xf0] }
  0x4d   :  { %1343 = vmatpush.bf16.msra.mxu1 %v9923_v9  ;;  %v7061_v9 = vld [vmem:[%s13716_s0 + $0xc0] sm:$0xf]  ;;  %v11047_v12 = vor.u32 %v9843_v7, %v7055_v8  ;;  %v9953_v7 = vld [vmem:[%s13718_s2 + $0x348] sm:$0xff]  ;;  %v9959_v8 = vld [vmem:[%s13718_s2 + $0x378] sm:$0xff] }
  0x4e   :  { %1374 = vmatpush.bf16.msra.mxu2 %v9929_v27  ;;  %v11049_v13 = vor.u32 %v9847_v10, %v7061_v9  ;;  %v9970_v27 = vld [vmem:[%s13718_s2 + $0x3d0] sm:$0xff]  ;;  %v9967_v9 = vld [vmem:[%s13718_s2 + $0x3b8] sm:$0xff] }
  0x4f   :  { %1401 = vmatpush.bf16.msra.mxu3 %v9939_v11  ;;  %v11045_v11 = vor.u32 %v9846_v2, %v7053_v1  ;;  %v9945_v2 = vld [vmem:[%s13718_s2 + $0x308] sm:$0xff] }
  0x50   :  { %1315 = vmatpush.bf16.msra.mxu0 %v9914_v18  ;;  %v9963_v18 = vld [vmem:[%s13718_s2 + $0x398] sm:$0xff] }
  0x51   :  { %1344 = vmatpush.bf16.msra.mxu1 %v9922_v19  ;;  %v9971_v19 = vld [vmem:[%s13718_s2 + $0x3d8] sm:$0xff] }
  0x52   :  { %1375 = vmatpush.bf16.msra.mxu2 %v9928_v35 }
  0x53   :  { %670 = vmatmul.bf16.gmra.mxu0 %v10832_v47  ;;  %1402 = vmatpush.bf16.msra.mxu3 %v9938_v21 }
  0x54   :  { %699 = vmatmul.bf16.gmra.mxu1 %v10834_v48  ;;  %1316 = vmatpush.bf16.msra.mxu0 %v9913_v25  ;;  %v9948_v25 = vld [vmem:[%s13718_s2 + $0x320] sm:$0xff] }
  0x55   :  { %728 = vmatmul.bf16.gmra.mxu2 %v10836_v49  ;;  %1345 = vmatpush.bf16.msra.mxu1 %v9921_v26  ;;  %v9962_v26 = vld [vmem:[%s13718_s2 + $0x390] sm:$0xff] }
  0x56   :  { %757 = vmatmul.bf16.gmra.mxu3 %v10838_v50  ;;  %1376 = vmatpush.bf16.msra.mxu2 %v9927_v39  ;;  %v9961_v39 = vld [vmem:[%s13718_s2 + $0x388] sm:$0xff] }
  0x57   :  { %1403 = vmatpush.bf16.msra.mxu3 %v9937_v28 }
  0x58   :  { %1317 = vmatpush.bf16.msra.mxu0 %v9912_v29 }
  0x59   :  { %1346 = vmatpush.bf16.msra.mxu1 %v9920_v30 }
  0x5a   :  { %1377 = vmatpush.bf16.msra.mxu2 %v9926_v62  ;;  %v9968_v62 = vld [vmem:[%s13718_s2 + $0x3c0] sm:$0xff] }
  0x5b   :  { %1404 = vmatpush.bf16.msra.mxu3 %v9936_v36 }
  0x5c   :  { %1318 = vmatpush.bf16.msra.mxu0 %v9911_v37  ;;  %v9947_v37 = vld [vmem:[%s13718_s2 + $0x318] sm:$0xff] }
  0x5d   :  { %1347 = vmatpush.bf16.msra.mxu1 %v9919_v38  ;;  %v9955_v38 = vld [vmem:[%s13718_s2 + $0x358] sm:$0xff] }
  0x5f   :  { %1405 = vmatpush.bf16.msra.mxu3 %v9935_v40  ;;  %v9969_v40 = vld [vmem:[%s13718_s2 + $0x3c8] sm:$0xff] }
  0x60   :  { %1319 = vmatpush.bf16.msra.mxu0 %v9910_v60 }
  0x61   :  { %1348 = vmatpush.bf16.msra.mxu1 %v9918_v61 }
  0x63   :  { %771 = vmatmul.bf16.vlgmr.msrb.gmra.mxu0 %v10862_v57  ;;  %1406 = vmatpush.bf16.msra.mxu3 %v9934_v0 }
  0x64   :  { %800 = vmatmul.bf16.vlgmr.msrb.gmra.mxu1 %v10864_v58  ;;  %1428 = vmatpush.bf16.msrb.mxu0 %v9949_v17  ;;  %v9958_v17 = vld [vmem:[%s13718_s2 + $0x370] sm:$0xff] }
  0x65   :  { %7279 = vmatmul.msk.bf16.vlgmr.msrb.gmra.mxu2 %vm634_vm0, %v10866_v59  ;;  %1459 = vmatpush.bf16.msrb.mxu1 %v9955_v38  ;;  %v9942_v38 = vld [vmem:[%s13718_s2 + $0x2f0] sm:$0xff] }
  0x66   :  { %1291 = vmatmul.bf16.vlgmr.msrb.gmra.mxu3 %v10634_v41  ;;  %1927 = vmatpush.bf16.msrb.mxu2 %v9963_v18 }
  0x67   :  { %1956 = vmatpush.bf16.msrb.mxu3 %v9971_v19 }
  0x68   :  { %1429 = vmatpush.bf16.msrb.mxu0 %v9948_v25 }
  0x69   :  { %1460 = vmatpush.bf16.msrb.mxu1 %v9954_v52  ;;  %v9964_v52 = vld [vmem:[%s13718_s2 + $0x3a0] sm:$0xff] }
  0x6a   :  { %1928 = vmatpush.bf16.msrb.mxu2 %v9962_v26 }
  0x6b   :  { %1957 = vmatpush.bf16.msrb.mxu3 %v9970_v27  ;;  %v9943_v27 = vld [vmem:[%s13718_s2 + $0x2f8] sm:$0xff] }
  0x6c   :  { %1430 = vmatpush.bf16.msrb.mxu0 %v9947_v37 }
  0x6d   :  { %1461 = vmatpush.bf16.msrb.mxu1 %v9953_v7 }
  0x6e   :  { %1929 = vmatpush.bf16.msrb.mxu2 %v9961_v39  ;;  %v9950_v39 = vld [vmem:[%s13718_s2 + $0x330] sm:$0xff] }
  0x6f   :  { %1958 = vmatpush.bf16.msrb.mxu3 %v9969_v40  ;;  %v9956_v40 = vld [vmem:[%s13718_s2 + $0x360] sm:$0xff] }
  0x70   :  { %1431 = vmatpush.bf16.msrb.mxu0 %v9946_v51 }
  0x72   :  { %1930 = vmatpush.bf16.msrb.mxu2 %v9960_v53 }
  0x73   :  { %776 = vmatmul.bf16.gmra.mxu0 %v10939_v22  ;;  %1959 = vmatpush.bf16.msrb.mxu3 %v9968_v62 }
  0x74   :  { %805 = vmatmul.bf16.gmra.mxu1 %v10941_v23  ;;  %1432 = vmatpush.bf16.msrb.mxu0 %v9945_v2 }
  0x75   :  { %7280 = vmatmul.msk.bf16.gmra.mxu2 %vm634_vm0, %v10943_v24 }
  0x76   :  { %1296 = vmatmul.bf16.gmra.mxu3 %v10712_v3  ;;  %1931 = vmatpush.bf16.msrb.mxu2 %v9959_v8 }
  0x77   :  { %1960 = vmatpush.bf16.msrb.mxu3 %v9967_v9 }
  0x7a   :  { %1932 = vmatpush.bf16.msrb.mxu2 %v9958_v17 }
  0x83   :  { %781 = vmatmul.bf16.gmra.mxu0 %v11004_v55 }
  0x84   :  { %810 = vmatmul.bf16.gmra.mxu1 %v11006_v56 }
  0x85   :  { %7281 = vmatmul.msk.bf16.gmra.mxu2 %vm634_vm0, %v11017_v63 }
  0x86   :  { %1301 = vmatmul.bf16.gmra.mxu3 %v10796_v31 }
  0x93   :  { %786 = vmatmul.bf16.gmra.mxu0 %v11045_v11 }
  0x94   :  { %815 = vmatmul.bf16.gmra.mxu1 %v11047_v12 }
  0x95   :  { %7282 = vmatmul.msk.bf16.gmra.mxu2 %vm634_vm0, %v11049_v13 }
  0x96   :  { %1306 = vmatmul.bf16.gmra.mxu3 %v10832_v47 }
  0xa0   :  { %v656_v14 = vpop.f32.mrf.mxu0 }
  0xa1   :  { %v685_v15 = vpop.f32.mrf.mxu1 }
  0xa2   :  { %v686_v16 = vadd.f32 %v685_v15, %v656_v14  ;;  %v9944_v15 = vld [vmem:[%s13718_s2 + $0x300] sm:$0xff] }
  0xa3   :  { %1320 = vmatmul.bf16.vlgmr.msra.gmra.mxu0 %v10636_v42 }
  0xa4   :  { %1349 = vmatmul.bf16.vlgmr.msra.gmra.mxu1 %v10638_v43  ;;  %1433 = vmatpush.bf16.msrb.mxu0 %v9944_v15 }
  0xa5   :  { %1378 = vmatmul.bf16.vlgmr.msra.gmra.mxu2 %v10640_v44 }
  0xa6   :  { %1407 = vmatmul.bf16.vlgmr.msra.gmra.mxu3 %v10862_v57 }
  0xa8   :  { %v714_v20 = vpop.f32.mrf.mxu2  ;;  %v658_v29 = vpop.f32.mrf.mxu0  ;;  %1434 = vmatpush.bf16.msrb.mxu0 %v9943_v27 }
  0xa9   :  { %v743_v21 = vpop.f32.mrf.mxu3  ;;  %v715_v28 = vadd.f32 %v714_v20, %v686_v16  ;;  %v687_v30 = vpop.f32.mrf.mxu1  ;;  %v9952_v16 = vld [vmem:[%s13718_s2 + $0x340] sm:$0xff] }
  0xaa   :  { %v688_v35 = vadd.f32 %v687_v30, %v658_v29  ;;  %1462 = vmatpush.bf16.msrb.mxu1 %v9952_v16  ;;  %v9957_v29 = vld [vmem:[%s13718_s2 + $0x368] sm:$0xff] }
  0xab   :  { %v11078_v36 = vadd.f32 %v743_v21, %v715_v28  ;;  %v9966_v21 = vld [vmem:[%s13718_s2 + $0x3b0] sm:$0xff]  ;;  %v9951_v28 = vld [vmem:[%s13718_s2 + $0x338] sm:$0xff]  ;;  %v9965_v30 = vld [vmem:[%s13718_s2 + $0x3a8] sm:$0xff]  ;;  %1933 = vmatpush.bf16.msrb.mxu2 %v9957_v29 }
  0xac   :  { %1961 = vmatpush.bf16.msrb.mxu3 %v9966_v21  ;;  %1435 = vmatpush.bf16.msrb.mxu0 %v9942_v38 }
  0xae   :  { %1463 = vmatpush.bf16.msrb.mxu1 %v9951_v28 }
  0xaf   :  { %1934 = vmatpush.bf16.msrb.mxu2 %v9956_v40 }
  0xb0   :  { %v716_v45 = vpop.f32.mrf.mxu2  ;;  %v661_v60 = vpop.f32.mrf.mxu0  ;;  %1962 = vmatpush.bf16.msrb.mxu3 %v9965_v30 }
  0xb1   :  { %v745_v46 = vpop.f32.mrf.mxu3  ;;  %v717_v54 = vadd.f32 %v716_v45, %v688_v35  ;;  %v690_v61 = vpop.f32.mrf.mxu1 }
  0xb2   :  { %v691_v0 = vadd.f32 %v690_v61, %v661_v60  ;;  %1464 = vmatpush.bf16.msrb.mxu1 %v9950_v39 }
  0xb3   :  { %v11104_v1 = vadd.f32 %v745_v46, %v717_v54  ;;  %1325 = vmatmul.bf16.gmra.mxu0 %v10714_v4 }
  0xb4   :  { %1354 = vmatmul.bf16.gmra.mxu1 %v10716_v5  ;;  %1963 = vmatpush.bf16.msrb.mxu3 %v9964_v52  ;;  %v9987_v52 = vld [vmem:[%s13718_s2 + $0x458] sm:$0xff] }
  0xb5   :  { %1383 = vmatmul.bf16.gmra.mxu2 %v10718_v6 }
  0xb6   :  { %1412 = vmatmul.bf16.gmra.mxu3 %v10939_v22  ;;  %2014 = vmatpush.bf16.msra.mxu1 %v9987_v52  ;;  %v9983_v52 = vld [vmem:[%s13718_s2 + $0x438] sm:$0xff] }
  0xb8   :  { %v719_v10 = vpop.f32.mrf.mxu2  ;;  %v663_v19 = vpop.f32.mrf.mxu0 }
  0xb9   :  { %v748_v14 = vpop.f32.mrf.mxu3  ;;  %v720_v18 = vadd.f32 %v719_v10, %v691_v0  ;;  %v692_v20 = vpop.f32.mrf.mxu1 }
  0xba   :  { %v693_v25 = vadd.f32 %v692_v20, %v663_v19 }
  0xbb   :  { %v11134_v26 = vadd.f32 %v748_v14, %v720_v18 }
  0xc0   :  { %v721_v35 = vpop.f32.mrf.mxu2  ;;  %v666_v46 = vpop.f32.mrf.mxu0 }
  0xc1   :  { %v750_v37 = vpop.f32.mrf.mxu3  ;;  %v722_v45 = vadd.f32 %v721_v35, %v693_v25  ;;  %v695_v51 = vpop.f32.mrf.mxu1 }
  0xc2   :  { %v696_v53 = vadd.f32 %v695_v51, %v666_v46  ;;  %v9979_v51 = vld [vmem:[%s13718_s2 + $0x418] sm:$0xff] }
  0xc3   :  { %v11160_v54 = vadd.f32 %v750_v37, %v722_v45  ;;  %1330 = vmatmul.bf16.gmra.mxu0 %v10798_v32 }
  0xc4   :  { %1359 = vmatmul.bf16.gmra.mxu1 %v10800_v33  ;;  %1985 = vmatpush.bf16.msra.mxu0 %v9979_v51  ;;  %v9975_v51 = vld [vmem:[%s13718_s2 + $0x3f8] sm:$0xff] }
  0xc5   :  { %1388 = vmatmul.bf16.gmra.mxu2 %v10802_v34 }
  0xc6   :  { %1417 = vmatmul.bf16.gmra.mxu3 %v11004_v55 }
  0xc8   :  { %v724_v60 = vpop.f32.mrf.mxu2  ;;  %v668_v0 = vpop.f32.mrf.mxu0 }
  0xc9   :  { %v753_v61 = vpop.f32.mrf.mxu3  ;;  %v725_v62 = vadd.f32 %v724_v60, %v696_v53  ;;  %v697_v2 = vpop.f32.mrf.mxu1  ;;  %v10003_v53 = vld [vmem:[%s13718_s2 + $0x4d8] sm:$0xff] }
  0xca   :  { %v698_v7 = vadd.f32 %v697_v2, %v668_v0  ;;  %2072 = vmatpush.bf16.msra.mxu3 %v10003_v53  ;;  %v9986_v0 = vld [vmem:[%s13718_s2 + $0x450] sm:$0xff] }
  0xcb   :  { %v11166_v8 = vadd.f32 %v753_v61, %v725_v62  ;;  %v9978_v62 = vld [vmem:[%s13718_s2 + $0x410] sm:$0xff]  ;;  %2015 = vmatpush.bf16.msra.mxu1 %v9986_v0 }
  0xcc   :  { %v9994_v2 = vld [vmem:[%s13718_s2 + $0x490] sm:$0xff]  ;;  %1986 = vmatpush.bf16.msra.mxu0 %v9978_v62 }
  0xcd   :  { %v9974_v62 = vld [vmem:[%s13718_s2 + $0x3f0] sm:$0xff] }
  0xce   :  { %v9982_v0 = vld [vmem:[%s13718_s2 + $0x430] sm:$0xff] }
  0xd0   :  { %v726_v9 = vpop.f32.mrf.mxu2  ;;  %v671_v15 = vpop.f32.mrf.mxu0 }
  0xd1   :  { %v755_v10 = vpop.f32.mrf.mxu3  ;;  %v727_v14 = vadd.f32 %v726_v9, %v698_v7  ;;  %v700_v16 = vpop.f32.mrf.mxu1 }
  0xd2   :  { %v701_v17 = vadd.f32 %v700_v16, %v671_v15 }
  0xd3   :  { %v11168_v18 = vadd.f32 %v755_v10, %v727_v14  ;;  %1335 = vmatmul.bf16.gmra.mxu0 %v10834_v48  ;;  %v10002_v14 = vld [vmem:[%s13718_s2 + $0x4d0] sm:$0xff] }
  0xd4   :  { %1364 = vmatmul.bf16.gmra.mxu1 %v10836_v49  ;;  %2073 = vmatpush.bf16.msra.mxu3 %v10002_v14 }
  0xd5   :  { %1393 = vmatmul.bf16.gmra.mxu2 %v10838_v50 }
  0xd6   :  { %1422 = vmatmul.bf16.gmra.mxu3 %v11045_v11 }
  0xd8   :  { %v729_v19 = vpop.f32.mrf.mxu2  ;;  %v673_v25 = vpop.f32.mrf.mxu0 }
  0xd9   :  { %v758_v20 = vpop.f32.mrf.mxu3  ;;  %v730_v21 = vadd.f32 %v729_v19, %v701_v17  ;;  %v702_v27 = vpop.f32.mrf.mxu1  ;;  %v9977_v17 = vld [vmem:[%s13718_s2 + $0x408] sm:$0xff] }
  0xda   :  { %v703_v28 = vadd.f32 %v702_v27, %v673_v25  ;;  %v9985_v19 = vld [vmem:[%s13718_s2 + $0x448] sm:$0xff]  ;;  %1987 = vmatpush.bf16.msra.mxu0 %v9977_v17  ;;  %v9976_v27 = vld [vmem:[%s13718_s2 + $0x400] sm:$0xff] }
  0xdb   :  { %v11174_v29 = vadd.f32 %v758_v20, %v730_v21  ;;  %v9993_v20 = vld [vmem:[%s13718_s2 + $0x488] sm:$0xff]  ;;  %2016 = vmatpush.bf16.msra.mxu1 %v9985_v19 }
  0xdc   :  { %v9973_v19 = vld [vmem:[%s13718_s2 + $0x3e8] sm:$0xff] }
  0xde   :  { %1988 = vmatpush.bf16.msra.mxu0 %v9976_v27 }
  0xe0   :  { %v731_v30 = vpop.f32.mrf.mxu2  ;;  %v772_v38 = vpop.f32.mrf.mxu0 }
  0xe1   :  { %v760_v35 = vpop.f32.mrf.mxu3  ;;  %v732_v37 = vadd.f32 %v731_v30, %v703_v28  ;;  %v801_v39 = vpop.f32.mrf.mxu1  ;;  %v773_v40 = vadd.f32 %v772_v38, %v11078_v36  ;;  %v9995_v36 = vld [vmem:[%s13718_s2 + $0x498] sm:$0xff]  ;;  %v9984_v28 = vld [vmem:[%s13718_s2 + $0x440] sm:$0xff] }
  0xe2   :  { %2043 = vmatpush.bf16.msra.mxu2 %v9995_v36  ;;  %v9992_v30 = vld [vmem:[%s13718_s2 + $0x480] sm:$0xff]  ;;  %2017 = vmatpush.bf16.msra.mxu1 %v9984_v28  ;;  %v9999_v36 = vld [vmem:[%s13718_s2 + $0x4b8] sm:$0xff] }
  0xe3   :  { %v11177_v45 = vadd.f32 %v760_v35, %v732_v37  ;;  %v802_v46 = vadd.f32 %v801_v39, %v773_v40  ;;  %1436 = vmatmul.bf16.vlgmr.msrb.gmra.mxu0 %v10864_v58  ;;  %v10000_v39 = vld [vmem:[%s13718_s2 + $0x4c0] sm:$0xff] }
  0xe4   :  { %7607 = vmatmul.msk.bf16.vlgmr.msrb.gmra.mxu1 %vm634_vm0, %v10866_v59  ;;  %1989 = vmatpush.bf16.msra.mxu0 %v9975_v51  ;;  %v9972_v28 = vld [vmem:[%s13718_s2 + $0x3e0] sm:$0xff] }
  0xe5   :  { %1935 = vmatmul.bf16.vlgmr.msrb.gmra.mxu2 %v10634_v41 }
  0xe6   :  { %1964 = vmatmul.bf16.vlgmr.msrb.gmra.mxu3 %v10636_v42  ;;  %2044 = vmatpush.bf16.msra.mxu2 %v9994_v2  ;;  %v9990_v2 = vld [vmem:[%s13718_s2 + $0x470] sm:$0xff] }
  0xe7   :  { %2018 = vmatpush.bf16.msra.mxu1 %v9983_v52 }
  0xe8   :  { %v830_v60 = vpop.f32.mrf.mxu2  ;;  %v774_v9 = vpop.f32.mrf.mxu0  ;;  %1990 = vmatpush.bf16.msra.mxu0 %v9974_v62 }
  0xe9   :  { %v11196_v61 = vpop.f32.mrf.mxu3  ;;  %v11207_v7 = vadd.f32 %v830_v60, %v802_v46  ;;  %v803_v10 = vpop.f32.mrf.mxu1  ;;  %v775_v15 = vadd.f32 %v774_v9, %v11104_v1  ;;  %v10001_v1 = vld [vmem:[%s13718_s2 + $0x4c8] sm:$0xff] }
  0xea   :  { %2045 = vmatpush.bf16.msra.mxu2 %v9993_v20  ;;  %2074 = vmatpush.bf16.msra.mxu3 %v10001_v1  ;;  %v9981_v20 = vld [vmem:[%s13718_s2 + $0x428] sm:$0xff] }
  0xeb   :  { %v804_v16 = vadd.f32 %v803_v10, %v775_v15  ;;  %v9998_v15 = vld [vmem:[%s13718_s2 + $0x4b0] sm:$0xff]  ;;  %2019 = vmatpush.bf16.msra.mxu1 %v9982_v0  ;;  %v9989_v1 = vld [vmem:[%s13718_s2 + $0x468] sm:$0xff] }
  0xec   :  { %1991 = vmatpush.bf16.msra.mxu0 %v9973_v19 }
  0xee   :  { %2046 = vmatpush.bf16.msra.mxu2 %v9992_v30  ;;  %2075 = vmatpush.bf16.msra.mxu3 %v10000_v39  ;;  %v9980_v30 = vld [vmem:[%s13718_s2 + $0x420] sm:$0xff] }
  0xef   :  { %2020 = vmatpush.bf16.msra.mxu1 %v9981_v20 }
  0xf0   :  { %v832_v21 = vpop.f32.mrf.mxu2  ;;  %v777_v37 = vpop.f32.mrf.mxu0  ;;  %1992 = vmatpush.bf16.msra.mxu0 %v9972_v28 }
  0xf1   :  { %v11225_v25 = vpop.f32.mrf.mxu3  ;;  %v11236_v35 = vadd.f32 %v832_v21, %v804_v16  ;;  %v806_v38 = vpop.f32.mrf.mxu1  ;;  %v778_v40 = vadd.f32 %v777_v37, %v11134_v26  ;;  %v9991_v26 = vld [vmem:[%s13718_s2 + $0x478] sm:$0xff]  ;;  %v9988_v37 = vld [vmem:[%s13718_s2 + $0x460] sm:$0xff] }
  0xf2   :  { %2047 = vmatpush.bf16.msra.mxu2 %v9991_v26  ;;  %2076 = vmatpush.bf16.msra.mxu3 %v9999_v36 }
  0xf3   :  { %v807_v46 = vadd.f32 %v806_v38, %v778_v40  ;;  %1441 = vmatmul.bf16.gmra.mxu0 %v10941_v23  ;;  %2021 = vmatpush.bf16.msra.mxu1 %v9980_v30 }
  0xf4   :  { %7608 = vmatmul.msk.bf16.gmra.mxu1 %vm634_vm0, %v10943_v24 }
  0xf5   :  { %1940 = vmatmul.bf16.gmra.mxu2 %v10712_v3 }
  0xf6   :  { %1969 = vmatmul.bf16.gmra.mxu3 %v10714_v4  ;;  %2048 = vmatpush.bf16.msra.mxu2 %v9990_v2 }
  0xf7   :  { %2077 = vmatpush.bf16.msra.mxu3 %v9998_v15 }
  0xf8   :  { %v835_v53 = vpop.f32.mrf.mxu2  ;;  %v779_v10 = vpop.f32.mrf.mxu0 }
  0xf9   :  { %v11259_v60 = vpop.f32.mrf.mxu3  ;;  %v11270_v9 = vadd.f32 %v835_v53, %v807_v46  ;;  %v808_v14 = vpop.f32.mrf.mxu1  ;;  %v780_v16 = vadd.f32 %v779_v10, %v11160_v54  ;;  %v9997_v54 = vld [vmem:[%s13718_s2 + $0x4a8] sm:$0xff]  ;;  %v9996_v46 = vld [vmem:[%s13718_s2 + $0x4a0] sm:$0xff] }
  0xfa   :  { %2049 = vmatpush.bf16.msra.mxu2 %v9989_v1 }
  0xfb   :  { %v809_v17 = vadd.f32 %v808_v14, %v780_v16  ;;  %2078 = vmatpush.bf16.msra.mxu3 %v9997_v54 }
  0xfe   :  { %2050 = vmatpush.bf16.msra.mxu2 %v9988_v37 }
  0xff   :  { %2079 = vmatpush.bf16.msra.mxu3 %v9996_v46 }
 0x100   :  { %v837_v21 = vpop.f32.mrf.mxu2  ;;  %v782_v39 = vpop.f32.mrf.mxu0 }
 0x101   :  { %v11288_v27 = vpop.f32.mrf.mxu3  ;;  %v11299_v38 = vadd.f32 %v837_v21, %v809_v17  ;;  %v811_v40 = vpop.f32.mrf.mxu1  ;;  %v783_v51 = vadd.f32 %v782_v39, %v11166_v8 }
 0x103   :  { %v812_v52 = vadd.f32 %v811_v40, %v783_v51  ;;  %1446 = vmatmul.bf16.gmra.mxu0 %v11006_v56 }
 0x104   :  { %7609 = vmatmul.msk.bf16.gmra.mxu1 %vm634_vm0, %v11017_v63 }
 0x105   :  { %1945 = vmatmul.bf16.gmra.mxu2 %v10796_v31 }
 0x106   :  { %1974 = vmatmul.bf16.gmra.mxu3 %v10798_v32 }
 0x108   :  { %v840_v26 = vpop.f32.mrf.mxu2  ;;  %v784_v8 = vpop.f32.mrf.mxu0 }
 0x109   :  { %v11310_v36 = vpop.f32.mrf.mxu3  ;;  %v11312_v53 = vadd.f32 %v840_v26, %v812_v52  ;;  %v813_v62 = vpop.f32.mrf.mxu1  ;;  %v785_v0 = vadd.f32 %v784_v8, %v11168_v18  ;;  %v10017_v8 = vld [vmem:[%s13718_s2 + $0x548] sm:$0xff] }
 0x10a   :  { %2571 = vmatpush.bf16.msrb.mxu1 %v10017_v8  ;;  %v10022_v8 = vld [vmem:[%s13718_s2 + $0x570] sm:$0xff] }
 0x10b   :  { %v814_v2 = vadd.f32 %v813_v62, %v785_v0  ;;  %v10033_v62 = vld [vmem:[%s13718_s2 + $0x5c8] sm:$0xff] }
 0x10c   :  { %2629 = vmatpush.bf16.msrb.mxu3 %v10033_v62 }
 0x110   :  { %v842_v10 = vpop.f32.mrf.mxu2  ;;  %v787_v16 = vpop.f32.mrf.mxu0 }
 0x111   :  { %v11315_v14 = vpop.f32.mrf.mxu3  ;;  %v11317_v15 = vadd.f32 %v842_v10, %v814_v2  ;;  %v816_v17 = vpop.f32.mrf.mxu1  ;;  %v788_v19 = vadd.f32 %v787_v16, %v11174_v29  ;;  %v10016_v2 = vld [vmem:[%s13718_s2 + $0x540] sm:$0xff] }
 0x112   :  { %v10024_v10 = vld [vmem:[%s13718_s2 + $0x580] sm:$0xff]  ;;  %2572 = vmatpush.bf16.msrb.mxu1 %v10016_v2 }
 0x113   :  { %v817_v20 = vadd.f32 %v816_v17, %v788_v19  ;;  %1451 = vmatmul.bf16.gmra.mxu0 %v11047_v12  ;;  %v10032_v16 = vld [vmem:[%s13718_s2 + $0x5c0] sm:$0xff] }
 0x114   :  { %7610 = vmatmul.msk.bf16.gmra.mxu1 %vm634_vm0, %v11049_v13  ;;  %2630 = vmatpush.bf16.msrb.mxu3 %v10032_v16 }
 0x115   :  { %1950 = vmatmul.bf16.gmra.mxu2 %v10832_v47 }
 0x116   :  { %1979 = vmatmul.bf16.gmra.mxu3 %v10834_v48 }
 0x118   :  { %v845_v18 = vpop.f32.mrf.mxu2  ;;  %v789_v21 = vpop.f32.mrf.mxu0 }
 0x119   :  { %v11325_v1 = vpop.f32.mrf.mxu3  ;;  %v11327_v54 = vadd.f32 %v845_v18, %v817_v20  ;;  %v818_v28 = vpop.f32.mrf.mxu1  ;;  %v790_v30 = vadd.f32 %v789_v21, %v11177_v45  ;;  %v10025_v45 = vld [vmem:[%s13718_s2 + $0x588] sm:$0xff] }
 0x11a   :  { %2600 = vmatpush.bf16.msrb.mxu2 %v10025_v45 }
 0x11b   :  { %v819_v29 = vadd.f32 %v818_v28, %v790_v30  ;;  %v10009_v30 = vld [vmem:[%s13718_s2 + $0x508] sm:$0xff] }
 0x11c   :  { %2103 = vmatpush.bf16.msrb.mxu0 %v10009_v30  ;;  %v10006_v30 = vld [vmem:[%s13718_s2 + $0x4f0] sm:$0xff] }
 0x11e   :  { %2601 = vmatpush.bf16.msrb.mxu2 %v10024_v10 }
 0x120   :  { %v847_v37 = vpop.f32.mrf.mxu2  ;;  %v1321_v46 = vpop.f32.mrf.mxu0 }
 0x121   :  { %v11330_v39 = vpop.f32.mrf.mxu3  ;;  %v11332_v40 = vadd.f32 %v847_v37, %v819_v29  ;;  %v1350_v51 = vpop.f32.mrf.mxu1  ;;  %v1322_v52 = vadd.f32 %v1321_v46, %v11196_v61  ;;  %v10015_v29 = vld [vmem:[%s13718_s2 + $0x538] sm:$0xff] }
 0x122   :  { %v10023_v37 = vld [vmem:[%s13718_s2 + $0x578] sm:$0xff]  ;;  %2573 = vmatpush.bf16.msrb.mxu1 %v10015_v29  ;;  %v10012_v29 = vld [vmem:[%s13718_s2 + $0x520] sm:$0xff] }
 0x123   :  { %v1351_v26 = vadd.f32 %v1350_v51, %v1322_v52  ;;  %1993 = vmatmul.bf16.vlgmr.msra.gmra.mxu0 %v10638_v43  ;;  %2602 = vmatpush.bf16.msrb.mxu2 %v10023_v37  ;;  %v10008_v52 = vld [vmem:[%s13718_s2 + $0x500] sm:$0xff] }
 0x124   :  { %2022 = vmatmul.bf16.vlgmr.msra.gmra.mxu1 %v10640_v44  ;;  %2104 = vmatpush.bf16.msrb.mxu0 %v10008_v52  ;;  %v10020_v37 = vld [vmem:[%s13718_s2 + $0x560] sm:$0xff] }
 0x125   :  { %2051 = vmatmul.bf16.vlgmr.msra.gmra.mxu2 %v10862_v57  ;;  %v10028_v52 = vld [vmem:[%s13718_s2 + $0x5a0] sm:$0xff] }
 0x126   :  { %2080 = vmatmul.bf16.vlgmr.msra.gmra.mxu3 %v10864_v58 }
 0x127   :  { %2603 = vmatpush.bf16.msrb.mxu2 %v10022_v8 }
 0x128   :  { %v1379_v61 = vpop.f32.mrf.mxu2  ;;  %v1323_v19 = vpop.f32.mrf.mxu0 }
 0x129   :  { %v1408_v0 = vpop.f32.mrf.mxu3  ;;  %v1380_v17 = vadd.f32 %v1379_v61, %v1351_v26  ;;  %v1352_v20 = vpop.f32.mrf.mxu1  ;;  %v1324_v18 = vadd.f32 %v1323_v19, %v11225_v25  ;;  %v10031_v25 = vld [vmem:[%s13718_s2 + $0x5b8] sm:$0xff]  ;;  %v10014_v26 = vld [vmem:[%s13718_s2 + $0x530] sm:$0xff]  ;;  %v10013_v19 = vld [vmem:[%s13718_s2 + $0x528] sm:$0xff] }
 0x12a   :  { %2631 = vmatpush.bf16.msrb.mxu3 %v10031_v25  ;;  %2574 = vmatpush.bf16.msrb.mxu1 %v10014_v26 }
 0x12b   :  { %v11358_v21 = vadd.f32 %v1408_v0, %v1380_v17  ;;  %v1353_v28 = vadd.f32 %v1352_v20, %v1324_v18  ;;  %v10030_v0 = vld [vmem:[%s13718_s2 + $0x5b0] sm:$0xff]  ;;  %v10007_v17 = vld [vmem:[%s13718_s2 + $0x4f8] sm:$0xff]  ;;  %v10029_v20 = vld [vmem:[%s13718_s2 + $0x5a8] sm:$0xff] }
 0x12c   :  { %2105 = vmatpush.bf16.msrb.mxu0 %v10007_v17  ;;  %v10004_v17 = vld [vmem:[%s13718_s2 + $0x4e0] sm:$0xff] }
 0x12e   :  { %2632 = vmatpush.bf16.msrb.mxu3 %v10030_v0  ;;  %2575 = vmatpush.bf16.msrb.mxu1 %v10013_v19  ;;  %v10019_v0 = vld [vmem:[%s13718_s2 + $0x558] sm:$0xff]  ;;  %v10010_v19 = vld [vmem:[%s13718_s2 + $0x510] sm:$0xff] }
 0x130   :  { %v1381_v46 = vpop.f32.mrf.mxu2  ;;  %v1326_v62 = vpop.f32.mrf.mxu0  ;;  %2106 = vmatpush.bf16.msrb.mxu0 %v10006_v30  ;;  %v10026_v30 = vld [vmem:[%s13718_s2 + $0x590] sm:$0xff] }
 0x131   :  { %v1410_v51 = vpop.f32.mrf.mxu3  ;;  %v1382_v45 = vadd.f32 %v1381_v46, %v1353_v28  ;;  %v1355_v61 = vpop.f32.mrf.mxu1  ;;  %v1327_v2 = vadd.f32 %v1326_v62, %v11259_v60  ;;  %v10021_v60 = vld [vmem:[%s13718_s2 + $0x568] sm:$0xff] }
 0x132   :  { %2604 = vmatpush.bf16.msrb.mxu2 %v10021_v60  ;;  %2633 = vmatpush.bf16.msrb.mxu3 %v10029_v20  ;;  %v10005_v62 = vld [vmem:[%s13718_s2 + $0x4e8] sm:$0xff]  ;;  %v10018_v60 = vld [vmem:[%s13718_s2 + $0x550] sm:$0xff] }
 0x133   :  { %v11385_v10 = vadd.f32 %v1410_v51, %v1382_v45  ;;  %v1356_v16 = vadd.f32 %v1355_v61, %v1327_v2  ;;  %1998 = vmatmul.bf16.gmra.mxu0 %v10716_v5  ;;  %2576 = vmatpush.bf16.msrb.mxu1 %v10012_v29  ;;  %v10011_v61 = vld [vmem:[%s13718_s2 + $0x518] sm:$0xff] }
 0x134   :  { %2027 = vmatmul.bf16.gmra.mxu1 %v10718_v6  ;;  %2107 = vmatpush.bf16.msrb.mxu0 %v10005_v62 }
 0x135   :  { %2056 = vmatmul.bf16.gmra.mxu2 %v10939_v22 }
 0x136   :  { %2085 = vmatmul.bf16.gmra.mxu3 %v10941_v23  ;;  %2605 = vmatpush.bf16.msrb.mxu2 %v10020_v37 }
 0x137   :  { %2634 = vmatpush.bf16.msrb.mxu3 %v10028_v52  ;;  %2577 = vmatpush.bf16.msrb.mxu1 %v10011_v61 }
 0x138   :  { %v1384_v18 = vpop.f32.mrf.mxu2  ;;  %v1328_v46 = vpop.f32.mrf.mxu0  ;;  %2108 = vmatpush.bf16.msrb.mxu0 %v10004_v17 }
 0x139   :  { %v1413_v28 = vpop.f32.mrf.mxu3  ;;  %v1385_v25 = vadd.f32 %v1384_v18, %v1356_v16  ;;  %v1357_v51 = vpop.f32.mrf.mxu1  ;;  %v1329_v26 = vadd.f32 %v1328_v46, %v11288_v27  ;;  %v10027_v27 = vld [vmem:[%s13718_s2 + $0x598] sm:$0xff] }
 0x13a   :  { %2606 = vmatpush.bf16.msrb.mxu2 %v10019_v0 }
 0x13b   :  { %v11416_v8 = vadd.f32 %v1413_v28, %v1385_v25  ;;  %v1358_v45 = vadd.f32 %v1357_v51, %v1329_v26  ;;  %2635 = vmatpush.bf16.msrb.mxu3 %v10027_v27  ;;  %2578 = vmatpush.bf16.msrb.mxu1 %v10010_v19 }
 0x13e   :  { %2607 = vmatpush.bf16.msrb.mxu2 %v10018_v60 }
 0x13f   :  { %2636 = vmatpush.bf16.msrb.mxu3 %v10026_v30 }
 0x140   :  { %v1386_v2 = vpop.f32.mrf.mxu2  ;;  %v1331_v18 = vpop.f32.mrf.mxu0 }
 0x141   :  { %v1415_v16 = vpop.f32.mrf.mxu3  ;;  %v1387_v20 = vadd.f32 %v1386_v2, %v1358_v45  ;;  %v1360_v28 = vpop.f32.mrf.mxu1  ;;  %v1332_v29 = vadd.f32 %v1331_v18, %v11310_v36 }
 0x143   :  { %v11443_v37 = vadd.f32 %v1415_v16, %v1387_v20  ;;  %v1361_v25 = vadd.f32 %v1360_v28, %v1332_v29  ;;  %2003 = vmatmul.bf16.gmra.mxu0 %v10800_v33 }
 0x144   :  { %2032 = vmatmul.bf16.gmra.mxu1 %v10802_v34 }
 0x145   :  { %2061 = vmatmul.bf16.gmra.mxu2 %v11004_v55 }
 0x146   :  { %2090 = vmatmul.bf16.gmra.mxu3 %v11006_v56 }
 0x148   :  { %v1389_v46 = vpop.f32.mrf.mxu2  ;;  %v1333_v26 = vpop.f32.mrf.mxu0 }
 0x149   :  { %v1418_v51 = vpop.f32.mrf.mxu3  ;;  %v1390_v52 = vadd.f32 %v1389_v46, %v1361_v25  ;;  %v1362_v36 = vpop.f32.mrf.mxu1  ;;  %v1334_v45 = vadd.f32 %v1333_v26, %v11315_v14 }
 0x14b   :  { %v11450_v62 = vadd.f32 %v1418_v51, %v1390_v52  ;;  %v1363_v61 = vadd.f32 %v1362_v36, %v1334_v45 }
 0x150   :  { %v1391_v0 = vpop.f32.mrf.mxu2  ;;  %v1336_v16 = vpop.f32.mrf.mxu0 }
 0x151   :  { %v1420_v27 = vpop.f32.mrf.mxu3  ;;  %v1392_v2 = vadd.f32 %v1391_v0, %v1363_v61  ;;  %v1365_v17 = vpop.f32.mrf.mxu1  ;;  %v1337_v19 = vadd.f32 %v1336_v16, %v11325_v1 }
 0x153   :  { %v11453_v60 = vadd.f32 %v1420_v27, %v1392_v2  ;;  %v1366_v20 = vadd.f32 %v1365_v17, %v1337_v19  ;;  %2008 = vmatmul.bf16.gmra.mxu0 %v10836_v49  ;;  %v10049_v2 = vld [vmem:[%s13718_s2 + $0x648] sm:$0xff] }
 0x154   :  { %2037 = vmatmul.bf16.gmra.mxu1 %v10838_v50 }
 0x155   :  { %2066 = vmatmul.bf16.gmra.mxu2 %v11045_v11  ;;  %2687 = vmatpush.bf16.msra.mxu1 %v10049_v2  ;;  %v10046_v2 = vld [vmem:[%s13718_s2 + $0x630] sm:$0xff] }
 0x156   :  { %2095 = vmatmul.bf16.gmra.mxu3 %v11047_v12 }
 0x158   :  { %v1394_v14 = vpop.f32.mrf.mxu2  ;;  %v1338_v30 = vpop.f32.mrf.mxu0 }
 0x159   :  { %v1423_v18 = vpop.f32.mrf.mxu3  ;;  %v1395_v28 = vadd.f32 %v1394_v14, %v1366_v20  ;;  %v1367_v29 = vpop.f32.mrf.mxu1  ;;  %v1339_v25 = vadd.f32 %v1338_v30, %v11330_v39  ;;  %v10041_v39 = vld [vmem:[%s13718_s2 + $0x608] sm:$0xff]  ;;  %v10040_v20 = vld [vmem:[%s13718_s2 + $0x600] sm:$0xff] }
 0x15a   :  { %2658 = vmatpush.bf16.msra.mxu0 %v10041_v39  ;;  %v10048_v14 = vld [vmem:[%s13718_s2 + $0x640] sm:$0xff]  ;;  %v10038_v39 = vld [vmem:[%s13718_s2 + $0x5f0] sm:$0xff] }
 0x15b   :  { %v11460_v46 = vadd.f32 %v1423_v18, %v1395_v28  ;;  %v1368_v1 = vadd.f32 %v1367_v29, %v1339_v25  ;;  %v10056_v18 = vld [vmem:[%s13718_s2 + $0x680] sm:$0xff]  ;;  %2688 = vmatpush.bf16.msra.mxu1 %v10048_v14  ;;  %v10062_v14 = vld [vmem:[%s13718_s2 + $0x6b0] sm:$0xff] }
 0x15e   :  { %2659 = vmatpush.bf16.msra.mxu0 %v10040_v20 }
 0x160   :  { %v1396_v51 = vpop.f32.mrf.mxu2  ;;  %v1437_v36 = vpop.f32.mrf.mxu0 }
 0x161   :  { %v1425_v52 = vpop.f32.mrf.mxu3  ;;  %v1397_v26 = vadd.f32 %v1396_v51, %v1368_v1  ;;  %v1466_v45 = vpop.f32.mrf.mxu1  ;;  %v1438_v61 = vadd.f32 %v1437_v36, %v11358_v21  ;;  %v10057_v21 = vld [vmem:[%s13718_s2 + $0x688] sm:$0xff]  ;;  %v10039_v51 = vld [vmem:[%s13718_s2 + $0x5f8] sm:$0xff] }
 0x162   :  { %2716 = vmatpush.bf16.msra.mxu2 %v10057_v21  ;;  %2660 = vmatpush.bf16.msra.mxu0 %v10039_v51  ;;  %v10054_v21 = vld [vmem:[%s13718_s2 + $0x670] sm:$0xff]  ;;  %v10061_v51 = vld [vmem:[%s13718_s2 + $0x6a8] sm:$0xff] }
 0x163   :  { %v11463_v0 = vadd.f32 %v1425_v52, %v1397_v26  ;;  %v11465_v27 = vadd.f32 %v1466_v45, %v1438_v61  ;;  %7935 = vmatmul.msk.bf16.vlgmr.msrb.gmra.mxu0 %vm634_vm0, %v10866_v59  ;;  %v10047_v52 = vld [vmem:[%s13718_s2 + $0x638] sm:$0xff] }
 0x164   :  { %2579 = vmatmul.bf16.vlgmr.msrb.gmra.mxu1 %v10634_v41  ;;  %v10055_v26 = vld [vmem:[%s13718_s2 + $0x678] sm:$0xff] }
 0x165   :  { %2608 = vmatmul.bf16.vlgmr.msrb.gmra.mxu2 %v10636_v42  ;;  %2689 = vmatpush.bf16.msra.mxu1 %v10047_v52 }
 0x166   :  { %2637 = vmatmul.bf16.vlgmr.msrb.gmra.mxu3 %v10638_v43  ;;  %2717 = vmatpush.bf16.msra.mxu2 %v10056_v18 }
 0x167   :  { %2661 = vmatpush.bf16.msra.mxu0 %v10038_v39  ;;  %v10052_v39 = vld [vmem:[%s13718_s2 + $0x660] sm:$0xff] }
 0x168   :  { %v1936_v17 = vpop.f32.mrf.mxu2  ;;  %v1439_v30 = vpop.f32.mrf.mxu0 }
 0x169   :  { %v1965_v19 = vpop.f32.mrf.mxu3  ;;  %v1468_v29 = vpop.f32.mrf.mxu1  ;;  %v1440_v25 = vadd.f32 %v1439_v30, %v11385_v10  ;;  %v10063_v10 = vld [vmem:[%s13718_s2 + $0x6b8] sm:$0xff]  ;;  %2690 = vmatpush.bf16.msra.mxu1 %v10046_v2 }
 0x16a   :  { %v11492_v28 = vadd.f32 %v1965_v19, %v1936_v17  ;;  %2718 = vmatpush.bf16.msra.mxu2 %v10055_v26  ;;  %2747 = vmatpush.bf16.msra.mxu3 %v10063_v10 }
 0x16b   :  { %v11495_v1 = vadd.f32 %v1468_v29, %v1440_v25  ;;  %v10037_v29 = vld [vmem:[%s13718_s2 + $0x5e8] sm:$0xff] }
 0x16c   :  { %v10045_v25 = vld [vmem:[%s13718_s2 + $0x628] sm:$0xff]  ;;  %2662 = vmatpush.bf16.msra.mxu0 %v10037_v29  ;;  %v10035_v29 = vld [vmem:[%s13718_s2 + $0x5d8] sm:$0xff] }
 0x16d   :  { %2691 = vmatpush.bf16.msra.mxu1 %v10045_v25  ;;  %v10043_v25 = vld [vmem:[%s13718_s2 + $0x618] sm:$0xff] }
 0x16e   :  { %2719 = vmatpush.bf16.msra.mxu2 %v10054_v21  ;;  %2748 = vmatpush.bf16.msra.mxu3 %v10062_v14 }
 0x170   :  { %v1938_v45 = vpop.f32.mrf.mxu2  ;;  %v1442_v19 = vpop.f32.mrf.mxu0 }
 0x171   :  { %v1967_v61 = vpop.f32.mrf.mxu3  ;;  %v1471_v20 = vpop.f32.mrf.mxu1  ;;  %v1443_v18 = vadd.f32 %v1442_v19, %v11416_v8  ;;  %v10053_v8 = vld [vmem:[%s13718_s2 + $0x668] sm:$0xff] }
 0x172   :  { %v11520_v17 = vadd.f32 %v1967_v61, %v1938_v45  ;;  %2720 = vmatpush.bf16.msra.mxu2 %v10053_v8  ;;  %2749 = vmatpush.bf16.msra.mxu3 %v10061_v51  ;;  %v10036_v45 = vld [vmem:[%s13718_s2 + $0x5e0] sm:$0xff]  ;;  %v10051_v8 = vld [vmem:[%s13718_s2 + $0x658] sm:$0xff] }
 0x173   :  { %v11526_v30 = vadd.f32 %v1471_v20, %v1443_v18  ;;  %7936 = vmatmul.msk.bf16.gmra.mxu0 %vm634_vm0, %v10943_v24  ;;  %v10044_v61 = vld [vmem:[%s13718_s2 + $0x620] sm:$0xff] }
 0x174   :  { %2584 = vmatmul.bf16.gmra.mxu1 %v10712_v3  ;;  %v10060_v20 = vld [vmem:[%s13718_s2 + $0x6a0] sm:$0xff]  ;;  %2663 = vmatpush.bf16.msra.mxu0 %v10036_v45  ;;  %v10034_v45 = vld [vmem:[%s13718_s2 + $0x5d0] sm:$0xff] }
 0x175   :  { %2613 = vmatmul.bf16.gmra.mxu2 %v10714_v4  ;;  %2692 = vmatpush.bf16.msra.mxu1 %v10044_v61  ;;  %v10042_v61 = vld [vmem:[%s13718_s2 + $0x610] sm:$0xff] }
 0x176   :  { %2642 = vmatmul.bf16.gmra.mxu3 %v10716_v5  ;;  %2721 = vmatpush.bf16.msra.mxu2 %v10052_v39  ;;  %v10050_v39 = vld [vmem:[%s13718_s2 + $0x650] sm:$0xff] }
 0x177   :  { %2750 = vmatpush.bf16.msra.mxu3 %v10060_v20 }
 0x178   :  { %v1941_v26 = vpop.f32.mrf.mxu2  ;;  %v1444_v21 = vpop.f32.mrf.mxu0  ;;  %2664 = vmatpush.bf16.msra.mxu0 %v10035_v29 }
 0x179   :  { %v1970_v10 = vpop.f32.mrf.mxu3  ;;  %v1473_v19 = vpop.f32.mrf.mxu1  ;;  %v1445_v14 = vadd.f32 %v1444_v21, %v11443_v37  ;;  %v10059_v37 = vld [vmem:[%s13718_s2 + $0x698] sm:$0xff]  ;;  %2693 = vmatpush.bf16.msra.mxu1 %v10043_v25 }
 0x17a   :  { %v11556_v2 = vadd.f32 %v1970_v10, %v1941_v26  ;;  %2722 = vmatpush.bf16.msra.mxu2 %v10051_v8 }
 0x17b   :  { %v11562_v18 = vadd.f32 %v1473_v19, %v1445_v14  ;;  %2751 = vmatpush.bf16.msra.mxu3 %v10059_v37  ;;  %v10058_v14 = vld [vmem:[%s13718_s2 + $0x690] sm:$0xff] }
 0x17c   :  { %2665 = vmatpush.bf16.msra.mxu0 %v10034_v45 }
 0x17d   :  { %2694 = vmatpush.bf16.msra.mxu1 %v10042_v61 }
 0x17e   :  { %2723 = vmatpush.bf16.msra.mxu2 %v10050_v39 }
 0x17f   :  { %2752 = vmatpush.bf16.msra.mxu3 %v10058_v14 }
 0x180   :  { %v1943_v26 = vpop.f32.mrf.mxu2  ;;  %v1447_v19 = vpop.f32.mrf.mxu0 }
 0x181   :  { %v1972_v10 = vpop.f32.mrf.mxu3  ;;  %v1476_v20 = vpop.f32.mrf.mxu1  ;;  %v1448_v29 = vadd.f32 %v1447_v19, %v11450_v62 }
 0x182   :  { %v11587_v21 = vadd.f32 %v1972_v10, %v1943_v26 }
 0x183   :  { %v11593_v25 = vadd.f32 %v1476_v20, %v1448_v29  ;;  %7937 = vmatmul.msk.bf16.gmra.mxu0 %vm634_vm0, %v11017_v63 }
 0x184   :  { %2589 = vmatmul.bf16.gmra.mxu1 %v10796_v31 }
 0x185   :  { %2618 = vmatmul.bf16.gmra.mxu2 %v10798_v32 }
 0x186   :  { %2647 = vmatmul.bf16.gmra.mxu3 %v10800_v33 }
 0x188   :  { %v1946_v37 = vpop.f32.mrf.mxu2  ;;  %v1449_v10 = vpop.f32.mrf.mxu0 }
 0x189   :  { %v1975_v62 = vpop.f32.mrf.mxu3  ;;  %v1478_v45 = vpop.f32.mrf.mxu1  ;;  %v1450_v61 = vadd.f32 %v1449_v10, %v11453_v60 }
 0x18a   :  { %v11602_v26 = vadd.f32 %v1975_v62, %v1946_v37 }
 0x18b   :  { %v11605_v39 = vadd.f32 %v1478_v45, %v1450_v61 }
 0x190   :  { %v1948_v20 = vpop.f32.mrf.mxu2  ;;  %v1452_v51 = vpop.f32.mrf.mxu0 }
 0x191   :  { %v1977_v14 = vpop.f32.mrf.mxu3  ;;  %v1481_v52 = vpop.f32.mrf.mxu1  ;;  %v1453_v8 = vadd.f32 %v1452_v51, %v11460_v46 }
 0x192   :  { %v11609_v29 = vadd.f32 %v1977_v14, %v1948_v20 }
 0x193   :  { %v11612_v36 = vadd.f32 %v1481_v52, %v1453_v8  ;;  %7938 = vmatmul.msk.bf16.gmra.mxu0 %vm634_vm0, %v11049_v13  ;;  %v10069_v8 = vld [vmem:[%s13718_s2 + $0x6e8] sm:$0xff] }
 0x194   :  { %2594 = vmatmul.bf16.gmra.mxu1 %v10832_v47 }
 0x195   :  { %2623 = vmatmul.bf16.gmra.mxu2 %v10834_v48 }
 0x196   :  { %2652 = vmatmul.bf16.gmra.mxu3 %v10836_v49 }
 0x198   :  { %v1951_v37 = vpop.f32.mrf.mxu2  ;;  %v1454_v45 = vpop.f32.mrf.mxu0 }
 0x199   :  { %v1980_v62 = vpop.f32.mrf.mxu3  ;;  %v1483_v46 = vpop.f32.mrf.mxu1  ;;  %v1455_v52 = vadd.f32 %v1454_v45, %v11463_v0  ;;  %v10071_v0 = vld [vmem:[%s13718_s2 + $0x6f8] sm:$0xff]  ;;  %v10078_v45 = vld [vmem:[%s13718_s2 + $0x730] sm:$0xff] }
 0x19a   :  { %v11621_v10 = vadd.f32 %v1980_v62, %v1951_v37  ;;  %v10079_v37 = vld [vmem:[%s13718_s2 + $0x738] sm:$0xff]  ;;  %3215 = vmatpush.bf16.msrb.mxu0 %v10071_v0  ;;  %v10094_v0 = vld [vmem:[%s13718_s2 + $0x7b0] sm:$0xff] }
 0x19b   :  { %v11624_v51 = vadd.f32 %v1483_v46, %v1455_v52  ;;  %v10087_v62 = vld [vmem:[%s13718_s2 + $0x778] sm:$0xff]  ;;  %3244 = vmatpush.bf16.msrb.mxu1 %v10079_v37  ;;  %v10086_v46 = vld [vmem:[%s13718_s2 + $0x770] sm:$0xff] }
 0x19c   :  { %3273 = vmatpush.bf16.msrb.mxu2 %v10087_v62 }
 0x19f   :  { %3245 = vmatpush.bf16.msrb.mxu1 %v10078_v45  ;;  %v10068_v45 = vld [vmem:[%s13718_s2 + $0x6e0] sm:$0xff] }
 0x1a0   :  { %v1953_v61 = vpop.f32.mrf.mxu2  ;;  %v1994_v19 = vpop.f32.mrf.mxu0  ;;  %3274 = vmatpush.bf16.msrb.mxu2 %v10086_v46  ;;  %v10076_v46 = vld [vmem:[%s13718_s2 + $0x720] sm:$0xff] }
 0x1a1   :  { %v1982_v20 = vpop.f32.mrf.mxu3  ;;  %v2023_v16 = vpop.f32.mrf.mxu1  ;;  %v1995_v60 = vadd.f32 %v1994_v19, %v11492_v28 }
 0x1a2   :  { %v11628_v14 = vadd.f32 %v1982_v20, %v1953_v61 }
 0x1a3   :  { %v2024_v49 = vadd.f32 %v2023_v16, %v1995_v60  ;;  %2666 = vmatmul.bf16.vlgmr.msra.gmra.mxu0 %v10640_v44  ;;  %v10095_v16 = vld [vmem:[%s13718_s2 + $0x7b8] sm:$0xff]  ;;  %v10070_v60 = vld [vmem:[%s13718_s2 + $0x6f0] sm:$0xff] }
 0x1a4   :  { %2695 = vmatmul.bf16.vlgmr.msra.gmra.mxu1 %v10862_v57  ;;  %3302 = vmatpush.bf16.msrb.mxu3 %v10095_v16 }
 0x1a5   :  { %2724 = vmatmul.bf16.vlgmr.msra.gmra.mxu2 %v10864_v58  ;;  %3216 = vmatpush.bf16.msrb.mxu0 %v10070_v60 }
 0x1a6   :  { %8263 = vmatmul.msk.bf16.vlgmr.msra.gmra.mxu3 %vm634_vm0, %v10866_v59 }
 0x1a8   :  { %v2052_v28 = vpop.f32.mrf.mxu2  ;;  %v1996_v61 = vpop.f32.mrf.mxu0  ;;  %3303 = vmatpush.bf16.msrb.mxu3 %v10094_v0  ;;  %v10092_v0 = vld [vmem:[%s13718_s2 + $0x7a0] sm:$0xff] }
 0x1a9   :  { %v2081_v19 = vpop.f32.mrf.mxu3  ;;  %v2053_v52 = vadd.f32 %v2052_v28, %v2024_v49  ;;  %v2025_v20 = vpop.f32.mrf.mxu1  ;;  %v1997_v37 = vadd.f32 %v1996_v61, %v11520_v17  ;;  %v10077_v49 = vld [vmem:[%s13718_s2 + $0x728] sm:$0xff]  ;;  %3217 = vmatpush.bf16.msrb.mxu0 %v10069_v8 }
 0x1aa   :  { %v10085_v28 = vld [vmem:[%s13718_s2 + $0x768] sm:$0xff]  ;;  %3246 = vmatpush.bf16.msrb.mxu1 %v10077_v49 }
 0x1ab   :  { %v11661_v62 = vadd.f32 %v2081_v19, %v2053_v52  ;;  %v2026_v16 = vadd.f32 %v2025_v20, %v1997_v37  ;;  %v10093_v17 = vld [vmem:[%s13718_s2 + $0x7a8] sm:$0xff]  ;;  %3275 = vmatpush.bf16.msrb.mxu2 %v10085_v28  ;;  %v10084_v52 = vld [vmem:[%s13718_s2 + $0x760] sm:$0xff] }
 0x1ac   :  { %3304 = vmatpush.bf16.msrb.mxu3 %v10093_v17  ;;  %v10075_v17 = vld [vmem:[%s13718_s2 + $0x718] sm:$0xff] }
 0x1ad   :  { %3218 = vmatpush.bf16.msrb.mxu0 %v10068_v45 }
 0x1ae   :  { %3247 = vmatpush.bf16.msrb.mxu1 %v10076_v46  ;;  %v10066_v46 = vld [vmem:[%s13718_s2 + $0x6d0] sm:$0xff] }
 0x1af   :  { %3276 = vmatpush.bf16.msrb.mxu2 %v10084_v52  ;;  %v10074_v52 = vld [vmem:[%s13718_s2 + $0x710] sm:$0xff] }
 0x1b0   :  { %v2054_v19 = vpop.f32.mrf.mxu2  ;;  %v1999_v20 = vpop.f32.mrf.mxu0  ;;  %3305 = vmatpush.bf16.msrb.mxu3 %v10092_v0 }
 0x1b1   :  { %v2083_v60 = vpop.f32.mrf.mxu3  ;;  %v2055_v61 = vadd.f32 %v2054_v19, %v2026_v16  ;;  %v2028_v8 = vpop.f32.mrf.mxu1  ;;  %v2000_v37 = vadd.f32 %v1999_v20, %v11556_v2  ;;  %v10067_v16 = vld [vmem:[%s13718_s2 + $0x6d8] sm:$0xff] }
 0x1b2   :  { %v10083_v2 = vld [vmem:[%s13718_s2 + $0x758] sm:$0xff]  ;;  %3219 = vmatpush.bf16.msrb.mxu0 %v10067_v16  ;;  %3248 = vmatpush.bf16.msrb.mxu1 %v10075_v17 }
 0x1b3   :  { %v11688_v49 = vadd.f32 %v2083_v60, %v2055_v61  ;;  %v2029_v28 = vadd.f32 %v2028_v8, %v2000_v37  ;;  %2671 = vmatmul.bf16.gmra.mxu0 %v10718_v6  ;;  %v10091_v19 = vld [vmem:[%s13718_s2 + $0x798] sm:$0xff]  ;;  %3277 = vmatpush.bf16.msrb.mxu2 %v10083_v2  ;;  %v10082_v61 = vld [vmem:[%s13718_s2 + $0x750] sm:$0xff] }
 0x1b4   :  { %2700 = vmatmul.bf16.gmra.mxu1 %v10939_v22  ;;  %3306 = vmatpush.bf16.msrb.mxu3 %v10091_v19  ;;  %v10090_v37 = vld [vmem:[%s13718_s2 + $0x790] sm:$0xff]  ;;  %v10065_v19 = vld [vmem:[%s13718_s2 + $0x6c8] sm:$0xff] }
 0x1b5   :  { %2729 = vmatmul.bf16.gmra.mxu2 %v10941_v23 }
 0x1b6   :  { %8264 = vmatmul.msk.bf16.gmra.mxu3 %vm634_vm0, %v10943_v24  ;;  %3220 = vmatpush.bf16.msrb.mxu0 %v10066_v46 }
 0x1b7   :  { %3249 = vmatpush.bf16.msrb.mxu1 %v10074_v52  ;;  %3278 = vmatpush.bf16.msrb.mxu2 %v10082_v61  ;;  %v10064_v52 = vld [vmem:[%s13718_s2 + $0x6c0] sm:$0xff] }
 0x1b8   :  { %v2057_v60 = vpop.f32.mrf.mxu2  ;;  %v2001_v8 = vpop.f32.mrf.mxu0  ;;  %3307 = vmatpush.bf16.msrb.mxu3 %v10090_v37  ;;  %v10072_v61 = vld [vmem:[%s13718_s2 + $0x700] sm:$0xff] }
 0x1b9   :  { %v2086_v45 = vpop.f32.mrf.mxu3  ;;  %v2058_v20 = vadd.f32 %v2057_v60, %v2029_v28  ;;  %v2030_v0 = vpop.f32.mrf.mxu1  ;;  %v2002_v16 = vadd.f32 %v2001_v8, %v11587_v21  ;;  %v10073_v28 = vld [vmem:[%s13718_s2 + $0x708] sm:$0xff] }
 0x1ba   :  { %v10081_v60 = vld [vmem:[%s13718_s2 + $0x748] sm:$0xff]  ;;  %3221 = vmatpush.bf16.msrb.mxu0 %v10065_v19 }
 0x1bb   :  { %v11720_v17 = vadd.f32 %v2086_v45, %v2058_v20  ;;  %v2031_v2 = vadd.f32 %v2030_v0, %v2002_v16  ;;  %v10089_v21 = vld [vmem:[%s13718_s2 + $0x788] sm:$0xff]  ;;  %3250 = vmatpush.bf16.msrb.mxu1 %v10073_v28  ;;  %3279 = vmatpush.bf16.msrb.mxu2 %v10081_v60  ;;  %v10080_v20 = vld [vmem:[%s13718_s2 + $0x740] sm:$0xff] }
 0x1bc   :  { %3308 = vmatpush.bf16.msrb.mxu3 %v10089_v21  ;;  %v10088_v16 = vld [vmem:[%s13718_s2 + $0x780] sm:$0xff] }
 0x1be   :  { %3222 = vmatpush.bf16.msrb.mxu0 %v10064_v52 }
 0x1bf   :  { %3251 = vmatpush.bf16.msrb.mxu1 %v10072_v61  ;;  %3280 = vmatpush.bf16.msrb.mxu2 %v10080_v20 }
 0x1c0   :  { %v2059_v45 = vpop.f32.mrf.mxu2  ;;  %v2004_v0 = vpop.f32.mrf.mxu0  ;;  %3309 = vmatpush.bf16.msrb.mxu3 %v10088_v16 }
 0x1c1   :  { %v2088_v46 = vpop.f32.mrf.mxu3  ;;  %v2060_v8 = vadd.f32 %v2059_v45, %v2031_v2  ;;  %v2033_v37 = vpop.f32.mrf.mxu1  ;;  %v2005_v19 = vadd.f32 %v2004_v0, %v11602_v26 }
 0x1c3   :  { %v11747_v28 = vadd.f32 %v2088_v46, %v2060_v8  ;;  %v2034_v60 = vadd.f32 %v2033_v37, %v2005_v19  ;;  %2676 = vmatmul.bf16.gmra.mxu0 %v10802_v34 }
 0x1c4   :  { %2705 = vmatmul.bf16.gmra.mxu1 %v11004_v55 }
 0x1c5   :  { %2734 = vmatmul.bf16.gmra.mxu2 %v11006_v56 }
 0x1c6   :  { %8265 = vmatmul.msk.bf16.gmra.mxu3 %vm634_vm0, %v11017_v63 }
 0x1c8   :  { %v2062_v2 = vpop.f32.mrf.mxu2  ;;  %v2006_v26 = vpop.f32.mrf.mxu0 }
 0x1c9   :  { %v2091_v21 = vpop.f32.mrf.mxu3  ;;  %v2063_v45 = vadd.f32 %v2062_v2, %v2034_v60  ;;  %v2035_v52 = vpop.f32.mrf.mxu1  ;;  %v2007_v46 = vadd.f32 %v2006_v26, %v11609_v29 }
 0x1cb   :  { %v11755_v61 = vadd.f32 %v2091_v21, %v2063_v45  ;;  %v2036_v20 = vadd.f32 %v2035_v52, %v2007_v46 }
 0x1d0   :  { %v2064_v8 = vpop.f32.mrf.mxu2  ;;  %v2009_v16 = vpop.f32.mrf.mxu0 }
 0x1d1   :  { %v2093_v0 = vpop.f32.mrf.mxu3  ;;  %v2065_v37 = vadd.f32 %v2064_v8, %v2036_v20  ;;  %v2038_v19 = vpop.f32.mrf.mxu1  ;;  %v2010_v56 = vadd.f32 %v2009_v16, %v11621_v10 }
 0x1d3   :  { %v11758_v55 = vadd.f32 %v2093_v0, %v2065_v37  ;;  %v2039_v63 = vadd.f32 %v2038_v19, %v2010_v56  ;;  %2681 = vmatmul.bf16.gmra.mxu0 %v10838_v50  ;;  %v13742_v19 = vmax.f32 %v11207_v7, %v11465_v27 }
 0x1d4   :  { %2710 = vmatmul.bf16.gmra.mxu1 %v11045_v11 }
 0x1d5   :  { %2739 = vmatmul.bf16.gmra.mxu2 %v11047_v12 }
 0x1d6   :  { %8266 = vmatmul.msk.bf16.gmra.mxu3 %vm634_vm0, %v11049_v13 }
 0x1d8   :  { %v2067_v29 = vpop.f32.mrf.mxu2  ;;  %v2011_v21 = vpop.f32.mrf.mxu0 }
 0x1d9   :  { %v2096_v60 = vpop.f32.mrf.mxu3  ;;  %v2068_v2 = vadd.f32 %v2067_v29, %v2039_v63  ;;  %v2040_v45 = vpop.f32.mrf.mxu1  ;;  %v2012_v26 = vadd.f32 %v2011_v21, %v11628_v14  ;;  %v10103_v14 = vld [vmem:[%s13718_s2 + $0x7f8] sm:$0xff]  ;;  %v10124_v21 = vld [vmem:[%s13718_s2 + $0x8a0] sm:$0xff] }
 0x1da   :  { %v10111_v29 = vld [vmem:[%s13718_s2 + $0x838] sm:$0xff]  ;;  %3331 = vmatpush.bf16.msra.mxu0 %v10103_v14  ;;  %v10100_v14 = vld [vmem:[%s13718_s2 + $0x7e0] sm:$0xff] }
 0x1db   :  { %v11766_v10 = vadd.f32 %v2096_v60, %v2068_v2  ;;  %v2041_v52 = vadd.f32 %v2040_v45, %v2012_v26  ;;  %3360 = vmatpush.bf16.msra.mxu1 %v10111_v29  ;;  %v10102_v60 = vld [vmem:[%s13718_s2 + $0x7f0] sm:$0xff]  ;;  %v10108_v29 = vld [vmem:[%s13718_s2 + $0x820] sm:$0xff] }
 0x1dc   :  { %v10110_v2 = vld [vmem:[%s13718_s2 + $0x830] sm:$0xff] }
 0x1de   :  { %3332 = vmatpush.bf16.msra.mxu0 %v10102_v60 }
 0x1df   :  { %3361 = vmatpush.bf16.msra.mxu1 %v10110_v2  ;;  %v10122_v2 = vld [vmem:[%s13718_s2 + $0x890] sm:$0xff] }
 0x1e0   :  { %v2069_v56 = vpop.f32.mrf.mxu2  ;;  %v2110_v8 = vpop.f32.mrf.mxu0 }
 0x1e1   :  { %v2098_v46 = vpop.f32.mrf.mxu3  ;;  %v2070_v20 = vadd.f32 %v2069_v56, %v2041_v52  ;;  %v2580_v0 = vpop.f32.mrf.mxu1  ;;  %v2111_v37 = vadd.f32 %v2110_v8, %v11661_v62  ;;  %v10125_v62 = vld [vmem:[%s13718_s2 + $0x8a8] sm:$0xff] }
 0x1e2   :  { %3859 = vmatpush.bf16.msra.mxu3 %v10125_v62  ;;  %v10116_v62 = vld [vmem:[%s13718_s2 + $0x860] sm:$0xff] }
 0x1e3   :  { %v11769_v16 = vadd.f32 %v2098_v46, %v2070_v20  ;;  %v11774_v63 = vmax.f32 %v13742_v19, %v2111_v37  ;;  %3223 = vmatmul.bf16.vlgmr.msrb.gmra.mxu0 %v10634_v41  ;;  %v13743_v20 = vmax.f32 %v11236_v35, %v11495_v1  ;;  %v10101_v37 = vld [vmem:[%s13718_s2 + $0x7e8] sm:$0xff]  ;;  %v10123_v19 = vld [vmem:[%s13718_s2 + $0x898] sm:$0xff] }
 0x1e4   :  { %3252 = vmatmul.bf16.vlgmr.msrb.gmra.mxu1 %v10636_v42  ;;  %3333 = vmatpush.bf16.msra.mxu0 %v10101_v37 }
 0x1e5   :  { %3281 = vmatmul.bf16.vlgmr.msrb.gmra.mxu2 %v10638_v43 }
 0x1e6   :  { %3310 = vmatmul.bf16.vlgmr.msrb.gmra.mxu3 %v10640_v44 }
 0x1e7   :  { %3860 = vmatpush.bf16.msra.mxu3 %v10124_v21 }
 0x1e8   :  { %v2609_v7 = vpop.f32.mrf.mxu2  ;;  %v2112_v26 = vpop.f32.mrf.mxu0  ;;  %3334 = vmatpush.bf16.msra.mxu0 %v10100_v14 }
 0x1e9   :  { %v2638_v27 = vpop.f32.mrf.mxu3  ;;  %v2610_v45 = vadd.f32 %v2609_v7, %v2580_v0  ;;  %v2582_v52 = vpop.f32.mrf.mxu1  ;;  %v2113_v56 = vadd.f32 %v2112_v26, %v11688_v49  ;;  %v10109_v0 = vld [vmem:[%s13718_s2 + $0x828] sm:$0xff]  ;;  %v13744_v26 = vmax.f32 %v11270_v9, %v11526_v30 }
 0x1ea   :  { %v10117_v49 = vld [vmem:[%s13718_s2 + $0x868] sm:$0xff]  ;;  %3362 = vmatpush.bf16.msra.mxu1 %v10109_v0  ;;  %v10098_v0 = vld [vmem:[%s13718_s2 + $0x7d0] sm:$0xff] }
 0x1eb   :  { %v11799_v46 = vadd.f32 %v2638_v27, %v2610_v45  ;;  %v11804_v8 = vmax.f32 %v13743_v20, %v2113_v56  ;;  %3391 = vmatpush.bf16.msra.mxu2 %v10117_v49  ;;  %3861 = vmatpush.bf16.msra.mxu3 %v10123_v19  ;;  %v10115_v20 = vld [vmem:[%s13718_s2 + $0x858] sm:$0xff]  ;;  %v10121_v9 = vld [vmem:[%s13718_s2 + $0x888] sm:$0xff]  ;;  %v10106_v49 = vld [vmem:[%s13718_s2 + $0x810] sm:$0xff] }
 0x1ec   :  { %v10114_v19 = vld [vmem:[%s13718_s2 + $0x850] sm:$0xff] }
 0x1ee   :  { %3363 = vmatpush.bf16.msra.mxu1 %v10108_v29  ;;  %v10120_v29 = vld [vmem:[%s13718_s2 + $0x880] sm:$0xff] }
 0x1ef   :  { %3392 = vmatpush.bf16.msra.mxu2 %v10116_v62  ;;  %3862 = vmatpush.bf16.msra.mxu3 %v10122_v2 }
 0x1f0   :  { %v2611_v35 = vpop.f32.mrf.mxu2  ;;  %v2115_v27 = vpop.f32.mrf.mxu0 }
 0x1f1   :  { %v2640_v1 = vpop.f32.mrf.mxu3  ;;  %v2612_v7 = vadd.f32 %v2611_v35, %v2582_v52  ;;  %v2585_v60 = vpop.f32.mrf.mxu1  ;;  %v2116_v21 = vadd.f32 %v2115_v27, %v11720_v17  ;;  %v10099_v52 = vld [vmem:[%s13718_s2 + $0x7d8] sm:$0xff]  ;;  %v13745_v27 = vmax.f32 %v11299_v38, %v11562_v18 }
 0x1f2   :  { %v10107_v17 = vld [vmem:[%s13718_s2 + $0x818] sm:$0xff]  ;;  %3335 = vmatpush.bf16.msra.mxu0 %v10099_v52  ;;  %v10096_v52 = vld [vmem:[%s13718_s2 + $0x7c0] sm:$0xff] }
 0x1f3   :  { %v11831_v45 = vadd.f32 %v2640_v1, %v2612_v7  ;;  %v11836_v56 = vmax.f32 %v13744_v26, %v2116_v21  ;;  %3228 = vmatmul.bf16.gmra.mxu0 %v10712_v3  ;;  %3364 = vmatpush.bf16.msra.mxu1 %v10107_v17  ;;  %v10105_v21 = vld [vmem:[%s13718_s2 + $0x808] sm:$0xff]  ;;  %v10119_v26 = vld [vmem:[%s13718_s2 + $0x878] sm:$0xff]  ;;  %v10104_v17 = vld [vmem:[%s13718_s2 + $0x800] sm:$0xff] }
 0x1f4   :  { %3257 = vmatmul.bf16.gmra.mxu1 %v10714_v4  ;;  %3393 = vmatpush.bf16.msra.mxu2 %v10115_v20  ;;  %v10112_v20 = vld [vmem:[%s13718_s2 + $0x840] sm:$0xff] }
 0x1f5   :  { %3286 = vmatmul.bf16.gmra.mxu2 %v10716_v5  ;;  %3863 = vmatpush.bf16.msra.mxu3 %v10121_v9 }
 0x1f6   :  { %3315 = vmatmul.bf16.gmra.mxu3 %v10718_v6  ;;  %3336 = vmatpush.bf16.msra.mxu0 %v10098_v0  ;;  %v10118_v0 = vld [vmem:[%s13718_s2 + $0x870] sm:$0xff] }
 0x1f7   :  { %3365 = vmatpush.bf16.msra.mxu1 %v10106_v49 }
 0x1f8   :  { %v2614_v30 = vpop.f32.mrf.mxu2  ;;  %v2117_v1 = vpop.f32.mrf.mxu0  ;;  %3394 = vmatpush.bf16.msra.mxu2 %v10114_v19 }
 0x1f9   :  { %v2643_v37 = vpop.f32.mrf.mxu3  ;;  %v2615_v35 = vadd.f32 %v2614_v30, %v2585_v60  ;;  %v2587_v14 = vpop.f32.mrf.mxu1  ;;  %v2118_v62 = vadd.f32 %v2117_v1, %v11747_v28  ;;  %3864 = vmatpush.bf16.msra.mxu3 %v10120_v29  ;;  %v10097_v60 = vld [vmem:[%s13718_s2 + $0x7c8] sm:$0xff] }
 0x1fa   :  { %v10113_v28 = vld [vmem:[%s13718_s2 + $0x848] sm:$0xff]  ;;  %3337 = vmatpush.bf16.msra.mxu0 %v10097_v60 }
 0x1fb   :  { %v11867_v7 = vadd.f32 %v2643_v37, %v2615_v35  ;;  %v11872_v2 = vmax.f32 %v13745_v27, %v2118_v62  ;;  %3366 = vmatpush.bf16.msra.mxu1 %v10105_v21  ;;  %v13746_v35 = vmax.f32 %v11312_v53, %v11593_v25  ;;  %v13747_v53 = vmax.f32 %v11317_v15, %v11605_v39  ;;  %v13749_v15 = vld [vmem:[#allocation6_spill] sm:$0xff] }
 0x1fc   :  { %3395 = vmatpush.bf16.msra.mxu2 %v10113_v28 }
 0x1fd   :  { %3865 = vmatpush.bf16.msra.mxu3 %v10119_v26 }
 0x1fe   :  { %3338 = vmatpush.bf16.msra.mxu0 %v10096_v52 }
 0x1ff   :  { %3367 = vmatpush.bf16.msra.mxu1 %v10104_v17 }
 0x200   :  { %v2616_v38 = vpop.f32.mrf.mxu2  ;;  %v2120_v30 = vpop.f32.mrf.mxu0  ;;  %3396 = vmatpush.bf16.msra.mxu2 %v10112_v20 }
 0x201   :  { %v2645_v18 = vpop.f32.mrf.mxu3  ;;  %v2617_v9 = vadd.f32 %v2616_v38, %v2587_v14  ;;  %v2590_v37 = vpop.f32.mrf.mxu1  ;;  %v2121_v49 = vadd.f32 %v2120_v30, %v11755_v61  ;;  %3866 = vmatpush.bf16.msra.mxu3 %v10118_v0 }
 0x203   :  { %v11899_v19 = vadd.f32 %v2645_v18, %v2617_v9  ;;  %v11904_v1 = vmax.f32 %v13746_v35, %v2121_v49  ;;  %3233 = vmatmul.bf16.gmra.mxu0 %v10796_v31  ;;  %v13748_v9 = vmax.f32 %v11327_v54, %v11612_v36  ;;  %v13750_v54 = vmax.f32 %v11332_v40, %v11624_v51  ;;  %v10133_v40 = vld [vmem:[%s13718_s2 + $0x8e8] sm:$0xff] }
 0x204   :  { %3262 = vmatmul.bf16.gmra.mxu1 %v10798_v32  ;;  %v10141_v51 = vld [vmem:[%s13718_s2 + $0x928] sm:$0xff]  ;;  %3888 = vmatpush.bf16.msrb.mxu0 %v10133_v40  ;;  %v10146_v40 = vld [vmem:[%s13718_s2 + $0x950] sm:$0xff] }
 0x205   :  { %3291 = vmatmul.bf16.gmra.mxu2 %v10800_v33  ;;  %3917 = vmatpush.bf16.msrb.mxu1 %v10141_v51 }
 0x206   :  { %3320 = vmatmul.bf16.gmra.mxu3 %v10802_v34 }
 0x208   :  { %v2619_v61 = vpop.f32.mrf.mxu2  ;;  %v2122_v62 = vpop.f32.mrf.mxu0 }
 0x209   :  { %v2648_v14 = vpop.f32.mrf.mxu3  ;;  %v2620_v29 = vadd.f32 %v2619_v61, %v2590_v37  ;;  %v2592_v27 = vpop.f32.mrf.mxu1  ;;  %v2123_v60 = vadd.f32 %v2122_v62, %v11758_v55 }
 0x20b   :  { %v11911_v21 = vadd.f32 %v2648_v14, %v2620_v29  ;;  %v11916_v25 = vmax.f32 %v13747_v53, %v2123_v60 }
 0x210   :  { %v2621_v28 = vpop.f32.mrf.mxu2  ;;  %v2125_v18 = vpop.f32.mrf.mxu0 }
 0x211   :  { %v2650_v26 = vpop.f32.mrf.mxu3  ;;  %v2622_v38 = vadd.f32 %v2621_v28, %v2592_v27  ;;  %v2595_v52 = vpop.f32.mrf.mxu1  ;;  %v2126_v17 = vadd.f32 %v2125_v18, %v11766_v10  ;;  %v10132_v18 = vld [vmem:[%s13718_s2 + $0x8e0] sm:$0xff] }
 0x212   :  { %3889 = vmatpush.bf16.msrb.mxu0 %v10132_v18 }
 0x213   :  { %v11919_v20 = vadd.f32 %v2650_v26, %v2622_v38  ;;  %v11924_v55 = vmax.f32 %v13748_v9, %v2126_v17  ;;  %3238 = vmatmul.bf16.gmra.mxu0 %v10832_v47  ;;  %v10148_v17 = vld [vmem:[%s13718_s2 + $0x960] sm:$0xff] }
 0x214   :  { %3267 = vmatmul.bf16.gmra.mxu1 %v10834_v48 }
 0x215   :  { %3296 = vmatmul.bf16.gmra.mxu2 %v13749_v15 }
 0x216   :  { %3325 = vmatmul.bf16.gmra.mxu3 %v10838_v50 }
 0x218   :  { %v2624_v39 = vpop.f32.mrf.mxu2  ;;  %v2127_v0 = vpop.f32.mrf.mxu0 }
 0x219   :  { %v2653_v30 = vpop.f32.mrf.mxu3  ;;  %v2625_v37 = vadd.f32 %v2624_v39, %v2595_v52  ;;  %v2597_v10 = vpop.f32.mrf.mxu1  ;;  %v2128_v49 = vadd.f32 %v2127_v0, %v11769_v16  ;;  %v10149_v16 = vld [vmem:[%s13718_s2 + $0x968] sm:$0xff]  ;;  %v10140_v52 = vld [vmem:[%s13718_s2 + $0x920] sm:$0xff] }
 0x21a   :  { %3946 = vmatpush.bf16.msrb.mxu2 %v10149_v16  ;;  %3918 = vmatpush.bf16.msrb.mxu1 %v10140_v52 }
 0x21b   :  { %v11931_v35 = vadd.f32 %v2653_v30, %v2625_v37  ;;  %v11936_v36 = vmax.f32 %v13750_v54, %v2128_v49  ;;  %v10156_v37 = vld [vmem:[%s13718_s2 + $0x9a0] sm:$0xff]  ;;  %v10131_v54 = vld [vmem:[%s13718_s2 + $0x8d8] sm:$0xff] }
 0x21c   :  { %3890 = vmatpush.bf16.msrb.mxu0 %v10131_v54  ;;  %v10136_v54 = vld [vmem:[%s13718_s2 + $0x900] sm:$0xff] }
 0x21e   :  { %3947 = vmatpush.bf16.msrb.mxu2 %v10148_v17  ;;  %v10129_v17 = vld [vmem:[%s13718_s2 + $0x8c8] sm:$0xff] }
 0x220   :  { %v2626_v61 = vpop.f32.mrf.mxu2  ;;  %v2667_v62 = vpop.f32.mrf.mxu0 }
 0x221   :  { %v2655_v14 = vpop.f32.mrf.mxu3  ;;  %v2627_v29 = vadd.f32 %v2626_v61, %v2597_v10  ;;  %v2696_v27 = vpop.f32.mrf.mxu1  ;;  %v2668_v60 = vadd.f32 %v2667_v62, %v11799_v46  ;;  %v10157_v46 = vld [vmem:[%s13718_s2 + $0x9a8] sm:$0xff]  ;;  %v10139_v61 = vld [vmem:[%s13718_s2 + $0x918] sm:$0xff] }
 0x222   :  { %3975 = vmatpush.bf16.msrb.mxu3 %v10157_v46  ;;  %3919 = vmatpush.bf16.msrb.mxu1 %v10139_v61  ;;  %v10144_v61 = vld [vmem:[%s13718_s2 + $0x940] sm:$0xff] }
 0x223   :  { %v11939_v53 = vadd.f32 %v2655_v14, %v2627_v29  ;;  %v2697_v28 = vadd.f32 %v2696_v27, %v2668_v60  ;;  %3339 = vmatmul.bf16.vlgmr.msra.gmra.mxu0 %v10862_v57  ;;  %v10147_v14 = vld [vmem:[%s13718_s2 + $0x958] sm:$0xff]  ;;  %v10130_v60 = vld [vmem:[%s13718_s2 + $0x8d0] sm:$0xff] }
 0x224   :  { %3368 = vmatmul.bf16.vlgmr.msra.gmra.mxu1 %v10864_v58  ;;  %v10155_v29 = vld [vmem:[%s13718_s2 + $0x998] sm:$0xff]  ;;  %3948 = vmatpush.bf16.msrb.mxu2 %v10147_v14 }
 0x225   :  { %8591 = vmatmul.msk.bf16.vlgmr.msra.gmra.mxu2 %vm634_vm0, %v10866_v59  ;;  %3891 = vmatpush.bf16.msrb.mxu0 %v10130_v60 }
 0x226   :  { %3867 = vmatmul.bf16.vlgmr.msra.gmra.mxu3 %v10634_v41 }
 0x227   :  { %3976 = vmatpush.bf16.msrb.mxu3 %v10156_v37 }
 0x228   :  { %v2725_v26 = vpop.f32.mrf.mxu2  ;;  %v2669_v39 = vpop.f32.mrf.mxu0  ;;  %3949 = vmatpush.bf16.msrb.mxu2 %v10146_v40 }
 0x229   :  { %v2754_v38 = vpop.f32.mrf.mxu3  ;;  %v2726_v9 = vadd.f32 %v2725_v26, %v2697_v28  ;;  %v2698_v30 = vpop.f32.mrf.mxu1  ;;  %v2670_v0 = vadd.f32 %v2669_v39, %v11831_v45  ;;  %v10138_v28 = vld [vmem:[%s13718_s2 + $0x910] sm:$0xff]  ;;  %3892 = vmatpush.bf16.msrb.mxu0 %v10129_v17 }
 0x22a   :  { %v10154_v26 = vld [vmem:[%s13718_s2 + $0x990] sm:$0xff]  ;;  %3920 = vmatpush.bf16.msrb.mxu1 %v10138_v28 }
 0x22b   :  { %v11971_v10 = vadd.f32 %v2754_v38, %v2726_v9  ;;  %v2699_v49 = vadd.f32 %v2698_v30, %v2670_v0  ;;  %3977 = vmatpush.bf16.msrb.mxu3 %v10155_v29  ;;  %v10137_v9 = vld [vmem:[%s13718_s2 + $0x908] sm:$0xff]  ;;  %v10126_v17 = vld [vmem:[%s13718_s2 + $0x8b0] sm:$0xff] }
 0x22c   :  { %v10153_v30 = vld [vmem:[%s13718_s2 + $0x988] sm:$0xff] }
 0x22e   :  { %3921 = vmatpush.bf16.msrb.mxu1 %v10137_v9  ;;  %v10134_v9 = vld [vmem:[%s13718_s2 + $0x8f0] sm:$0xff] }
 0x22f   :  { %3978 = vmatpush.bf16.msrb.mxu3 %v10154_v26  ;;  %v10151_v26 = vld [vmem:[%s13718_s2 + $0x978] sm:$0xff] }
 0x230   :  { %v2727_v62 = vpop.f32.mrf.mxu2  ;;  %v2672_v16 = vpop.f32.mrf.mxu0 }
 0x231   :  { %v2756_v27 = vpop.f32.mrf.mxu3  ;;  %v2728_v51 = vadd.f32 %v2727_v62, %v2699_v49  ;;  %v2701_v46 = vpop.f32.mrf.mxu1  ;;  %v2673_v38 = vadd.f32 %v2672_v16, %v11867_v7  ;;  %v10145_v7 = vld [vmem:[%s13718_s2 + $0x948] sm:$0xff]  ;;  %v10128_v49 = vld [vmem:[%s13718_s2 + $0x8c0] sm:$0xff]  ;;  %v10135_v16 = vld [vmem:[%s13718_s2 + $0x8f8] sm:$0xff] }
 0x232   :  { %3950 = vmatpush.bf16.msrb.mxu2 %v10145_v7  ;;  %3893 = vmatpush.bf16.msrb.mxu0 %v10128_v49  ;;  %v10142_v7 = vld [vmem:[%s13718_s2 + $0x930] sm:$0xff] }
 0x233   :  { %v12000_v18 = vadd.f32 %v2756_v27, %v2728_v51  ;;  %v2702_v52 = vadd.f32 %v2701_v46, %v2673_v38  ;;  %3344 = vmatmul.bf16.gmra.mxu0 %v10939_v22  ;;  %3979 = vmatpush.bf16.msrb.mxu3 %v10153_v30  ;;  %v10152_v27 = vld [vmem:[%s13718_s2 + $0x980] sm:$0xff]  ;;  %v10127_v51 = vld [vmem:[%s13718_s2 + $0x8b8] sm:$0xff]  ;;  %v10150_v49 = vld [vmem:[%s13718_s2 + $0x970] sm:$0xff] }
 0x234   :  { %3373 = vmatmul.bf16.gmra.mxu1 %v10941_v23  ;;  %v10143_v46 = vld [vmem:[%s13718_s2 + $0x938] sm:$0xff] }
 0x235   :  { %8592 = vmatmul.msk.bf16.gmra.mxu2 %vm634_vm0, %v10943_v24  ;;  %3922 = vmatpush.bf16.msrb.mxu1 %v10136_v54 }
 0x236   :  { %3872 = vmatmul.bf16.gmra.mxu3 %v10712_v3  ;;  %3951 = vmatpush.bf16.msrb.mxu2 %v10144_v61 }
 0x237   :  { %3980 = vmatpush.bf16.msrb.mxu3 %v10152_v27  ;;  %3894 = vmatpush.bf16.msrb.mxu0 %v10127_v51 }
 0x238   :  { %v2730_v37 = vpop.f32.mrf.mxu2  ;;  %v2674_v29 = vpop.f32.mrf.mxu0 }
 0x239   :  { %v2759_v0 = vpop.f32.mrf.mxu3  ;;  %v2731_v14 = vadd.f32 %v2730_v37, %v2702_v52  ;;  %v2703_v62 = vpop.f32.mrf.mxu1  ;;  %v2675_v60 = vadd.f32 %v2674_v29, %v11899_v19  ;;  %3923 = vmatpush.bf16.msrb.mxu1 %v10135_v16  ;;  %v13751_v29 = vld [vmem:[#allocation8_spill] sm:$0xff] }
 0x23a   :  { %3952 = vmatpush.bf16.msrb.mxu2 %v10143_v46 }
 0x23b   :  { %v12034_v28 = vadd.f32 %v2759_v0, %v2731_v14  ;;  %v2704_v40 = vadd.f32 %v2703_v62, %v2675_v60  ;;  %3981 = vmatpush.bf16.msrb.mxu3 %v10151_v26  ;;  %3895 = vmatpush.bf16.msrb.mxu0 %v10126_v17  ;;  %v13752_v62 = vld [vmem:[#allocation9_spill] sm:$0xff]  ;;  %v13753_v60 = vld [vmem:[#allocation10_spill] sm:$0xff] }
 0x23d   :  { %3924 = vmatpush.bf16.msrb.mxu1 %v10134_v9 }
 0x23e   :  { %3953 = vmatpush.bf16.msrb.mxu2 %v10142_v7 }
 0x23f   :  { %3982 = vmatpush.bf16.msrb.mxu3 %v10150_v49 }
 0x240   :  { %v2732_v38 = vpop.f32.mrf.mxu2  ;;  %v2677_v37 = vpop.f32.mrf.mxu0 }
 0x241   :  { %v2761_v52 = vpop.f32.mrf.mxu3  ;;  %v2733_v30 = vadd.f32 %v2732_v38, %v2704_v40  ;;  %v2706_v0 = vpop.f32.mrf.mxu1  ;;  %v2678_v54 = vadd.f32 %v2677_v37, %v11911_v21 }
 0x243   :  { %v12063_v61 = vadd.f32 %v2761_v52, %v2733_v30  ;;  %v2707_v14 = vadd.f32 %v2706_v0, %v2678_v54  ;;  %3349 = vmatmul.bf16.gmra.mxu0 %v13751_v29 }
 0x244   :  { %3378 = vmatmul.bf16.gmra.mxu1 %v13752_v62 }
 0x245   :  { %8593 = vmatmul.msk.bf16.gmra.mxu2 %vm634_vm0, %v13753_v60 }
 0x246   :  { %3877 = vmatmul.bf16.gmra.mxu3 %v10796_v31 }
 0x248   :  { %v2735_v21 = vpop.f32.mrf.mxu2  ;;  %v2679_v16 = vpop.f32.mrf.mxu0 }
 0x249   :  { %v2764_v40 = vpop.f32.mrf.mxu3  ;;  %v2736_v51 = vadd.f32 %v2735_v21, %v2707_v14  ;;  %v2708_v46 = vpop.f32.mrf.mxu1  ;;  %v2680_v26 = vadd.f32 %v2679_v16, %v11919_v20 }
 0x24b   :  { %v12073_v38 = vadd.f32 %v2764_v40, %v2736_v51  ;;  %v2709_v52 = vadd.f32 %v2708_v46, %v2680_v26 }
 0x250   :  { %v2737_v9 = vpop.f32.mrf.mxu2  ;;  %v2682_v37 = vpop.f32.mrf.mxu0 }
 0x251   :  { %v2766_v7 = vpop.f32.mrf.mxu3  ;;  %v2738_v30 = vadd.f32 %v2737_v9, %v2709_v52  ;;  %v2711_v0 = vpop.f32.mrf.mxu1  ;;  %v2683_v49 = vadd.f32 %v2682_v37, %v11931_v35 }
 0x253   :  { %v12078_v54 = vadd.f32 %v2766_v7, %v2738_v30  ;;  %v2712_v14 = vadd.f32 %v2711_v0, %v2683_v49  ;;  %3354 = vmatmul.bf16.gmra.mxu0 %v11045_v11 }
 0x254   :  { %3383 = vmatmul.bf16.gmra.mxu1 %v11047_v12 }
 0x255   :  { %8594 = vmatmul.msk.bf16.gmra.mxu2 %vm634_vm0, %v11049_v13 }
 0x256   :  { %3882 = vmatmul.bf16.gmra.mxu3 %v10832_v47 }
 0x258   :  { %v2740_v21 = vpop.f32.mrf.mxu2  ;;  %v2684_v16 = vpop.f32.mrf.mxu0 }
 0x259   :  { %v2769_v40 = vpop.f32.mrf.mxu3  ;;  %v2741_v51 = vadd.f32 %v2740_v21, %v2712_v14  ;;  %v2713_v35 = vpop.f32.mrf.mxu1  ;;  %v2685_v46 = vadd.f32 %v2684_v16, %v11939_v53  ;;  %v10165_v53 = vld [vmem:[%s13718_s2 + $0x9e8] sm:$0xff]  ;;  %v10179_v14 = vld [vmem:[%s13718_s2 + $0xa58] sm:$0xff] }
 0x25a   :  { %v10187_v21 = vld [vmem:[%s13718_s2 + $0xa98] sm:$0xff]  ;;  %4004 = vmatpush.bf16.msra.mxu0 %v10165_v53  ;;  %4503 = vmatpush.bf16.msra.mxu2 %v10179_v14 }
 0x25b   :  { %v12088_v26 = vadd.f32 %v2769_v40, %v2741_v51  ;;  %v2714_v52 = vadd.f32 %v2713_v35, %v2685_v46  ;;  %4532 = vmatpush.bf16.msra.mxu3 %v10187_v21  ;;  %v10164_v35 = vld [vmem:[%s13718_s2 + $0x9e0] sm:$0xff]  ;;  %v10178_v46 = vld [vmem:[%s13718_s2 + $0xa50] sm:$0xff]  ;;  %v10163_v53 = vld [vmem:[%s13718_s2 + $0x9d8] sm:$0xff] }
 0x25c   :  { %v10171_v14 = vld [vmem:[%s13718_s2 + $0xa18] sm:$0xff]  ;;  %v10185_v21 = vld [vmem:[%s13718_s2 + $0xa88] sm:$0xff] }
 0x25d   :  { %4035 = vmatpush.bf16.msra.mxu1 %v10171_v14  ;;  %v10159_v40 = vld [vmem:[%s13718_s2 + $0x9b8] sm:$0xff] }
 0x25e   :  { %4005 = vmatpush.bf16.msra.mxu0 %v10164_v35  ;;  %4504 = vmatpush.bf16.msra.mxu2 %v10178_v46  ;;  %v10162_v35 = vld [vmem:[%s13718_s2 + $0x9d0] sm:$0xff] }
 0x25f   :  { %v10170_v46 = vld [vmem:[%s13718_s2 + $0xa10] sm:$0xff] }
 0x260   :  { %v2742_v7 = vpop.f32.mrf.mxu2  ;;  %v3224_v0 = vpop.f32.mrf.mxu0 }
 0x261   :  { %v2771_v30 = vpop.f32.mrf.mxu3  ;;  %v2743_v37 = vadd.f32 %v2742_v7, %v2714_v52  ;;  %v3253_v49 = vpop.f32.mrf.mxu1  ;;  %v10186_v52 = vld [vmem:[%s13718_s2 + $0xa90] sm:$0xff]  ;;  %4036 = vmatpush.bf16.msra.mxu1 %v10170_v46 }
 0x262   :  { %v3254_v20 = vadd.f32 %v3253_v49, %v3224_v0  ;;  %4533 = vmatpush.bf16.msra.mxu3 %v10186_v52  ;;  %4006 = vmatpush.bf16.msra.mxu0 %v10163_v53  ;;  %v10176_v52 = vld [vmem:[%s13718_s2 + $0xa40] sm:$0xff] }
 0x263   :  { %v12092_v17 = vadd.f32 %v2771_v30, %v2743_v37  ;;  %3896 = vmatmul.bf16.vlgmr.msrb.gmra.mxu0 %v10636_v42  ;;  %v10184_v53 = vld [vmem:[%s13718_s2 + $0xa80] sm:$0xff] }
 0x264   :  { %3925 = vmatmul.bf16.vlgmr.msrb.gmra.mxu1 %v10638_v43 }
 0x265   :  { %3954 = vmatmul.bf16.vlgmr.msrb.gmra.mxu2 %v10640_v44 }
 0x266   :  { %3983 = vmatmul.bf16.vlgmr.msrb.gmra.mxu3 %v10862_v57  ;;  %4007 = vmatpush.bf16.msra.mxu0 %v10162_v35 }
 0x267   :  { %4534 = vmatpush.bf16.msra.mxu3 %v10185_v21  ;;  %v10169_v21 = vld [vmem:[%s13718_s2 + $0xa08] sm:$0xff] }
 0x268   :  { %v3282_v51 = vpop.f32.mrf.mxu2  ;;  %v3226_v30 = vpop.f32.mrf.mxu0  ;;  %4037 = vmatpush.bf16.msra.mxu1 %v10169_v21  ;;  %v10182_v21 = vld [vmem:[%s13718_s2 + $0xa70] sm:$0xff] }
 0x269   :  { %v3311_v16 = vpop.f32.mrf.mxu3  ;;  %v3283_v7 = vadd.f32 %v3282_v51, %v3254_v20  ;;  %v3255_v37 = vpop.f32.mrf.mxu1  ;;  %v10177_v20 = vld [vmem:[%s13718_s2 + $0xa48] sm:$0xff] }
 0x26a   :  { %v3256_v0 = vadd.f32 %v3255_v37, %v3226_v30  ;;  %4505 = vmatpush.bf16.msra.mxu2 %v10177_v20 }
 0x26b   :  { %v12118_v49 = vadd.f32 %v3311_v16, %v3283_v7  ;;  %4535 = vmatpush.bf16.msra.mxu3 %v10184_v53 }
 0x26e   :  { %4506 = vmatpush.bf16.msra.mxu2 %v10176_v52  ;;  %v10160_v52 = vld [vmem:[%s13718_s2 + $0x9c0] sm:$0xff] }
 0x270   :  { %v3284_v51 = vpop.f32.mrf.mxu2  ;;  %v3229_v30 = vpop.f32.mrf.mxu0 }
 0x271   :  { %v3313_v16 = vpop.f32.mrf.mxu3  ;;  %v3285_v7 = vadd.f32 %v3284_v51, %v3256_v0  ;;  %v3258_v37 = vpop.f32.mrf.mxu1  ;;  %v10161_v0 = vld [vmem:[%s13718_s2 + $0x9c8] sm:$0xff]  ;;  %v10175_v51 = vld [vmem:[%s13718_s2 + $0xa38] sm:$0xff] }
 0x272   :  { %v3259_v14 = vadd.f32 %v3258_v37, %v3229_v30  ;;  %4008 = vmatpush.bf16.msra.mxu0 %v10161_v0  ;;  %4507 = vmatpush.bf16.msra.mxu2 %v10175_v51  ;;  %v10174_v30 = vld [vmem:[%s13718_s2 + $0xa30] sm:$0xff] }
 0x273   :  { %v12144_v20 = vadd.f32 %v3313_v16, %v3285_v7  ;;  %3901 = vmatmul.bf16.gmra.mxu0 %v10714_v4  ;;  %v10183_v16 = vld [vmem:[%s13718_s2 + $0xa78] sm:$0xff]  ;;  %v10168_v7 = vld [vmem:[%s13718_s2 + $0xa00] sm:$0xff] }
 0x274   :  { %3930 = vmatmul.bf16.gmra.mxu1 %v10716_v5  ;;  %4536 = vmatpush.bf16.msra.mxu3 %v10183_v16 }
 0x275   :  { %3959 = vmatmul.bf16.gmra.mxu2 %v10718_v6  ;;  %4038 = vmatpush.bf16.msra.mxu1 %v10168_v7 }
 0x276   :  { %3988 = vmatmul.bf16.gmra.mxu3 %v10939_v22  ;;  %4009 = vmatpush.bf16.msra.mxu0 %v10160_v52  ;;  %v10181_v52 = vld [vmem:[%s13718_s2 + $0xa68] sm:$0xff] }
 0x277   :  { %4508 = vmatpush.bf16.msra.mxu2 %v10174_v30  ;;  %v10158_v30 = vld [vmem:[%s13718_s2 + $0x9b0] sm:$0xff] }
 0x278   :  { %v3287_v35 = vpop.f32.mrf.mxu2  ;;  %v3231_v53 = vpop.f32.mrf.mxu0  ;;  %4537 = vmatpush.bf16.msra.mxu3 %v10182_v21 }
 0x279   :  { %v3316_v46 = vpop.f32.mrf.mxu3  ;;  %v3288_v37 = vadd.f32 %v3287_v35, %v3259_v14  ;;  %v3260_v0 = vpop.f32.mrf.mxu1  ;;  %v10167_v14 = vld [vmem:[%s13718_s2 + $0x9f8] sm:$0xff]  ;;  %v10173_v35 = vld [vmem:[%s13718_s2 + $0xa28] sm:$0xff] }
 0x27a   :  { %v3261_v51 = vadd.f32 %v3260_v0, %v3231_v53  ;;  %4010 = vmatpush.bf16.msra.mxu0 %v10159_v40  ;;  %4039 = vmatpush.bf16.msra.mxu1 %v10167_v14  ;;  %v10172_v53 = vld [vmem:[%s13718_s2 + $0xa20] sm:$0xff] }
 0x27b   :  { %v12174_v16 = vadd.f32 %v3316_v46, %v3288_v37  ;;  %4509 = vmatpush.bf16.msra.mxu2 %v10173_v35  ;;  %v10166_v37 = vld [vmem:[%s13718_s2 + $0x9f0] sm:$0xff]  ;;  %v10180_v14 = vld [vmem:[%s13718_s2 + $0xa60] sm:$0xff] }
 0x27c   :  { %4538 = vmatpush.bf16.msra.mxu3 %v10181_v52 }
 0x27e   :  { %4011 = vmatpush.bf16.msra.mxu0 %v10158_v30  ;;  %4040 = vmatpush.bf16.msra.mxu1 %v10166_v37 }
 0x27f   :  { %4510 = vmatpush.bf16.msra.mxu2 %v10172_v53 }
 0x280   :  { %v3289_v46 = vpop.f32.mrf.mxu2  ;;  %v3234_v21 = vpop.f32.mrf.mxu0  ;;  %4539 = vmatpush.bf16.msra.mxu3 %v10180_v14 }
 0x281   :  { %v3318_v7 = vpop.f32.mrf.mxu3  ;;  %v3290_v0 = vadd.f32 %v3289_v46, %v3261_v51  ;;  %v3263_v40 = vpop.f32.mrf.mxu1 }
 0x282   :  { %v3264_v35 = vadd.f32 %v3263_v40, %v3234_v21 }
 0x283   :  { %v12200_v52 = vadd.f32 %v3318_v7, %v3290_v0  ;;  %3906 = vmatmul.bf16.gmra.mxu0 %v10798_v32 }
 0x284   :  { %3935 = vmatmul.bf16.gmra.mxu1 %v10800_v33 }
 0x285   :  { %3964 = vmatmul.bf16.gmra.mxu2 %v10802_v34 }
 0x286   :  { %3993 = vmatmul.bf16.gmra.mxu3 %v13751_v29 }
 0x288   :  { %v3292_v51 = vpop.f32.mrf.mxu2  ;;  %v3236_v27 = vpop.f32.mrf.mxu0 }
 0x289   :  { %v3321_v46 = vpop.f32.mrf.mxu3  ;;  %v3293_v9 = vadd.f32 %v3292_v51, %v3264_v35  ;;  %v3265_v19 = vpop.f32.mrf.mxu1 }
 0x28a   :  { %v3266_v21 = vadd.f32 %v3265_v19, %v3236_v27 }
 0x28b   :  { %v12206_v30 = vadd.f32 %v3321_v46, %v3293_v9 }
 0x290   :  { %v3294_v7 = vpop.f32.mrf.mxu2  ;;  %v3239_v0 = vpop.f32.mrf.mxu0 }
 0x291   :  { %v3323_v37 = vpop.f32.mrf.mxu3  ;;  %v3295_v53 = vadd.f32 %v3294_v7, %v3266_v21  ;;  %v3268_v40 = vpop.f32.mrf.mxu1 }
 0x292   :  { %v3269_v14 = vadd.f32 %v3268_v40, %v3239_v0 }
 0x293   :  { %v12208_v39 = vadd.f32 %v3323_v37, %v3295_v53  ;;  %3911 = vmatmul.bf16.gmra.mxu0 %v10834_v48 }
 0x294   :  { %3940 = vmatmul.bf16.gmra.mxu1 %v13749_v15 }
 0x295   :  { %3969 = vmatmul.bf16.gmra.mxu2 %v10838_v50 }
 0x296   :  { %3998 = vmatmul.bf16.gmra.mxu3 %v11045_v11 }
 0x298   :  { %v3297_v35 = vpop.f32.mrf.mxu2  ;;  %v3241_v9 = vpop.f32.mrf.mxu0 }
 0x299   :  { %v3326_v19 = vpop.f32.mrf.mxu3  ;;  %v3298_v27 = vadd.f32 %v3297_v35, %v3269_v14  ;;  %v3270_v51 = vpop.f32.mrf.mxu1  ;;  %v10195_v14 = vld [vmem:[%s13718_s2 + $0xad8] sm:$0xff] }
 0x29a   :  { %v3271_v46 = vadd.f32 %v3270_v51, %v3241_v9  ;;  %v10203_v35 = vld [vmem:[%s13718_s2 + $0xb18] sm:$0xff]  ;;  %4561 = vmatpush.bf16.msrb.mxu0 %v10195_v14  ;;  %v10194_v9 = vld [vmem:[%s13718_s2 + $0xad0] sm:$0xff]  ;;  %v13754_v14 = vmax.f32 %v11774_v63, %v11971_v10  ;;  %v10217_v63 = vld [vmem:[%s13718_s2 + $0xb88] sm:$0xff] }
 0x29b   :  { %v12214_v21 = vadd.f32 %v3326_v19, %v3298_v27  ;;  %4590 = vmatpush.bf16.msrb.mxu1 %v10203_v35  ;;  %v10202_v51 = vld [vmem:[%s13718_s2 + $0xb10] sm:$0xff] }
 0x29e   :  { %4562 = vmatpush.bf16.msrb.mxu0 %v10194_v9  ;;  %v10192_v9 = vld [vmem:[%s13718_s2 + $0xac0] sm:$0xff] }
 0x29f   :  { %4591 = vmatpush.bf16.msrb.mxu1 %v10202_v51  ;;  %v10200_v51 = vld [vmem:[%s13718_s2 + $0xb00] sm:$0xff] }
 0x2a0   :  { %v3299_v7 = vpop.f32.mrf.mxu2  ;;  %v3340_v53 = vpop.f32.mrf.mxu0 }
 0x2a1   :  { %v3328_v0 = vpop.f32.mrf.mxu3  ;;  %v3300_v37 = vadd.f32 %v3299_v7, %v3271_v46  ;;  %v3369_v40 = vpop.f32.mrf.mxu1  ;;  %v3341_v45 = vadd.f32 %v3340_v53, %v12118_v49  ;;  %v10211_v49 = vld [vmem:[%s13718_s2 + $0xb58] sm:$0xff]  ;;  %v10210_v46 = vld [vmem:[%s13718_s2 + $0xb50] sm:$0xff] }
 0x2a2   :  { %4619 = vmatpush.bf16.msrb.mxu2 %v10211_v49  ;;  %v10218_v53 = vld [vmem:[%s13718_s2 + $0xb90] sm:$0xff] }
 0x2a3   :  { %v12217_v15 = vadd.f32 %v3328_v0, %v3300_v37  ;;  %v3370_v50 = vadd.f32 %v3369_v40, %v3341_v45  ;;  %4012 = vmatmul.bf16.vlgmr.msra.gmra.mxu0 %v10864_v58  ;;  %v10219_v45 = vld [vmem:[%s13718_s2 + $0xb98] sm:$0xff] }
 0x2a4   :  { %8919 = vmatmul.msk.bf16.vlgmr.msra.gmra.mxu1 %vm634_vm0, %v10866_v59  ;;  %4648 = vmatpush.bf16.msrb.mxu3 %v10219_v45  ;;  %v10201_v45 = vld [vmem:[%s13718_s2 + $0xb08] sm:$0xff] }
 0x2a5   :  { %4511 = vmatmul.bf16.vlgmr.msra.gmra.mxu2 %v10634_v41  ;;  %4592 = vmatpush.bf16.msrb.mxu1 %v10201_v45 }
 0x2a6   :  { %4540 = vmatmul.bf16.vlgmr.msra.gmra.mxu3 %v10636_v42  ;;  %4620 = vmatpush.bf16.msrb.mxu2 %v10210_v46  ;;  %v10208_v46 = vld [vmem:[%s13718_s2 + $0xb40] sm:$0xff] }
 0x2a8   :  { %v3398_v19 = vpop.f32.mrf.mxu2  ;;  %v3342_v0 = vpop.f32.mrf.mxu0  ;;  %4649 = vmatpush.bf16.msrb.mxu3 %v10218_v53  ;;  %v10216_v53 = vld [vmem:[%s13718_s2 + $0xb80] sm:$0xff] }
 0x2a9   :  { %v12236_v27 = vpop.f32.mrf.mxu3  ;;  %v3399_v7 = vadd.f32 %v3398_v19, %v3370_v50  ;;  %v3371_v37 = vpop.f32.mrf.mxu1  ;;  %v3343_v40 = vadd.f32 %v3342_v0, %v12144_v20  ;;  %v10193_v50 = vld [vmem:[%s13718_s2 + $0xac8] sm:$0xff]  ;;  %4593 = vmatpush.bf16.msrb.mxu1 %v10200_v51  ;;  %v10206_v51 = vld [vmem:[%s13718_s2 + $0xb30] sm:$0xff] }
 0x2aa   :  { %v10209_v20 = vld [vmem:[%s13718_s2 + $0xb48] sm:$0xff]  ;;  %4563 = vmatpush.bf16.msrb.mxu0 %v10193_v50 }
 0x2ab   :  { %v12254_v35 = vmax.f32 %v13754_v14, %v3399_v7  ;;  %v3372_v49 = vadd.f32 %v3371_v37, %v3343_v40  ;;  %4621 = vmatpush.bf16.msrb.mxu2 %v10209_v20  ;;  %v13755_v14 = vmax.f32 %v11804_v8, %v12000_v18  ;;  %v10207_v8 = vld [vmem:[%s13718_s2 + $0xb38] sm:$0xff] }
 0x2ac   :  { %4650 = vmatpush.bf16.msrb.mxu3 %v10217_v63  ;;  %v10215_v18 = vld [vmem:[%s13718_s2 + $0xb78] sm:$0xff] }
 0x2ae   :  { %4564 = vmatpush.bf16.msrb.mxu0 %v10192_v9  ;;  %v10198_v9 = vld [vmem:[%s13718_s2 + $0xaf0] sm:$0xff] }
 0x2af   :  { %4622 = vmatpush.bf16.msrb.mxu2 %v10208_v46 }
 0x2b0   :  { %v3400_v10 = vpop.f32.mrf.mxu2  ;;  %v3345_v0 = vpop.f32.mrf.mxu0  ;;  %4651 = vmatpush.bf16.msrb.mxu3 %v10216_v53 }
 0x2b1   :  { %v12268_v19 = vpop.f32.mrf.mxu3  ;;  %v3401_v7 = vadd.f32 %v3400_v10, %v3372_v49  ;;  %v3374_v37 = vpop.f32.mrf.mxu1  ;;  %v3346_v40 = vadd.f32 %v3345_v0, %v12174_v16  ;;  %v10191_v49 = vld [vmem:[%s13718_s2 + $0xab8] sm:$0xff]  ;;  %v10190_v10 = vld [vmem:[%s13718_s2 + $0xab0] sm:$0xff] }
 0x2b2   :  { %v10199_v16 = vld [vmem:[%s13718_s2 + $0xaf8] sm:$0xff]  ;;  %4565 = vmatpush.bf16.msrb.mxu0 %v10191_v49 }
 0x2b3   :  { %v12286_v50 = vmax.f32 %v13755_v14, %v3401_v7  ;;  %v3375_v45 = vadd.f32 %v3374_v37, %v3346_v40  ;;  %4017 = vmatmul.bf16.gmra.mxu0 %v10941_v23  ;;  %4594 = vmatpush.bf16.msrb.mxu1 %v10199_v16  ;;  %v10214_v37 = vld [vmem:[%s13718_s2 + $0xb70] sm:$0xff]  ;;  %v13756_v40 = vmax.f32 %v11836_v56, %v12034_v28  ;;  %v10197_v16 = vld [vmem:[%s13718_s2 + $0xae8] sm:$0xff] }
 0x2b4   :  { %8920 = vmatmul.msk.bf16.gmra.mxu1 %vm634_vm0, %v10943_v24  ;;  %4623 = vmatpush.bf16.msrb.mxu2 %v10207_v8  ;;  %v10213_v56 = vld [vmem:[%s13718_s2 + $0xb68] sm:$0xff] }
 0x2b5   :  { %4516 = vmatmul.bf16.gmra.mxu2 %v10712_v3  ;;  %4652 = vmatpush.bf16.msrb.mxu3 %v10215_v18  ;;  %v10188_v18 = vld [vmem:[%s13718_s2 + $0xaa0] sm:$0xff] }
 0x2b6   :  { %4545 = vmatmul.bf16.gmra.mxu3 %v10714_v4  ;;  %4566 = vmatpush.bf16.msrb.mxu0 %v10190_v10  ;;  %v10204_v10 = vld [vmem:[%s13718_s2 + $0xb20] sm:$0xff] }
 0x2b7   :  { %4595 = vmatpush.bf16.msrb.mxu1 %v10198_v9 }
 0x2b8   :  { %v3403_v20 = vpop.f32.mrf.mxu2  ;;  %v3347_v7 = vpop.f32.mrf.mxu0  ;;  %4624 = vmatpush.bf16.msrb.mxu2 %v10206_v51 }
 0x2b9   :  { %v12305_v63 = vpop.f32.mrf.mxu3  ;;  %v3404_v46 = vadd.f32 %v3403_v20, %v3375_v45  ;;  %v3376_v0 = vpop.f32.mrf.mxu1  ;;  %v3348_v53 = vadd.f32 %v3347_v7, %v12200_v52  ;;  %4653 = vmatpush.bf16.msrb.mxu3 %v10214_v37  ;;  %v10189_v45 = vld [vmem:[%s13718_s2 + $0xaa8] sm:$0xff]  ;;  %v10196_v20 = vld [vmem:[%s13718_s2 + $0xae0] sm:$0xff]  ;;  %v13757_v37 = vmax.f32 %v11872_v2, %v12063_v61 }
 0x2ba   :  { %v10205_v52 = vld [vmem:[%s13718_s2 + $0xb28] sm:$0xff]  ;;  %4567 = vmatpush.bf16.msrb.mxu0 %v10189_v45  ;;  %v10212_v7 = vld [vmem:[%s13718_s2 + $0xb60] sm:$0xff] }
 0x2bb   :  { %v12323_v14 = vmax.f32 %v13756_v40, %v3404_v46  ;;  %v3377_v49 = vadd.f32 %v3376_v0, %v3348_v53  ;;  %4596 = vmatpush.bf16.msrb.mxu1 %v10197_v16 }
 0x2bc   :  { %4625 = vmatpush.bf16.msrb.mxu2 %v10205_v52  ;;  %v13758_v52 = vmax.f32 %v11904_v1, %v12073_v38 }
 0x2bd   :  { %4654 = vmatpush.bf16.msrb.mxu3 %v10213_v56 }
 0x2be   :  { %4568 = vmatpush.bf16.msrb.mxu0 %v10188_v18 }
 0x2bf   :  { %4597 = vmatpush.bf16.msrb.mxu1 %v10196_v20 }
 0x2c0   :  { %v3405_v28 = vpop.f32.mrf.mxu2  ;;  %v3350_v51 = vpop.f32.mrf.mxu0  ;;  %4626 = vmatpush.bf16.msrb.mxu2 %v10204_v10 }
 0x2c1   :  { %v12337_v8 = vpop.f32.mrf.mxu3  ;;  %v3406_v9 = vadd.f32 %v3405_v28, %v3377_v49  ;;  %v3379_v46 = vpop.f32.mrf.mxu1  ;;  %v3351_v0 = vadd.f32 %v3350_v51, %v12206_v30  ;;  %4655 = vmatpush.bf16.msrb.mxu3 %v10212_v7  ;;  %v13759_v7 = vmax.f32 %v11916_v25, %v12078_v54  ;;  %v13760_v54 = vmax.f32 %v11924_v55, %v12088_v26  ;;  %v10233_v55 = vld [vmem:[%s13718_s2 + $0xc08] sm:$0xff] }
 0x2c2   :  { %v10241_v26 = vld [vmem:[%s13718_s2 + $0xc48] sm:$0xff] }
 0x2c3   :  { %v12355_v53 = vmax.f32 %v13757_v37, %v3406_v9  ;;  %v3380_v40 = vadd.f32 %v3379_v46, %v3351_v0  ;;  %4022 = vmatmul.bf16.gmra.mxu0 %v13752_v62  ;;  %5147 = vmatpush.bf16.msra.mxu1 %v10233_v55 }
 0x2c4   :  { %8921 = vmatmul.msk.bf16.gmra.mxu1 %vm634_vm0, %v13753_v60  ;;  %5176 = vmatpush.bf16.msra.mxu2 %v10241_v26 }
 0x2c5   :  { %4521 = vmatmul.bf16.gmra.mxu2 %v10796_v31 }
 0x2c6   :  { %4550 = vmatmul.bf16.gmra.mxu3 %v10798_v32 }
 0x2c8   :  { %v3408_v30 = vpop.f32.mrf.mxu2  ;;  %v3352_v16 = vpop.f32.mrf.mxu0 }
 0x2c9   :  { %v12362_v49 = vpop.f32.mrf.mxu3  ;;  %v3409_v45 = vadd.f32 %v3408_v30, %v3380_v40  ;;  %v3381_v2 = vpop.f32.mrf.mxu1  ;;  %v3353_v61 = vadd.f32 %v3352_v16, %v12208_v39 }
 0x2cb   :  { %v12368_v56 = vmax.f32 %v13758_v52, %v3409_v45  ;;  %v3382_v28 = vadd.f32 %v3381_v2, %v3353_v61 }
 0x2d0   :  { %v3410_v18 = vpop.f32.mrf.mxu2  ;;  %v3355_v9 = vpop.f32.mrf.mxu0 }
 0x2d1   :  { %v12370_v20 = vpop.f32.mrf.mxu3  ;;  %v3411_v10 = vadd.f32 %v3410_v18, %v3382_v28  ;;  %v3384_v51 = vpop.f32.mrf.mxu1  ;;  %v3356_v46 = vadd.f32 %v3355_v9, %v12214_v21 }
 0x2d3   :  { %v12376_v0 = vmax.f32 %v13759_v7, %v3411_v10  ;;  %v3385_v39 = vadd.f32 %v3384_v51, %v3356_v46  ;;  %4027 = vmatmul.bf16.gmra.mxu0 %v11047_v12  ;;  %v13761_v10 = vmax.f32 %v11936_v36, %v12092_v17  ;;  %v10232_v51 = vld [vmem:[%s13718_s2 + $0xc00] sm:$0xff] }
 0x2d4   :  { %8922 = vmatmul.msk.bf16.gmra.mxu1 %vm634_vm0, %v11049_v13  ;;  %v10240_v46 = vld [vmem:[%s13718_s2 + $0xc40] sm:$0xff] }
 0x2d5   :  { %4526 = vmatmul.bf16.gmra.mxu2 %v10832_v47  ;;  %v10248_v7 = vld [vmem:[%s13718_s2 + $0xc80] sm:$0xff]  ;;  %5148 = vmatpush.bf16.msra.mxu1 %v10232_v51 }
 0x2d6   :  { %4555 = vmatmul.bf16.gmra.mxu3 %v10834_v48  ;;  %5177 = vmatpush.bf16.msra.mxu2 %v10240_v46  ;;  %v10223_v46 = vld [vmem:[%s13718_s2 + $0xbb8] sm:$0xff] }
 0x2d8   :  { %v3413_v1 = vpop.f32.mrf.mxu2  ;;  %v3357_v21 = vpop.f32.mrf.mxu0 }
 0x2d9   :  { %v12383_v38 = vpop.f32.mrf.mxu3  ;;  %v3414_v37 = vadd.f32 %v3413_v1, %v3385_v39  ;;  %v3386_v40 = vpop.f32.mrf.mxu1  ;;  %v3358_v25 = vadd.f32 %v3357_v21, %v12217_v15 }
 0x2db   :  { %v12389_v30 = vmax.f32 %v13760_v54, %v3414_v37  ;;  %v3387_v45 = vadd.f32 %v3386_v40, %v3358_v25  ;;  %v10225_v54 = vld [vmem:[%s13718_s2 + $0xbc8] sm:$0xff] }
 0x2dc   :  { %4679 = vmatpush.bf16.msra.mxu0 %v10225_v54  ;;  %v10236_v54 = vld [vmem:[%s13718_s2 + $0xc20] sm:$0xff] }
 0x2e0   :  { %v3415_v16 = vpop.f32.mrf.mxu2  ;;  %v3897_v52 = vpop.f32.mrf.mxu0 }
 0x2e1   :  { %v12391_v2 = vpop.f32.mrf.mxu3  ;;  %v3416_v61 = vadd.f32 %v3415_v16, %v3387_v45  ;;  %v3926_v28 = vpop.f32.mrf.mxu1  ;;  %v3898_v18 = vadd.f32 %v3897_v52, %v12236_v27  ;;  %v10249_v27 = vld [vmem:[%s13718_s2 + $0xc88] sm:$0xff]  ;;  %v10231_v45 = vld [vmem:[%s13718_s2 + $0xbf8] sm:$0xff] }
 0x2e2   :  { %5205 = vmatpush.bf16.msra.mxu3 %v10249_v27  ;;  %v10239_v16 = vld [vmem:[%s13718_s2 + $0xc38] sm:$0xff]  ;;  %5149 = vmatpush.bf16.msra.mxu1 %v10231_v45  ;;  %v10246_v27 = vld [vmem:[%s13718_s2 + $0xc70] sm:$0xff] }
 0x2e3   :  { %v12397_v9 = vmax.f32 %v13761_v10, %v3416_v61  ;;  %v3927_v15 = vadd.f32 %v3926_v28, %v3898_v18  ;;  %4569 = vmatmul.bf16.vlgmr.msrb.gmra.mxu0 %v10638_v43  ;;  %5178 = vmatpush.bf16.msra.mxu2 %v10239_v16  ;;  %v10224_v28 = vld [vmem:[%s13718_s2 + $0xbc0] sm:$0xff]  ;;  %v10230_v18 = vld [vmem:[%s13718_s2 + $0xbf0] sm:$0xff] }
 0x2e4   :  { %4598 = vmatmul.bf16.vlgmr.msrb.gmra.mxu1 %v10640_v44  ;;  %v10238_v10 = vld [vmem:[%s13718_s2 + $0xc30] sm:$0xff]  ;;  %4680 = vmatpush.bf16.msra.mxu0 %v10224_v28 }
 0x2e5   :  { %13762 = vst [vmem:[#allocation8_spill] sm:$0xff] %v12397_v9  ;;  %4627 = vmatmul.bf16.vlgmr.msrb.gmra.mxu2 %v10862_v57 }
 0x2e6   :  { %4656 = vmatmul.bf16.vlgmr.msrb.gmra.mxu3 %v10864_v58  ;;  %5150 = vmatpush.bf16.msra.mxu1 %v10230_v18 }
 0x2e7   :  { %5206 = vmatpush.bf16.msra.mxu3 %v10248_v7  ;;  %5179 = vmatpush.bf16.msra.mxu2 %v10238_v10  ;;  %v10229_v7 = vld [vmem:[%s13718_s2 + $0xbe8] sm:$0xff] }
 0x2e8   :  { %v3955_v36 = vpop.f32.mrf.mxu2  ;;  %v3899_v1 = vpop.f32.mrf.mxu0  ;;  %4681 = vmatpush.bf16.msra.mxu0 %v10223_v46  ;;  %v10221_v10 = vld [vmem:[%s13718_s2 + $0xba8] sm:$0xff]  ;;  %v10234_v46 = vld [vmem:[%s13718_s2 + $0xc10] sm:$0xff] }
 0x2e9   :  { %v3984_v17 = vpop.f32.mrf.mxu3  ;;  %v3956_v39 = vadd.f32 %v3955_v36, %v3927_v15  ;;  %v3928_v37 = vpop.f32.mrf.mxu1  ;;  %v3900_v21 = vadd.f32 %v3899_v1, %v12268_v19  ;;  %v10247_v19 = vld [vmem:[%s13718_s2 + $0xc78] sm:$0xff] }
 0x2ea   :  { %5151 = vmatpush.bf16.msra.mxu1 %v10229_v7 }
 0x2eb   :  { %v12422_v40 = vadd.f32 %v3984_v17, %v3956_v39  ;;  %v3929_v25 = vadd.f32 %v3928_v37, %v3900_v21  ;;  %5207 = vmatpush.bf16.msra.mxu3 %v10247_v19  ;;  %v10245_v39 = vld [vmem:[%s13718_s2 + $0xc68] sm:$0xff]  ;;  %v10222_v21 = vld [vmem:[%s13718_s2 + $0xbb0] sm:$0xff] }
 0x2ec   :  { %4682 = vmatpush.bf16.msra.mxu0 %v10222_v21 }
 0x2ef   :  { %5208 = vmatpush.bf16.msra.mxu3 %v10246_v27 }
 0x2f0   :  { %v3957_v61 = vpop.f32.mrf.mxu2  ;;  %v3902_v55 = vpop.f32.mrf.mxu0  ;;  %4683 = vmatpush.bf16.msra.mxu0 %v10221_v10 }
 0x2f1   :  { %v3986_v52 = vpop.f32.mrf.mxu3  ;;  %v3958_v15 = vadd.f32 %v3957_v61, %v3929_v25  ;;  %v3931_v26 = vpop.f32.mrf.mxu1  ;;  %v3903_v36 = vadd.f32 %v3902_v55, %v12305_v63  ;;  %v10237_v63 = vld [vmem:[%s13718_s2 + $0xc28] sm:$0xff]  ;;  %v10228_v25 = vld [vmem:[%s13718_s2 + $0xbe0] sm:$0xff]  ;;  %v10235_v55 = vld [vmem:[%s13718_s2 + $0xc18] sm:$0xff] }
 0x2f2   :  { %5180 = vmatpush.bf16.msra.mxu2 %v10237_v63  ;;  %v10244_v61 = vld [vmem:[%s13718_s2 + $0xc60] sm:$0xff]  ;;  %5152 = vmatpush.bf16.msra.mxu1 %v10228_v25 }
 0x2f3   :  { %v12449_v17 = vadd.f32 %v3986_v52, %v3958_v15  ;;  %v3932_v51 = vadd.f32 %v3931_v26, %v3903_v36  ;;  %4574 = vmatmul.bf16.gmra.mxu0 %v10716_v5  ;;  %5209 = vmatpush.bf16.msra.mxu3 %v10245_v39  ;;  %v10227_v15 = vld [vmem:[%s13718_s2 + $0xbd8] sm:$0xff]  ;;  %v10220_v36 = vld [vmem:[%s13718_s2 + $0xba0] sm:$0xff] }
 0x2f4   :  { %4603 = vmatmul.bf16.gmra.mxu1 %v10718_v6  ;;  %4684 = vmatpush.bf16.msra.mxu0 %v10220_v36 }
 0x2f5   :  { %4632 = vmatmul.bf16.gmra.mxu2 %v10939_v22 }
 0x2f6   :  { %4661 = vmatmul.bf16.gmra.mxu3 %v10941_v23  ;;  %5181 = vmatpush.bf16.msra.mxu2 %v10236_v54 }
 0x2f7   :  { %5210 = vmatpush.bf16.msra.mxu3 %v10244_v61  ;;  %5153 = vmatpush.bf16.msra.mxu1 %v10227_v15 }
 0x2f8   :  { %v3960_v1 = vpop.f32.mrf.mxu2  ;;  %v3904_v16 = vpop.f32.mrf.mxu0 }
 0x2f9   :  { %v3989_v37 = vpop.f32.mrf.mxu3  ;;  %v3961_v45 = vadd.f32 %v3960_v1, %v3932_v51  ;;  %v3933_v19 = vpop.f32.mrf.mxu1  ;;  %v3905_v52 = vadd.f32 %v3904_v16, %v12337_v8  ;;  %v10243_v8 = vld [vmem:[%s13718_s2 + $0xc58] sm:$0xff]  ;;  %v10226_v51 = vld [vmem:[%s13718_s2 + $0xbd0] sm:$0xff] }
 0x2fa   :  { %5182 = vmatpush.bf16.msra.mxu2 %v10235_v55  ;;  %v10242_v1 = vld [vmem:[%s13718_s2 + $0xc50] sm:$0xff] }
 0x2fb   :  { %v12480_v28 = vadd.f32 %v3989_v37, %v3961_v45  ;;  %v3934_v18 = vadd.f32 %v3933_v19, %v3905_v52  ;;  %5211 = vmatpush.bf16.msra.mxu3 %v10243_v8  ;;  %5154 = vmatpush.bf16.msra.mxu1 %v10226_v51 }
 0x2fe   :  { %5183 = vmatpush.bf16.msra.mxu2 %v10234_v46  ;;  %v13763_v46 = vld [vmem:[#allocation6_spill] sm:$0xff] }
 0x2ff   :  { %5212 = vmatpush.bf16.msra.mxu3 %v10242_v1 }
 0x300   :  { %v3962_v26 = vpop.f32.mrf.mxu2  ;;  %v3907_v63 = vpop.f32.mrf.mxu0 }
 0x301   :  { %v3991_v27 = vpop.f32.mrf.mxu3  ;;  %v3963_v7 = vadd.f32 %v3962_v26, %v3934_v18  ;;  %v3936_v39 = vpop.f32.mrf.mxu1  ;;  %v3908_v37 = vadd.f32 %v3907_v63, %v12362_v49 }
 0x303   :  { %v12507_v21 = vadd.f32 %v3991_v27, %v3963_v7  ;;  %v3937_v25 = vadd.f32 %v3936_v39, %v3908_v37  ;;  %4579 = vmatmul.bf16.gmra.mxu0 %v10800_v33  ;;  %v13764_v7 = vld [vmem:[#allocation7_spill] sm:$0xff] }
 0x304   :  { %4608 = vmatmul.bf16.gmra.mxu1 %v10802_v34 }
 0x305   :  { %4637 = vmatmul.bf16.gmra.mxu2 %v13751_v29 }
 0x306   :  { %4666 = vmatmul.bf16.gmra.mxu3 %v13752_v62 }
 0x308   :  { %v3965_v54 = vpop.f32.mrf.mxu2  ;;  %v3909_v19 = vpop.f32.mrf.mxu0 }
 0x309   :  { %v3994_v45 = vpop.f32.mrf.mxu3  ;;  %v3966_v16 = vadd.f32 %v3965_v54, %v3937_v25  ;;  %v3938_v49 = vpop.f32.mrf.mxu1  ;;  %v3910_v61 = vadd.f32 %v3909_v19, %v12370_v20 }
 0x30b   :  { %v12514_v52 = vadd.f32 %v3994_v45, %v3966_v16  ;;  %v3939_v18 = vadd.f32 %v3938_v49, %v3910_v61 }
 0x310   :  { %v3967_v10 = vpop.f32.mrf.mxu2  ;;  %v3912_v8 = vpop.f32.mrf.mxu0 }
 0x311   :  { %v3996_v15 = vpop.f32.mrf.mxu3  ;;  %v3968_v55 = vadd.f32 %v3967_v10, %v3939_v18  ;;  %v3941_v26 = vpop.f32.mrf.mxu1  ;;  %v3913_v27 = vadd.f32 %v3912_v8, %v12383_v38 }
 0x313   :  { %v12517_v36 = vadd.f32 %v3996_v15, %v3968_v55  ;;  %v3942_v51 = vadd.f32 %v3941_v26, %v3913_v27  ;;  %4584 = vmatmul.bf16.gmra.mxu0 %v13763_v46  ;;  %v10265_v55 = vld [vmem:[%s13718_s2 + $0xd08] sm:$0xff]  ;;  %v10256_v27 = vld [vmem:[%s13718_s2 + $0xcc0] sm:$0xff] }
 0x314   :  { %4613 = vmatmul.bf16.gmra.mxu1 %v13764_v7 }
 0x315   :  { %4642 = vmatmul.bf16.gmra.mxu2 %v11045_v11  ;;  %5263 = vmatpush.bf16.msrb.mxu1 %v10265_v55 }
 0x316   :  { %4671 = vmatmul.bf16.gmra.mxu3 %v11047_v12 }
 0x318   :  { %v3970_v20 = vpop.f32.mrf.mxu2  ;;  %v3914_v1 = vpop.f32.mrf.mxu0 }
 0x319   :  { %v3999_v63 = vpop.f32.mrf.mxu3  ;;  %v3971_v39 = vadd.f32 %v3970_v20, %v3942_v51  ;;  %v3943_v37 = vpop.f32.mrf.mxu1  ;;  %v3915_v25 = vadd.f32 %v3914_v1, %v12391_v2  ;;  %v10257_v2 = vld [vmem:[%s13718_s2 + $0xcc8] sm:$0xff]  ;;  %v10264_v51 = vld [vmem:[%s13718_s2 + $0xd00] sm:$0xff] }
 0x31a   :  { %5234 = vmatpush.bf16.msrb.mxu0 %v10257_v2  ;;  %5264 = vmatpush.bf16.msrb.mxu1 %v10264_v51  ;;  %v10253_v51 = vld [vmem:[%s13718_s2 + $0xca8] sm:$0xff] }
 0x31b   :  { %v12524_v54 = vadd.f32 %v3999_v63, %v3971_v39  ;;  %v3944_v38 = vadd.f32 %v3943_v37, %v3915_v25  ;;  %v10255_v37 = vld [vmem:[%s13718_s2 + $0xcb8] sm:$0xff] }
 0x31c   :  { %v10263_v25 = vld [vmem:[%s13718_s2 + $0xcf8] sm:$0xff] }
 0x31e   :  { %5235 = vmatpush.bf16.msrb.mxu0 %v10256_v27  ;;  %5265 = vmatpush.bf16.msrb.mxu1 %v10263_v25 }
 0x320   :  { %v3972_v45 = vpop.f32.mrf.mxu2  ;;  %v4013_v49 = vpop.f32.mrf.mxu0 }
 0x321   :  { %v4001_v16 = vpop.f32.mrf.mxu3  ;;  %v3973_v19 = vadd.f32 %v3972_v45, %v3944_v38  ;;  %v4042_v61 = vpop.f32.mrf.mxu1  ;;  %v4014_v18 = vadd.f32 %v4013_v49, %v12422_v40  ;;  %v10273_v40 = vld [vmem:[%s13718_s2 + $0xd48] sm:$0xff]  ;;  %v10271_v38 = vld [vmem:[%s13718_s2 + $0xd38] sm:$0xff]  ;;  %v10254_v49 = vld [vmem:[%s13718_s2 + $0xcb0] sm:$0xff] }
 0x322   :  { %5292 = vmatpush.bf16.msrb.mxu2 %v10273_v40  ;;  %5236 = vmatpush.bf16.msrb.mxu0 %v10255_v37  ;;  %v10252_v37 = vld [vmem:[%s13718_s2 + $0xca0] sm:$0xff] }
 0x323   :  { %v12527_v10 = vadd.f32 %v4001_v16, %v3973_v19  ;;  %v12529_v15 = vadd.f32 %v4042_v61, %v4014_v18  ;;  %9247 = vmatmul.msk.bf16.vlgmr.msra.gmra.mxu0 %vm634_vm0, %v10866_v59  ;;  %v10262_v61 = vld [vmem:[%s13718_s2 + $0xcf0] sm:$0xff] }
 0x324   :  { %5155 = vmatmul.bf16.vlgmr.msra.gmra.mxu1 %v10634_v41  ;;  %v10270_v18 = vld [vmem:[%s13718_s2 + $0xd30] sm:$0xff] }
 0x325   :  { %5184 = vmatmul.bf16.vlgmr.msra.gmra.mxu2 %v10636_v42  ;;  %v10272_v42 = vld [vmem:[%s13718_s2 + $0xd40] sm:$0xff]  ;;  %5266 = vmatpush.bf16.msrb.mxu1 %v10262_v61  ;;  %v10251_v61 = vld [vmem:[%s13718_s2 + $0xc98] sm:$0xff] }
 0x326   :  { %5213 = vmatmul.bf16.vlgmr.msra.gmra.mxu3 %v10638_v43  ;;  %5293 = vmatpush.bf16.msrb.mxu2 %v10272_v42  ;;  %v10261_v42 = vld [vmem:[%s13718_s2 + $0xce8] sm:$0xff] }
 0x327   :  { %5237 = vmatpush.bf16.msrb.mxu0 %v10254_v49 }
 0x328   :  { %v4512_v41 = vpop.f32.mrf.mxu2  ;;  %v4015_v20 = vpop.f32.mrf.mxu0 }
 0x329   :  { %v4541_v26 = vpop.f32.mrf.mxu3  ;;  %v4044_v63 = vpop.f32.mrf.mxu1  ;;  %v4016_v39 = vadd.f32 %v4015_v20, %v12449_v17  ;;  %v10279_v17 = vld [vmem:[%s13718_s2 + $0xd78] sm:$0xff]  ;;  %5267 = vmatpush.bf16.msrb.mxu1 %v10261_v42  ;;  %v10258_v42 = vld [vmem:[%s13718_s2 + $0xcd0] sm:$0xff] }
 0x32a   :  { %v12556_v43 = vadd.f32 %v4541_v26, %v4512_v41  ;;  %5294 = vmatpush.bf16.msrb.mxu2 %v10271_v38  ;;  %5323 = vmatpush.bf16.msrb.mxu3 %v10279_v17  ;;  %v10278_v41 = vld [vmem:[%s13718_s2 + $0xd70] sm:$0xff] }
 0x32b   :  { %v12559_v1 = vadd.f32 %v4044_v63, %v4016_v39  ;;  %5238 = vmatpush.bf16.msrb.mxu0 %v10253_v51  ;;  %v10250_v51 = vld [vmem:[%s13718_s2 + $0xc90] sm:$0xff] }
 0x32e   :  { %5295 = vmatpush.bf16.msrb.mxu2 %v10270_v18  ;;  %5324 = vmatpush.bf16.msrb.mxu3 %v10278_v41  ;;  %v10259_v18 = vld [vmem:[%s13718_s2 + $0xcd8] sm:$0xff] }
 0x32f   :  { %5239 = vmatpush.bf16.msrb.mxu0 %v10252_v37  ;;  %v10274_v37 = vld [vmem:[%s13718_s2 + $0xd50] sm:$0xff] }
 0x330   :  { %v4514_v16 = vpop.f32.mrf.mxu2  ;;  %v4018_v55 = vpop.f32.mrf.mxu0 }
 0x331   :  { %v4543_v19 = vpop.f32.mrf.mxu3  ;;  %v4047_v40 = vpop.f32.mrf.mxu1  ;;  %v4019_v26 = vadd.f32 %v4018_v55, %v12480_v28  ;;  %v10269_v28 = vld [vmem:[%s13718_s2 + $0xd28] sm:$0xff]  ;;  %v10267_v55 = vld [vmem:[%s13718_s2 + $0xd18] sm:$0xff] }
 0x332   :  { %v12584_v2 = vadd.f32 %v4543_v19, %v4514_v16  ;;  %5296 = vmatpush.bf16.msrb.mxu2 %v10269_v28  ;;  %v10276_v16 = vld [vmem:[%s13718_s2 + $0xd60] sm:$0xff]  ;;  %v10266_v28 = vld [vmem:[%s13718_s2 + $0xd10] sm:$0xff] }
 0x333   :  { %v12590_v27 = vadd.f32 %v4047_v40, %v4019_v26  ;;  %9248 = vmatmul.msk.bf16.gmra.mxu0 %vm634_vm0, %v10943_v24 }
 0x334   :  { %5160 = vmatmul.bf16.gmra.mxu1 %v10712_v3  ;;  %v10277_v3 = vld [vmem:[%s13718_s2 + $0xd68] sm:$0xff]  ;;  %5240 = vmatpush.bf16.msrb.mxu0 %v10251_v61 }
 0x335   :  { %5189 = vmatmul.bf16.gmra.mxu2 %v10714_v4  ;;  %5325 = vmatpush.bf16.msrb.mxu3 %v10277_v3  ;;  %v10260_v4 = vld [vmem:[%s13718_s2 + $0xce0] sm:$0xff] }
 0x336   :  { %5218 = vmatmul.bf16.gmra.mxu3 %v10716_v5  ;;  %v10268_v5 = vld [vmem:[%s13718_s2 + $0xd20] sm:$0xff]  ;;  %5268 = vmatpush.bf16.msrb.mxu1 %v10260_v4 }
 0x337   :  { %5297 = vmatpush.bf16.msrb.mxu2 %v10268_v5 }
 0x338   :  { %v4517_v63 = vpop.f32.mrf.mxu2  ;;  %v4020_v38 = vpop.f32.mrf.mxu0  ;;  %5241 = vmatpush.bf16.msrb.mxu0 %v10250_v51 }
 0x339   :  { %v4546_v39 = vpop.f32.mrf.mxu3  ;;  %v4049_v17 = vpop.f32.mrf.mxu1  ;;  %v4021_v19 = vadd.f32 %v4020_v38, %v12507_v21  ;;  %5326 = vmatpush.bf16.msrb.mxu3 %v10276_v16  ;;  %v10275_v21 = vld [vmem:[%s13718_s2 + $0xd58] sm:$0xff] }
 0x33a   :  { %v12620_v25 = vadd.f32 %v4546_v39, %v4517_v63  ;;  %5269 = vmatpush.bf16.msrb.mxu1 %v10259_v18 }
 0x33b   :  { %v12626_v49 = vadd.f32 %v4049_v17, %v4021_v19  ;;  %5298 = vmatpush.bf16.msrb.mxu2 %v10267_v55  ;;  %v10462_v55 = vmov 0  }
 0x33c   :  { %10290 = vset.pattern.permute.xlu1 %v10462_v55  ;;  %10289 = vset.pattern.permute.xlu0 %v10462_v55 }
 0x33d   :  { %5327 = vmatpush.bf16.msrb.mxu3 %v10275_v21  ;;  %10291 = vset.pattern.permute.xlu2 %v10462_v55 }
 0x33e   :  { %5270 = vmatpush.bf16.msrb.mxu1 %v10258_v42 }
 0x33f   :  { %5299 = vmatpush.bf16.msrb.mxu2 %v10266_v28  ;;  %v5365_v28 = vld [vmem:[%s13717_s1 + $0x38] sm:$0xff] }
 0x340   :  { %v4519_v41 = vpop.f32.mrf.mxu2  ;;  %v4023_v63 = vpop.f32.mrf.mxu0  ;;  %5403 = vperm.xlu0 %10289, %v5365_v28  }
 0x341   :  { %v4548_v26 = vpop.f32.mrf.mxu3  ;;  %v4052_v39 = vpop.f32.mrf.mxu1  ;;  %v4024_v4 = vadd.f32 %v4023_v63, %v12514_v52  ;;  %5328 = vmatpush.bf16.msrb.mxu3 %v10274_v37  ;;  %v5362_v63 = vld [vmem:[%s13717_s1 + $0x20] sm:$0xff] }
 0x342   :  { %v12651_v3 = vadd.f32 %v4548_v26, %v4519_v41 }
 0x343   :  { %v12657_v5 = vadd.f32 %v4052_v39, %v4024_v4  ;;  %9249 = vmatmul.msk.bf16.gmra.mxu0 %vm634_vm0, %v13753_v60 }
 0x344   :  { %5165 = vmatmul.bf16.gmra.mxu1 %v10796_v31  ;;  %v5363_v31 = vld [vmem:[%s13717_s1 + $0x28] sm:$0xff] }
 0x345   :  { %5194 = vmatmul.bf16.gmra.mxu2 %v10798_v32  ;;  %5393 = vperm.xlu1 %10290, %v5363_v31  }
 0x346   :  { %5223 = vmatmul.bf16.gmra.mxu3 %v10800_v33 }
 0x348   :  { %v4522_v17 = vpop.f32.mrf.mxu2  ;;  %v4025_v19 = vpop.f32.mrf.mxu0 }
 0x349   :  { %v4551_v52 = vpop.f32.mrf.mxu3  ;;  %v4054_v61 = vpop.f32.mrf.mxu1  ;;  %v4026_v18 = vadd.f32 %v4025_v19, %v12517_v36 }
 0x34a   :  { %v12666_v16 = vadd.f32 %v4551_v52, %v4522_v17 }
 0x34b   :  { %v12672_v32 = vadd.f32 %v4054_v61, %v4026_v18 }
 0x34d   :  { %5388 = vperm.xlu1 %10290, %v5362_v63  }
 0x350   :  { %v4524_v21 = vpop.f32.mrf.mxu2  ;;  %v4028_v51 = vpop.f32.mrf.mxu0 }
 0x351   :  { %v4553_v41 = vpop.f32.mrf.mxu3  ;;  %v4057_v36 = vpop.f32.mrf.mxu1  ;;  %v4029_v42 = vadd.f32 %v4028_v51, %v12524_v54  ;;  %v5359_v51 = vld [vmem:[%s13717_s1 + $0x8] sm:$0xff] }
 0x352   :  { %v12676_v26 = vadd.f32 %v4553_v41, %v4524_v21 }
 0x353   :  { %v12685_v39 = vadd.f32 %v4057_v36, %v4029_v42  ;;  %9250 = vmatmul.msk.bf16.gmra.mxu0 %vm634_vm0, %v11049_v13 }
 0x354   :  { %5170 = vmatmul.bf16.gmra.mxu1 %v10832_v47  ;;  %v5364_v47 = vld [vmem:[%s13717_s1 + $0x30] sm:$0xff] }
 0x355   :  { %5199 = vmatmul.bf16.gmra.mxu2 %v10834_v48  ;;  %v5358_v48 = vld [vmem:[%s13717_s1] sm:$0xff]  ;;  %5398 = vperm.xlu0 %10289, %v5364_v47  }
 0x356   :  { %5228 = vmatmul.bf16.gmra.mxu3 %v13763_v46  ;;  %5368 = vperm.xlu1 %10290, %v5358_v48  }
 0x358   :  { %v4527_v37 = vpop.f32.mrf.mxu2  ;;  %v4030_v52 = vpop.f32.mrf.mxu0 }
 0x359   :  { %v4556_v4 = vpop.f32.mrf.mxu3  ;;  %v4059_v19 = vpop.f32.mrf.mxu1  ;;  %v4031_v61 = vadd.f32 %v4030_v52, %v12527_v10 }
 0x35a   :  { %v12694_v17 = vadd.f32 %v4556_v4, %v4527_v37 }
 0x35b   :  { %v12703_v46 = vadd.f32 %v4059_v19, %v4031_v61  ;;  %v5361_v61 = vld [vmem:[%s13717_s1 + $0x18] sm:$0xff] }
 0x35c   :  { %5383 = vperm.xlu2 %10291, %v5361_v61  }
 0x35d   :  { %13765 = vst [vmem:[#allocation9_spill] sm:$0xff] %v12703_v46  ;;  %5373 = vperm.xlu0 %10289, %v5359_v51   ;;  %v13766_v46 = vmax.f32 %v12254_v35, %v12529_v15 }
 0x360   :  { %v4529_v55 = vpop.f32.mrf.mxu2  ;;  %v4570_v10 = vpop.f32.mrf.mxu0 }
 0x361   :  { %v4558_v31 = vpop.f32.mrf.mxu3  ;;  %v4599_v41 = vpop.f32.mrf.mxu1 }
 0x362   :  { %v12707_v21 = vadd.f32 %v4558_v31, %v4529_v55 }
 0x363   :  { %5242 = vmatmul.bf16.vlgmr.msrb.gmra.mxu0 %v10640_v44 }
 0x364   :  { %5271 = vmatmul.bf16.vlgmr.msrb.gmra.mxu1 %v10862_v57 }
 0x365   :  { %5300 = vmatmul.bf16.vlgmr.msrb.gmra.mxu2 %v10864_v58 }
 0x366   :  { %9575 = vmatmul.msk.bf16.vlgmr.msrb.gmra.mxu3 %vm634_vm0, %v10866_v59 }
 0x368   :  { %v4628_v36 = vpop.f32.mrf.mxu2  ;;  %v4572_v28 = vpop.f32.mrf.mxu0 }
 0x369   :  { %v4657_v42 = vpop.f32.mrf.mxu3  ;;  %v4601_v63 = vpop.f32.mrf.mxu1 }
 0x370   :  { %v4630_v37 = vpop.f32.mrf.mxu2  ;;  %v4575_v52 = vpop.f32.mrf.mxu0 }
 0x371   :  { %v4659_v4 = vpop.f32.mrf.mxu3  ;;  %v4604_v19 = vpop.f32.mrf.mxu1 }
 0x373   :  { %5247 = vmatmul.bf16.gmra.mxu0 %v10718_v6 }
 0x374   :  { %5276 = vmatmul.bf16.gmra.mxu1 %v10939_v22  ;;  %v5360_v22 = vld [vmem:[%s13717_s1 + $0x10] sm:$0xff]  ;;  %s10463_s1 = smov 126  }
 0x375   :  { %5305 = vmatmul.bf16.gmra.mxu2 %v10941_v23  ;;  %5378 = vperm.xlu2 %10291, %v5360_v22  }
 0x376   :  { %9576 = vmatmul.msk.bf16.gmra.mxu3 %vm634_vm0, %v10943_v24 }
 0x378   :  { %v4633_v44 = vpop.f32.mrf.mxu2  ;;  %v4577_v58 = vpop.f32.mrf.mxu0 }
 0x379   :  { %v4662_v57 = vpop.f32.mrf.mxu3  ;;  %v4606_v59 = vpop.f32.mrf.mxu1  ;;  %v4578_v35 = vadd.f32 %v4577_v58, %v12651_v3 }
 0x380   :  { %v4635_v47 = vpop.f32.mrf.mxu2  ;;  %v4580_v55 = vpop.f32.mrf.mxu0 }
 0x381   :  { %v4664_v48 = vpop.f32.mrf.mxu3  ;;  %v4609_v6 = vpop.f32.mrf.mxu1 }
 0x383   :  { %5252 = vmatmul.bf16.gmra.mxu0 %v10802_v34  ;;  %v4571_v34 = vadd.f32 %v4570_v10, %v12556_v43 }
 0x384   :  { %5281 = vmatmul.bf16.gmra.mxu1 %v13751_v29 }
 0x385   :  { %5310 = vmatmul.bf16.gmra.mxu2 %v13752_v62  ;;  %v4600_v38 = vadd.f32 %v4599_v41, %v4571_v34 }
 0x386   :  { %9577 = vmatmul.msk.bf16.gmra.mxu3 %vm634_vm0, %v13753_v60 }
 0x387   :  { %v4629_v40 = vadd.f32 %v4628_v36, %v4600_v38  ;;  %v4576_v38 = vadd.f32 %v4575_v52, %v12620_v25  ;;  %v4607_v52 = vadd.f32 %v4606_v59, %v4578_v35 }
 0x388   :  { %v4638_v23 = vpop.f32.mrf.mxu2  ;;  %v4582_v31 = vpop.f32.mrf.mxu0 }
 0x389   :  { %v4667_v24 = vpop.f32.mrf.mxu3  ;;  %v4611_v51 = vpop.f32.mrf.mxu1 }
 0x390   :  { %v12733_v61 = vpop.f32.mrf.mxu2  ;;  %v12737_v54 = vpop.f32.mrf.mxu0 }
 0x391   :  { %v12735_v18 = vpop.f32.mrf.mxu3  ;;  %v12739_v33 = vpop.f32.mrf.mxu1 }
 0x393   :  { %5257 = vmatmul.bf16.gmra.mxu0 %v13764_v7  ;;  %v4573_v7 = vadd.f32 %v4572_v28, %v12584_v2  ;;  %v4605_v28 = vadd.f32 %v4604_v19, %v4576_v38  ;;  %v4636_v19 = vadd.f32 %v4635_v47, %v4607_v52  ;;  %v13769_v47 = vmax.f32 %v12355_v53, %v12626_v49 }
 0x394   :  { %5286 = vmatmul.bf16.gmra.mxu1 %v11045_v11  ;;  %v4658_v11 = vadd.f32 %v4657_v42, %v4629_v40  ;;  %v4586_v49 = vadd.f32 %v12737_v54, %v12694_v17 }
 0x395   :  { %5315 = vmatmul.bf16.gmra.mxu2 %v11047_v12  ;;  %v4602_v43 = vadd.f32 %v4601_v63, %v4573_v7  ;;  %v4634_v63 = vadd.f32 %v4633_v44, %v4605_v28  ;;  %v13768_v44 = vmax.f32 %v12323_v14, %v12590_v27  ;;  %v4583_v14 = vadd.f32 %v4582_v31, %v12676_v26 }
 0x396   :  { %9578 = vmatmul.msk.bf16.gmra.mxu3 %vm634_vm0, %v11049_v13 }
 0x397   :  { %v4631_v8 = vadd.f32 %v4630_v37, %v4602_v43  ;;  %v13767_v37 = vmax.f32 %v12286_v50, %v12559_v1  ;;  %v4663_v15 = vadd.f32 %v4662_v57, %v4634_v63  ;;  %v4581_v50 = vadd.f32 %v4580_v55, %v12666_v16 }
 0x398   :  { %v12747_v29 = vpop.f32.mrf.mxu2  ;;  %v12751_v60 = vpop.f32.mrf.mxu0  ;;  %v4665_v1 = vadd.f32 %v4664_v48, %v4636_v19  ;;  %v4612_v28 = vadd.f32 %v4611_v51, %v4583_v14  ;;  %v4615_v51 = vadd.f32 %v12739_v33, %v4586_v49 }
 0x399   :  { %v12749_v62 = vpop.f32.mrf.mxu3  ;;  %v12753_v22 = vpop.f32.mrf.mxu1  ;;  %v4660_v41 = vadd.f32 %v4659_v4, %v4631_v8  ;;  %v4588_v54 = vadd.f32 %v12751_v60, %v12707_v21 }
 0x39a   :  { %v4644_v35 = vadd.f32 %v12747_v29, %v4615_v51 }
 0x39b   :  { %v4617_v33 = vadd.f32 %v12753_v22, %v4588_v54  ;;  %v13774_v22 = vld [vmem:[#allocation9_spill] sm:$0xff] }
 0x39c   :  { %v4673_v17 = vadd.f32 %v12749_v62, %v4644_v35 }
 0x3a0   :  { %v12756_v20 = vpop.f32.mrf.mxu2  ;;  %v4686_v13 = vpop.f32.mrf.mxu0 }
 0x3a1   :  { %v12758_v12 = vpop.f32.mrf.mxu3  ;;  %v12760_v45 = vpop.f32.mrf.mxu1  ;;  %v4687_v10 = vadd.f32 %v4686_v13, %v4658_v11 }
 0x3a3   :  { %v12765_v9 = vmax.f32 %v13766_v46, %v4687_v10  ;;  %v4610_v10 = vadd.f32 %v4609_v6, %v4581_v50  ;;  %v4641_v6 = vadd.f32 %v12733_v61, %v4612_v28 }
 0x3a5   :  { %v4639_v59 = vadd.f32 %v4638_v23, %v4610_v10  ;;  %v13770_v23 = vmax.f32 %v12368_v56, %v12657_v5  ;;  %v4670_v26 = vadd.f32 %v12735_v18, %v4641_v6  ;;  %v13771_v56 = vmax.f32 %v12376_v0, %v12672_v32 }
 0x3a6   :  { %v13772_v0 = vmax.f32 %v12389_v30, %v12685_v39 }
 0x3a7   :  { %v4668_v27 = vadd.f32 %v4667_v24, %v4639_v59 }
 0x3a8   :  { %v12768_v2 = vpop.f32.mrf.mxu2  ;;  %v4688_v36 = vpop.f32.mrf.mxu0 }
 0x3a9   :  { %v12770_v40 = vpop.f32.mrf.mxu3  ;;  %v12772_v42 = vpop.f32.mrf.mxu1  ;;  %v4689_v34 = vadd.f32 %v4688_v36, %v4660_v41  ;;  %v5186_v30 = vadd.f32 %v12768_v2, %v12760_v45 }
 0x3ab   :  { %v12777_v7 = vmax.f32 %v13767_v37, %v4689_v34  ;;  %v5215_v14 = vadd.f32 %v12770_v40, %v5186_v30 }
 0x3b0   :  { %v12780_v25 = vpop.f32.mrf.mxu2  ;;  %v4691_v46 = vpop.f32.mrf.mxu0 }
 0x3b1   :  { %v12782_v8 = vpop.f32.mrf.mxu3  ;;  %v12784_v4 = vpop.f32.mrf.mxu1  ;;  %v4692_v11 = vadd.f32 %v4691_v46, %v4663_v15 }
 0x3b2   :  { %v12864_v39 = vpop.permute.xlu0 %5403 }
 0x3b3   :  { %v12789_v13 = vmax.f32 %v13768_v44, %v4692_v11  ;;  %v4646_v11 = vadd.f32 %v12756_v20, %v4617_v33 }
 0x3b5   :  { %v4675_v21 = vadd.f32 %v12758_v12, %v4646_v11 }
 0x3b7   :  { %v12862_v20 = vpop.permute.xlu1 %5393 }
 0x3b8   :  { %v12792_v3 = vpop.f32.mrf.mxu2  ;;  %v4693_v58 = vpop.f32.mrf.mxu0 }
 0x3b9   :  { %v12794_v57 = vpop.f32.mrf.mxu3  ;;  %v12796_v43 = vpop.f32.mrf.mxu1  ;;  %v4694_v38 = vadd.f32 %v4693_v58, %v4665_v1  ;;  %v13773_v1 = vld [vmem:[#allocation8_spill] sm:$0xff]  ;;  %v5191_v40 = vadd.f32 %v12792_v3, %v12784_v4 }
 0x3ba   :  { %v13775_v58 = vmax.f32 %v13773_v1, %v13774_v22 }
 0x3bb   :  { %v12801_v41 = vmax.f32 %v13769_v47, %v4694_v38 }
 0x3bf   :  { %v12874_v49 = vpop.permute.xlu1 %5388 }
 0x3c0   :  { %v12804_v16 = vpop.f32.mrf.mxu2  ;;  %v4696_v55 = vpop.f32.mrf.mxu0 }
 0x3c1   :  { %v12806_v48 = vpop.f32.mrf.mxu3  ;;  %v12808_v36 = vpop.f32.mrf.mxu1  ;;  %v4697_v34 = vadd.f32 %v4696_v55, %v4668_v27  ;;  %v5188_v27 = vadd.f32 %v12780_v25, %v12772_v42 }
 0x3c3   :  { %v12814_v53 = vmax.f32 %v13770_v23, %v4697_v34  ;;  %v5217_v45 = vadd.f32 %v12782_v8, %v5188_v27  ;;  %v5220_v8 = vadd.f32 %v12794_v57, %v5191_v40 }
 0x3c8   :  { %v12819_v24 = vpop.f32.mrf.mxu2  ;;  %v4698_v63 = vpop.f32.mrf.mxu0 }
 0x3c9   :  { %v12821_v31 = vpop.f32.mrf.mxu3  ;;  %v12823_v37 = vpop.f32.mrf.mxu1  ;;  %v4699_v61 = vadd.f32 %v4698_v63, %v4670_v26 }
 0x3ca   :  { %v12876_v26 = vpop.permute.xlu0 %5398  ;;  %v5369_v11 = vpop.permute.xlu1 %5368 }
 0x3cb   :  { %v12830_v5 = vmax.f32 %v13771_v56, %v4699_v61 }
 0x3d0   :  { %v12835_v18 = vpop.f32.mrf.mxu2  ;;  %v4701_v46 = vpop.f32.mrf.mxu0 }
 0x3d1   :  { %v12837_v15 = vpop.f32.mrf.mxu3  ;;  %v12839_v52 = vpop.f32.mrf.mxu1  ;;  %v4702_v29 = vadd.f32 %v4701_v46, %v4673_v17 }
 0x3d3   :  { %v12846_v32 = vmax.f32 %v13772_v0, %v4702_v29  ;;  %v5193_v29 = vadd.f32 %v12804_v16, %v12796_v43  ;;  %v5374_v0 = vpop.permute.xlu0 %5373  ;;  %v5384_v43 = vpop.permute.xlu2 %5383 }
 0x3d8   :  { %v12849_v62 = vpop.f32.mrf.mxu2  ;;  %v4703_v19 = vpop.f32.mrf.mxu0 }
 0x3d9   :  { %v12851_v60 = vpop.f32.mrf.mxu3  ;;  %v12853_v44 = vpop.f32.mrf.mxu1  ;;  %v4704_v50 = vadd.f32 %v4703_v19, %v4675_v21 }
 0x3db   :  { %v12858_v10 = vmax.f32 %v13775_v58, %v4704_v50  ;;  %v5222_v50 = vadd.f32 %v12806_v48, %v5193_v29 }
 0x3e0   :  { %v12866_v12 = vpop.f32.mrf.mxu2  ;;  %v5243_v59 = vpop.f32.mrf.mxu0 }
 0x3e1   :  { %v12868_v38 = vpop.f32.mrf.mxu3  ;;  %v5272_v47 = vpop.f32.mrf.mxu1  ;;  %v5244_v55 = vadd.f32 %v5243_v59, %v5215_v14 }
 0x3e3   :  { %v5273_v2 = vadd.f32 %v5272_v47, %v5244_v55 }
 0x3e8   :  { %v5301_v28 = vpop.f32.mrf.mxu2  ;;  %v5245_v6 = vpop.f32.mrf.mxu0 }
 0x3e9   :  { %v5330_v34 = vpop.f32.mrf.mxu3  ;;  %v5274_v23 = vpop.f32.mrf.mxu1  ;;  %v5302_v63 = vadd.f32 %v5301_v28, %v5273_v2  ;;  %v5246_v51 = vadd.f32 %v5245_v6, %v5217_v45 }
 0x3eb   :  { %v5331_v61 = vadd.f32 %v5330_v34, %v5302_v63  ;;  %v5275_v35 = vadd.f32 %v5274_v23, %v5246_v51  ;;  %v5198_v23 = vadd.f32 %v12835_v18, %v12823_v37  ;;  %v5379_v63 = vpop.permute.xlu2 %5378  ;;  %v5201_v37 = vadd.f32 %v12849_v62, %v12839_v52 }
 0x3ed   :  { %v5350_v46 = vmax.f32 %v12765_v9, %v5331_v61  ;;  %v5227_v61 = vadd.f32 %v12837_v15, %v5198_v23  ;;  %v5230_v15 = vadd.f32 %v12851_v60, %v5201_v37  ;;  %v5427_v23 = vld [vmem:[%s13720_s4 + $0x68] sm:$0xff]  ;;  %v5418_v37 = vld [vmem:[%s13720_s4 + $0x20] sm:$0xff] }
 0x3ef   :  { %v12885_v3 = vadd.f32 %v5369_v11, %v5350_v46 }
 0x3f0   :  { %v5303_v42 = vpop.f32.mrf.mxu2  ;;  %v5248_v54 = vpop.f32.mrf.mxu0 }
 0x3f1   :  { %v5332_v25 = vpop.f32.mrf.mxu3  ;;  %v5304_v56 = vadd.f32 %v5303_v42, %v5275_v35  ;;  %v5277_v17 = vpop.f32.mrf.mxu1  ;;  %v5249_v21 = vadd.f32 %v5248_v54, %v5220_v8 }
 0x3f3   :  { %v5333_v33 = vadd.f32 %v5332_v25, %v5304_v56  ;;  %v5278_v57 = vadd.f32 %v5277_v17, %v5249_v21  ;;  %v5203_v21 = vadd.f32 %v12866_v12, %v12853_v44 }
 0x3f5   :  { %v5351_v4 = vmax.f32 %v12777_v7, %v5333_v33  ;;  %v5196_v7 = vadd.f32 %v12819_v24, %v12808_v36 }
 0x3f7   :  { %v12887_v19 = vadd.f32 %v5374_v0, %v5351_v4  ;;  %v5225_v45 = vadd.f32 %v12821_v31, %v5196_v7 }
 0x3f8   :  { %v5306_v1 = vpop.f32.mrf.mxu2  ;;  %v5250_v58 = vpop.f32.mrf.mxu0 }
 0x3f9   :  { %v5335_v22 = vpop.f32.mrf.mxu3  ;;  %v5279_v9 = vpop.f32.mrf.mxu1  ;;  %v12892_v30 = vpack.i.bf16 %v12885_v3, %v12887_v19  ;;  %v5307_v16 = vadd.f32 %v5306_v1, %v5278_v57  ;;  %v5251_v59 = vadd.f32 %v5250_v58, %v5222_v50 }
 0x3fb   :  { %v5336_v47 = vadd.f32 %v5335_v22, %v5307_v16  ;;  %v5280_v14 = vadd.f32 %v5279_v9, %v5251_v59  ;;  %v5232_v22 = vadd.f32 %v12868_v38, %v5203_v21 }
 0x3fd   :  { %v5352_v2 = vmax.f32 %v12789_v13, %v5336_v47 }
 0x3ff   :  { %v5408_v36 = vadd.f32 %v5379_v63, %v5352_v2  ;;  %v5425_v2 = vld [vmem:[%s13720_s4 + $0x58] sm:$0xff]  ;;  %v5422_v63 = vld [vmem:[%s13720_s4 + $0x40] sm:$0xff] }
 0x400   :  { %v5308_v27 = vpop.f32.mrf.mxu2  ;;  %v5253_v28 = vpop.f32.mrf.mxu0 }
 0x401   :  { %v5337_v55 = vpop.f32.mrf.mxu3  ;;  %v5309_v48 = vadd.f32 %v5308_v27, %v5280_v14  ;;  %v5282_v34 = vpop.f32.mrf.mxu1  ;;  %v5254_v40 = vadd.f32 %v5253_v28, %v5225_v45  ;;  %v5428_v28 = vld [vmem:[%s13720_s4 + $0x70] sm:$0xff]  ;;  %v5533_v45 = vld [vmem:[%s13719_s3 + $0x38] sm:$0xff] }
 0x403   :  { %v5338_v6 = vadd.f32 %v5337_v55, %v5309_v48  ;;  %v5283_v25 = vadd.f32 %v5282_v34, %v5254_v40  ;;  %v5532_v48 = vld [vmem:[%s13719_s3 + $0x30] sm:$0xff]  ;;  %v5429_v34 = vld [vmem:[%s13720_s4 + $0x78] sm:$0xff] }
 0x404   :  { %v5424_v40 = vld [vmem:[%s13720_s4 + $0x50] sm:$0xff] }
 0x405   :  { %v5353_v51 = vmax.f32 %v12801_v41, %v5338_v6  ;;  %v5426_v6 = vld [vmem:[%s13720_s4 + $0x60] sm:$0xff] }
 0x407   :  { %v5409_v24 = vadd.f32 %v5384_v43, %v5353_v51  ;;  %v5423_v51 = vld [vmem:[%s13720_s4 + $0x48] sm:$0xff] }
 0x408   :  { %v5311_v35 = vpop.f32.mrf.mxu2  ;;  %v5255_v56 = vpop.f32.mrf.mxu0 }
 0x409   :  { %v5340_v42 = vpop.f32.mrf.mxu3  ;;  %v12902_v54 = vpack.i.bf16 %v5408_v36, %v5409_v24  ;;  %v5284_v31 = vpop.f32.mrf.mxu1  ;;  %v5312_v13 = vadd.f32 %v5311_v35, %v5283_v25  ;;  %v5256_v17 = vadd.f32 %v5255_v56, %v5227_v61  ;;  %v5419_v61 = vld [vmem:[%s13720_s4 + $0x28] sm:$0xff]  ;;  %v5420_v35 = vld [vmem:[%s13720_s4 + $0x30] sm:$0xff] }
 0x40a   :  { %v5536_v25 = vld [vmem:[%s13719_s3 + $0x50] sm:$0xff] }
 0x40b   :  { %v5341_v18 = vadd.f32 %v5340_v42, %v5312_v13  ;;  %v5285_v8 = vadd.f32 %v5284_v31, %v5256_v17  ;;  %v5421_v42 = vld [vmem:[%s13720_s4 + $0x38] sm:$0xff]  ;;  %v5416_v31 = vld [vmem:[%s13720_s4 + $0x10] sm:$0xff] }
 0x40c   :  { %v5417_v17 = vld [vmem:[%s13720_s4 + $0x18] sm:$0xff] }
 0x40d   :  { %v5354_v11 = vmax.f32 %v12814_v53, %v5341_v18 }
 0x40f   :  { %v5410_v52 = vadd.f32 %v12874_v49, %v5354_v11  ;;  %v5414_v11 = vld [vmem:[%s13720_s4] sm:$0xff] }
 0x410   :  { %v5313_v41 = vpop.f32.mrf.mxu2  ;;  %v5258_v29 = vpop.f32.mrf.mxu0 }
 0x411   :  { %v5342_v46 = vpop.f32.mrf.mxu3  ;;  %v5314_v33 = vadd.f32 %v5313_v41, %v5285_v8  ;;  %v5287_v4 = vpop.f32.mrf.mxu1  ;;  %v5259_v1 = vadd.f32 %v5258_v29, %v5230_v15  ;;  %v5537_v41 = vld [vmem:[%s13719_s3 + $0x58] sm:$0xff]  ;;  %v6887_v29 = vld [vmem:[#allocation2] sm:$0x1] }
 0x413   :  { %v5343_v0 = vadd.f32 %v5342_v46, %v5314_v33  ;;  %v5288_v9 = vadd.f32 %v5287_v4, %v5259_v1  ;;  %v5538_v4 = vld [vmem:[%s13719_s3 + $0x60] sm:$0xff] }
 0x415   :  { %v5355_v50 = vmax.f32 %v12830_v5, %v5343_v0  ;;  %v5415_v0 = vld [vmem:[%s13720_s4 + $0x8] sm:$0xff] }
 0x417   :  { %v5411_v62 = vadd.f32 %v12862_v20, %v5355_v50 }
 0x418   :  { %v5316_v57 = vpop.f32.mrf.mxu2  ;;  %v5260_v60 = vpop.f32.mrf.mxu0 }
 0x419   :  { %v5345_v58 = vpop.f32.mrf.mxu3  ;;  %v10302_v43 = vpack.i.bf16 %v5410_v52, %v5411_v62  ;;  %v5317_v53 = vadd.f32 %v5316_v57, %v5288_v9  ;;  %v5261_v16 = vadd.f32 %v5260_v60, %v5232_v22  ;;  %v5289_v5 = vpop.f32.mrf.mxu1  ;;  %v9627_v22 = vld [vmem:[%s13719_s3 + $0x100] sm:$0xff] }
 0x41b   :  { %10303 = vrot.lane.b32.xlu1 %v10302_v43, %s10463_s1  ;;  %10298 = vrot.lane.b32.xlu0 %v10302_v43, %s10464_s29  ;;  %v5346_v44 = vadd.f32 %v5345_v58, %v5317_v53  ;;  %v5290_v20 = vadd.f32 %v5289_v5, %v5261_v16  ;;  %v5539_v58 = vld [vmem:[%s13719_s3 + $0x68] sm:$0xff] }
 0x41c   :  { %10293 = vrot.lane.b32.xlu2 %v10302_v43, %s10465_s30 }
 0x41d   :  { %v5356_v59 = vmax.f32 %v12846_v32, %v5346_v44  ;;  %v5526_v32 = vld [vmem:[%s13719_s3] sm:$0xff]  ;;  %v9628_v44 = vld [vmem:[%s13719_s3 + $0x108] sm:$0xff] }
 0x41f   :  { %v5412_v14 = vadd.f32 %v12876_v26, %v5356_v59  ;;  %v5529_v26 = vld [vmem:[%s13719_s3 + $0x18] sm:$0xff] }
 0x420   :  { %v5318_v12 = vpop.f32.mrf.mxu2 }
 0x421   :  { %v5319_v38 = vadd.f32 %v5318_v12, %v5290_v20  ;;  %v5347_v49 = vpop.f32.mrf.mxu3 }
 0x423   :  { %v5348_v7 = vadd.f32 %v5347_v49, %v5319_v38 }
 0x425   :  { %v5357_v47 = vmax.f32 %v12858_v10, %v5348_v7  ;;  %v5527_v10 = vld [vmem:[%s13719_s3 + $0x8] sm:$0xff]  ;;  %v5540_v7 = vld [vmem:[%s13719_s3 + $0x70] sm:$0xff] }
 0x427   :  { %v5413_v27 = vadd.f32 %v12864_v39, %v5357_v47  ;;  %v5528_v39 = vld [vmem:[%s13719_s3 + $0x10] sm:$0xff] }
 0x429   :  { %5599 = vmatpush.msra.mxu0 %v5413_v27  ;;  %v10327_v55 = vpack.i.bf16 %v5412_v14, %v5413_v27 }
 0x42b   :  { %5600 = vmatpush.msra.mxu0 %v5412_v14  ;;  %10328 = vrot.lane.b32.xlu1 %v10327_v55, %s10463_s1 }
 0x42c   :  { %10318 = vrot.lane.b32.xlu0 %v10327_v55, %s10464_s29  ;;  %10308 = vrot.lane.b32.xlu2 %v10327_v55, %s10465_s30 }
 0x42d   :  { %5601 = vmatpush.msra.mxu0 %v5411_v62 }
 0x42f   :  { %5602 = vmatpush.msra.mxu0 %v5410_v52 }
 0x431   :  { %5603 = vmatpush.msra.mxu0 %v5409_v24 }
 0x433   :  { %10333 = vrot.lane.b32.xlu1 %v12902_v54, %s10463_s1  ;;  %5604 = vmatpush.msra.mxu0 %v5408_v36  ;;  %v5535_v36 = vld [vmem:[%s13719_s3 + $0x48] sm:$0xff] }
 0x434   :  { %10323 = vrot.lane.b32.xlu0 %v12902_v54, %s10464_s29  ;;  %10313 = vrot.lane.b32.xlu2 %v12902_v54, %s10465_s30 }
 0x435   :  { %5605 = vmatpush.msra.mxu0 %v12887_v19  ;;  %v5531_v19 = vld [vmem:[%s13719_s3 + $0x28] sm:$0xff] }
 0x437   :  { %5606 = vmatpush.msra.mxu0 %v12885_v3  ;;  %v5530_v3 = vld [vmem:[%s13719_s3 + $0x20] sm:$0xff] }
 0x438   :  { %9579 = vmatmul.msk.f32.vlgmr.msra.gmra.mxu0 %vm5542_vm1, %v5526_v32 }
 0x43b   :  { %10348 = vrot.lane.b32.xlu1 %v12892_v30, %s10463_s1 }
 0x43c   :  { %10343 = vrot.lane.b32.xlu0 %v12892_v30, %s10464_s29  ;;  %10338 = vrot.lane.b32.xlu2 %v12892_v30, %s10465_s30 }
 0x440   :  { %9580 = vmatmul.msk.f32.gmra.mxu0 %vm5542_vm1, %v5527_v10 }
 0x443   :  { %10358 = vrot.lane.b32.xlu1 %v10302_v43, %s10466_s11 }
 0x444   :  { %10353 = vrot.lane.b32.xlu0 %v10302_v43, %s10467_s12  ;;  %10363 = vrot.lane.b32.xlu2 %v10302_v43, %s10468_s13 }
 0x448   :  { %9581 = vmatmul.msk.f32.gmra.mxu0 %vm5542_vm1, %v5528_v39  ;;  %v9629_v39 = vld [vmem:[%s13719_s3 + $0x110] sm:$0xff] }
 0x44b   :  { %10373 = vrot.lane.b32.xlu1 %v12902_v54, %s10467_s12 }
 0x44c   :  { %10368 = vrot.lane.b32.xlu0 %v10302_v43, %s10469_s14  ;;  %10378 = vrot.lane.b32.xlu2 %v12902_v54, %s10466_s11 }
 0x450   :  { %9582 = vmatmul.msk.f32.gmra.mxu0 %vm5542_vm1, %v5529_v26 }
 0x453   :  { %10398 = vrot.lane.b32.xlu1 %v10327_v55, %s10468_s13 }
 0x454   :  { %10388 = vrot.lane.b32.xlu0 %v10327_v55, %s10466_s11  ;;  %10383 = vrot.lane.b32.xlu2 %v10327_v55, %s10467_s12 }
 0x458   :  { %9583 = vmatmul.msk.f32.gmra.mxu0 %vm5542_vm1, %v5530_v3  ;;  %v5541_v3 = vld [vmem:[%s13719_s3 + $0x78] sm:$0xff] }
 0x45b   :  { %10403 = vrot.lane.b32.xlu1 %v12902_v54, %s10469_s14 }
 0x45c   :  { %10393 = vrot.lane.b32.xlu0 %v12902_v54, %s10468_s13  ;;  %10408 = vrot.lane.b32.xlu2 %v10327_v55, %s10469_s14 }
 0x460   :  { %9584 = vmatmul.msk.f32.gmra.mxu0 %vm5542_vm1, %v5531_v19 }
 0x463   :  { %10423 = vrot.lane.b32.xlu1 %v12892_v30, %s10468_s13 }
 0x464   :  { %10418 = vrot.lane.b32.xlu0 %v12892_v30, %s10466_s11  ;;  %10413 = vrot.lane.b32.xlu2 %v12892_v30, %s10467_s12 }
 0x468   :  { %9585 = vmatmul.msk.f32.gmra.mxu0 %vm5542_vm1, %v5532_v48 }
 0x46b   :  { %5502 = vperm.xlu1 %10290, %v5428_v28  }
 0x46c   :  { %5507 = vperm.xlu0 %10289, %v5429_v34   ;;  %10428 = vrot.lane.b32.xlu2 %v12892_v30, %s10469_s14  ;;  %v5534_v30 = vld [vmem:[%s13719_s3 + $0x40] sm:$0xff] }
 0x470   :  { %9586 = vmatmul.msk.f32.gmra.mxu0 %vm5542_vm1, %v5533_v45 }
 0x473   :  { %5487 = vperm.xlu1 %10290, %v5425_v2  }
 0x474   :  { %5492 = vperm.xlu0 %10289, %v5426_v6   ;;  %5497 = vperm.xlu2 %10291, %v5427_v23  }
 0x476   :  { %v10294_v24 = vpop.permute.xlu2 %10293 }
 0x477   :  { %v10295_v18 = vunpack.i.l.bf16 %v10294_v24  ;;  %v10296_v8 = vunpack.i.h.bf16 %v10294_v24 }
 0x478   :  { %9587 = vmatmul.msk.f32.gmra.mxu0 %vm5542_vm1, %v5534_v30  ;;  %v9595_v30 = vld [vmem:[%s13719_s3 + $0x80] sm:$0xff] }
 0x47b   :  { %5472 = vperm.xlu1 %10290, %v5422_v63   ;;  %v9659_v63 = vld [vmem:[%s13719_s3 + $0x180] sm:$0xff] }
 0x47c   :  { %5477 = vperm.xlu0 %10289, %v5423_v51   ;;  %5482 = vperm.xlu2 %10291, %v5424_v40   ;;  %v9630_v51 = vld [vmem:[%s13719_s3 + $0x118] sm:$0xff] }
 0x480   :  { %9588 = vmatmul.msk.f32.gmra.mxu0 %vm5542_vm1, %v5535_v36 }
 0x483   :  { %5457 = vperm.xlu1 %10290, %v5419_v61  }
 0x484   :  { %5462 = vperm.xlu0 %10289, %v5420_v35   ;;  %5467 = vperm.xlu2 %10291, %v5421_v42  }
 0x486   :  { %v10309_v56 = vpop.permute.xlu2 %10308 }
 0x487   :  { %v10310_v54 = vunpack.i.l.bf16 %v10309_v56  ;;  %v10311_v13 = vunpack.i.h.bf16 %v10309_v56  ;;  %v9596_v56 = vld [vmem:[%s13719_s3 + $0x88] sm:$0xff] }
 0x488   :  { %9589 = vmatmul.msk.f32.gmra.mxu0 %vm5542_vm1, %v5536_v25 }
 0x489   :  { %5947 = vmatpush.msra.mxu2 %v10310_v54  ;;  %v9660_v54 = vld [vmem:[%s13719_s3 + $0x188] sm:$0xff] }
 0x48b   :  { %5948 = vmatpush.msra.mxu2 %v10311_v13  ;;  %5442 = vperm.xlu1 %10290, %v5416_v31   ;;  %v9631_v31 = vld [vmem:[%s13719_s3 + $0x120] sm:$0xff] }
 0x48c   :  { %5447 = vperm.xlu0 %10289, %v5417_v17   ;;  %5452 = vperm.xlu2 %10291, %v5418_v37  }
 0x48d   :  { %5949 = vmatpush.msra.mxu2 %v10295_v18  ;;  %v10304_v21 = vpop.permute.xlu1 %10303  ;;  %v10299_v50 = vpop.permute.xlu0 %10298 }
 0x48e   :  { %v10314_v46 = vpop.permute.xlu2 %10313  ;;  %v10305_v20 = vunpack.i.l.bf16 %v10304_v21  ;;  %v10300_v12 = vunpack.i.l.bf16 %v10299_v50  ;;  %v10306_v38 = vunpack.i.h.bf16 %v10304_v21  ;;  %v10301_v49 = vunpack.i.h.bf16 %v10299_v50 }
 0x48f   :  { %v10315_v33 = vunpack.i.l.bf16 %v10314_v46  ;;  %5950 = vmatpush.msra.mxu2 %v10296_v8  ;;  %v10316_v15 = vunpack.i.h.bf16 %v10314_v46 }
 0x490   :  { %9590 = vmatmul.msk.f32.gmra.mxu0 %vm5542_vm1, %v5537_v41 }
 0x491   :  { %5951 = vmatpush.msra.mxu2 %v10315_v33 }
 0x493   :  { %5952 = vmatpush.msra.mxu2 %v10316_v15  ;;  %6890 = vperm.xlu1 %10290, %v6887_v29   ;;  %v9597_v29 = vld [vmem:[%s13719_s3 + $0x90] sm:$0xff] }
 0x494   :  { %5432 = vperm.xlu0 %10289, %v5414_v11   ;;  %5437 = vperm.xlu2 %10291, %v5415_v0   ;;  %v9661_v15 = vld [vmem:[%s13719_s3 + $0x190] sm:$0xff]  ;;  %v9632_v0 = vld [vmem:[%s13719_s3 + $0x128] sm:$0xff] }
 0x496   :  { %v10339_v1 = vpop.permute.xlu2 %10338 }
 0x497   :  { %v10340_v52 = vunpack.i.l.bf16 %v10339_v1  ;;  %v10341_v62 = vunpack.i.h.bf16 %v10339_v1 }
 0x498   :  { %9591 = vmatmul.msk.f32.gmra.mxu0 %vm5542_vm1, %v5538_v4 }
 0x499   :  { %5953 = vmatpush.msra.mxu2 %v10340_v52 }
 0x49b   :  { %5954 = vmatpush.msra.mxu2 %v10341_v62 }
 0x49c   :  { %9643 = vmatmul.msk.f32.vlgmr.msra.gmra.mxu2 %vm5542_vm1, %v9627_v22 }
 0x49d   :  { %v10329_v57 = vpop.permute.xlu1 %10328 }
 0x49e   :  { %v10330_v9 = vunpack.i.l.bf16 %v10329_v57  ;;  %v10319_v60 = vpop.permute.xlu0 %10318  ;;  %v13053_v43 = vpop.permute.xlu2 %10363  ;;  %v10331_v16 = vunpack.i.h.bf16 %v10329_v57 }
 0x49f   :  { %v10320_v53 = vunpack.i.l.bf16 %v10319_v60  ;;  %v10321_v5 = vunpack.i.h.bf16 %v10319_v60  ;;  %v10365_v60 = vunpack.i.l.bf16 %v13053_v43 }
 0x4a0   :  { %9592 = vmatmul.msk.f32.gmra.mxu0 %vm5542_vm1, %v5539_v58  ;;  %5777 = vmatpush.msra.mxu1 %v10330_v9  ;;  %v9598_v58 = vld [vmem:[%s13719_s3 + $0x98] sm:$0xff] }
 0x4a1   :  { %6117 = vmatpush.msra.mxu3 %v10320_v53  ;;  %v9662_v9 = vld [vmem:[%s13719_s3 + $0x198] sm:$0xff] }
 0x4a2   :  { %5778 = vmatpush.msra.mxu1 %v10331_v16  ;;  %v9633_v16 = vld [vmem:[%s13719_s3 + $0x130] sm:$0xff] }
 0x4a3   :  { %6118 = vmatpush.msra.mxu3 %v10321_v5  ;;  %v10366_v5 = vunpack.i.h.bf16 %v13053_v43 }
 0x4a4   :  { %5779 = vmatpush.msra.mxu1 %v10305_v20  ;;  %9644 = vmatmul.msk.f32.gmra.mxu2 %vm5542_vm1, %v9628_v44 }
 0x4a5   :  { %6119 = vmatpush.msra.mxu3 %v10300_v12  ;;  %v10334_v59 = vpop.permute.xlu1 %10333 }
 0x4a6   :  { %v10335_v47 = vunpack.i.l.bf16 %v10334_v59  ;;  %v10324_v14 = vpop.permute.xlu0 %10323  ;;  %v13063_v27 = vpop.permute.xlu2 %10378  ;;  %5780 = vmatpush.msra.mxu1 %v10306_v38  ;;  %v10336_v32 = vunpack.i.h.bf16 %v10334_v59 }
 0x4a7   :  { %v10325_v55 = vunpack.i.l.bf16 %v10324_v14  ;;  %6120 = vmatpush.msra.mxu3 %v10301_v49  ;;  %v10326_v10 = vunpack.i.h.bf16 %v10324_v14  ;;  %v10380_v49 = vunpack.i.l.bf16 %v13063_v27  ;;  %v10381_v43 = vunpack.i.h.bf16 %v13063_v27 }
 0x4a8   :  { %9593 = vmatmul.msk.f32.gmra.mxu0 %vm5542_vm1, %v5540_v7  ;;  %5781 = vmatpush.msra.mxu1 %v10335_v47 }
 0x4a9   :  { %6121 = vmatpush.msra.mxu3 %v10325_v55 }
 0x4aa   :  { %5782 = vmatpush.msra.mxu1 %v10336_v32  ;;  %v9599_v32 = vld [vmem:[%s13719_s3 + $0xa0] sm:$0xff] }
 0x4ab   :  { %6122 = vmatpush.msra.mxu3 %v10326_v10  ;;  %v9663_v10 = vld [vmem:[%s13719_s3 + $0x1a0] sm:$0xff] }
 0x4ac   :  { %9645 = vmatmul.msk.f32.gmra.mxu2 %vm5542_vm1, %v9629_v39 }
 0x4ad   :  { %v10349_v26 = vpop.permute.xlu1 %10348 }
 0x4ae   :  { %v10350_v19 = vunpack.i.l.bf16 %v10349_v26  ;;  %v10344_v48 = vpop.permute.xlu0 %10343  ;;  %v10384_v28 = vpop.permute.xlu2 %10383  ;;  %v10351_v2 = vunpack.i.h.bf16 %v10349_v26  ;;  %v9634_v26 = vld [vmem:[%s13719_s3 + $0x138] sm:$0xff] }
 0x4af   :  { %v10345_v34 = vunpack.i.l.bf16 %v10344_v48  ;;  %v10385_v45 = vunpack.i.l.bf16 %v10384_v28  ;;  %v10346_v6 = vunpack.i.h.bf16 %v10344_v48  ;;  %v10386_v23 = vunpack.i.h.bf16 %v10384_v28 }
 0x4b0   :  { %9594 = vmatmul.msk.f32.gmra.mxu0 %vm5542_vm1, %v5541_v3  ;;  %5783 = vmatpush.msra.mxu1 %v10350_v19 }
 0x4b1   :  { %6123 = vmatpush.msra.mxu3 %v10345_v34  ;;  %6627 = vmatpush.msrb.mxu2 %v10385_v45 }
 0x4b2   :  { %5784 = vmatpush.msra.mxu1 %v10351_v2  ;;  %v9600_v2 = vld [vmem:[%s13719_s3 + $0xa8] sm:$0xff] }
 0x4b3   :  { %6124 = vmatpush.msra.mxu3 %v10346_v6  ;;  %6628 = vmatpush.msrb.mxu2 %v10386_v23  ;;  %v9664_v6 = vld [vmem:[%s13719_s3 + $0x1a8] sm:$0xff] }
 0x4b4   :  { %9611 = vmatmul.msk.f32.vlgmr.msra.gmra.mxu1 %vm5542_vm1, %v9595_v30  ;;  %9675 = vmatmul.msk.f32.vlgmr.msra.gmra.mxu3 %vm5542_vm1, %v9659_v63  ;;  %v9691_v30 = vld [vmem:[%s13719_s3 + $0x200] sm:$0xff] }
 0x4b5   :  { %v13085_v40 = vpop.permute.xlu1 %10358  ;;  %9646 = vmatmul.msk.f32.gmra.mxu2 %vm5542_vm1, %v9630_v51  ;;  %v13097_v13 = vpop.f32.mrf.mxu0  ;;  %v9635_v63 = vld [vmem:[%s13719_s3 + $0x140] sm:$0xff]  ;;  %v9601_v51 = vld [vmem:[%s13719_s3 + $0xb0] sm:$0xff] }
 0x4b6   :  { %v10354_v36 = vpop.permute.xlu0 %10353  ;;  %v10409_v24 = vpop.permute.xlu2 %10408  ;;  %v10360_v53 = vunpack.i.l.bf16 %v13085_v40  ;;  %v10361_v44 = vunpack.i.h.bf16 %v13085_v40  ;;  %v9665_v40 = vld [vmem:[%s13719_s3 + $0x1b0] sm:$0xff] }
 0x4b7   :  { %v10355_v61 = vunpack.i.l.bf16 %v10354_v36  ;;  %v10410_v35 = vunpack.i.l.bf16 %v10409_v24  ;;  %v10356_v42 = vunpack.i.h.bf16 %v10354_v36  ;;  %v10411_v25 = vunpack.i.h.bf16 %v10409_v24  ;;  %v9692_v36 = vld [vmem:[%s13719_s3 + $0x208] sm:$0xff] }
 0x4b8   :  { %v9636_v24 = vld [vmem:[%s13719_s3 + $0x148] sm:$0xff] }
 0x4b9   :  { %6457 = vmatpush.msrb.mxu1 %v10410_v35  ;;  %6629 = vmatpush.msrb.mxu2 %v10355_v61  ;;  %v9602_v35 = vld [vmem:[%s13719_s3 + $0xb8] sm:$0xff] }
 0x4bb   :  { %6458 = vmatpush.msrb.mxu1 %v10411_v25  ;;  %6630 = vmatpush.msrb.mxu2 %v10356_v42  ;;  %v9666_v42 = vld [vmem:[%s13719_s3 + $0x1b8] sm:$0xff]  ;;  %v9693_v25 = vld [vmem:[%s13719_s3 + $0x210] sm:$0xff] }
 0x4bc   :  { %9612 = vmatmul.msk.f32.gmra.mxu1 %vm5542_vm1, %v9596_v56  ;;  %9676 = vmatmul.msk.f32.gmra.mxu3 %vm5542_vm1, %v9660_v54  ;;  %v9637_v56 = vld [vmem:[%s13719_s3 + $0x150] sm:$0xff] }
 0x4bd   :  { %v10374_v17 = vpop.permute.xlu1 %10373  ;;  %9647 = vmatmul.msk.f32.gmra.mxu2 %vm5542_vm1, %v9631_v31  ;;  %v13113_v50 = vpop.f32.mrf.mxu0  ;;  %v9603_v31 = vld [vmem:[%s13719_s3 + $0xc0] sm:$0xff] }
 0x4be   :  { %v10375_v37 = vunpack.i.l.bf16 %v10374_v17  ;;  %v10369_v18 = vpop.permute.xlu0 %10368  ;;  %v10376_v41 = vunpack.i.h.bf16 %v10374_v17  ;;  %v10414_v46 = vpop.permute.xlu2 %10413  ;;  %v9667_v17 = vld [vmem:[%s13719_s3 + $0x1c0] sm:$0xff] }
 0x4bf   :  { %v10370_v8 = vunpack.i.l.bf16 %v10369_v18  ;;  %v10371_v33 = vunpack.i.h.bf16 %v10369_v18  ;;  %v10415_v11 = vunpack.i.l.bf16 %v10414_v46  ;;  %v10416_v21 = vunpack.i.h.bf16 %v10414_v46  ;;  %v9638_v18 = vld [vmem:[%s13719_s3 + $0x158] sm:$0xff]  ;;  %v9668_v46 = vld [vmem:[%s13719_s3 + $0x1c8] sm:$0xff] }
 0x4c0   :  { %6631 = vmatpush.msrb.mxu2 %v10375_v37  ;;  %v9694_v37 = vld [vmem:[%s13719_s3 + $0x218] sm:$0xff] }
 0x4c1   :  { %6459 = vmatpush.msrb.mxu1 %v10370_v8 }
 0x4c2   :  { %6632 = vmatpush.msrb.mxu2 %v10376_v41  ;;  %v9604_v41 = vld [vmem:[%s13719_s3 + $0xc8] sm:$0xff] }
 0x4c3   :  { %6460 = vmatpush.msrb.mxu1 %v10371_v33  ;;  %v9695_v33 = vld [vmem:[%s13719_s3 + $0x220] sm:$0xff] }
 0x4c4   :  { %9613 = vmatmul.msk.f32.gmra.mxu1 %vm5542_vm1, %v9597_v29  ;;  %9677 = vmatmul.msk.f32.gmra.mxu3 %vm5542_vm1, %v9661_v15  ;;  %v9639_v15 = vld [vmem:[%s13719_s3 + $0x160] sm:$0xff] }
 0x4c5   :  { %6633 = vmatpush.msrb.mxu2 %v10415_v11  ;;  %v10399_v4 = vpop.permute.xlu1 %10398  ;;  %v13133_v47 = vpop.f32.mrf.mxu0  ;;  %v9605_v11 = vld [vmem:[%s13719_s3 + $0xd0] sm:$0xff] }
 0x4c6   :  { %v10400_v1 = vunpack.i.l.bf16 %v10399_v4  ;;  %v10389_v52 = vpop.permute.xlu0 %10388  ;;  %9648 = vmatmul.msk.f32.gmra.mxu2 %vm5542_vm1, %v9632_v0  ;;  %v10401_v22 = vunpack.i.h.bf16 %v10399_v4  ;;  %v10429_v7 = vpop.permute.xlu2 %10428  ;;  %v9669_v0 = vld [vmem:[%s13719_s3 + $0x1d0] sm:$0xff]  ;;  %v9696_v4 = vld [vmem:[%s13719_s3 + $0x228] sm:$0xff] }
 0x4c7   :  { %v10390_v62 = vunpack.i.l.bf16 %v10389_v52  ;;  %6634 = vmatpush.msrb.mxu2 %v10416_v21  ;;  %v10391_v57 = vunpack.i.h.bf16 %v10389_v52  ;;  %v10430_v39 = vunpack.i.l.bf16 %v10429_v7  ;;  %v10431_v27 = vunpack.i.h.bf16 %v10429_v7  ;;  %v9608_v7 = vld [vmem:[%s13719_s3 + $0xe8] sm:$0xff] }
 0x4c8   :  { %6797 = vmatpush.msrb.mxu3 %v10400_v1  ;;  %v9640_v1 = vld [vmem:[%s13719_s3 + $0x168] sm:$0xff] }
 0x4c9   :  { %6287 = vmatpush.msrb.mxu0 %v10390_v62  ;;  %v9606_v62 = vld [vmem:[%s13719_s3 + $0xd8] sm:$0xff] }
 0x4ca   :  { %6798 = vmatpush.msrb.mxu3 %v10401_v22  ;;  %v9670_v22 = vld [vmem:[%s13719_s3 + $0x1d8] sm:$0xff] }
 0x4cb   :  { %6288 = vmatpush.msrb.mxu0 %v10391_v57  ;;  %v9697_v57 = vld [vmem:[%s13719_s3 + $0x230] sm:$0xff] }
 0x4cc   :  { %9614 = vmatmul.msk.f32.gmra.mxu1 %vm5542_vm1, %v9598_v58  ;;  %9678 = vmatmul.msk.f32.gmra.mxu3 %vm5542_vm1, %v9662_v9  ;;  %v9641_v58 = vld [vmem:[%s13719_s3 + $0x170] sm:$0xff] }
 0x4cd   :  { %6289 = vmatpush.msrb.mxu0 %v10360_v53  ;;  %6799 = vmatpush.msrb.mxu3 %v10365_v60  ;;  %v10404_v20 = vpop.permute.xlu1 %10403  ;;  %v13154_v23 = vpop.f32.mrf.mxu0 }
 0x4ce   :  { %v10405_v12 = vunpack.i.l.bf16 %v10404_v20  ;;  %v10394_v38 = vpop.permute.xlu0 %10393  ;;  %9649 = vmatmul.msk.f32.gmra.mxu2 %vm5542_vm1, %v9633_v16  ;;  %v10406_v14 = vunpack.i.h.bf16 %v10404_v20  ;;  %v13274_v60 = vpop.permute.xlu2 %5497  ;;  %v9607_v16 = vld [vmem:[%s13719_s3 + $0xe0] sm:$0xff]  ;;  %v9642_v20 = vld [vmem:[%s13719_s3 + $0x178] sm:$0xff] }
 0x4cf   :  { %v10395_v59 = vunpack.i.l.bf16 %v10394_v38  ;;  %6290 = vmatpush.msrb.mxu0 %v10361_v44  ;;  %6800 = vmatpush.msrb.mxu3 %v10366_v5  ;;  %v10396_v55 = vunpack.i.h.bf16 %v10394_v38  ;;  %v9671_v5 = vld [vmem:[%s13719_s3 + $0x1e0] sm:$0xff]  ;;  %v9698_v44 = vld [vmem:[%s13719_s3 + $0x238] sm:$0xff] }
 0x4d0   :  { %6461 = vmatpush.msrb.mxu1 %v10405_v12 }
 0x4d1   :  { %6291 = vmatpush.msrb.mxu0 %v10380_v49  ;;  %6801 = vmatpush.msrb.mxu3 %v10395_v59 }
 0x4d2   :  { %6462 = vmatpush.msrb.mxu1 %v10406_v14  ;;  %v9672_v14 = vld [vmem:[%s13719_s3 + $0x1e8] sm:$0xff] }
 0x4d3   :  { %6292 = vmatpush.msrb.mxu0 %v10381_v43  ;;  %6802 = vmatpush.msrb.mxu3 %v10396_v55  ;;  %v9699_v43 = vld [vmem:[%s13719_s3 + $0x240] sm:$0xff] }
 0x4d4   :  { %9615 = vmatmul.msk.f32.gmra.mxu1 %vm5542_vm1, %v9599_v32  ;;  %9679 = vmatmul.msk.f32.gmra.mxu3 %vm5542_vm1, %v9663_v10  ;;  %v9755_v55 = vld [vmem:[%s13719_s3 + $0x300] sm:$0xff] }
 0x4d5   :  { %6463 = vmatpush.msrb.mxu1 %v10430_v39  ;;  %v10424_v3 = vpop.permute.xlu1 %10423  ;;  %v13178_v61 = vpop.f32.mrf.mxu0 }
 0x4d6   :  { %v10425_v19 = vunpack.i.l.bf16 %v10424_v3  ;;  %v10419_v48 = vpop.permute.xlu0 %10418  ;;  %9650 = vmatmul.msk.f32.gmra.mxu2 %vm5542_vm1, %v9634_v26  ;;  %v10426_v34 = vunpack.i.h.bf16 %v10424_v3  ;;  %v13300_v49 = vpop.permute.xlu2 %5482  ;;  %v9673_v3 = vld [vmem:[%s13719_s3 + $0x1f0] sm:$0xff] }
 0x4d7   :  { %v10420_v28 = vunpack.i.l.bf16 %v10419_v48  ;;  %6464 = vmatpush.msrb.mxu1 %v10431_v27  ;;  %v10421_v45 = vunpack.i.h.bf16 %v10419_v48  ;;  %v9609_v27 = vld [vmem:[%s13719_s3 + $0xf0] sm:$0xff] }
 0x4d8   :  { %6803 = vmatpush.msrb.mxu3 %v10425_v19  ;;  %v9700_v19 = vld [vmem:[%s13719_s3 + $0x248] sm:$0xff] }
 0x4d9   :  { %6293 = vmatpush.msrb.mxu0 %v10420_v28  ;;  %v9756_v28 = vld [vmem:[%s13719_s3 + $0x308] sm:$0xff] }
 0x4da   :  { %6804 = vmatpush.msrb.mxu3 %v10426_v34 }
 0x4db   :  { %6294 = vmatpush.msrb.mxu0 %v10421_v45 }
 0x4dc   :  { %9616 = vmatmul.msk.f32.gmra.mxu1 %vm5542_vm1, %v9600_v2  ;;  %9680 = vmatmul.msk.f32.gmra.mxu3 %vm5542_vm1, %v9664_v6  ;;  %v9610_v2 = vld [vmem:[%s13719_s3 + $0xf8] sm:$0xff] }
 0x4dd   :  { %9707 = vmatmul.msk.f32.vlgmr.msrb.gmra.mxu0 %vm5542_vm1, %v9691_v30  ;;  %v13199_v54 = vpop.f32.mrf.mxu0  ;;  %v13294_v12 = vpop.permute.xlu1 %5502  ;;  %v9674_v6 = vld [vmem:[%s13719_s3 + $0x1f8] sm:$0xff] }
 0x4de   :  { %9651 = vmatmul.msk.f32.gmra.mxu2 %vm5542_vm1, %v9635_v63  ;;  %v13229_v29 = vpop.permute.xlu0 %5507  ;;  %v13324_v26 = vpop.permute.xlu2 %5467  ;;  %v9701_v63 = vld [vmem:[%s13719_s3 + $0x250] sm:$0xff] }
 0x4e4   :  { %9617 = vmatmul.msk.f32.gmra.mxu1 %vm5542_vm1, %v9601_v51  ;;  %9681 = vmatmul.msk.f32.gmra.mxu3 %vm5542_vm1, %v9665_v40  ;;  %v9757_v40 = vld [vmem:[%s13719_s3 + $0x310] sm:$0xff] }
 0x4e5   :  { %9708 = vmatmul.msk.f32.gmra.mxu0 %vm5542_vm1, %v9692_v36  ;;  %v13218_v8 = vpop.f32.mrf.mxu0  ;;  %v13320_v32 = vpop.permute.xlu1 %5487 }
 0x4e6   :  { %9652 = vmatmul.msk.f32.gmra.mxu2 %vm5542_vm1, %v9636_v24  ;;  %v13254_v52 = vpop.permute.xlu0 %5492  ;;  %v13357_v51 = vpop.permute.xlu2 %5452 }
 0x4ec   :  { %9618 = vmatmul.msk.f32.gmra.mxu1 %vm5542_vm1, %v9602_v35  ;;  %9682 = vmatmul.msk.f32.gmra.mxu3 %vm5542_vm1, %v9666_v42 }
 0x4ed   :  { %9709 = vmatmul.msk.f32.gmra.mxu0 %vm5542_vm1, %v9693_v25  ;;  %v13244_v21 = vpop.f32.mrf.mxu0  ;;  %v13344_v45 = vpop.permute.xlu1 %5472  ;;  %v9723_v25 = vld [vmem:[%s13719_s3 + $0x280] sm:$0xff] }
 0x4ee   :  { %9653 = vmatmul.msk.f32.gmra.mxu2 %vm5542_vm1, %v9637_v56  ;;  %v13278_v53 = vpop.permute.xlu0 %5477  ;;  %v9787_v56 = vld [vmem:[%s13719_s3 + $0x380] sm:$0xff] }
 0x4f4   :  { %9619 = vmatmul.msk.f32.gmra.mxu1 %vm5542_vm1, %v9603_v31  ;;  %9683 = vmatmul.msk.f32.gmra.mxu3 %vm5542_vm1, %v9667_v17  ;;  %v9702_v17 = vld [vmem:[%s13719_s3 + $0x258] sm:$0xff] }
 0x4f5   :  { %9710 = vmatmul.msk.f32.gmra.mxu0 %vm5542_vm1, %v9694_v37  ;;  %v13270_v9 = vpop.f32.mrf.mxu0  ;;  %v13376_v37 = vpop.permute.xlu1 %5457 }
 0x4f6   :  { %9654 = vmatmul.msk.f32.gmra.mxu2 %vm5542_vm1, %v9638_v18  ;;  %v13302_v59 = vpop.permute.xlu0 %5462 }
 0x4fc   :  { %9620 = vmatmul.msk.f32.gmra.mxu1 %vm5542_vm1, %v9604_v41  ;;  %9684 = vmatmul.msk.f32.gmra.mxu3 %vm5542_vm1, %v9668_v46  ;;  %v5438_v41 = vpop.permute.xlu2 %5437 }
 0x4fd   :  { %9711 = vmatmul.msk.f32.gmra.mxu0 %vm5542_vm1, %v9695_v33  ;;  %v13297_v38 = vpop.f32.mrf.mxu0 }
 0x4fe   :  { %9655 = vmatmul.msk.f32.gmra.mxu2 %vm5542_vm1, %v9639_v15  ;;  %v13335_v48 = vpop.permute.xlu0 %5447  ;;  %v5657_v15 = vadd.f32 %v13113_v50, %v5438_v41  ;;  %v9759_v50 = vld [vmem:[%s13719_s3 + $0x320] sm:$0xff] }
 0x4ff   :  { %v9791_v41 = vld [vmem:[%s13719_s3 + $0x3a0] sm:$0xff] }
 0x504   :  { %9621 = vmatmul.msk.f32.gmra.mxu1 %vm5542_vm1, %v9605_v11  ;;  %9685 = vmatmul.msk.f32.gmra.mxu3 %vm5542_vm1, %v9669_v0 }
 0x505   :  { %9712 = vmatmul.msk.f32.gmra.mxu0 %vm5542_vm1, %v9696_v4  ;;  %v13322_v39 = vpop.f32.mrf.mxu0 }
 0x506   :  { %9656 = vmatmul.msk.f32.gmra.mxu2 %vm5542_vm1, %v9640_v1  ;;  %v5433_v36 = vpop.permute.xlu0 %5432  ;;  %v9724_v1 = vld [vmem:[%s13719_s3 + $0x288] sm:$0xff] }
 0x507   :  { %v5656_v35 = vadd.f32 %v13097_v13, %v5433_v36  ;;  %v9758_v13 = vld [vmem:[%s13719_s3 + $0x318] sm:$0xff] }
 0x508   :  { %v9790_v36 = vld [vmem:[%s13719_s3 + $0x398] sm:$0xff] }
 0x50c   :  { %9622 = vmatmul.msk.f32.gmra.mxu1 %vm5542_vm1, %v9606_v62  ;;  %9686 = vmatmul.msk.f32.gmra.mxu3 %vm5542_vm1, %v9670_v22  ;;  %v9788_v62 = vld [vmem:[%s13719_s3 + $0x388] sm:$0xff] }
 0x50d   :  { %9713 = vmatmul.msk.f32.gmra.mxu0 %vm5542_vm1, %v9697_v57  ;;  %v13352_v30 = vpop.f32.mrf.mxu0  ;;  %v9703_v57 = vld [vmem:[%s13719_s3 + $0x260] sm:$0xff] }
 0x50e   :  { %9657 = vmatmul.msk.f32.gmra.mxu2 %vm5542_vm1, %v9641_v58  ;;  %v5443_v58 = vpop.permute.xlu1 %5442 }
 0x514   :  { %9623 = vmatmul.msk.f32.gmra.mxu1 %vm5542_vm1, %v9607_v16  ;;  %9687 = vmatmul.msk.f32.gmra.mxu3 %vm5542_vm1, %v9671_v5 }
 0x515   :  { %9714 = vmatmul.msk.f32.gmra.mxu0 %vm5542_vm1, %v9698_v44  ;;  %v13381_v18 = vpop.f32.mrf.mxu0 }
 0x516   :  { %9658 = vmatmul.msk.f32.gmra.mxu2 %vm5542_vm1, %v9642_v20  ;;  %v5658_v20 = vadd.f32 %v13133_v47, %v5443_v58  ;;  %v9760_v47 = vld [vmem:[%s13719_s3 + $0x328] sm:$0xff] }
 0x51c   :  { %9624 = vmatmul.msk.f32.gmra.mxu1 %vm5542_vm1, %v9608_v7  ;;  %9688 = vmatmul.msk.f32.gmra.mxu3 %vm5542_vm1, %v9672_v14 }
 0x51d   :  { %9715 = vmatmul.msk.f32.gmra.mxu0 %vm5542_vm1, %v9699_v43  ;;  %v13405_v16 = vpop.f32.mrf.mxu0 }
 0x51e   :  { %9771 = vmatmul.msk.f32.vlgmr.msrb.gmra.mxu2 %vm5542_vm1, %v9755_v55  ;;  %v9725_v55 = vld [vmem:[%s13719_s3 + $0x290] sm:$0xff] }
 0x51f   :  { %v5956_v10 = vpop.f32.mrf.mxu2 }
 0x524   :  { %9625 = vmatmul.msk.f32.gmra.mxu1 %vm5542_vm1, %v9609_v27  ;;  %9689 = vmatmul.msk.f32.gmra.mxu3 %vm5542_vm1, %v9673_v3  ;;  %v9704_v3 = vld [vmem:[%s13719_s3 + $0x268] sm:$0xff] }
 0x525   :  { %9716 = vmatmul.msk.f32.gmra.mxu0 %vm5542_vm1, %v9700_v19 }
 0x526   :  { %9772 = vmatmul.msk.f32.gmra.mxu2 %vm5542_vm1, %v9756_v28 }
 0x527   :  { %v5959_v34 = vpop.f32.mrf.mxu2 }
 0x52c   :  { %9626 = vmatmul.msk.f32.gmra.mxu1 %vm5542_vm1, %v9610_v2  ;;  %9690 = vmatmul.msk.f32.gmra.mxu3 %vm5542_vm1, %v9674_v6  ;;  %v13429_v2 = vpop.f32.mrf.mxu0 }
 0x52d   :  { %9717 = vmatmul.msk.f32.gmra.mxu0 %vm5542_vm1, %v9701_v63 }
 0x52e   :  { %9773 = vmatmul.msk.f32.gmra.mxu2 %vm5542_vm1, %v9757_v40  ;;  %v9726_v40 = vld [vmem:[%s13719_s3 + $0x298] sm:$0xff] }
 0x52f   :  { %v5962_v24 = vpop.f32.mrf.mxu2 }
 0x531   :  { %v5786_v42 = vpop.f32.mrf.mxu1 }
 0x532   :  { %v5834_v31 = vadd.f32 %v5786_v42, %v5656_v35  ;;  %v9705_v42 = vld [vmem:[%s13719_s3 + $0x270] sm:$0xff] }
 0x534   :  { %9739 = vmatmul.msk.f32.vlgmr.msrb.gmra.mxu1 %vm5542_vm1, %v9723_v25  ;;  %9803 = vmatmul.msk.f32.vlgmr.msrb.gmra.mxu3 %vm5542_vm1, %v9787_v56  ;;  %v6004_v46 = vadd.f32 %v5956_v10, %v5834_v31  ;;  %v9789_v10 = vld [vmem:[%s13719_s3 + $0x390] sm:$0xff]  ;;  %v5660_v56 = vadd.f32 %v13178_v61, %v13357_v51  ;;  %v9762_v61 = vld [vmem:[%s13719_s3 + $0x338] sm:$0xff] }
 0x535   :  { %9718 = vmatmul.msk.f32.gmra.mxu0 %vm5542_vm1, %v9702_v17 }
 0x536   :  { %9774 = vmatmul.msk.f32.gmra.mxu2 %vm5542_vm1, %v9758_v13  ;;  %v9727_v13 = vld [vmem:[%s13719_s3 + $0x2a0] sm:$0xff] }
 0x537   :  { %v6126_v33 = vpop.f32.mrf.mxu3 }
 0x538   :  { %v13388_v11 = vadd.f32 %v6126_v33, %v6004_v46  ;;  %v5965_v0 = vpop.f32.mrf.mxu2  ;;  %v13459_v33 = vpop.f32.mrf.mxu0 }
 0x539   :  { %v5789_v4 = vpop.f32.mrf.mxu1 }
 0x53a   :  { %v5835_v22 = vadd.f32 %v5789_v4, %v5657_v15 }
 0x53c   :  { %9740 = vmatmul.msk.f32.gmra.mxu1 %vm5542_vm1, %v9724_v1  ;;  %9804 = vmatmul.msk.f32.gmra.mxu3 %vm5542_vm1, %v9788_v62  ;;  %v6005_v5 = vadd.f32 %v5959_v34, %v5835_v22  ;;  %v5659_v34 = vadd.f32 %v13154_v23, %v13335_v48  ;;  %v9761_v23 = vld [vmem:[%s13719_s3 + $0x330] sm:$0xff]  ;;  %v5661_v1 = vadd.f32 %v13199_v54, %v13376_v37  ;;  %v9763_v54 = vld [vmem:[%s13719_s3 + $0x340] sm:$0xff] }
 0x53d   :  { %9719 = vmatmul.msk.f32.gmra.mxu0 %vm5542_vm1, %v9703_v57  ;;  %v9728_v57 = vld [vmem:[%s13719_s3 + $0x2a8] sm:$0xff] }
 0x53e   :  { %9775 = vmatmul.msk.f32.gmra.mxu2 %vm5542_vm1, %v9759_v50  ;;  %v9792_v50 = vld [vmem:[%s13719_s3 + $0x3a8] sm:$0xff] }
 0x53f   :  { %v6129_v44 = vpop.f32.mrf.mxu3 }
 0x540   :  { %v13409_v7 = vadd.f32 %v6129_v44, %v6005_v5  ;;  %v5968_v14 = vpop.f32.mrf.mxu2 }
 0x541   :  { %v5792_v43 = vpop.f32.mrf.mxu1 }
 0x542   :  { %v5836_v27 = vadd.f32 %v5792_v43, %v5658_v20  ;;  %v5662_v43 = vadd.f32 %v13218_v8, %v13302_v59  ;;  %v9764_v8 = vld [vmem:[%s13719_s3 + $0x348] sm:$0xff] }
 0x544   :  { %9741 = vmatmul.msk.f32.gmra.mxu1 %vm5542_vm1, %v9725_v55  ;;  %9805 = vmatmul.msk.f32.gmra.mxu3 %vm5542_vm1, %v9789_v10  ;;  %v6006_v19 = vadd.f32 %v5962_v24, %v5836_v27  ;;  %v9793_v27 = vld [vmem:[%s13719_s3 + $0x3b0] sm:$0xff] }
 0x545   :  { %9720 = vmatmul.msk.f32.gmra.mxu0 %vm5542_vm1, %v9704_v3 }
 0x546   :  { %9776 = vmatmul.msk.f32.gmra.mxu2 %vm5542_vm1, %v9760_v47 }
 0x547   :  { %v6132_v28 = vpop.f32.mrf.mxu3 }
 0x548   :  { %v13431_v6 = vadd.f32 %v6132_v28, %v6006_v19 }
 0x549   :  { %v5795_v63 = vpop.f32.mrf.mxu1  ;;  %v5971_v24 = vpop.f32.mrf.mxu2 }
 0x54a   :  { %v5837_v35 = vadd.f32 %v5795_v63, %v5659_v34  ;;  %v5663_v63 = vadd.f32 %v13244_v21, %v13324_v26  ;;  %v9765_v21 = vld [vmem:[%s13719_s3 + $0x350] sm:$0xff] }
 0x54c   :  { %9742 = vmatmul.msk.f32.gmra.mxu1 %vm5542_vm1, %v9726_v40  ;;  %9806 = vmatmul.msk.f32.gmra.mxu3 %vm5542_vm1, %v9790_v36  ;;  %v6007_v48 = vadd.f32 %v5965_v0, %v5837_v35  ;;  %v9706_v0 = vld [vmem:[%s13719_s3 + $0x278] sm:$0xff] }
 0x54d   :  { %9721 = vmatmul.msk.f32.gmra.mxu0 %vm5542_vm1, %v9705_v42 }
 0x54e   :  { %9777 = vmatmul.msk.f32.gmra.mxu2 %vm5542_vm1, %v9761_v23 }
 0x54f   :  { %v6135_v25 = vpop.f32.mrf.mxu3 }
 0x550   :  { %v13451_v31 = vadd.f32 %v6135_v25, %v6007_v48 }
 0x551   :  { %v5798_v17 = vpop.f32.mrf.mxu1  ;;  %v5974_v46 = vpop.f32.mrf.mxu2 }
 0x552   :  { %v5838_v15 = vadd.f32 %v5798_v17, %v5660_v56  ;;  %v5664_v56 = vadd.f32 %v13270_v9, %v13344_v45  ;;  %v9766_v9 = vld [vmem:[%s13719_s3 + $0x358] sm:$0xff] }
 0x554   :  { %9743 = vmatmul.msk.f32.gmra.mxu1 %vm5542_vm1, %v9727_v13  ;;  %9807 = vmatmul.msk.f32.gmra.mxu3 %vm5542_vm1, %v9791_v41  ;;  %v6008_v51 = vadd.f32 %v5968_v14, %v5838_v15  ;;  %v9795_v41 = vld [vmem:[%s13719_s3 + $0x3c0] sm:$0xff] }
 0x555   :  { %9722 = vmatmul.msk.f32.gmra.mxu0 %vm5542_vm1, %v9706_v0 }
 0x556   :  { %9778 = vmatmul.msk.f32.gmra.mxu2 %vm5542_vm1, %v9762_v61 }
 0x557   :  { %v6138_v4 = vpop.f32.mrf.mxu3 }
 0x558   :  { %v13473_v62 = vadd.f32 %v6138_v4, %v6008_v51  ;;  %v5665_v4 = vadd.f32 %v13297_v38, %v13278_v53  ;;  %v9767_v53 = vld [vmem:[%s13719_s3 + $0x360] sm:$0xff] }
 0x559   :  { %v5801_v22 = vpop.f32.mrf.mxu1  ;;  %v5977_v58 = vpop.f32.mrf.mxu2 }
 0x55a   :  { %v5839_v5 = vadd.f32 %v5801_v22, %v5661_v1  ;;  %v6296_v44 = vpop.f32.mrf.mxu0 }
 0x55b   :  { %v13482_v20 = vadd.f32 %v6296_v44, %v13388_v11  ;;  %v9729_v11 = vld [vmem:[%s13719_s3 + $0x2b0] sm:$0xff] }
 0x55c   :  { %9744 = vmatmul.msk.f32.gmra.mxu1 %vm5542_vm1, %v9728_v57  ;;  %9808 = vmatmul.msk.f32.gmra.mxu3 %vm5542_vm1, %v9792_v50  ;;  %v6009_v37 = vadd.f32 %v5971_v24, %v5839_v5  ;;  %v9794_v24 = vld [vmem:[%s13719_s3 + $0x3b8] sm:$0xff]  ;;  %v9796_v57 = vld [vmem:[%s13719_s3 + $0x3c8] sm:$0xff] }
 0x55e   :  { %9779 = vmatmul.msk.f32.gmra.mxu2 %vm5542_vm1, %v9763_v54 }
 0x55f   :  { %v6141_v14 = vpop.f32.mrf.mxu3 }
 0x560   :  { %v13492_v55 = vadd.f32 %v6141_v14, %v6009_v37  ;;  %v5666_v37 = vadd.f32 %v13322_v39, %v13300_v49  ;;  %v9768_v49 = vld [vmem:[%s13719_s3 + $0x368] sm:$0xff] }
 0x561   :  { %v5804_v10 = vpop.f32.mrf.mxu1  ;;  %v5980_v3 = vpop.f32.mrf.mxu2 }
 0x562   :  { %v5840_v47 = vadd.f32 %v5804_v10, %v5662_v43  ;;  %v6299_v19 = vpop.f32.mrf.mxu0  ;;  %v9797_v10 = vld [vmem:[%s13719_s3 + $0x3d0] sm:$0xff] }
 0x563   :  { %v13501_v28 = vadd.f32 %v6299_v19, %v13409_v7  ;;  %v9730_v7 = vld [vmem:[%s13719_s3 + $0x2b8] sm:$0xff] }
 0x564   :  { %9745 = vmatmul.msk.f32.gmra.mxu1 %vm5542_vm1, %v9729_v11  ;;  %9809 = vmatmul.msk.f32.gmra.mxu3 %vm5542_vm1, %v9793_v27  ;;  %v6010_v59 = vadd.f32 %v5974_v46, %v5840_v47 }
 0x566   :  { %9780 = vmatmul.msk.f32.gmra.mxu2 %vm5542_vm1, %v9764_v8  ;;  %v5667_v8 = vadd.f32 %v13352_v30, %v13320_v32  ;;  %v9769_v32 = vld [vmem:[%s13719_s3 + $0x370] sm:$0xff] }
 0x567   :  { %v6144_v34 = vpop.f32.mrf.mxu3 }
 0x568   :  { %v13511_v40 = vadd.f32 %v6144_v34, %v6010_v59 }
 0x569   :  { %v5807_v36 = vpop.f32.mrf.mxu1  ;;  %v5983_v35 = vpop.f32.mrf.mxu2 }
 0x56a   :  { %v5841_v42 = vadd.f32 %v5807_v36, %v5663_v63  ;;  %v6302_v23 = vpop.f32.mrf.mxu0  ;;  %v9798_v63 = vld [vmem:[%s13719_s3 + $0x3d8] sm:$0xff] }
 0x56b   :  { %v13520_v48 = vadd.f32 %v6302_v23, %v13431_v6  ;;  %v9731_v6 = vld [vmem:[%s13719_s3 + $0x2c0] sm:$0xff]  ;;  %v5668_v23 = vadd.f32 %v13381_v18, %v13254_v52  ;;  %v9770_v52 = vld [vmem:[%s13719_s3 + $0x378] sm:$0xff] }
 0x56c   :  { %9746 = vmatmul.msk.f32.gmra.mxu1 %vm5542_vm1, %v9730_v7  ;;  %9810 = vmatmul.msk.f32.gmra.mxu3 %vm5542_vm1, %v9794_v24  ;;  %v6011_v26 = vadd.f32 %v5977_v58, %v5841_v42 }
 0x56e   :  { %9781 = vmatmul.msk.f32.gmra.mxu2 %vm5542_vm1, %v9765_v21 }
 0x56f   :  { %v6147_v25 = vpop.f32.mrf.mxu3 }
 0x570   :  { %v13530_v17 = vadd.f32 %v6147_v25, %v6011_v26  ;;  %v9799_v25 = vld [vmem:[%s13719_s3 + $0x3e0] sm:$0xff] }
 0x571   :  { %v5810_v13 = vpop.f32.mrf.mxu1  ;;  %v5986_v46 = vpop.f32.mrf.mxu2 }
 0x572   :  { %v5842_v15 = vadd.f32 %v5810_v13, %v5664_v56  ;;  %v6305_v0 = vpop.f32.mrf.mxu0 }
 0x573   :  { %v13539_v61 = vadd.f32 %v6305_v0, %v13451_v31  ;;  %v9732_v31 = vld [vmem:[%s13719_s3 + $0x2c8] sm:$0xff] }
 0x574   :  { %v6012_v45 = vadd.f32 %v5980_v3, %v5842_v15  ;;  %9747 = vmatmul.msk.f32.gmra.mxu1 %vm5542_vm1, %v9731_v6  ;;  %9811 = vmatmul.msk.f32.gmra.mxu3 %vm5542_vm1, %v9795_v41  ;;  %v5669_v15 = vadd.f32 %v13405_v16, %v13274_v60  ;;  %v5670_v16 = vadd.f32 %v13429_v2, %v13294_v12 }
 0x575   :  { %v5671_v12 = vadd.f32 %v13459_v33, %v13229_v29 }
 0x576   :  { %9782 = vmatmul.msk.f32.gmra.mxu2 %vm5542_vm1, %v9766_v9 }
 0x577   :  { %v6150_v51 = vpop.f32.mrf.mxu3 }
 0x578   :  { %v13549_v1 = vadd.f32 %v6150_v51, %v6012_v45  ;;  %v9800_v45 = vld [vmem:[%s13719_s3 + $0x3e8] sm:$0xff] }
 0x579   :  { %v5813_v22 = vpop.f32.mrf.mxu1  ;;  %v5989_v50 = vpop.f32.mrf.mxu2 }
 0x57a   :  { %v5843_v58 = vadd.f32 %v5813_v22, %v5665_v4  ;;  %v6308_v5 = vpop.f32.mrf.mxu0 }
 0x57b   :  { %v13558_v44 = vadd.f32 %v6308_v5, %v13473_v62  ;;  %v9733_v62 = vld [vmem:[%s13719_s3 + $0x2d0] sm:$0xff] }
 0x57c   :  { %v6013_v38 = vadd.f32 %v5983_v35, %v5843_v58  ;;  %9748 = vmatmul.msk.f32.gmra.mxu1 %vm5542_vm1, %v9732_v31  ;;  %9812 = vmatmul.msk.f32.gmra.mxu3 %vm5542_vm1, %v9796_v57  ;;  %v9737_v5 = vld [vmem:[%s13719_s3 + $0x2f0] sm:$0xff] }
 0x57e   :  { %9783 = vmatmul.msk.f32.gmra.mxu2 %vm5542_vm1, %v9767_v53 }
 0x57f   :  { %v6153_v54 = vpop.f32.mrf.mxu3 }
 0x580   :  { %v13568_v14 = vadd.f32 %v6153_v54, %v6013_v38 }
 0x581   :  { %v5816_v43 = vpop.f32.mrf.mxu1  ;;  %v5992_v11 = vpop.f32.mrf.mxu2 }
 0x582   :  { %v5844_v27 = vadd.f32 %v5816_v43, %v5666_v37  ;;  %v6311_v3 = vpop.f32.mrf.mxu0 }
 0x583   :  { %v13577_v47 = vadd.f32 %v6311_v3, %v13492_v55  ;;  %v9734_v55 = vld [vmem:[%s13719_s3 + $0x2d8] sm:$0xff] }
 0x584   :  { %v6014_v39 = vadd.f32 %v5986_v46, %v5844_v27  ;;  %9749 = vmatmul.msk.f32.gmra.mxu1 %vm5542_vm1, %v9733_v62  ;;  %9813 = vmatmul.msk.f32.gmra.mxu3 %vm5542_vm1, %v9797_v10  ;;  %v9738_v62 = vld [vmem:[%s13719_s3 + $0x2f8] sm:$0xff] }
 0x585   :  { %v9802_v10 = vld [vmem:[%s13719_s3 + $0x3f8] sm:$0xff] }
 0x586   :  { %9784 = vmatmul.msk.f32.gmra.mxu2 %vm5542_vm1, %v9768_v49 }
 0x587   :  { %v6156_v19 = vpop.f32.mrf.mxu3 }
 0x588   :  { %v13587_v59 = vadd.f32 %v6156_v19, %v6014_v39 }
 0x589   :  { %v5819_v34 = vpop.f32.mrf.mxu1  ;;  %v5995_v36 = vpop.f32.mrf.mxu2 }
 0x58a   :  { %v5845_v7 = vadd.f32 %v5819_v34, %v5667_v8  ;;  %v6314_v24 = vpop.f32.mrf.mxu0 }
 0x58b   :  { %v13596_v35 = vadd.f32 %v6314_v24, %v13511_v40  ;;  %v9735_v40 = vld [vmem:[%s13719_s3 + $0x2e0] sm:$0xff] }
 0x58c   :  { %v6015_v30 = vadd.f32 %v5989_v50, %v5845_v7  ;;  %9750 = vmatmul.msk.f32.gmra.mxu1 %vm5542_vm1, %v9734_v55  ;;  %9814 = vmatmul.msk.f32.gmra.mxu3 %vm5542_vm1, %v9798_v63 }
 0x58e   :  { %9785 = vmatmul.msk.f32.gmra.mxu2 %vm5542_vm1, %v9769_v32 }
 0x58f   :  { %v6159_v42 = vpop.f32.mrf.mxu3 }
 0x590   :  { %v13606_v21 = vadd.f32 %v6159_v42, %v6015_v30 }
 0x591   :  { %v5822_v26 = vpop.f32.mrf.mxu1  ;;  %v5998_v56 = vpop.f32.mrf.mxu2 }
 0x592   :  { %v5846_v13 = vadd.f32 %v5822_v26, %v5668_v23  ;;  %v6317_v6 = vpop.f32.mrf.mxu0 }
 0x593   :  { %v13615_v41 = vadd.f32 %v6317_v6, %v13530_v17  ;;  %v9736_v17 = vld [vmem:[%s13719_s3 + $0x2e8] sm:$0xff] }
 0x594   :  { %v6016_v18 = vadd.f32 %v5992_v11, %v5846_v13  ;;  %9751 = vmatmul.msk.f32.gmra.mxu1 %vm5542_vm1, %v9735_v40  ;;  %9815 = vmatmul.msk.f32.gmra.mxu3 %vm5542_vm1, %v9799_v25 }
 0x596   :  { %9786 = vmatmul.msk.f32.gmra.mxu2 %vm5542_vm1, %v9770_v52 }
 0x597   :  { %v6162_v46 = vpop.f32.mrf.mxu3 }
 0x598   :  { %v13625_v0 = vadd.f32 %v6162_v46, %v6016_v18 }
 0x599   :  { %v5825_v9 = vpop.f32.mrf.mxu1  ;;  %v6001_v51 = vpop.f32.mrf.mxu2 }
 0x59a   :  { %v5847_v4 = vadd.f32 %v5825_v9, %v5669_v15  ;;  %v6320_v22 = vpop.f32.mrf.mxu0 }
 0x59b   :  { %v13634_v31 = vadd.f32 %v6320_v22, %v13549_v1  ;;  %v9801_v1 = vld [vmem:[%s13719_s3 + $0x3f0] sm:$0xff] }
 0x59c   :  { %v6017_v57 = vadd.f32 %v5995_v36, %v5847_v4  ;;  %9752 = vmatmul.msk.f32.gmra.mxu1 %vm5542_vm1, %v9736_v17  ;;  %9816 = vmatmul.msk.f32.gmra.mxu3 %vm5542_vm1, %v9800_v45 }
 0x59f   :  { %v6165_v60 = vpop.f32.mrf.mxu3 }
 0x5a0   :  { %v13640_v50 = vadd.f32 %v6165_v60, %v6017_v57 }
 0x5a1   :  { %v5828_v58 = vpop.f32.mrf.mxu1  ;;  %v6636_v53 = vpop.f32.mrf.mxu2 }
 0x5a2   :  { %v5848_v38 = vadd.f32 %v5828_v58, %v5670_v16 }
 0x5a4   :  { %v6018_v54 = vadd.f32 %v5998_v56, %v5848_v38  ;;  %9753 = vmatmul.msk.f32.gmra.mxu1 %vm5542_vm1, %v9737_v5  ;;  %9817 = vmatmul.msk.f32.gmra.mxu3 %vm5542_vm1, %v9801_v1 }
 0x5a7   :  { %v6168_v37 = vpop.f32.mrf.mxu3 }
 0x5a8   :  { %v13652_v2 = vadd.f32 %v6168_v37, %v6018_v54 }
 0x5a9   :  { %v5831_v43 = vpop.f32.mrf.mxu1  ;;  %v6639_v11 = vpop.f32.mrf.mxu2 }
 0x5aa   :  { %v5849_v27 = vadd.f32 %v5831_v43, %v5671_v12 }
 0x5ac   :  { %v6019_v3 = vadd.f32 %v6001_v51, %v5849_v27  ;;  %9754 = vmatmul.msk.f32.gmra.mxu1 %vm5542_vm1, %v9738_v62  ;;  %9818 = vmatmul.msk.f32.gmra.mxu3 %vm5542_vm1, %v9802_v10 }
 0x5af   :  { %v6171_v49 = vpop.f32.mrf.mxu3 }
 0x5b0   :  { %v13662_v29 = vadd.f32 %v6171_v49, %v6019_v3 }
 0x5b1   :  { %v6466_v33 = vpop.f32.mrf.mxu1  ;;  %v6642_v39 = vpop.f32.mrf.mxu2 }
 0x5b2   :  { %v6514_v19 = vadd.f32 %v6466_v33, %v13482_v20 }
 0x5b4   :  { %v6684_v8 = vadd.f32 %v6636_v53, %v6514_v19 }
 0x5b7   :  { %v6806_v34 = vpop.f32.mrf.mxu3 }
 0x5b8   :  { %v13665_v55 = vadd.f32 %v6806_v34, %v6684_v8 }
 0x5b9   :  { %v6469_v63 = vpop.f32.mrf.mxu1  ;;  %v6645_v36 = vpop.f32.mrf.mxu2 }
 0x5ba   :  { %v6515_v7 = vadd.f32 %v6469_v63, %v13501_v28 }
 0x5bc   :  { %v6685_v24 = vadd.f32 %v6639_v11, %v6515_v7 }
 0x5bf   :  { %v6809_v32 = vpop.f32.mrf.mxu3 }
 0x5c0   :  { %v13668_v30 = vadd.f32 %v6809_v32, %v6685_v24 }
 0x5c1   :  { %v6472_v42 = vpop.f32.mrf.mxu1  ;;  %v6648_v23 = vpop.f32.mrf.mxu2 }
 0x5c2   :  { %v6516_v26 = vadd.f32 %v6472_v42, %v13520_v48 }
 0x5c4   :  { %v6686_v40 = vadd.f32 %v6642_v39, %v6516_v26 }
 0x5c7   :  { %v6812_v25 = vpop.f32.mrf.mxu3 }
 0x5c8   :  { %v13671_v56 = vadd.f32 %v6812_v25, %v6686_v40 }
 0x5c9   :  { %v6475_v20 = vpop.f32.mrf.mxu1  ;;  %v6651_v13 = vpop.f32.mrf.mxu2 }
 0x5ca   :  { %v6517_v6 = vadd.f32 %v6475_v20, %v13539_v61 }
 0x5cc   :  { %v6687_v52 = vadd.f32 %v6645_v36, %v6517_v6 }
 0x5cf   :  { %v6815_v18 = vpop.f32.mrf.mxu3 }
 0x5d0   :  { %v13674_v46 = vadd.f32 %v6815_v18, %v6687_v52 }
 0x5d1   :  { %v6478_v28 = vpop.f32.mrf.mxu1  ;;  %v6654_v15 = vpop.f32.mrf.mxu2 }
 0x5d2   :  { %v6518_v9 = vadd.f32 %v6478_v28, %v13558_v44  ;;  %v6323_v44 = vpop.f32.mrf.mxu0 }
 0x5d4   :  { %v6688_v17 = vadd.f32 %v6648_v23, %v6518_v9 }
 0x5d7   :  { %v6818_v45 = vpop.f32.mrf.mxu3 }
 0x5d8   :  { %v13677_v51 = vadd.f32 %v6818_v45, %v6688_v17 }
 0x5d9   :  { %v6481_v48 = vpop.f32.mrf.mxu1  ;;  %v6657_v22 = vpop.f32.mrf.mxu2 }
 0x5da   :  { %v6519_v4 = vadd.f32 %v6481_v48, %v13577_v47  ;;  %v6326_v27 = vpop.f32.mrf.mxu0 }
 0x5dc   :  { %v6689_v57 = vadd.f32 %v6651_v13, %v6519_v4 }
 0x5df   :  { %v6821_v60 = vpop.f32.mrf.mxu3 }
 0x5e0   :  { %v13680_v16 = vadd.f32 %v6821_v60, %v6689_v57 }
 0x5e1   :  { %v6484_v61 = vpop.f32.mrf.mxu1  ;;  %v6660_v1 = vpop.f32.mrf.mxu2 }
 0x5e2   :  { %v6520_v58 = vadd.f32 %v6484_v61, %v13596_v35  ;;  %v6329_v19 = vpop.f32.mrf.mxu0 }
 0x5e3   :  { %v6355_v60 = vadd.f32 %v6329_v19, %v13606_v21 }
 0x5e4   :  { %v6690_v5 = vadd.f32 %v6654_v15, %v6520_v58 }
 0x5e7   :  { %v6824_v53 = vpop.f32.mrf.mxu3 }
 0x5e8   :  { %v13683_v38 = vadd.f32 %v6824_v53, %v6690_v5 }
 0x5e9   :  { %v6487_v54 = vpop.f32.mrf.mxu1  ;;  %v13686_v47 = vpop.f32.mrf.mxu2 }
 0x5ea   :  { %v6521_v37 = vadd.f32 %v6487_v54, %v13615_v41  ;;  %v6332_v63 = vpop.f32.mrf.mxu0 }
 0x5ec   :  { %v6691_v12 = vadd.f32 %v6657_v22, %v6521_v37  ;;  %v6356_v22 = vadd.f32 %v6332_v63, %v13625_v0 }
 0x5ef   :  { %v6827_v43 = vpop.f32.mrf.mxu3 }
 0x5f0   :  { %v13688_v62 = vadd.f32 %v6827_v43, %v6691_v12 }
 0x5f1   :  { %v6490_v10 = vpop.f32.mrf.mxu1  ;;  %v6666_v39 = vpop.f32.mrf.mxu2 }
 0x5f2   :  { %v6522_v11 = vadd.f32 %v6490_v10, %v13634_v31  ;;  %v6335_v42 = vpop.f32.mrf.mxu0 }
 0x5f3   :  { %v6357_v17 = vadd.f32 %v6335_v42, %v13640_v50  ;;  %v6353_v50 = vadd.f32 %v6323_v44, %v13568_v14 }
 0x5f4   :  { %v6692_v35 = vadd.f32 %v6660_v1, %v6522_v11  ;;  %v6354_v1 = vadd.f32 %v6326_v27, %v13587_v59 }
 0x5f7   :  { %v6830_v3 = vpop.f32.mrf.mxu3 }
 0x5f8   :  { %v13691_v49 = vadd.f32 %v6830_v3, %v6692_v35 }
 0x5f9   :  { %v6493_v33 = vpop.f32.mrf.mxu1  ;;  %v6669_v41 = vpop.f32.mrf.mxu2 }
 0x5fa   :  { %v6338_v25 = vpop.f32.mrf.mxu0  ;;  %v6523_v0 = vadd.f32 %v6493_v33, %v6353_v50  ;;  %v6878_v33 = vmax.f32 %v13691_v49, 0.0  ;;  %v6871_v49 = vmax.f32 %v13668_v30, 0.0 }
 0x5fb   :  { %v6358_v28 = vadd.f32 %v6338_v25, %v13652_v2 }
 0x5fc   :  { %v6693_v59 = vadd.f32 %v13686_v47, %v6523_v0  ;;  %v6875_v47 = vmax.f32 %v13680_v16, 0.0  ;;  %v6886_v16 = vld [vmem:[%s13721_s5] sm:$0x1]  ;;  %s6940_s5 = sshll.u32 %s10470_s19, 4  ;;  %s6941_s5 = int_to_ptr.vmem [resolvable:$true] %s6940_s5 }
 0x5ff   :  { %v6833_v8 = vpop.f32.mrf.mxu3 }
 0x601   :  { %v6496_v34 = vpop.f32.mrf.mxu1  ;;  %v6672_v24 = vpop.f32.mrf.mxu2 }
 0x602   :  { %v6341_v52 = vpop.f32.mrf.mxu0  ;;  %v6524_v12 = vadd.f32 %v6496_v34, %v6354_v1 }
 0x603   :  { %v6359_v15 = vadd.f32 %v6341_v52, %v13662_v29 }
 0x604   :  { %v6694_v19 = vadd.f32 %v6666_v39, %v6524_v12  ;;  %v6877_v39 = vmax.f32 %v13688_v62, 0.0  ;;  %v6870_v62 = vmax.f32 %v13665_v55, 0.0 }
 0x607   :  { %v6836_v36 = vpop.f32.mrf.mxu3 }
 0x608   :  { %v6864_v27 = vadd.f32 %v6836_v36, %v6694_v19  ;;  %v6873_v36 = vmax.f32 %v13674_v46, 0.0 }
 0x609   :  { %v6499_v7 = vpop.f32.mrf.mxu1  ;;  %v6675_v31 = vpop.f32.mrf.mxu2 }
 0x60a   :  { %v6525_v2 = vadd.f32 %v6499_v7, %v6355_v60  ;;  %v6880_v44 = vmax.f32 %v6864_v27, 0.0 }
 0x60c   :  { %v6695_v35 = vadd.f32 %v6669_v41, %v6525_v2  ;;  %v6876_v41 = vmax.f32 %v13683_v38, 0.0 }
 0x60f   :  { %v6839_v32 = vpop.f32.mrf.mxu3 }
 0x610   :  { %v6865_v63 = vadd.f32 %v6839_v32, %v6695_v35 }
 0x611   :  { %v6502_v23 = vpop.f32.mrf.mxu1  ;;  %v6678_v6 = vpop.f32.mrf.mxu2 }
 0x612   :  { %v6526_v61 = vadd.f32 %v6502_v23, %v6356_v22  ;;  %v6863_v23 = vadd.f32 %v6833_v8, %v6693_v59  ;;  %v6881_v14 = vmax.f32 %v6865_v63, 0.0  ;;  %v6874_v8 = vmax.f32 %v13677_v51, 0.0  ;;  %v6891_v51 = vpop.permute.xlu1 %6890 }
 0x613   :  { %v6893_v38 = vperm.slane %v6891_v51, 0 }
 0x614   :  { %v6696_v43 = vadd.f32 %v6672_v24, %v6526_v61  ;;  %v6879_v34 = vmax.f32 %v6863_v23, 0.0  ;;  %v6872_v24 = vmax.f32 %v13671_v56, 0.0 }
 0x617   :  { %v6842_v26 = vpop.f32.mrf.mxu3 }
 0x618   :  { %v6866_v3 = vadd.f32 %v6842_v26, %v6696_v43 }
 0x619   :  { %v6505_v40 = vpop.f32.mrf.mxu1  ;;  %v6681_v4 = vpop.f32.mrf.mxu2 }
 0x61a   :  { %v6527_v57 = vadd.f32 %v6505_v40, %v6357_v17  ;;  %v6882_v7 = vmax.f32 %v6866_v3, 0.0 }
 0x61c   :  { %v6697_v54 = vadd.f32 %v6675_v31, %v6527_v57 }
 0x61f   :  { %v6845_v20 = vpop.f32.mrf.mxu3 }
 0x620   :  { %v6867_v10 = vadd.f32 %v6845_v20, %v6697_v54 }
 0x621   :  { %v6508_v13 = vpop.f32.mrf.mxu1 }
 0x622   :  { %v6528_v45 = vadd.f32 %v6508_v13, %v6358_v28  ;;  %v6883_v42 = vmax.f32 %v6867_v10, 0.0 }
 0x624   :  { %v6698_v58 = vadd.f32 %v6678_v6, %v6528_v45 }
 0x627   :  { %v6848_v18 = vpop.f32.mrf.mxu3 }
 0x628   :  { %v6868_v29 = vadd.f32 %v6848_v18, %v6698_v58 }
 0x629   :  { %v6511_v9 = vpop.f32.mrf.mxu1 }
 0x62a   :  { %v6529_v48 = vadd.f32 %v6511_v9, %v6359_v15  ;;  %v6884_v21 = vmax.f32 %v6868_v29, 0.0 }
 0x62c   :  { %v6699_v5 = vadd.f32 %v6681_v4, %v6529_v48 }
 0x62f   :  { %v6851_v53 = vpop.f32.mrf.mxu3 }
 0x630   :  { %v6869_v37 = vadd.f32 %v6851_v53, %v6699_v5 }
 0x632   :  { %v6885_v11 = vmax.f32 %v6869_v37, 0.0 }
 0x634   :  { %6894 = vmatpush.msra.mxu0 %v6885_v11 }
 0x636   :  { %6895 = vmatpush.msra.mxu0 %v6884_v21 }
 0x638   :  { %6896 = vmatpush.msra.mxu0 %v6883_v42 }
 0x63a   :  { %6897 = vmatpush.msra.mxu0 %v6882_v7 }
 0x63c   :  { %6898 = vmatpush.msra.mxu0 %v6881_v14 }
 0x63e   :  { %6899 = vmatpush.msra.mxu0 %v6880_v44 }
 0x640   :  { %6900 = vmatpush.msra.mxu0 %v6879_v34 }
 0x642   :  { %6901 = vmatpush.msra.mxu0 %v6878_v33 }
 0x644   :  { %6902 = vmatpush.msra.mxu0 %v6877_v39 }
 0x646   :  { %6903 = vmatpush.msra.mxu0 %v6876_v41 }
 0x648   :  { %6904 = vmatpush.msra.mxu0 %v6875_v47 }
 0x64a   :  { %6905 = vmatpush.msra.mxu0 %v6874_v8 }
 0x64c   :  { %6906 = vmatpush.msra.mxu0 %v6873_v36 }
 0x64e   :  { %6907 = vmatpush.msra.mxu0 %v6872_v24 }
 0x650   :  { %6908 = vmatpush.msra.mxu0 %v6871_v49 }
 0x652   :  { %6909 = vmatpush.msra.mxu0 %v6870_v62 }
 0x653   :  { %6910 = vmatmul.f32.vlgmr.msra.gmra.mxu0 %v6886_v16 }
 0x6d0   :  { %v6911_v32 = vpop.f32.mrf.mxu0 }
 0x6d1   :  { %v6912_v46 = vadd.f32 %v6911_v32, %v6893_v38 }
 0x6d3   :  { %v9819_v26 = vmul.f32 -1.442695, %v6912_v46 }
 0x6d5   :  { %10432 = vpow2.f32 %v9819_v26 }
 0x6db   :  { %v10433_v56 = vpop.eup %10432 }
 0x6dc   :  { %v6917_v31 = vadd.f32 1.0, %v10433_v56 }
 0x6de   :  { %10434 = vrcp.f32 %v6917_v31  ;;  %v6929_v55 = vand.u32 2147483648, %v6917_v31  ;;  %v6927_v13 = vand.u32 2147483647, %v6917_v31  ;;  %vm6923_vm3 = vweird.f32 %v6917_v31 }
 0x6e0   :  { %v6930_v52 = vor.u32 1.1754944e-38, %v6929_v55  ;;  %vm6928_vm6 = vcmp.eq.f32.partialorder %v6927_v13, 8.507059e+37 }
 0x6e4   :  { %v10435_v30 = vpop.eup %10434 }
 0x6e5   :  { %v6919_v40 = vmul.f32 %v10435_v30, %v6917_v31  ;;  %vm6924_vm2 = vweird.f32 %v10435_v30 }
 0x6e6   :  { %vm6925_vm4 = vmor %vm6923_vm3, %vm6924_vm2 }
 0x6e7   :  { %v6920_v25 = vsub.f32 1.0, %v6919_v40 }
 0x6e9   :  { %v6921_v20 = vmul.f32 %v10435_v30, %v6920_v25 }
 0x6eb   :  { %v6922_v6 = vadd.f32 %v10435_v30, %v6921_v20 }
 0x6ed   :  { %v6926_v18 = vsel %vm6925_vm4, %v10435_v30, %v6922_v6 }
 0x6ee   :  { %v6931_v28 = vsel %vm6928_vm6, %v6930_v52, %v6926_v18 }
 0x6ef   :  { %6934 = vst.msk [vmem:[#allocation3] sm:$0x1] %vm6933_vm5, %v6931_v28 }
 0x6f0   :  { %6945 = dma.vmem_to_hbm [thread:$0]  %s6941_s5, 16, %s6943_s22, [#allocation4]  }
 0x6f1   :  { %10460 = dma.done.wait [#allocation4], 16  }
 0x6f2   :  { %10461 = vsyncadd [#allocation4], 4294967280 }
 0x6f3   :  { %6950 = vsyncpa [#allocation4], 1 }

</bundles_post_ra>
